<compile_context>
chip_gen: v6e
topology: v6e:2x2x1
jax: 0.10.0
libtpu: 0.0.40
codegen_flags: <defaults>
</compile_context>

<pallas_src>
import jax
import jax.numpy as jnp
from jax.experimental import pallas as pl
from jax.experimental.pallas import tpu as pltpu

FEATURES_DIM = 64 * (64 * 10 + 1)   # 41024
MAX_ACTIVE = 16                     # max active HalfKP features per side (15 legal)


def _round_up(x, m):
    return (x + m - 1) // m * m


def _default_board_tile():
    """Board tile (rows of the tail matmul): 128 on v5e, 256 on v6e/v7x."""
    try:
        kind = jax.devices()[0].device_kind.lower()
    except Exception:
        return 128
    return 128 if "v5" in kind else 256


# ---------------------------------------------------------------------------
# Glue: sparse HalfKP encoding (replaces the dense 82048-wide scatter).
# ---------------------------------------------------------------------------
def active_feature_indices(board):
    """board: (8, 8) int32 -> (idx_wm, idx_wo), each (MAX_ACTIVE,) int32.

    idx_wm: feature indices of OPPONENT pieces (feed the "my_pieces" Linear,
            matching the opps/mys crossing in the PyTorch module).
    idx_wo: feature indices of MY pieces (feed the "opp_pieces" Linear).
    Inactive slots hold FEATURES_DIM, which indexes the appended all-zero
    weight row, so gathering them adds nothing.
    """
    flat = board.reshape(-1).astype(jnp.int32)
    pos = jnp.arange(64, dtype=jnp.int32)
    my_king = jnp.argmax(flat == 0).astype(jnp.int32)     # square of piece 0
    opp_king = jnp.argmax(flat == 12).astype(jnp.int32)   # square of piece 12
    is_my = (flat >= 1) & (flat <= 5)                     # MY_PIECE_TYPES  = [1..5]
    is_opp = (flat >= 7) & (flat <= 11)                   # OPP_PIECE_TYPES = [11..7]
    opp_feat = opp_king * (64 * 10 + 1) + (11 - flat) * 64 + pos
    my_feat = my_king * (64 * 10 + 1) + (flat - 1) * 64 + pos
    # Sort pushes the FEATURES_DIM sentinels to the back; keep MAX_ACTIVE slots.
    idx_wm = jnp.sort(jnp.where(is_opp, opp_feat, FEATURES_DIM))[:MAX_ACTIVE]
    idx_wo = jnp.sort(jnp.where(is_my, my_feat, FEATURES_DIM))[:MAX_ACTIVE]
    return idx_wm.astype(jnp.int32), idx_wo.astype(jnp.int32)


# Dense port of encode_dataset(), used only by the pure-JAX reference.
def encode_board_features(board):
    flat = board.reshape(-1).astype(jnp.int32)
    pos = jnp.arange(64, dtype=jnp.int32)
    my_king = jnp.argmax(flat == 0).astype(jnp.int32)
    opp_king = jnp.argmax(flat == 12).astype(jnp.int32)
    is_opp = (flat >= 7) & (flat <= 11)
    is_my = (flat >= 1) & (flat <= 5)
    opp_idx = opp_king * (64 * 10 + 1) + (11 - flat) * 64 + pos
    my_idx = my_king * (64 * 10 + 1) + (flat - 1) * 64 + pos
    opp_scatter = jnp.where(is_opp, opp_idx, FEATURES_DIM)     # OOB sentinel -> dropped
    my_scatter = jnp.where(is_my, my_idx, FEATURES_DIM)
    opps = jnp.zeros((FEATURES_DIM,), jnp.float32).at[opp_scatter].set(1.0, mode="drop")
    mys = jnp.zeros((FEATURES_DIM,), jnp.float32).at[my_scatter].set(1.0, mode="drop")
    return jnp.concatenate([opps, mys])


# ---------------------------------------------------------------------------
# Pallas kernel.
# Grid = (num_tiles, TB): axis 0 = board tile ("parallel"), axis 1 = board
# within the tile ("arbitrary", last).  One step gathers all 2*MAX_ACTIVE
# weight rows of one board and writes its (1, 512) sum into the (TB, 512)
# scratch; the last board of a tile runs the MLP tail for all TB boards.
# ---------------------------------------------------------------------------
def nnue_kernel(iwm_ref, iwo_ref, *refs):
    g = MAX_ACTIVE
    wm_rows = refs[:g]                 # 16 x (1, 1, 256): gathered "my_pieces" rows
    wo_rows = refs[g:2 * g]            # 16 x (1, 1, 256): gathered "opp_pieces" rows
    (bm_ref, bo_ref, w2_ref, b2_ref, w3_ref, b3_ref, w4t_ref, b4_ref,
     out_ref, acc_ref) = refs[2 * g:]

    b = pl.program_id(1)               # board index within this tile

    # One cross-sublane reduce per side (XLU slot) instead of serial VPU adds.
    # Sentinel slots fetched the appended all-zero weight row.
    wm_sum = jnp.sum(jnp.concatenate([r[0] for r in wm_rows], axis=0),
                     axis=0, keepdims=True)                       # (1, 256)
    wo_sum = jnp.sum(jnp.concatenate([r[0] for r in wo_rows], axis=0),
                     axis=0, keepdims=True)                       # (1, 256)
    acc_ref[pl.ds(b, 1), :] = jnp.concatenate([wm_sum, wo_sum], axis=1)  # (1, 512)

    # MLP tail once per board tile: full (TB, .) MXU matmuls, lane-dense store.
    @pl.when(b == pl.num_programs(1) - 1)
    def _tail():
        acc = acc_ref[...]                                        # (TB, 512)
        my_pos = jnp.maximum(acc[:, :256] + bm_ref[...], 0.0)     # (TB, 256) ReLU
        opp_pos = jnp.maximum(acc[:, 256:] + bo_ref[...], 0.0)    # (TB, 256) ReLU
        # cat((my_pos, opp_pos), dim=1) @ W2 == my @ W2[:256] + opp @ W2[256:]
        h1 = (jnp.dot(my_pos, w2_ref[:256, :], preferred_element_type=jnp.float32)
              + jnp.dot(opp_pos, w2_ref[256:, :], preferred_element_type=jnp.float32)
              + b2_ref[...])
        h1 = jnp.maximum(h1, 0.0)
        h2 = jnp.maximum(
            jnp.dot(h1, w3_ref[...], preferred_element_type=jnp.float32) + b3_ref[...],
            0.0)
        # final Linear(32, 1) as a lane reduction
        val = jnp.sum(h2 * w4t_ref[...], axis=1, keepdims=True) + b4_ref[...]  # (TB, 1)
        out_ref[...] = jnp.broadcast_to(val, out_ref.shape)       # (TB, 128) lane-dense


def model_forward_pallas(boards, params, board_tile=None):
    boards = boards.astype(jnp.int32)
    B = boards.shape[0]
    idx_wm, idx_wo = jax.vmap(active_feature_indices)(boards)     # (B, MAX_ACTIVE) each

    if board_tile is None:
        board_tile = _default_board_tile()
    TB = min(board_tile, _round_up(max(B, 1), 8))
    Bp = _round_up(B, TB)
    num_tiles = Bp // TB

    pad = Bp - B
    if pad:
        sentinel = jnp.full((pad, MAX_ACTIVE), FEATURES_DIM, jnp.int32)
        idx_wm = jnp.concatenate([idx_wm, sentinel], axis=0)
        idx_wo = jnp.concatenate([idx_wo, sentinel], axis=0)
    # Flatten: 1-D SMEM arrays pad far better than 2-D (sublane x lane padding).
    idx_wm = idx_wm.reshape(-1)
    idx_wo = idx_wo.reshape(-1)

    def wm_map(slot):
        return lambda t, b, iwm, iwo, slot=slot: (
            iwm[(t * TB + b) * MAX_ACTIVE + slot], 0, 0)

    def wo_map(slot):
        return lambda t, b, iwm, iwo, slot=slot: (
            iwo[(t * TB + b) * MAX_ACTIVE + slot], 0, 0)

    gather_specs = (
        [pl.BlockSpec((1, 1, 256), wm_map(s)) for s in range(MAX_ACTIVE)]
        + [pl.BlockSpec((1, 1, 256), wo_map(s)) for s in range(MAX_ACTIVE)])

    c2 = lambda t, b, iwm, iwo: (0, 0)            # small params stay VMEM-resident
    param_specs = [
        pl.BlockSpec((1, 256), c2),    # b_my
        pl.BlockSpec((1, 256), c2),    # b_opp
        pl.BlockSpec((512, 32), c2),   # W2
        pl.BlockSpec((1, 32), c2),     # b2
        pl.BlockSpec((32, 32), c2),    # W3
        pl.BlockSpec((1, 32), c2),     # b3
        pl.BlockSpec((1, 32), c2),     # W4^T
        pl.BlockSpec((1, 1), c2),      # b4
    ]

    flops = 2 * Bp * (2 * MAX_ACTIVE * 256 + 512 * 32 + 32 * 32 + 32)
    bytes_accessed = (Bp * 2 * MAX_ACTIVE * (256 * 4 + 4)          # gathered rows + indices
                      + 4 * (2 * 256 + 512 * 32 + 32 + 32 * 32 + 32 + 32 + 1)
                      + Bp * 128 * 4)

    out = pl.pallas_call(
        nnue_kernel,
        out_shape=jax.ShapeDtypeStruct((Bp, 128), jnp.float32),
        grid_spec=pltpu.PrefetchScalarGridSpec(
            num_scalar_prefetch=2,
            grid=(num_tiles, TB),                 # board-within-tile axis last
            in_specs=gather_specs + param_specs,
            out_specs=pl.BlockSpec((TB, 128), lambda t, b, iwm, iwo: (t, 0)),
            scratch_shapes=[pltpu.VMEM((TB, 512), jnp.float32)],
        ),
        compiler_params=pltpu.CompilerParams(
            dimension_semantics=("parallel", "arbitrary")),
        cost_estimate=pl.CostEstimate(flops=flops, transcendentals=0,
                                      bytes_accessed=bytes_accessed),
    )(idx_wm, idx_wo,
      *([params["wm3"]] * MAX_ACTIVE), *([params["wo3"]] * MAX_ACTIVE),
      params["bm"], params["bo"], params["w2"], params["b2"],
      params["w3"], params["b3"], params["w4t"], params["b4"])

    return out[:B, 0]    # output.flatten()


# ---------------------------------------------------------------------------
# Pure-JAX reference (dense math, independent of the sparse path).
# ---------------------------------------------------------------------------
def model_forward_ref(boards, params):
    feats = jax.vmap(encode_board_features)(boards.astype(jnp.int32))
    wm = params["wm3"][:FEATURES_DIM, 0, :]
    wo = params["wo3"][:FEATURES_DIM, 0, :]
    xm = feats[:, :FEATURES_DIM]     # == opps -> "my_pieces" Linear (as in PyTorch)
    xo = feats[:, FEATURES_DIM:]     # == mys  -> "opp_pieces" Linear
    my_pos = jax.nn.relu(xm @ wm + params["bm"])
    opp_pos = jax.nn.relu(xo @ wo + params["bo"])
    h = jnp.concatenate([my_pos, opp_pos], axis=1)
    h1 = jax.nn.relu(h @ params["w2"] + params["b2"])
    h2 = jax.nn.relu(h1 @ params["w3"] + params["b3"])
    out = h2 @ params["w4t"].T + params["b4"]
    return out.reshape(-1)


def init_params(key):
    """torch.nn.Linear-style init; weights stored as (in_features, out_features).

    The two big HalfKP matrices get one extra all-zero row (gather sentinel)
    and are reshaped to (FEATURES_DIM + 1, 1, 256) so a gathered row is a
    legal (1, 1, 256) Pallas block whose last two dims equal the array's.
    """
    ks = jax.random.split(key, 10)

    def lin(kw, kb, fan_in, fan_out):
        s = float(fan_in) ** -0.5
        w = jax.random.uniform(kw, (fan_in, fan_out), jnp.float32, -s, s)
        b = jax.random.uniform(kb, (1, fan_out), jnp.float32, -s, s)
        return w, b

    wm, bm = lin(ks[0], ks[1], FEATURES_DIM, 256)   # HalfKP "my_pieces" Linear
    wo, bo = lin(ks[2], ks[3], FEATURES_DIM, 256)   # HalfKP "opp_pieces" Linear
    w2, b2 = lin(ks[4], ks[5], 512, 32)             # transform[0]
    w3, b3 = lin(ks[6], ks[7], 32, 32)              # transform[2]
    w4, b4 = lin(ks[8], ks[9], 32, 1)               # transform[4]

    zrow = jnp.zeros((1, 256), jnp.float32)
    wm3 = jnp.concatenate([wm, zrow], axis=0).reshape(FEATURES_DIM + 1, 1, 256)
    wo3 = jnp.concatenate([wo, zrow], axis=0).reshape(FEATURES_DIM + 1, 1, 256)
    return dict(wm3=wm3, bm=bm, wo3=wo3, bo=bo,
                w2=w2, b2=b2, w3=w3, b3=b3,
                w4t=w4.T, b4=b4)                    # w4t: (1, 32)


def make_boards(key, B, n_my=10, n_opp=10):
    """Deterministic pseudo-chess boards: both kings plus n_my / n_opp (<= 15)
    non-king pieces per side, respecting the MAX_ACTIVE precondition."""
    my_codes = jnp.array([1, 2, 3, 4, 5], jnp.int32)
    opp_codes = jnp.array([7, 8, 9, 10, 11], jnp.int32)

    def one(k):
        kp, k1, k2 = jax.random.split(k, 3)
        squares = jax.random.permutation(kp, 64)
        board = jnp.full((64,), 6, jnp.int32)                     # 6 == empty
        board = board.at[squares[2:2 + n_my]].set(
            jax.random.choice(k1, my_codes, (n_my,)))
        board = board.at[squares[2 + n_my:2 + n_my + n_opp]].set(
            jax.random.choice(k2, opp_codes, (n_opp,)))
        board = board.at[squares[0]].set(0)                       # my king
        board = board.at[squares[1]].set(12)                      # opp king
        return board.reshape(8, 8)

    return jax.vmap(one)(jax.random.split(key, B))


if __name__ == "__main__":
    key = jax.random.PRNGKey(0)
    pkey, bkey = jax.random.split(key)
    params = init_params(pkey)

    B = 2
    boards = make_boards(bkey, B)                  # (B, 8, 8) int32, <= 10 pieces/side

    fwd = jax.jit(model_forward_pallas)
    out = jax.block_until_ready(fwd(boards, params))

    ref = model_forward_ref(boards, params)
    assert out.shape == (B,)
    assert jnp.allclose(out, ref, rtol=1e-4, atol=1e-4), (out, ref)
    print("KERNEL_OK")
</pallas_src>

<mosaic_0001>
module attributes {stable_mosaic.version = 11 : i64} {
  func.func @nnue_kernel(%arg0: i32, %arg1: i32, %arg2: memref<128xi32, #tpu.memory_space<smem>>, %arg3: memref<128xi32, #tpu.memory_space<smem>>, %arg4: memref<1x1x256xf32, #tpu.memory_space<vmem>>, %arg5: memref<1x1x256xf32, #tpu.memory_space<vmem>>, %arg6: memref<1x1x256xf32, #tpu.memory_space<vmem>>, %arg7: memref<1x1x256xf32, #tpu.memory_space<vmem>>, %arg8: memref<1x1x256xf32, #tpu.memory_space<vmem>>, %arg9: memref<1x1x256xf32, #tpu.memory_space<vmem>>, %arg10: memref<1x1x256xf32, #tpu.memory_space<vmem>>, %arg11: memref<1x1x256xf32, #tpu.memory_space<vmem>>, %arg12: memref<1x1x256xf32, #tpu.memory_space<vmem>>, %arg13: memref<1x1x256xf32, #tpu.memory_space<vmem>>, %arg14: memref<1x1x256xf32, #tpu.memory_space<vmem>>, %arg15: memref<1x1x256xf32, #tpu.memory_space<vmem>>, %arg16: memref<1x1x256xf32, #tpu.memory_space<vmem>>, %arg17: memref<1x1x256xf32, #tpu.memory_space<vmem>>, %arg18: memref<1x1x256xf32, #tpu.memory_space<vmem>>, %arg19: memref<1x1x256xf32, #tpu.memory_space<vmem>>, %arg20: memref<1x1x256xf32, #tpu.memory_space<vmem>>, %arg21: memref<1x1x256xf32, #tpu.memory_space<vmem>>, %arg22: memref<1x1x256xf32, #tpu.memory_space<vmem>>, %arg23: memref<1x1x256xf32, #tpu.memory_space<vmem>>, %arg24: memref<1x1x256xf32, #tpu.memory_space<vmem>>, %arg25: memref<1x1x256xf32, #tpu.memory_space<vmem>>, %arg26: memref<1x1x256xf32, #tpu.memory_space<vmem>>, %arg27: memref<1x1x256xf32, #tpu.memory_space<vmem>>, %arg28: memref<1x1x256xf32, #tpu.memory_space<vmem>>, %arg29: memref<1x1x256xf32, #tpu.memory_space<vmem>>, %arg30: memref<1x1x256xf32, #tpu.memory_space<vmem>>, %arg31: memref<1x1x256xf32, #tpu.memory_space<vmem>>, %arg32: memref<1x1x256xf32, #tpu.memory_space<vmem>>, %arg33: memref<1x1x256xf32, #tpu.memory_space<vmem>>, %arg34: memref<1x1x256xf32, #tpu.memory_space<vmem>>, %arg35: memref<1x1x256xf32, #tpu.memory_space<vmem>>, %arg36: memref<1x256xf32, #tpu.memory_space<vmem>>, %arg37: memref<1x256xf32, #tpu.memory_space<vmem>>, %arg38: memref<512x32xf32, #tpu.memory_space<vmem>>, %arg39: memref<1x32xf32, #tpu.memory_space<vmem>>, %arg40: memref<32x32xf32, #tpu.memory_space<vmem>>, %arg41: memref<1x32xf32, #tpu.memory_space<vmem>>, %arg42: memref<1x32xf32, #tpu.memory_space<vmem>>, %arg43: memref<1x1xf32, #tpu.memory_space<vmem>>, %arg44: memref<8x128xf32, #tpu.memory_space<vmem>>, %arg45: memref<8x512xf32, #tpu.memory_space<vmem>>) attributes {dimension_semantics = [#tpu.dimension_semantics<parallel>, #tpu.dimension_semantics<arbitrary>], iteration_bounds = array<i64: 1, 8>, scalar_prefetch = 2 : i64, scratch_operands = 1 : i64, tpu.core_type = #tpu.core_type<tc>, window_params = [{transform_indices = @transform_0, window_bounds = array<i64: 1, 1, 256>}, {transform_indices = @transform_1, window_bounds = array<i64: 1, 1, 256>}, {transform_indices = @transform_2, window_bounds = array<i64: 1, 1, 256>}, {transform_indices = @transform_3, window_bounds = array<i64: 1, 1, 256>}, {transform_indices = @transform_4, window_bounds = array<i64: 1, 1, 256>}, {transform_indices = @transform_5, window_bounds = array<i64: 1, 1, 256>}, {transform_indices = @transform_6, window_bounds = array<i64: 1, 1, 256>}, {transform_indices = @transform_7, window_bounds = array<i64: 1, 1, 256>}, {transform_indices = @transform_8, window_bounds = array<i64: 1, 1, 256>}, {transform_indices = @transform_9, window_bounds = array<i64: 1, 1, 256>}, {transform_indices = @transform_10, window_bounds = array<i64: 1, 1, 256>}, {transform_indices = @transform_11, window_bounds = array<i64: 1, 1, 256>}, {transform_indices = @transform_12, window_bounds = array<i64: 1, 1, 256>}, {transform_indices = @transform_13, window_bounds = array<i64: 1, 1, 256>}, {transform_indices = @transform_14, window_bounds = array<i64: 1, 1, 256>}, {transform_indices = @transform_15, window_bounds = array<i64: 1, 1, 256>}, {transform_indices = @transform_16, window_bounds = array<i64: 1, 1, 256>}, {transform_indices = @transform_17, window_bounds = array<i64: 1, 1, 256>}, {transform_indices = @transform_18, window_bounds = array<i64: 1, 1, 256>}, {transform_indices = @transform_19, window_bounds = array<i64: 1, 1, 256>}, {transform_indices = @transform_20, window_bounds = array<i64: 1, 1, 256>}, {transform_indices = @transform_21, window_bounds = array<i64: 1, 1, 256>}, {transform_indices = @transform_22, window_bounds = array<i64: 1, 1, 256>}, {transform_indices = @transform_23, window_bounds = array<i64: 1, 1, 256>}, {transform_indices = @transform_24, window_bounds = array<i64: 1, 1, 256>}, {transform_indices = @transform_25, window_bounds = array<i64: 1, 1, 256>}, {transform_indices = @transform_26, window_bounds = array<i64: 1, 1, 256>}, {transform_indices = @transform_27, window_bounds = array<i64: 1, 1, 256>}, {transform_indices = @transform_28, window_bounds = array<i64: 1, 1, 256>}, {transform_indices = @transform_29, window_bounds = array<i64: 1, 1, 256>}, {transform_indices = @transform_30, window_bounds = array<i64: 1, 1, 256>}, {transform_indices = @transform_31, window_bounds = array<i64: 1, 1, 256>}, {pipeline_mode = #tpu.pipeline_mode<synchronous>, transform_indices = @transform_32, window_bounds = array<i64: 1, 256>}, {pipeline_mode = #tpu.pipeline_mode<synchronous>, transform_indices = @transform_33, window_bounds = array<i64: 1, 256>}, {pipeline_mode = #tpu.pipeline_mode<synchronous>, transform_indices = @transform_34, window_bounds = array<i64: 512, 32>}, {pipeline_mode = #tpu.pipeline_mode<synchronous>, transform_indices = @transform_35, window_bounds = array<i64: 1, 32>}, {pipeline_mode = #tpu.pipeline_mode<synchronous>, transform_indices = @transform_36, window_bounds = array<i64: 32, 32>}, {pipeline_mode = #tpu.pipeline_mode<synchronous>, transform_indices = @transform_37, window_bounds = array<i64: 1, 32>}, {pipeline_mode = #tpu.pipeline_mode<synchronous>, transform_indices = @transform_38, window_bounds = array<i64: 1, 32>}, {pipeline_mode = #tpu.pipeline_mode<synchronous>, transform_indices = @transform_39, window_bounds = array<i64: 1, 1>}, {transform_indices = @transform_40, window_bounds = array<i64: 8, 128>}]} {
    %c0 = arith.constant 0 : index
    %c0_0 = arith.constant 0 : index
    %c0_1 = arith.constant 0 : index
    %0 = vector.load %arg4[%c0, %c0_0, %c0_1] : memref<1x1x256xf32, #tpu.memory_space<vmem>>, vector<1x1x256xf32>
    %1 = vector.shape_cast %0 : vector<1x1x256xf32> to vector<1x256xf32>
    %c0_2 = arith.constant 0 : index
    %c0_3 = arith.constant 0 : index
    %c0_4 = arith.constant 0 : index
    %2 = vector.load %arg5[%c0_2, %c0_3, %c0_4] : memref<1x1x256xf32, #tpu.memory_space<vmem>>, vector<1x1x256xf32>
    %3 = vector.shape_cast %2 : vector<1x1x256xf32> to vector<1x256xf32>
    %c0_5 = arith.constant 0 : index
    %c0_6 = arith.constant 0 : index
    %c0_7 = arith.constant 0 : index
    %4 = vector.load %arg6[%c0_5, %c0_6, %c0_7] : memref<1x1x256xf32, #tpu.memory_space<vmem>>, vector<1x1x256xf32>
    %5 = vector.shape_cast %4 : vector<1x1x256xf32> to vector<1x256xf32>
    %c0_8 = arith.constant 0 : index
    %c0_9 = arith.constant 0 : index
    %c0_10 = arith.constant 0 : index
    %6 = vector.load %arg7[%c0_8, %c0_9, %c0_10] : memref<1x1x256xf32, #tpu.memory_space<vmem>>, vector<1x1x256xf32>
    %7 = vector.shape_cast %6 : vector<1x1x256xf32> to vector<1x256xf32>
    %c0_11 = arith.constant 0 : index
    %c0_12 = arith.constant 0 : index
    %c0_13 = arith.constant 0 : index
    %8 = vector.load %arg8[%c0_11, %c0_12, %c0_13] : memref<1x1x256xf32, #tpu.memory_space<vmem>>, vector<1x1x256xf32>
    %9 = vector.shape_cast %8 : vector<1x1x256xf32> to vector<1x256xf32>
    %c0_14 = arith.constant 0 : index
    %c0_15 = arith.constant 0 : index
    %c0_16 = arith.constant 0 : index
    %10 = vector.load %arg9[%c0_14, %c0_15, %c0_16] : memref<1x1x256xf32, #tpu.memory_space<vmem>>, vector<1x1x256xf32>
    %11 = vector.shape_cast %10 : vector<1x1x256xf32> to vector<1x256xf32>
    %c0_17 = arith.constant 0 : index
    %c0_18 = arith.constant 0 : index
    %c0_19 = arith.constant 0 : index
    %12 = vector.load %arg10[%c0_17, %c0_18, %c0_19] : memref<1x1x256xf32, #tpu.memory_space<vmem>>, vector<1x1x256xf32>
    %13 = vector.shape_cast %12 : vector<1x1x256xf32> to vector<1x256xf32>
    %c0_20 = arith.constant 0 : index
    %c0_21 = arith.constant 0 : index
    %c0_22 = arith.constant 0 : index
    %14 = vector.load %arg11[%c0_20, %c0_21, %c0_22] : memref<1x1x256xf32, #tpu.memory_space<vmem>>, vector<1x1x256xf32>
    %15 = vector.shape_cast %14 : vector<1x1x256xf32> to vector<1x256xf32>
    %c0_23 = arith.constant 0 : index
    %c0_24 = arith.constant 0 : index
    %c0_25 = arith.constant 0 : index
    %16 = vector.load %arg12[%c0_23, %c0_24, %c0_25] : memref<1x1x256xf32, #tpu.memory_space<vmem>>, vector<1x1x256xf32>
    %17 = vector.shape_cast %16 : vector<1x1x256xf32> to vector<1x256xf32>
    %c0_26 = arith.constant 0 : index
    %c0_27 = arith.constant 0 : index
    %c0_28 = arith.constant 0 : index
    %18 = vector.load %arg13[%c0_26, %c0_27, %c0_28] : memref<1x1x256xf32, #tpu.memory_space<vmem>>, vector<1x1x256xf32>
    %19 = vector.shape_cast %18 : vector<1x1x256xf32> to vector<1x256xf32>
    %c0_29 = arith.constant 0 : index
    %c0_30 = arith.constant 0 : index
    %c0_31 = arith.constant 0 : index
    %20 = vector.load %arg14[%c0_29, %c0_30, %c0_31] : memref<1x1x256xf32, #tpu.memory_space<vmem>>, vector<1x1x256xf32>
    %21 = vector.shape_cast %20 : vector<1x1x256xf32> to vector<1x256xf32>
    %c0_32 = arith.constant 0 : index
    %c0_33 = arith.constant 0 : index
    %c0_34 = arith.constant 0 : index
    %22 = vector.load %arg15[%c0_32, %c0_33, %c0_34] : memref<1x1x256xf32, #tpu.memory_space<vmem>>, vector<1x1x256xf32>
    %23 = vector.shape_cast %22 : vector<1x1x256xf32> to vector<1x256xf32>
    %c0_35 = arith.constant 0 : index
    %c0_36 = arith.constant 0 : index
    %c0_37 = arith.constant 0 : index
    %24 = vector.load %arg16[%c0_35, %c0_36, %c0_37] : memref<1x1x256xf32, #tpu.memory_space<vmem>>, vector<1x1x256xf32>
    %25 = vector.shape_cast %24 : vector<1x1x256xf32> to vector<1x256xf32>
    %c0_38 = arith.constant 0 : index
    %c0_39 = arith.constant 0 : index
    %c0_40 = arith.constant 0 : index
    %26 = vector.load %arg17[%c0_38, %c0_39, %c0_40] : memref<1x1x256xf32, #tpu.memory_space<vmem>>, vector<1x1x256xf32>
    %27 = vector.shape_cast %26 : vector<1x1x256xf32> to vector<1x256xf32>
    %c0_41 = arith.constant 0 : index
    %c0_42 = arith.constant 0 : index
    %c0_43 = arith.constant 0 : index
    %28 = vector.load %arg18[%c0_41, %c0_42, %c0_43] : memref<1x1x256xf32, #tpu.memory_space<vmem>>, vector<1x1x256xf32>
    %29 = vector.shape_cast %28 : vector<1x1x256xf32> to vector<1x256xf32>
    %c0_44 = arith.constant 0 : index
    %c0_45 = arith.constant 0 : index
    %c0_46 = arith.constant 0 : index
    %30 = vector.load %arg19[%c0_44, %c0_45, %c0_46] : memref<1x1x256xf32, #tpu.memory_space<vmem>>, vector<1x1x256xf32>
    %31 = vector.shape_cast %30 : vector<1x1x256xf32> to vector<1x256xf32>
    %32 = tpu.concatenate %1, %3, %5, %7, %9, %11, %13, %15, %17, %19, %21, %23, %25, %27, %29, %31 in 0 : vector<1x256xf32>, vector<1x256xf32>, vector<1x256xf32>, vector<1x256xf32>, vector<1x256xf32>, vector<1x256xf32>, vector<1x256xf32>, vector<1x256xf32>, vector<1x256xf32>, vector<1x256xf32>, vector<1x256xf32>, vector<1x256xf32>, vector<1x256xf32>, vector<1x256xf32>, vector<1x256xf32>, vector<1x256xf32> -> vector<16x256xf32>
    %cst = arith.constant dense<0.000000e+00> : vector<256xf32>
    %33 = vector.multi_reduction <add>, %32, %cst [0] : vector<16x256xf32> to vector<256xf32>
    %34 = vector.shape_cast %33 : vector<256xf32> to vector<1x256xf32>
    %c0_47 = arith.constant 0 : index
    %c0_48 = arith.constant 0 : index
    %c0_49 = arith.constant 0 : index
    %35 = vector.load %arg20[%c0_47, %c0_48, %c0_49] : memref<1x1x256xf32, #tpu.memory_space<vmem>>, vector<1x1x256xf32>
    %36 = vector.shape_cast %35 : vector<1x1x256xf32> to vector<1x256xf32>
    %c0_50 = arith.constant 0 : index
    %c0_51 = arith.constant 0 : index
    %c0_52 = arith.constant 0 : index
    %37 = vector.load %arg21[%c0_50, %c0_51, %c0_52] : memref<1x1x256xf32, #tpu.memory_space<vmem>>, vector<1x1x256xf32>
    %38 = vector.shape_cast %37 : vector<1x1x256xf32> to vector<1x256xf32>
    %c0_53 = arith.constant 0 : index
    %c0_54 = arith.constant 0 : index
    %c0_55 = arith.constant 0 : index
    %39 = vector.load %arg22[%c0_53, %c0_54, %c0_55] : memref<1x1x256xf32, #tpu.memory_space<vmem>>, vector<1x1x256xf32>
    %40 = vector.shape_cast %39 : vector<1x1x256xf32> to vector<1x256xf32>
    %c0_56 = arith.constant 0 : index
    %c0_57 = arith.constant 0 : index
    %c0_58 = arith.constant 0 : index
    %41 = vector.load %arg23[%c0_56, %c0_57, %c0_58] : memref<1x1x256xf32, #tpu.memory_space<vmem>>, vector<1x1x256xf32>
    %42 = vector.shape_cast %41 : vector<1x1x256xf32> to vector<1x256xf32>
    %c0_59 = arith.constant 0 : index
    %c0_60 = arith.constant 0 : index
    %c0_61 = arith.constant 0 : index
    %43 = vector.load %arg24[%c0_59, %c0_60, %c0_61] : memref<1x1x256xf32, #tpu.memory_space<vmem>>, vector<1x1x256xf32>
    %44 = vector.shape_cast %43 : vector<1x1x256xf32> to vector<1x256xf32>
    %c0_62 = arith.constant 0 : index
    %c0_63 = arith.constant 0 : index
    %c0_64 = arith.constant 0 : index
    %45 = vector.load %arg25[%c0_62, %c0_63, %c0_64] : memref<1x1x256xf32, #tpu.memory_space<vmem>>, vector<1x1x256xf32>
    %46 = vector.shape_cast %45 : vector<1x1x256xf32> to vector<1x256xf32>
    %c0_65 = arith.constant 0 : index
    %c0_66 = arith.constant 0 : index
    %c0_67 = arith.constant 0 : index
    %47 = vector.load %arg26[%c0_65, %c0_66, %c0_67] : memref<1x1x256xf32, #tpu.memory_space<vmem>>, vector<1x1x256xf32>
    %48 = vector.shape_cast %47 : vector<1x1x256xf32> to vector<1x256xf32>
    %c0_68 = arith.constant 0 : index
    %c0_69 = arith.constant 0 : index
    %c0_70 = arith.constant 0 : index
    %49 = vector.load %arg27[%c0_68, %c0_69, %c0_70] : memref<1x1x256xf32, #tpu.memory_space<vmem>>, vector<1x1x256xf32>
    %50 = vector.shape_cast %49 : vector<1x1x256xf32> to vector<1x256xf32>
    %c0_71 = arith.constant 0 : index
    %c0_72 = arith.constant 0 : index
    %c0_73 = arith.constant 0 : index
    %51 = vector.load %arg28[%c0_71, %c0_72, %c0_73] : memref<1x1x256xf32, #tpu.memory_space<vmem>>, vector<1x1x256xf32>
    %52 = vector.shape_cast %51 : vector<1x1x256xf32> to vector<1x256xf32>
    %c0_74 = arith.constant 0 : index
    %c0_75 = arith.constant 0 : index
    %c0_76 = arith.constant 0 : index
    %53 = vector.load %arg29[%c0_74, %c0_75, %c0_76] : memref<1x1x256xf32, #tpu.memory_space<vmem>>, vector<1x1x256xf32>
    %54 = vector.shape_cast %53 : vector<1x1x256xf32> to vector<1x256xf32>
    %c0_77 = arith.constant 0 : index
    %c0_78 = arith.constant 0 : index
    %c0_79 = arith.constant 0 : index
    %55 = vector.load %arg30[%c0_77, %c0_78, %c0_79] : memref<1x1x256xf32, #tpu.memory_space<vmem>>, vector<1x1x256xf32>
    %56 = vector.shape_cast %55 : vector<1x1x256xf32> to vector<1x256xf32>
    %c0_80 = arith.constant 0 : index
    %c0_81 = arith.constant 0 : index
    %c0_82 = arith.constant 0 : index
    %57 = vector.load %arg31[%c0_80, %c0_81, %c0_82] : memref<1x1x256xf32, #tpu.memory_space<vmem>>, vector<1x1x256xf32>
    %58 = vector.shape_cast %57 : vector<1x1x256xf32> to vector<1x256xf32>
    %c0_83 = arith.constant 0 : index
    %c0_84 = arith.constant 0 : index
    %c0_85 = arith.constant 0 : index
    %59 = vector.load %arg32[%c0_83, %c0_84, %c0_85] : memref<1x1x256xf32, #tpu.memory_space<vmem>>, vector<1x1x256xf32>
    %60 = vector.shape_cast %59 : vector<1x1x256xf32> to vector<1x256xf32>
    %c0_86 = arith.constant 0 : index
    %c0_87 = arith.constant 0 : index
    %c0_88 = arith.constant 0 : index
    %61 = vector.load %arg33[%c0_86, %c0_87, %c0_88] : memref<1x1x256xf32, #tpu.memory_space<vmem>>, vector<1x1x256xf32>
    %62 = vector.shape_cast %61 : vector<1x1x256xf32> to vector<1x256xf32>
    %c0_89 = arith.constant 0 : index
    %c0_90 = arith.constant 0 : index
    %c0_91 = arith.constant 0 : index
    %63 = vector.load %arg34[%c0_89, %c0_90, %c0_91] : memref<1x1x256xf32, #tpu.memory_space<vmem>>, vector<1x1x256xf32>
    %64 = vector.shape_cast %63 : vector<1x1x256xf32> to vector<1x256xf32>
    %c0_92 = arith.constant 0 : index
    %c0_93 = arith.constant 0 : index
    %c0_94 = arith.constant 0 : index
    %65 = vector.load %arg35[%c0_92, %c0_93, %c0_94] : memref<1x1x256xf32, #tpu.memory_space<vmem>>, vector<1x1x256xf32>
    %66 = vector.shape_cast %65 : vector<1x1x256xf32> to vector<1x256xf32>
    %67 = tpu.concatenate %36, %38, %40, %42, %44, %46, %48, %50, %52, %54, %56, %58, %60, %62, %64, %66 in 0 : vector<1x256xf32>, vector<1x256xf32>, vector<1x256xf32>, vector<1x256xf32>, vector<1x256xf32>, vector<1x256xf32>, vector<1x256xf32>, vector<1x256xf32>, vector<1x256xf32>, vector<1x256xf32>, vector<1x256xf32>, vector<1x256xf32>, vector<1x256xf32>, vector<1x256xf32>, vector<1x256xf32>, vector<1x256xf32> -> vector<16x256xf32>
    %cst_95 = arith.constant dense<0.000000e+00> : vector<256xf32>
    %68 = vector.multi_reduction <add>, %67, %cst_95 [0] : vector<16x256xf32> to vector<256xf32>
    %69 = vector.shape_cast %68 : vector<256xf32> to vector<1x256xf32>
    %70 = tpu.concatenate %34, %69 in 1 : vector<1x256xf32>, vector<1x256xf32> -> vector<1x512xf32>
    %71 = arith.index_cast %arg1 : i32 to index
    %c0_96 = arith.constant 0 : index
    %72 = vector.load %arg45[%71, %c0_96] : memref<8x512xf32, #tpu.memory_space<vmem>>, vector<1x512xf32>
    tpu.vector_store %arg45[%71, %c0_96], %70 {strides = array<i32>} : memref<8x512xf32, #tpu.memory_space<vmem>>, vector<1x512xf32>,
    %c7_i32 = arith.constant 7 : i32
    %73 = arith.cmpi eq, %arg1, %c7_i32 : i32
    %74 = arith.extui %73 : i1 to i32
    %c0_i32 = arith.constant 0 : i32
    %75 = arith.cmpi ne, %74, %c0_i32 : i32
    scf.if %75 {
      %c0_97 = arith.constant 0 : index
      %c0_98 = arith.constant 0 : index
      %76 = vector.load %arg45[%c0_97, %c0_98] : memref<8x512xf32, #tpu.memory_space<vmem>>, vector<8x512xf32>
      %77 = vector.extract_strided_slice %76 {offsets = [0, 0], sizes = [8, 256], strides = [1, 1]} : vector<8x512xf32> to vector<8x256xf32>
      %c0_99 = arith.constant 0 : index
      %c0_100 = arith.constant 0 : index
      %78 = vector.load %arg36[%c0_99, %c0_100] : memref<1x256xf32, #tpu.memory_space<vmem>>, vector<1x256xf32>
      %79 = vector.broadcast %78 : vector<1x256xf32> to vector<8x256xf32>
      %80 = arith.addf %77, %79 : vector<8x256xf32>
      %cst_101 = arith.constant 0.000000e+00 : f32
      %81 = vector.broadcast %cst_101 : f32 to vector<8x256xf32>
      %82 = arith.maximumf %80, %81 : vector<8x256xf32>
      %83 = vector.extract_strided_slice %76 {offsets = [0, 256], sizes = [8, 256], strides = [1, 1]} : vector<8x512xf32> to vector<8x256xf32>
      %c0_102 = arith.constant 0 : index
      %c0_103 = arith.constant 0 : index
      %84 = vector.load %arg37[%c0_102, %c0_103] : memref<1x256xf32, #tpu.memory_space<vmem>>, vector<1x256xf32>
      %85 = vector.broadcast %84 : vector<1x256xf32> to vector<8x256xf32>
      %86 = arith.addf %83, %85 : vector<8x256xf32>
      %cst_104 = arith.constant 0.000000e+00 : f32
      %87 = vector.broadcast %cst_104 : f32 to vector<8x256xf32>
      %88 = arith.maximumf %86, %87 : vector<8x256xf32>
      %c0_105 = arith.constant 0 : index
      %c0_106 = arith.constant 0 : index
      %89 = vector.load %arg38[%c0_105, %c0_106] : memref<512x32xf32, #tpu.memory_space<vmem>>, vector<256x32xf32>
      %cst_107 = arith.constant dense<0.000000e+00> : vector<8x32xf32>
      %90 = tpu.matmul %82, %89, %cst_107 {dimension_numbers = #tpu.dot_dimension_numbers<[1], [0], [0], [1], [0, 0, 1, 1], [], []>} : vector<8x256xf32>, vector<256x32xf32>, vector<8x32xf32> -> vector<8x32xf32>
      %c256 = arith.constant 256 : index
      %c0_108 = arith.constant 0 : index
      %91 = vector.load %arg38[%c256, %c0_108] : memref<512x32xf32, #tpu.memory_space<vmem>>, vector<256x32xf32>
      %cst_109 = arith.constant dense<0.000000e+00> : vector<8x32xf32>
      %92 = tpu.matmul %88, %91, %cst_109 {dimension_numbers = #tpu.dot_dimension_numbers<[1], [0], [0], [1], [0, 0, 1, 1], [], []>} : vector<8x256xf32>, vector<256x32xf32>, vector<8x32xf32> -> vector<8x32xf32>
      %93 = arith.addf %90, %92 : vector<8x32xf32>
      %c0_110 = arith.constant 0 : index
      %c0_111 = arith.constant 0 : index
      %94 = vector.load %arg39[%c0_110, %c0_111] : memref<1x32xf32, #tpu.memory_space<vmem>>, vector<1x32xf32>
      %95 = vector.broadcast %94 : vector<1x32xf32> to vector<8x32xf32>
      %96 = arith.addf %93, %95 : vector<8x32xf32>
      %cst_112 = arith.constant 0.000000e+00 : f32
      %97 = vector.broadcast %cst_112 : f32 to vector<8x32xf32>
      %98 = arith.maximumf %96, %97 : vector<8x32xf32>
      %c0_113 = arith.constant 0 : index
      %c0_114 = arith.constant 0 : index
      %99 = vector.load %arg40[%c0_113, %c0_114] : memref<32x32xf32, #tpu.memory_space<vmem>>, vector<32x32xf32>
      %cst_115 = arith.constant dense<0.000000e+00> : vector<8x32xf32>
      %100 = tpu.matmul %98, %99, %cst_115 {dimension_numbers = #tpu.dot_dimension_numbers<[1], [0], [0], [1], [0, 0, 1, 1], [], []>} : vector<8x32xf32>, vector<32x32xf32>, vector<8x32xf32> -> vector<8x32xf32>
      %c0_116 = arith.constant 0 : index
      %c0_117 = arith.constant 0 : index
      %101 = vector.load %arg41[%c0_116, %c0_117] : memref<1x32xf32, #tpu.memory_space<vmem>>, vector<1x32xf32>
      %102 = vector.broadcast %101 : vector<1x32xf32> to vector<8x32xf32>
      %103 = arith.addf %100, %102 : vector<8x32xf32>
      %cst_118 = arith.constant 0.000000e+00 : f32
      %104 = vector.broadcast %cst_118 : f32 to vector<8x32xf32>
      %105 = arith.maximumf %103, %104 : vector<8x32xf32>
      %c0_119 = arith.constant 0 : index
      %c0_120 = arith.constant 0 : index
      %106 = vector.load %arg42[%c0_119, %c0_120] : memref<1x32xf32, #tpu.memory_space<vmem>>, vector<1x32xf32>
      %107 = vector.broadcast %106 : vector<1x32xf32> to vector<8x32xf32>
      %108 = arith.mulf %105, %107 : vector<8x32xf32>
      %cst_121 = arith.constant dense<0.000000e+00> : vector<8xf32>
      %109 = vector.multi_reduction <add>, %108, %cst_121 [1] : vector<8x32xf32> to vector<8xf32>
      %110 = vector.shape_cast %109 : vector<8xf32> to vector<8x1xf32>
      %c0_122 = arith.constant 0 : index
      %c0_123 = arith.constant 0 : index
      %111 = vector.load %arg43[%c0_122, %c0_123] : memref<1x1xf32, #tpu.memory_space<vmem>>, vector<1x1xf32>
      %112 = vector.broadcast %111 : vector<1x1xf32> to vector<8x1xf32>
      %113 = arith.addf %110, %112 : vector<8x1xf32>
      %114 = vector.shape_cast %113 : vector<8x1xf32> to vector<8x1xf32>
      %115 = vector.broadcast %114 : vector<8x1xf32> to vector<8x128xf32>
      %c0_124 = arith.constant 0 : index
      %c0_125 = arith.constant 0 : index
      %116 = vector.load %arg44[%c0_124, %c0_125] : memref<8x128xf32, #tpu.memory_space<vmem>>, vector<8x128xf32>
      tpu.vector_store %arg44[%c0_124, %c0_125], %115 {strides = array<i32>} : memref<8x128xf32, #tpu.memory_space<vmem>>, vector<8x128xf32>,
    } else {
    }
    return
  }
  func.func @transform_0(%arg0: i32, %arg1: i32, %arg2: memref<128xi32, #tpu.memory_space<smem>>, %arg3: memref<128xi32, #tpu.memory_space<smem>>) -> (i32, i32, i32) {
    %c8_i32 = arith.constant 8 : i32
    %0 = arith.muli %arg0, %c8_i32 : i32
    %1 = arith.addi %0, %arg1 : i32
    %c16_i32 = arith.constant 16 : i32
    %2 = arith.muli %1, %c16_i32 : i32
    %c0_i32 = arith.constant 0 : i32
    %3 = arith.addi %2, %c0_i32 : i32
    %4 = arith.index_cast %3 : i32 to index
    %5 = memref.load %arg2[%4] : memref<128xi32, #tpu.memory_space<smem>>
    %c0_i32_0 = arith.constant 0 : i32
    %c0_i32_1 = arith.constant 0 : i32
    %c0_i32_2 = arith.constant 0 : i32
    return %5, %c0_i32_0, %c0_i32_1 : i32, i32, i32
  }
  func.func @transform_1(%arg0: i32, %arg1: i32, %arg2: memref<128xi32, #tpu.memory_space<smem>>, %arg3: memref<128xi32, #tpu.memory_space<smem>>) -> (i32, i32, i32) {
    %c8_i32 = arith.constant 8 : i32
    %0 = arith.muli %arg0, %c8_i32 : i32
    %1 = arith.addi %0, %arg1 : i32
    %c16_i32 = arith.constant 16 : i32
    %2 = arith.muli %1, %c16_i32 : i32
    %c1_i32 = arith.constant 1 : i32
    %3 = arith.addi %2, %c1_i32 : i32
    %4 = arith.index_cast %3 : i32 to index
    %5 = memref.load %arg2[%4] : memref<128xi32, #tpu.memory_space<smem>>
    %c0_i32 = arith.constant 0 : i32
    %c0_i32_0 = arith.constant 0 : i32
    %c0_i32_1 = arith.constant 0 : i32
    return %5, %c0_i32, %c0_i32_0 : i32, i32, i32
  }
  func.func @transform_2(%arg0: i32, %arg1: i32, %arg2: memref<128xi32, #tpu.memory_space<smem>>, %arg3: memref<128xi32, #tpu.memory_space<smem>>) -> (i32, i32, i32) {
    %c8_i32 = arith.constant 8 : i32
    %0 = arith.muli %arg0, %c8_i32 : i32
    %1 = arith.addi %0, %arg1 : i32
    %c16_i32 = arith.constant 16 : i32
    %2 = arith.muli %1, %c16_i32 : i32
    %c2_i32 = arith.constant 2 : i32
    %3 = arith.addi %2, %c2_i32 : i32
    %4 = arith.index_cast %3 : i32 to index
    %5 = memref.load %arg2[%4] : memref<128xi32, #tpu.memory_space<smem>>
    %c0_i32 = arith.constant 0 : i32
    %c0_i32_0 = arith.constant 0 : i32
    %c0_i32_1 = arith.constant 0 : i32
    return %5, %c0_i32, %c0_i32_0 : i32, i32, i32
  }
  func.func @transform_3(%arg0: i32, %arg1: i32, %arg2: memref<128xi32, #tpu.memory_space<smem>>, %arg3: memref<128xi32, #tpu.memory_space<smem>>) -> (i32, i32, i32) {
    %c8_i32 = arith.constant 8 : i32
    %0 = arith.muli %arg0, %c8_i32 : i32
    %1 = arith.addi %0, %arg1 : i32
    %c16_i32 = arith.constant 16 : i32
    %2 = arith.muli %1, %c16_i32 : i32
    %c3_i32 = arith.constant 3 : i32
    %3 = arith.addi %2, %c3_i32 : i32
    %4 = arith.index_cast %3 : i32 to index
    %5 = memref.load %arg2[%4] : memref<128xi32, #tpu.memory_space<smem>>
    %c0_i32 = arith.constant 0 : i32
    %c0_i32_0 = arith.constant 0 : i32
    %c0_i32_1 = arith.constant 0 : i32
    return %5, %c0_i32, %c0_i32_0 : i32, i32, i32
  }
  func.func @transform_4(%arg0: i32, %arg1: i32, %arg2: memref<128xi32, #tpu.memory_space<smem>>, %arg3: memref<128xi32, #tpu.memory_space<smem>>) -> (i32, i32, i32) {
    %c8_i32 = arith.constant 8 : i32
    %0 = arith.muli %arg0, %c8_i32 : i32
    %1 = arith.addi %0, %arg1 : i32
    %c16_i32 = arith.constant 16 : i32
    %2 = arith.muli %1, %c16_i32 : i32
    %c4_i32 = arith.constant 4 : i32
    %3 = arith.addi %2, %c4_i32 : i32
    %4 = arith.index_cast %3 : i32 to index
    %5 = memref.load %arg2[%4] : memref<128xi32, #tpu.memory_space<smem>>
    %c0_i32 = arith.constant 0 : i32
    %c0_i32_0 = arith.constant 0 : i32
    %c0_i32_1 = arith.constant 0 : i32
    return %5, %c0_i32, %c0_i32_0 : i32, i32, i32
  }
  func.func @transform_5(%arg0: i32, %arg1: i32, %arg2: memref<128xi32, #tpu.memory_space<smem>>, %arg3: memref<128xi32, #tpu.memory_space<smem>>) -> (i32, i32, i32) {
    %c8_i32 = arith.constant 8 : i32
    %0 = arith.muli %arg0, %c8_i32 : i32
    %1 = arith.addi %0, %arg1 : i32
    %c16_i32 = arith.constant 16 : i32
    %2 = arith.muli %1, %c16_i32 : i32
    %c5_i32 = arith.constant 5 : i32
    %3 = arith.addi %2, %c5_i32 : i32
    %4 = arith.index_cast %3 : i32 to index
    %5 = memref.load %arg2[%4] : memref<128xi32, #tpu.memory_space<smem>>
    %c0_i32 = arith.constant 0 : i32
    %c0_i32_0 = arith.constant 0 : i32
    %c0_i32_1 = arith.constant 0 : i32
    return %5, %c0_i32, %c0_i32_0 : i32, i32, i32
  }
  func.func @transform_6(%arg0: i32, %arg1: i32, %arg2: memref<128xi32, #tpu.memory_space<smem>>, %arg3: memref<128xi32, #tpu.memory_space<smem>>) -> (i32, i32, i32) {
    %c8_i32 = arith.constant 8 : i32
    %0 = arith.muli %arg0, %c8_i32 : i32
    %1 = arith.addi %0, %arg1 : i32
    %c16_i32 = arith.constant 16 : i32
    %2 = arith.muli %1, %c16_i32 : i32
    %c6_i32 = arith.constant 6 : i32
    %3 = arith.addi %2, %c6_i32 : i32
    %4 = arith.index_cast %3 : i32 to index
    %5 = memref.load %arg2[%4] : memref<128xi32, #tpu.memory_space<smem>>
    %c0_i32 = arith.constant 0 : i32
    %c0_i32_0 = arith.constant 0 : i32
    %c0_i32_1 = arith.constant 0 : i32
    return %5, %c0_i32, %c0_i32_0 : i32, i32, i32
  }
  func.func @transform_7(%arg0: i32, %arg1: i32, %arg2: memref<128xi32, #tpu.memory_space<smem>>, %arg3: memref<128xi32, #tpu.memory_space<smem>>) -> (i32, i32, i32) {
    %c8_i32 = arith.constant 8 : i32
    %0 = arith.muli %arg0, %c8_i32 : i32
    %1 = arith.addi %0, %arg1 : i32
    %c16_i32 = arith.constant 16 : i32
    %2 = arith.muli %1, %c16_i32 : i32
    %c7_i32 = arith.constant 7 : i32
    %3 = arith.addi %2, %c7_i32 : i32
    %4 = arith.index_cast %3 : i32 to index
    %5 = memref.load %arg2[%4] : memref<128xi32, #tpu.memory_space<smem>>
    %c0_i32 = arith.constant 0 : i32
    %c0_i32_0 = arith.constant 0 : i32
    %c0_i32_1 = arith.constant 0 : i32
    return %5, %c0_i32, %c0_i32_0 : i32, i32, i32
  }
  func.func @transform_8(%arg0: i32, %arg1: i32, %arg2: memref<128xi32, #tpu.memory_space<smem>>, %arg3: memref<128xi32, #tpu.memory_space<smem>>) -> (i32, i32, i32) {
    %c8_i32 = arith.constant 8 : i32
    %0 = arith.muli %arg0, %c8_i32 : i32
    %1 = arith.addi %0, %arg1 : i32
    %c16_i32 = arith.constant 16 : i32
    %2 = arith.muli %1, %c16_i32 : i32
    %c8_i32_0 = arith.constant 8 : i32
    %3 = arith.addi %2, %c8_i32_0 : i32
    %4 = arith.index_cast %3 : i32 to index
    %5 = memref.load %arg2[%4] : memref<128xi32, #tpu.memory_space<smem>>
    %c0_i32 = arith.constant 0 : i32
    %c0_i32_1 = arith.constant 0 : i32
    %c0_i32_2 = arith.constant 0 : i32
    return %5, %c0_i32, %c0_i32_1 : i32, i32, i32
  }
  func.func @transform_9(%arg0: i32, %arg1: i32, %arg2: memref<128xi32, #tpu.memory_space<smem>>, %arg3: memref<128xi32, #tpu.memory_space<smem>>) -> (i32, i32, i32) {
    %c8_i32 = arith.constant 8 : i32
    %0 = arith.muli %arg0, %c8_i32 : i32
    %1 = arith.addi %0, %arg1 : i32
    %c16_i32 = arith.constant 16 : i32
    %2 = arith.muli %1, %c16_i32 : i32
    %c9_i32 = arith.constant 9 : i32
    %3 = arith.addi %2, %c9_i32 : i32
    %4 = arith.index_cast %3 : i32 to index
    %5 = memref.load %arg2[%4] : memref<128xi32, #tpu.memory_space<smem>>
    %c0_i32 = arith.constant 0 : i32
    %c0_i32_0 = arith.constant 0 : i32
    %c0_i32_1 = arith.constant 0 : i32
    return %5, %c0_i32, %c0_i32_0 : i32, i32, i32
  }
  func.func @transform_10(%arg0: i32, %arg1: i32, %arg2: memref<128xi32, #tpu.memory_space<smem>>, %arg3: memref<128xi32, #tpu.memory_space<smem>>) -> (i32, i32, i32) {
    %c8_i32 = arith.constant 8 : i32
    %0 = arith.muli %arg0, %c8_i32 : i32
    %1 = arith.addi %0, %arg1 : i32
    %c16_i32 = arith.constant 16 : i32
    %2 = arith.muli %1, %c16_i32 : i32
    %c10_i32 = arith.constant 10 : i32
    %3 = arith.addi %2, %c10_i32 : i32
    %4 = arith.index_cast %3 : i32 to index
    %5 = memref.load %arg2[%4] : memref<128xi32, #tpu.memory_space<smem>>
    %c0_i32 = arith.constant 0 : i32
    %c0_i32_0 = arith.constant 0 : i32
    %c0_i32_1 = arith.constant 0 : i32
    return %5, %c0_i32, %c0_i32_0 : i32, i32, i32
  }
  func.func @transform_11(%arg0: i32, %arg1: i32, %arg2: memref<128xi32, #tpu.memory_space<smem>>, %arg3: memref<128xi32, #tpu.memory_space<smem>>) -> (i32, i32, i32) {
    %c8_i32 = arith.constant 8 : i32
    %0 = arith.muli %arg0, %c8_i32 : i32
    %1 = arith.addi %0, %arg1 : i32
    %c16_i32 = arith.constant 16 : i32
    %2 = arith.muli %1, %c16_i32 : i32
    %c11_i32 = arith.constant 11 : i32
    %3 = arith.addi %2, %c11_i32 : i32
    %4 = arith.index_cast %3 : i32 to index
    %5 = memref.load %arg2[%4] : memref<128xi32, #tpu.memory_space<smem>>
    %c0_i32 = arith.constant 0 : i32
    %c0_i32_0 = arith.constant 0 : i32
    %c0_i32_1 = arith.constant 0 : i32
    return %5, %c0_i32, %c0_i32_0 : i32, i32, i32
  }
  func.func @transform_12(%arg0: i32, %arg1: i32, %arg2: memref<128xi32, #tpu.memory_space<smem>>, %arg3: memref<128xi32, #tpu.memory_space<smem>>) -> (i32, i32, i32) {
    %c8_i32 = arith.constant 8 : i32
    %0 = arith.muli %arg0, %c8_i32 : i32
    %1 = arith.addi %0, %arg1 : i32
    %c16_i32 = arith.constant 16 : i32
    %2 = arith.muli %1, %c16_i32 : i32
    %c12_i32 = arith.constant 12 : i32
    %3 = arith.addi %2, %c12_i32 : i32
    %4 = arith.index_cast %3 : i32 to index
    %5 = memref.load %arg2[%4] : memref<128xi32, #tpu.memory_space<smem>>
    %c0_i32 = arith.constant 0 : i32
    %c0_i32_0 = arith.constant 0 : i32
    %c0_i32_1 = arith.constant 0 : i32
    return %5, %c0_i32, %c0_i32_0 : i32, i32, i32
  }
  func.func @transform_13(%arg0: i32, %arg1: i32, %arg2: memref<128xi32, #tpu.memory_space<smem>>, %arg3: memref<128xi32, #tpu.memory_space<smem>>) -> (i32, i32, i32) {
    %c8_i32 = arith.constant 8 : i32
    %0 = arith.muli %arg0, %c8_i32 : i32
    %1 = arith.addi %0, %arg1 : i32
    %c16_i32 = arith.constant 16 : i32
    %2 = arith.muli %1, %c16_i32 : i32
    %c13_i32 = arith.constant 13 : i32
    %3 = arith.addi %2, %c13_i32 : i32
    %4 = arith.index_cast %3 : i32 to index
    %5 = memref.load %arg2[%4] : memref<128xi32, #tpu.memory_space<smem>>
    %c0_i32 = arith.constant 0 : i32
    %c0_i32_0 = arith.constant 0 : i32
    %c0_i32_1 = arith.constant 0 : i32
    return %5, %c0_i32, %c0_i32_0 : i32, i32, i32
  }
  func.func @transform_14(%arg0: i32, %arg1: i32, %arg2: memref<128xi32, #tpu.memory_space<smem>>, %arg3: memref<128xi32, #tpu.memory_space<smem>>) -> (i32, i32, i32) {
    %c8_i32 = arith.constant 8 : i32
    %0 = arith.muli %arg0, %c8_i32 : i32
    %1 = arith.addi %0, %arg1 : i32
    %c16_i32 = arith.constant 16 : i32
    %2 = arith.muli %1, %c16_i32 : i32
    %c14_i32 = arith.constant 14 : i32
    %3 = arith.addi %2, %c14_i32 : i32
    %4 = arith.index_cast %3 : i32 to index
    %5 = memref.load %arg2[%4] : memref<128xi32, #tpu.memory_space<smem>>
    %c0_i32 = arith.constant 0 : i32
    %c0_i32_0 = arith.constant 0 : i32
    %c0_i32_1 = arith.constant 0 : i32
    return %5, %c0_i32, %c0_i32_0 : i32, i32, i32
  }
  func.func @transform_15(%arg0: i32, %arg1: i32, %arg2: memref<128xi32, #tpu.memory_space<smem>>, %arg3: memref<128xi32, #tpu.memory_space<smem>>) -> (i32, i32, i32) {
    %c8_i32 = arith.constant 8 : i32
    %0 = arith.muli %arg0, %c8_i32 : i32
    %1 = arith.addi %0, %arg1 : i32
    %c16_i32 = arith.constant 16 : i32
    %2 = arith.muli %1, %c16_i32 : i32
    %c15_i32 = arith.constant 15 : i32
    %3 = arith.addi %2, %c15_i32 : i32
    %4 = arith.index_cast %3 : i32 to index
    %5 = memref.load %arg2[%4] : memref<128xi32, #tpu.memory_space<smem>>
    %c0_i32 = arith.constant 0 : i32
    %c0_i32_0 = arith.constant 0 : i32
    %c0_i32_1 = arith.constant 0 : i32
    return %5, %c0_i32, %c0_i32_0 : i32, i32, i32
  }
  func.func @transform_16(%arg0: i32, %arg1: i32, %arg2: memref<128xi32, #tpu.memory_space<smem>>, %arg3: memref<128xi32, #tpu.memory_space<smem>>) -> (i32, i32, i32) {
    %c8_i32 = arith.constant 8 : i32
    %0 = arith.muli %arg0, %c8_i32 : i32
    %1 = arith.addi %0, %arg1 : i32
    %c16_i32 = arith.constant 16 : i32
    %2 = arith.muli %1, %c16_i32 : i32
    %c0_i32 = arith.constant 0 : i32
    %3 = arith.addi %2, %c0_i32 : i32
    %4 = arith.index_cast %3 : i32 to index
    %5 = memref.load %arg3[%4] : memref<128xi32, #tpu.memory_space<smem>>
    %c0_i32_0 = arith.constant 0 : i32
    %c0_i32_1 = arith.constant 0 : i32
    %c0_i32_2 = arith.constant 0 : i32
    return %5, %c0_i32_0, %c0_i32_1 : i32, i32, i32
  }
  func.func @transform_17(%arg0: i32, %arg1: i32, %arg2: memref<128xi32, #tpu.memory_space<smem>>, %arg3: memref<128xi32, #tpu.memory_space<smem>>) -> (i32, i32, i32) {
    %c8_i32 = arith.constant 8 : i32
    %0 = arith.muli %arg0, %c8_i32 : i32
    %1 = arith.addi %0, %arg1 : i32
    %c16_i32 = arith.constant 16 : i32
    %2 = arith.muli %1, %c16_i32 : i32
    %c1_i32 = arith.constant 1 : i32
    %3 = arith.addi %2, %c1_i32 : i32
    %4 = arith.index_cast %3 : i32 to index
    %5 = memref.load %arg3[%4] : memref<128xi32, #tpu.memory_space<smem>>
    %c0_i32 = arith.constant 0 : i32
    %c0_i32_0 = arith.constant 0 : i32
    %c0_i32_1 = arith.constant 0 : i32
    return %5, %c0_i32, %c0_i32_0 : i32, i32, i32
  }
  func.func @transform_18(%arg0: i32, %arg1: i32, %arg2: memref<128xi32, #tpu.memory_space<smem>>, %arg3: memref<128xi32, #tpu.memory_space<smem>>) -> (i32, i32, i32) {
    %c8_i32 = arith.constant 8 : i32
    %0 = arith.muli %arg0, %c8_i32 : i32
    %1 = arith.addi %0, %arg1 : i32
    %c16_i32 = arith.constant 16 : i32
    %2 = arith.muli %1, %c16_i32 : i32
    %c2_i32 = arith.constant 2 : i32
    %3 = arith.addi %2, %c2_i32 : i32
    %4 = arith.index_cast %3 : i32 to index
    %5 = memref.load %arg3[%4] : memref<128xi32, #tpu.memory_space<smem>>
    %c0_i32 = arith.constant 0 : i32
    %c0_i32_0 = arith.constant 0 : i32
    %c0_i32_1 = arith.constant 0 : i32
    return %5, %c0_i32, %c0_i32_0 : i32, i32, i32
  }
  func.func @transform_19(%arg0: i32, %arg1: i32, %arg2: memref<128xi32, #tpu.memory_space<smem>>, %arg3: memref<128xi32, #tpu.memory_space<smem>>) -> (i32, i32, i32) {
    %c8_i32 = arith.constant 8 : i32
    %0 = arith.muli %arg0, %c8_i32 : i32
    %1 = arith.addi %0, %arg1 : i32
    %c16_i32 = arith.constant 16 : i32
    %2 = arith.muli %1, %c16_i32 : i32
    %c3_i32 = arith.constant 3 : i32
    %3 = arith.addi %2, %c3_i32 : i32
    %4 = arith.index_cast %3 : i32 to index
    %5 = memref.load %arg3[%4] : memref<128xi32, #tpu.memory_space<smem>>
    %c0_i32 = arith.constant 0 : i32
    %c0_i32_0 = arith.constant 0 : i32
    %c0_i32_1 = arith.constant 0 : i32
    return %5, %c0_i32, %c0_i32_0 : i32, i32, i32
  }
  func.func @transform_20(%arg0: i32, %arg1: i32, %arg2: memref<128xi32, #tpu.memory_space<smem>>, %arg3: memref<128xi32, #tpu.memory_space<smem>>) -> (i32, i32, i32) {
    %c8_i32 = arith.constant 8 : i32
    %0 = arith.muli %arg0, %c8_i32 : i32
    %1 = arith.addi %0, %arg1 : i32
    %c16_i32 = arith.constant 16 : i32
    %2 = arith.muli %1, %c16_i32 : i32
    %c4_i32 = arith.constant 4 : i32
    %3 = arith.addi %2, %c4_i32 : i32
    %4 = arith.index_cast %3 : i32 to index
    %5 = memref.load %arg3[%4] : memref<128xi32, #tpu.memory_space<smem>>
    %c0_i32 = arith.constant 0 : i32
    %c0_i32_0 = arith.constant 0 : i32
    %c0_i32_1 = arith.constant 0 : i32
    return %5, %c0_i32, %c0_i32_0 : i32, i32, i32
  }
  func.func @transform_21(%arg0: i32, %arg1: i32, %arg2: memref<128xi32, #tpu.memory_space<smem>>, %arg3: memref<128xi32, #tpu.memory_space<smem>>) -> (i32, i32, i32) {
    %c8_i32 = arith.constant 8 : i32
    %0 = arith.muli %arg0, %c8_i32 : i32
    %1 = arith.addi %0, %arg1 : i32
    %c16_i32 = arith.constant 16 : i32
    %2 = arith.muli %1, %c16_i32 : i32
    %c5_i32 = arith.constant 5 : i32
    %3 = arith.addi %2, %c5_i32 : i32
    %4 = arith.index_cast %3 : i32 to index
    %5 = memref.load %arg3[%4] : memref<128xi32, #tpu.memory_space<smem>>
    %c0_i32 = arith.constant 0 : i32
    %c0_i32_0 = arith.constant 0 : i32
    %c0_i32_1 = arith.constant 0 : i32
    return %5, %c0_i32, %c0_i32_0 : i32, i32, i32
  }
  func.func @transform_22(%arg0: i32, %arg1: i32, %arg2: memref<128xi32, #tpu.memory_space<smem>>, %arg3: memref<128xi32, #tpu.memory_space<smem>>) -> (i32, i32, i32) {
    %c8_i32 = arith.constant 8 : i32
    %0 = arith.muli %arg0, %c8_i32 : i32
    %1 = arith.addi %0, %arg1 : i32
    %c16_i32 = arith.constant 16 : i32
    %2 = arith.muli %1, %c16_i32 : i32
    %c6_i32 = arith.constant 6 : i32
    %3 = arith.addi %2, %c6_i32 : i32
    %4 = arith.index_cast %3 : i32 to index
    %5 = memref.load %arg3[%4] : memref<128xi32, #tpu.memory_space<smem>>
    %c0_i32 = arith.constant 0 : i32
    %c0_i32_0 = arith.constant 0 : i32
    %c0_i32_1 = arith.constant 0 : i32
    return %5, %c0_i32, %c0_i32_0 : i32, i32, i32
  }
  func.func @transform_23(%arg0: i32, %arg1: i32, %arg2: memref<128xi32, #tpu.memory_space<smem>>, %arg3: memref<128xi32, #tpu.memory_space<smem>>) -> (i32, i32, i32) {
    %c8_i32 = arith.constant 8 : i32
    %0 = arith.muli %arg0, %c8_i32 : i32
    %1 = arith.addi %0, %arg1 : i32
    %c16_i32 = arith.constant 16 : i32
    %2 = arith.muli %1, %c16_i32 : i32
    %c7_i32 = arith.constant 7 : i32
    %3 = arith.addi %2, %c7_i32 : i32
    %4 = arith.index_cast %3 : i32 to index
    %5 = memref.load %arg3[%4] : memref<128xi32, #tpu.memory_space<smem>>
    %c0_i32 = arith.constant 0 : i32
    %c0_i32_0 = arith.constant 0 : i32
    %c0_i32_1 = arith.constant 0 : i32
    return %5, %c0_i32, %c0_i32_0 : i32, i32, i32
  }
  func.func @transform_24(%arg0: i32, %arg1: i32, %arg2: memref<128xi32, #tpu.memory_space<smem>>, %arg3: memref<128xi32, #tpu.memory_space<smem>>) -> (i32, i32, i32) {
    %c8_i32 = arith.constant 8 : i32
    %0 = arith.muli %arg0, %c8_i32 : i32
    %1 = arith.addi %0, %arg1 : i32
    %c16_i32 = arith.constant 16 : i32
    %2 = arith.muli %1, %c16_i32 : i32
    %c8_i32_0 = arith.constant 8 : i32
    %3 = arith.addi %2, %c8_i32_0 : i32
    %4 = arith.index_cast %3 : i32 to index
    %5 = memref.load %arg3[%4] : memref<128xi32, #tpu.memory_space<smem>>
    %c0_i32 = arith.constant 0 : i32
    %c0_i32_1 = arith.constant 0 : i32
    %c0_i32_2 = arith.constant 0 : i32
    return %5, %c0_i32, %c0_i32_1 : i32, i32, i32
  }
  func.func @transform_25(%arg0: i32, %arg1: i32, %arg2: memref<128xi32, #tpu.memory_space<smem>>, %arg3: memref<128xi32, #tpu.memory_space<smem>>) -> (i32, i32, i32) {
    %c8_i32 = arith.constant 8 : i32
    %0 = arith.muli %arg0, %c8_i32 : i32
    %1 = arith.addi %0, %arg1 : i32
    %c16_i32 = arith.constant 16 : i32
    %2 = arith.muli %1, %c16_i32 : i32
    %c9_i32 = arith.constant 9 : i32
    %3 = arith.addi %2, %c9_i32 : i32
    %4 = arith.index_cast %3 : i32 to index
    %5 = memref.load %arg3[%4] : memref<128xi32, #tpu.memory_space<smem>>
    %c0_i32 = arith.constant 0 : i32
    %c0_i32_0 = arith.constant 0 : i32
    %c0_i32_1 = arith.constant 0 : i32
    return %5, %c0_i32, %c0_i32_0 : i32, i32, i32
  }
  func.func @transform_26(%arg0: i32, %arg1: i32, %arg2: memref<128xi32, #tpu.memory_space<smem>>, %arg3: memref<128xi32, #tpu.memory_space<smem>>) -> (i32, i32, i32) {
    %c8_i32 = arith.constant 8 : i32
    %0 = arith.muli %arg0, %c8_i32 : i32
    %1 = arith.addi %0, %arg1 : i32
    %c16_i32 = arith.constant 16 : i32
    %2 = arith.muli %1, %c16_i32 : i32
    %c10_i32 = arith.constant 10 : i32
    %3 = arith.addi %2, %c10_i32 : i32
    %4 = arith.index_cast %3 : i32 to index
    %5 = memref.load %arg3[%4] : memref<128xi32, #tpu.memory_space<smem>>
    %c0_i32 = arith.constant 0 : i32
    %c0_i32_0 = arith.constant 0 : i32
    %c0_i32_1 = arith.constant 0 : i32
    return %5, %c0_i32, %c0_i32_0 : i32, i32, i32
  }
  func.func @transform_27(%arg0: i32, %arg1: i32, %arg2: memref<128xi32, #tpu.memory_space<smem>>, %arg3: memref<128xi32, #tpu.memory_space<smem>>) -> (i32, i32, i32) {
    %c8_i32 = arith.constant 8 : i32
    %0 = arith.muli %arg0, %c8_i32 : i32
    %1 = arith.addi %0, %arg1 : i32
    %c16_i32 = arith.constant 16 : i32
    %2 = arith.muli %1, %c16_i32 : i32
    %c11_i32 = arith.constant 11 : i32
    %3 = arith.addi %2, %c11_i32 : i32
    %4 = arith.index_cast %3 : i32 to index
    %5 = memref.load %arg3[%4] : memref<128xi32, #tpu.memory_space<smem>>
    %c0_i32 = arith.constant 0 : i32
    %c0_i32_0 = arith.constant 0 : i32
    %c0_i32_1 = arith.constant 0 : i32
    return %5, %c0_i32, %c0_i32_0 : i32, i32, i32
  }
  func.func @transform_28(%arg0: i32, %arg1: i32, %arg2: memref<128xi32, #tpu.memory_space<smem>>, %arg3: memref<128xi32, #tpu.memory_space<smem>>) -> (i32, i32, i32) {
    %c8_i32 = arith.constant 8 : i32
    %0 = arith.muli %arg0, %c8_i32 : i32
    %1 = arith.addi %0, %arg1 : i32
    %c16_i32 = arith.constant 16 : i32
    %2 = arith.muli %1, %c16_i32 : i32
    %c12_i32 = arith.constant 12 : i32
    %3 = arith.addi %2, %c12_i32 : i32
    %4 = arith.index_cast %3 : i32 to index
    %5 = memref.load %arg3[%4] : memref<128xi32, #tpu.memory_space<smem>>
    %c0_i32 = arith.constant 0 : i32
    %c0_i32_0 = arith.constant 0 : i32
    %c0_i32_1 = arith.constant 0 : i32
    return %5, %c0_i32, %c0_i32_0 : i32, i32, i32
  }
  func.func @transform_29(%arg0: i32, %arg1: i32, %arg2: memref<128xi32, #tpu.memory_space<smem>>, %arg3: memref<128xi32, #tpu.memory_space<smem>>) -> (i32, i32, i32) {
    %c8_i32 = arith.constant 8 : i32
    %0 = arith.muli %arg0, %c8_i32 : i32
    %1 = arith.addi %0, %arg1 : i32
    %c16_i32 = arith.constant 16 : i32
    %2 = arith.muli %1, %c16_i32 : i32
    %c13_i32 = arith.constant 13 : i32
    %3 = arith.addi %2, %c13_i32 : i32
    %4 = arith.index_cast %3 : i32 to index
    %5 = memref.load %arg3[%4] : memref<128xi32, #tpu.memory_space<smem>>
    %c0_i32 = arith.constant 0 : i32
    %c0_i32_0 = arith.constant 0 : i32
    %c0_i32_1 = arith.constant 0 : i32
    return %5, %c0_i32, %c0_i32_0 : i32, i32, i32
  }
  func.func @transform_30(%arg0: i32, %arg1: i32, %arg2: memref<128xi32, #tpu.memory_space<smem>>, %arg3: memref<128xi32, #tpu.memory_space<smem>>) -> (i32, i32, i32) {
    %c8_i32 = arith.constant 8 : i32
    %0 = arith.muli %arg0, %c8_i32 : i32
    %1 = arith.addi %0, %arg1 : i32
    %c16_i32 = arith.constant 16 : i32
    %2 = arith.muli %1, %c16_i32 : i32
    %c14_i32 = arith.constant 14 : i32
    %3 = arith.addi %2, %c14_i32 : i32
    %4 = arith.index_cast %3 : i32 to index
    %5 = memref.load %arg3[%4] : memref<128xi32, #tpu.memory_space<smem>>
    %c0_i32 = arith.constant 0 : i32
    %c0_i32_0 = arith.constant 0 : i32
    %c0_i32_1 = arith.constant 0 : i32
    return %5, %c0_i32, %c0_i32_0 : i32, i32, i32
  }
  func.func @transform_31(%arg0: i32, %arg1: i32, %arg2: memref<128xi32, #tpu.memory_space<smem>>, %arg3: memref<128xi32, #tpu.memory_space<smem>>) -> (i32, i32, i32) {
    %c8_i32 = arith.constant 8 : i32
    %0 = arith.muli %arg0, %c8_i32 : i32
    %1 = arith.addi %0, %arg1 : i32
    %c16_i32 = arith.constant 16 : i32
    %2 = arith.muli %1, %c16_i32 : i32
    %c15_i32 = arith.constant 15 : i32
    %3 = arith.addi %2, %c15_i32 : i32
    %4 = arith.index_cast %3 : i32 to index
    %5 = memref.load %arg3[%4] : memref<128xi32, #tpu.memory_space<smem>>
    %c0_i32 = arith.constant 0 : i32
    %c0_i32_0 = arith.constant 0 : i32
    %c0_i32_1 = arith.constant 0 : i32
    return %5, %c0_i32, %c0_i32_0 : i32, i32, i32
  }
  func.func @transform_32(%arg0: i32, %arg1: i32, %arg2: memref<128xi32, #tpu.memory_space<smem>>, %arg3: memref<128xi32, #tpu.memory_space<smem>>) -> (i32, i32) {
    %c0_i32 = arith.constant 0 : i32
    %c0_i32_0 = arith.constant 0 : i32
    %c0_i32_1 = arith.constant 0 : i32
    return %c0_i32, %c0_i32_0 : i32, i32
  }
  func.func @transform_33(%arg0: i32, %arg1: i32, %arg2: memref<128xi32, #tpu.memory_space<smem>>, %arg3: memref<128xi32, #tpu.memory_space<smem>>) -> (i32, i32) {
    %c0_i32 = arith.constant 0 : i32
    %c0_i32_0 = arith.constant 0 : i32
    %c0_i32_1 = arith.constant 0 : i32
    return %c0_i32, %c0_i32_0 : i32, i32
  }
  func.func @transform_34(%arg0: i32, %arg1: i32, %arg2: memref<128xi32, #tpu.memory_space<smem>>, %arg3: memref<128xi32, #tpu.memory_space<smem>>) -> (i32, i32) {
    %c0_i32 = arith.constant 0 : i32
    %c0_i32_0 = arith.constant 0 : i32
    %c0_i32_1 = arith.constant 0 : i32
    return %c0_i32, %c0_i32_0 : i32, i32
  }
  func.func @transform_35(%arg0: i32, %arg1: i32, %arg2: memref<128xi32, #tpu.memory_space<smem>>, %arg3: memref<128xi32, #tpu.memory_space<smem>>) -> (i32, i32) {
    %c0_i32 = arith.constant 0 : i32
    %c0_i32_0 = arith.constant 0 : i32
    %c0_i32_1 = arith.constant 0 : i32
    return %c0_i32, %c0_i32_0 : i32, i32
  }
  func.func @transform_36(%arg0: i32, %arg1: i32, %arg2: memref<128xi32, #tpu.memory_space<smem>>, %arg3: memref<128xi32, #tpu.memory_space<smem>>) -> (i32, i32) {
    %c0_i32 = arith.constant 0 : i32
    %c0_i32_0 = arith.constant 0 : i32
    %c0_i32_1 = arith.constant 0 : i32
    return %c0_i32, %c0_i32_0 : i32, i32
  }
  func.func @transform_37(%arg0: i32, %arg1: i32, %arg2: memref<128xi32, #tpu.memory_space<smem>>, %arg3: memref<128xi32, #tpu.memory_space<smem>>) -> (i32, i32) {
    %c0_i32 = arith.constant 0 : i32
    %c0_i32_0 = arith.constant 0 : i32
    %c0_i32_1 = arith.constant 0 : i32
    return %c0_i32, %c0_i32_0 : i32, i32
  }
  func.func @transform_38(%arg0: i32, %arg1: i32, %arg2: memref<128xi32, #tpu.memory_space<smem>>, %arg3: memref<128xi32, #tpu.memory_space<smem>>) -> (i32, i32) {
    %c0_i32 = arith.constant 0 : i32
    %c0_i32_0 = arith.constant 0 : i32
    %c0_i32_1 = arith.constant 0 : i32
    return %c0_i32, %c0_i32_0 : i32, i32
  }
  func.func @transform_39(%arg0: i32, %arg1: i32, %arg2: memref<128xi32, #tpu.memory_space<smem>>, %arg3: memref<128xi32, #tpu.memory_space<smem>>) -> (i32, i32) {
    %c0_i32 = arith.constant 0 : i32
    %c0_i32_0 = arith.constant 0 : i32
    %c0_i32_1 = arith.constant 0 : i32
    return %c0_i32, %c0_i32_0 : i32, i32
  }
  func.func @transform_40(%arg0: i32, %arg1: i32, %arg2: memref<128xi32, #tpu.memory_space<smem>>, %arg3: memref<128xi32, #tpu.memory_space<smem>>) -> (i32, i32) {
    %c0_i32 = arith.constant 0 : i32
    %c0_i32_0 = arith.constant 0 : i32
    return %arg0, %c0_i32 : i32, i32
  }
}

</mosaic_0001>

<bundles_post_ra>
// kernel: model_forward_pallas.1
= control target key start
LH: loop header
LB: loop body
LE: loop exit
PB: predicated region body
PF: predicated region fallthrough
CT: control target
= control target key end

     0   :  { %s8171_s6 = smov 2   ;;  %s8172_s10 = smov 3   ;;  %s11684_s0 = inlined_call_operand.smem [shape: u32[43], index: -1, kind: input, shape index: {}] }
   0x1   :  { %s8267_s5 = sld [smem:[%s11684_s0]]   ;;  %s8173_s14 = smov 4  }
   0x2   :  { %s8272_s9 = sld [smem:[%s11684_s0 + %s8171_s6]]   ;;  %s8174_s18 = smov 5  }
   0x3   :  { %s8277_s13 = sld [smem:[%s11684_s0 + %s8172_s10]]   ;;  %s8175_s22 = smov 6  }
   0x4   :  { %s8282_s17 = sld [smem:[%s11684_s0 + %s8173_s14]]   ;;  %s8176_s26 = smov 7  }
   0x5   :  { %s8287_s21 = sld [smem:[%s11684_s0 + %s8174_s18]]   ;;  %s8177_s30 = smov 8  }
   0x6   :  { %s8292_s25 = sld [smem:[%s11684_s0 + %s8175_s22]]   ;;  %s8178_s4 = smov 9  }
   0x7   :  { %s8297_s29 = sld [smem:[%s11684_s0 + %s8176_s26]]   ;;  %s8179_s10 = smov 10  }
   0x8   :  { %12098 = sst [smem:[#allocation134_spill]] %s8272_s9  ;;  %s8180_s15 = smov 11  }
   0x9   :  { %12099 = sst [smem:[#allocation135_spill]] %s8277_s13  ;;  %s8181_s20 = smov 12  }
   0xa   :  { %12100 = sst [smem:[#allocation136_spill]] %s8282_s17  ;;  %s8182_s26 = smov 13  }
   0xb   :  { %12101 = sst [smem:[#allocation137_spill]] %s8287_s21  ;;  %s8183_s1 = smov 14  }
   0xc   :  { %12102 = sst [smem:[#allocation138_spill]] %s8292_s25  ;;  %s8184_s7 = smov 15  }
   0xd   :  { %12103 = sst [smem:[#allocation139_spill]] %s8297_s29  ;;  %s8186_s22 = smov 17  }
   0xe   :  { %s8302_s3 = sld [smem:[%s11684_s0 + %s8177_s30]]   ;;  %s8187_s28 = smov 18  }
   0xf   :  { %s8307_s8 = sld [smem:[%s11684_s0 + %s8178_s4]]  }
  0x10   :  { %s8312_s14 = sld [smem:[%s11684_s0 + %s8179_s10]]  }
  0x11   :  { %s8317_s19 = sld [smem:[%s11684_s0 + %s8180_s15]]   ;;  %s8185_s15 = smov 16  }
  0x12   :  { %s8322_s24 = sld [smem:[%s11684_s0 + %s8181_s20]]  }
  0x13   :  { %s8327_s30 = sld [smem:[%s11684_s0 + %s8182_s26]]  }
  0x14   :  { %12104 = sst [smem:[#allocation140_spill]] %s8302_s3 }
  0x15   :  { %12105 = sst [smem:[#allocation141_spill]] %s8307_s8 }
  0x16   :  { %12106 = sst [smem:[#allocation142_spill]] %s8312_s14 }
  0x17   :  { %12107 = sst [smem:[#allocation143_spill]] %s8317_s19 }
  0x18   :  { %12108 = sst [smem:[#allocation144_spill]] %s8322_s24 }
  0x19   :  { %12109 = sst [smem:[#allocation145_spill]] %s8327_s30 }
  0x1a   :  { %s8332_s6 = sld [smem:[%s11684_s0 + %s8183_s1]]  }
  0x1b   :  { %s8337_s12 = sld [smem:[%s11684_s0 + %s8184_s7]]   ;;  %s8188_s7 = smov 19  }
  0x1c   :  { %s8342_s20 = sld [smem:[%s11684_s0 + %s8185_s15]]   ;;  %s8189_s15 = smov 20  }
  0x1d   :  { %s8347_s27 = sld [smem:[%s11684_s0 + %s8186_s22]]   ;;  %s8190_s22 = smov 21  }
  0x1e   :  { %s8352_s4 = sld [smem:[%s11684_s0 + %s8187_s28]]   ;;  %s8191_s28 = smov 22  }
  0x1f   :  { %s8367_s24 = sld [smem:[%s11684_s0 + %s8190_s22]]   ;;  %s8194_s22 = smov 25  }
  0x20   :  { %12110 = sst [smem:[#allocation146_spill]] %s8332_s6 }
  0x21   :  { %12111 = sst [smem:[#allocation147_spill]] %s8337_s12 }
  0x22   :  { %12112 = sst [smem:[#allocation148_spill]] %s8342_s20 }
  0x23   :  { %12113 = sst [smem:[#allocation149_spill]] %s8347_s27 }
  0x24   :  { %12114 = sst [smem:[#allocation150_spill]] %s8352_s4 }
  0x25   :  { %s8357_s6 = sld [smem:[%s11684_s0 + %s8188_s7]]   ;;  %s8192_s7 = smov 23  }
  0x26   :  { %s8362_s20 = sld [smem:[%s11684_s0 + %s8189_s15]]   ;;  %s8193_s15 = smov 24  }
  0x27   :  { %12117 = sst [smem:[#allocation153_spill]] %s8367_s24 }
  0x28   :  { %s8372_s4 = sld [smem:[%s11684_s0 + %s8191_s28]]   ;;  %s8195_s28 = smov 26  }
  0x29   :  { %s8377_s14 = sld [smem:[%s11684_s0 + %s8192_s7]]   ;;  %s8196_s7 = smov 27  }
  0x2a   :  { %s8387_s3 = sld [smem:[%s11684_s0 + %s8194_s22]]   ;;  %s8198_s22 = smov 29  }
  0x2b   :  { %12115 = sst [smem:[#allocation151_spill]] %s8357_s6 }
  0x2c   :  { %12116 = sst [smem:[#allocation152_spill]] %s8362_s20 }
  0x2d   :  { %s8382_s20 = sld [smem:[%s11684_s0 + %s8193_s15]]   ;;  %s8197_s15 = smov 28  }
  0x2e   :  { %12118 = sst [smem:[#allocation154_spill]] %s8372_s4 }
  0x2f   :  { %12119 = sst [smem:[#allocation155_spill]] %s8377_s14 }
  0x30   :  { %12121 = sst [smem:[#allocation157_spill]] %s8387_s3 }
  0x31   :  { %s8392_s4 = sld [smem:[%s11684_s0 + %s8195_s28]]   ;;  %s8199_s28 = smov 30  }
  0x32   :  { %s8397_s25 = sld [smem:[%s11684_s0 + %s8196_s7]]   ;;  %s8200_s7 = smov 31  }
  0x33   :  { %12120 = sst [smem:[#allocation156_spill]] %s8382_s20 }
  0x34   :  { %s8402_s20 = sld [smem:[%s11684_s0 + %s8197_s15]]   ;;  %s8201_s15 = smov 32  }
  0x35   :  { %s8407_s17 = sld [smem:[%s11684_s0 + %s8198_s22]]   ;;  %s8202_s22 = smov 33  }
  0x36   :  { %s8417_s9 = sld [smem:[%s11684_s0 + %s8200_s7]]   ;;  %s8204_s7 = smov 35  }
  0x37   :  { %12122 = sst [smem:[#allocation158_spill]] %s8392_s4 }
  0x38   :  { %12123 = sst [smem:[#allocation159_spill]] %s8397_s25 }
  0x39   :  { %s8412_s4 = sld [smem:[%s11684_s0 + %s8199_s28]]   ;;  %s8203_s28 = smov 34  }
  0x3a   :  { %12124 = sst [smem:[#allocation160_spill]] %s8402_s20  ;;  %s8206_s20 = smov 37  }
  0x3b   :  { %12125 = sst [smem:[#allocation161_spill]] %s8407_s17 }
  0x3c   :  { %12127 = sst [smem:[#allocation163_spill]] %s8417_s9  ;;  %s8208_s9 = smov 39  }
  0x3d   :  { %s8422_s23 = sld [smem:[%s11684_s0 + %s8201_s15]]   ;;  %s8205_s15 = smov 36  }
  0x3e   :  { %s8427_s1 = sld [smem:[%s11684_s0 + %s8202_s22]]  }
  0x3f   :  { %12126 = sst [smem:[#allocation162_spill]] %s8412_s4  ;;  %s8207_s4 = smov 38  }
  0x40   :  { %s8432_s10 = sld [smem:[%s11684_s0 + %s8203_s28]]  }
  0x41   :  { %s8437_s16 = sld [smem:[%s11684_s0 + %s8204_s7]]  }
  0x42   :  { %s8442_s17 = sld [smem:[%s11684_s0 + %s8205_s15]]   ;;  %s8209_s15 = smov 40  }
  0x43   :  { %12128 = sst [smem:[#allocation164_spill]] %s8422_s23  ;;  %s90_s23 = sshll.u32 %s8267_s5, 4  ;;  %s91_s23 = int_to_ptr.vmem [resolvable:$true] %s90_s23 }
  0x44   :  { %12129 = sst [smem:[#allocation165_spill]] %s8427_s1  ;;  %s6221_s28 = scalar_lea.vmem %s91_s23, 16 }
  0x45   :  { %s8447_s1 = sld [smem:[%s11684_s0 + %s8206_s20]]   ;;  %s8210_s20 = smov 42  }
  0x46   :  { %12130 = sst [smem:[#allocation166_spill]] %s8432_s10  ;;  %p6222_p0 = scmp.ne.s32.totalorder %s91_s23, %s6221_s28 }
  0x47   :  { %12131 = sst [smem:[#allocation167_spill]] %s8437_s16  ;;  %p6226_p1 = scmp.lt.s32.totalorder %s91_s23, %s91_s23 }
  0x48   :  { %12132 = sst [smem:[#allocation168_spill]] %s8442_s17  ;;  %p6227_p2 = scmp.lt.s32.totalorder %s6221_s28, %s6221_s28 }
  0x49   :  { %s8452_s25 = sld [smem:[%s11684_s0 + %s8207_s4]]  }
  0x4a   :  { %s8457_s3 = sld [smem:[%s11684_s0 + %s8208_s9]]   ;;  %p6228_p3 = por %p6227_p2, %p6226_p1 }
  0x4b   :  { %12133 = sst [smem:[#allocation169_spill]] %s8447_s1 }
  0x4c   :  { %s8463_s22 = sld [smem:[%s11684_s0 + %s8209_s15]]   ;;  %p6229_p4 = pnand %p6228_p3, %p6222_p0 }
  0x4d   :  { %s8468_s4 = sld [smem:[%s11684_s0 + %s8210_s20]]  }
  0x4f   :  { %12134 = sst [smem:[#allocation170_spill]] %s8452_s25 }
  0x50   :  { %12135 = sst [smem:[#allocation171_spill]] %s8457_s3 }
  0x52   :  { %12136 = sst [smem:[#allocation172_spill]] %s8463_s22 }
  0x53   :  { %12137 = sst [smem:[#allocation173_spill]] %s8468_s4 }
  0x54   :  { %6232 = shalt.err (!%p6229_p4)  }
  0x55   :  { %s8211_s5 = smov [#allocation4]   ;;  %s8212_s2 = smov 1  }
  0x56   :  { %93 = dma.vmem_to_smem %s91_s23, 16, %s8211_s5, [#allocation3] }
  0x57   :  { %s4777_s7 = sld [smem:[%s11684_s0 + %s8212_s2]]   ;;  %s8213_s11 = smov 41  }
  0x58   :  { %s4817_s14 = sld [smem:[%s11684_s0 + %s8213_s11]]  }
  0x5d   :  { %s94_s20 = sshll.u32 %s4777_s7, 4  ;;  %s95_s20 = int_to_ptr.vmem [resolvable:$true] %s94_s20 }
  0x5e   :  { %v98_v0 = vstv %s4817_s14  ;;  %s6233_s26 = scalar_lea.vmem %s95_s20, 16  ;;  %p6238_p6 = scmp.lt.s32.totalorder %s95_s20, %s95_s20 }
  0x5f   :  { %p6234_p5 = scmp.ne.s32.totalorder %s95_s20, %s6233_s26  ;;  %p6239_p7 = scmp.lt.s32.totalorder %s6233_s26, %s6233_s26 }
  0x61   :  { %p6240_p8 = por %p6239_p7, %p6238_p6 }
  0x63   :  { %p6241_p9 = pnand %p6240_p8, %p6234_p5 }
  0x65   :  { %6244 = shalt.err (!%p6241_p9)  }
  0x66   :  { %s8214_s23 = smov [#allocation5]   ;;  %99 = vst [vmem:[#allocation6] sm:$0x1] %v98_v0 }
  0x67   :  { %97 = dma.vmem_to_smem %s95_s20, 16, %s8214_s23, [#allocation3] }
  0x68   :  { %7629 = dma.done.wait [#allocation3], 32 }
  0x69   :  { %7630 = vsyncadd [#allocation3], 4294967264 }
  0x6a   :  { %101 = sfence }
  0x6b   :  { %102 = vsyncpa [#allocation8], 0 }
  0x6c   :  { %104 = vsyncpa [#allocation8 + $0x1], 0 }
  0x6d   :  { %105 = vsyncpa [#allocation10], 0 }
  0x6e   :  { %107 = vsyncpa [#allocation10 + $0x1], 0 }
  0x6f   :  { %108 = vsyncpa [#allocation13], 0 }
  0x70   :  { %110 = vsyncpa [#allocation13 + $0x1], 0 }
  0x71   :  { %111 = vsyncpa [#allocation16], 0 }
  0x72   :  { %113 = vsyncpa [#allocation16 + $0x1], 0 }
  0x73   :  { %114 = vsyncpa [#allocation19], 0 }
  0x74   :  { %116 = vsyncpa [#allocation19 + $0x1], 0 }
  0x75   :  { %117 = vsyncpa [#allocation22], 0 }
  0x76   :  { %119 = vsyncpa [#allocation22 + $0x1], 0 }
  0x77   :  { %120 = vsyncpa [#allocation25], 0 }
  0x78   :  { %122 = vsyncpa [#allocation25 + $0x1], 0 }
  0x79   :  { %123 = vsyncpa [#allocation28], 0 }
  0x7a   :  { %125 = vsyncpa [#allocation28 + $0x1], 0 }
  0x7b   :  { %126 = vsyncpa [#allocation31], 0 }
  0x7c   :  { %128 = vsyncpa [#allocation31 + $0x1], 0 }
  0x7d   :  { %129 = vsyncpa [#allocation34], 0 }
  0x7e   :  { %131 = vsyncpa [#allocation34 + $0x1], 0 }
  0x7f   :  { %132 = vsyncpa [#allocation37], 0 }
  0x80   :  { %134 = vsyncpa [#allocation37 + $0x1], 0 }
  0x81   :  { %135 = vsyncpa [#allocation40], 0 }
  0x82   :  { %137 = vsyncpa [#allocation40 + $0x1], 0 }
  0x83   :  { %138 = vsyncpa [#allocation43], 0 }
  0x84   :  { %140 = vsyncpa [#allocation43 + $0x1], 0 }
  0x85   :  { %141 = vsyncpa [#allocation46], 0 }
  0x86   :  { %143 = vsyncpa [#allocation46 + $0x1], 0 }
  0x87   :  { %144 = vsyncpa [#allocation49], 0 }
  0x88   :  { %146 = vsyncpa [#allocation49 + $0x1], 0 }
  0x89   :  { %147 = vsyncpa [#allocation52], 0 }
  0x8a   :  { %149 = vsyncpa [#allocation52 + $0x1], 0 }
  0x8b   :  { %150 = vsyncpa [#allocation55], 0 }
  0x8c   :  { %152 = vsyncpa [#allocation55 + $0x1], 0 }
  0x8d   :  { %153 = vsyncpa [#allocation58], 0 }
  0x8e   :  { %154 = vsyncpa [#allocation61], 0 }
  0x8f   :  { %155 = vsyncpa [#allocation64], 0  ;;  %s8476_s0 = smov 0   ;;  %s8478_s28 = smov 0  }
  0x90   :  { %s8480_s5 = smov 0   ;;  %s8482_s2 = smov 0  }
  0x91   :  { %s8484_s17 = smov 0   ;;  %s8486_s9 = smov 0  }
  0x92   :  { %s8488_s7 = smov 0   ;;  %s8490_s11 = smov 0  }
  0x93   :  { %12138 = sst [smem:[#allocation174_spill]] %s8488_s7  ;;  %s8492_s15 = smov 0  }
  0x94   :  { %12139 = sst [smem:[#allocation175_spill]] %s8492_s15  ;;  %s8494_s18 = smov 0  }
  0x95   :  { %12140 = sst [smem:[#allocation176_spill]] %s8494_s18  ;;  %s8496_s14 = smov 0  }
  0x96   :  { %s8498_s20 = smov 0   ;;  %s8500_s26 = smov 0  }
  0x97   :  { %12141 = sst [smem:[#allocation177_spill]] %s8498_s20  ;;  %s8502_s23 = smov 0  }
  0x98   :  { %12142 = sst [smem:[#allocation178_spill]] %s8500_s26  ;;  %s8504_s4 = smov 0  }
  0x99   :  { %12143 = sst [smem:[#allocation179_spill]] %s8502_s23  ;;  %s8506_s24 = smov 0  }
  0x9a   :  { %12144 = sst [smem:[#allocation180_spill]] %s8504_s4  ;;  %s8508_s6 = smov 0  }
  0x9b   :  { %12145 = sst [smem:[#allocation181_spill]] %s8506_s24  ;;  %s8510_s27 = smov 0  }
  0x9c   :  { %12146 = sst [smem:[#allocation182_spill]] %s8508_s6  ;;  %s8512_s12 = smov 0  }
  0x9d   :  { %12147 = sst [smem:[#allocation183_spill]] %s8510_s27  ;;  %s8514_s30 = smov 0  }
  0x9e   :  { %12148 = sst [smem:[#allocation184_spill]] %s8512_s12  ;;  %s8516_s19 = smov 0  }
  0x9f   :  { %12149 = sst [smem:[#allocation185_spill]] %s8514_s30  ;;  %s8518_s8 = smov 0  }
  0xa0   :  { %12150 = sst [smem:[#allocation186_spill]] %s8516_s19  ;;  %s8520_s29 = smov 0  }
  0xa1   :  { %12151 = sst [smem:[#allocation187_spill]] %s8518_s8  ;;  %s8522_s21 = smov 0  }
  0xa2   :  { %12152 = sst [smem:[#allocation188_spill]] %s8520_s29  ;;  %s8524_s13 = smov 0  }
  0xa3   :  { %12153 = sst [smem:[#allocation189_spill]] %s8522_s21  ;;  %s8526_s22 = smov 0  }
  0xa4   :  { %12154 = sst [smem:[#allocation190_spill]] %s8524_s13  ;;  %s8528_s3 = smov 0  }
  0xa5   :  { %12155 = sst [smem:[#allocation191_spill]] %s8526_s22  ;;  %s8530_s1 = smov 0  }
  0xa6   :  { %12156 = sst [smem:[#allocation192_spill]] %s8528_s3  ;;  %s8532_s10 = smov 0  }
  0xa7   :  { %12157 = sst [smem:[#allocation193_spill]] %s8530_s1  ;;  %s8534_s25 = smov 0  }
  0xa8   :  { %12158 = sst [smem:[#allocation194_spill]] %s8532_s10  ;;  %s8536_s16 = smov 0  }
  0xa9   :  { %12159 = sst [smem:[#allocation195_spill]] %s8534_s25  ;;  %s8538_s19 = smov 0  }
  0xaa   :  { %12160 = sst [smem:[#allocation196_spill]] %s8536_s16  ;;  %s8540_s8 = smov 0  }
  0xab   :  { %12161 = sst [smem:[#allocation197_spill]] %s8538_s19  ;;  %s8542_s29 = smov 0  }
  0xac   :  { %12162 = sst [smem:[#allocation198_spill]] %s8540_s8  ;;  %s8544_s21 = smov 0  }
  0xad   :  { %12163 = sst [smem:[#allocation199_spill]] %s8542_s29  ;;  %s8546_s13 = smov 0  }
  0xae   :  { %12164 = sst [smem:[#allocation200_spill]] %s8544_s21  ;;  %s8548_s22 = smov 0  }
  0xaf   :  { %12165 = sst [smem:[#allocation201_spill]] %s8546_s13  ;;  %s8550_s3 = smov 0  }
  0xb0   :  { %12166 = sst [smem:[#allocation202_spill]] %s8548_s22  ;;  %s8552_s1 = smov 0  }
  0xb1   :  { %12167 = sst [smem:[#allocation203_spill]] %s8550_s3  ;;  %s8554_s10 = smov 0  }
  0xb2   :  { %12168 = sst [smem:[#allocation204_spill]] %s8552_s1  ;;  %s8556_s25 = smov 0  }
  0xb3   :  { %12169 = sst [smem:[#allocation205_spill]] %s8554_s10  ;;  %s8558_s16 = smov 0  }
  0xb4   :  { %12170 = sst [smem:[#allocation206_spill]] %s8556_s25  ;;  %s8560_s19 = smov 0  }
  0xb5   :  { %12171 = sst [smem:[#allocation207_spill]] %s8558_s16  ;;  %s8562_s8 = smov 0  }
  0xb6   :  { %12172 = sst [smem:[#allocation208_spill]] %s8560_s19  ;;  %s8564_s29 = smov 0  }
  0xb7   :  { %12173 = sst [smem:[#allocation209_spill]] %s8562_s8  ;;  %s8566_s21 = smov 0  }
  0xb8   :  { %12174 = sst [smem:[#allocation210_spill]] %s8564_s29  ;;  %s8568_s13 = smov 0  }
  0xb9   :  { %12175 = sst [smem:[#allocation211_spill]] %s8566_s21  ;;  %s8570_s22 = smov 0  }
  0xba   :  { %12176 = sst [smem:[#allocation212_spill]] %s8568_s13  ;;  %s8572_s3 = smov 0  }
  0xbb   :  { %12177 = sst [smem:[#allocation213_spill]] %s8570_s22  ;;  %s8574_s1 = smov 0  }
  0xbc   :  { %12178 = sst [smem:[#allocation214_spill]] %s8572_s3  ;;  %s8576_s10 = smov 0  }
  0xbd   :  { %12179 = sst [smem:[#allocation215_spill]] %s8574_s1  ;;  %s8578_s25 = smov 0  }
  0xbe   :  { %12180 = sst [smem:[#allocation216_spill]] %s8576_s10  ;;  %s8580_s16 = smov 0  }
  0xbf   :  { %12181 = sst [smem:[#allocation217_spill]] %s8578_s25  ;;  %s8582_s19 = smov 0  }
  0xc0   :  { %12182 = sst [smem:[#allocation218_spill]] %s8580_s16  ;;  %s8584_s8 = smov 0  }
  0xc1   :  { %12183 = sst [smem:[#allocation219_spill]] %s8582_s19  ;;  %s8586_s29 = smov 0  }
  0xc2   :  { %12184 = sst [smem:[#allocation220_spill]] %s8584_s8  ;;  %s8588_s21 = smov 0  }
  0xc3   :  { %12185 = sst [smem:[#allocation221_spill]] %s8586_s29  ;;  %s8590_s13 = smov 0  }
  0xc4   :  { %12186 = sst [smem:[#allocation222_spill]] %s8588_s21  ;;  %s8592_s22 = smov 0  }
  0xc5   :  { %12187 = sst [smem:[#allocation223_spill]] %s8590_s13  ;;  %s8594_s3 = smov 0  }
  0xc6   :  { %12188 = sst [smem:[#allocation224_spill]] %s8592_s22  ;;  %s8596_s1 = smov 0  }
  0xc7   :  { %12189 = sst [smem:[#allocation225_spill]] %s8594_s3  ;;  %s8598_s10 = smov 0  }
  0xc8   :  { %12190 = sst [smem:[#allocation226_spill]] %s8596_s1  ;;  %s8600_s25 = smov 0  }
  0xc9   :  { %12191 = sst [smem:[#allocation227_spill]] %s8598_s10  ;;  %s8602_s16 = smov 0  }
  0xca   :  { %12192 = sst [smem:[#allocation228_spill]] %s8600_s25  ;;  %s8604_s19 = smov 0  }
  0xcb   :  { %12193 = sst [smem:[#allocation229_spill]] %s8602_s16  ;;  %s8606_s8 = smov 0  }
  0xcc   :  { %12194 = sst [smem:[#allocation230_spill]] %s8604_s19  ;;  %s8608_s29 = smov 0  }
  0xcd   :  { %12195 = sst [smem:[#allocation231_spill]] %s8606_s8  ;;  %s8610_s21 = smov 0  }
  0xce   :  { %12196 = sst [smem:[#allocation232_spill]] %s8608_s29  ;;  %s8612_s13 = smov 0  }
  0xcf   :  { %12197 = sst [smem:[#allocation233_spill]] %s8610_s21  ;;  %s8614_s22 = smov 0  }
  0xd0   :  { %12198 = sst [smem:[#allocation234_spill]] %s8612_s13  ;;  %s8616_s3 = smov 0  }
  0xd1   :  { %12199 = sst [smem:[#allocation235_spill]] %s8614_s22  ;;  %s8618_s1 = smov 0  }
  0xd2   :  { %12200 = sst [smem:[#allocation236_spill]] %s8616_s3  ;;  %s8620_s10 = smov 0  }
  0xd3   :  { %12201 = sst [smem:[#allocation237_spill]] %s8618_s1  ;;  %s8622_s25 = smov 0  }
  0xd4   :  { %12202 = sst [smem:[#allocation238_spill]] %s8620_s10  ;;  %s8624_s16 = smov 0  }
  0xd5   :  { %12203 = sst [smem:[#allocation239_spill]] %s8622_s25  ;;  %s8626_s19 = smov 0  }
  0xd6   :  { %12204 = sst [smem:[#allocation240_spill]] %s8624_s16  ;;  %s8628_s8 = smov 0  }
  0xd7   :  { %12205 = sst [smem:[#allocation241_spill]] %s8626_s19  ;;  %s8630_s29 = smov 0  }
  0xd8   :  { %12206 = sst [smem:[#allocation242_spill]] %s8628_s8  ;;  %s8632_s21 = smov 0  }
  0xd9   :  { %12207 = sst [smem:[#allocation243_spill]] %s8630_s29  ;;  %s8634_s13 = smov 0  }
  0xda   :  { %12208 = sst [smem:[#allocation244_spill]] %s8632_s21  ;;  %s8636_s22 = smov 0  }
  0xdb   :  { %12209 = sst [smem:[#allocation245_spill]] %s8634_s13  ;;  %s8638_s3 = smov 0  }
  0xdc   :  { %12210 = sst [smem:[#allocation246_spill]] %s8636_s22  ;;  %s8640_s1 = smov 0  }
  0xdd   :  { %12211 = sst [smem:[#allocation247_spill]] %s8638_s3  ;;  %s8642_s10 = smov 0  }
  0xde   :  { %12212 = sst [smem:[#allocation248_spill]] %s8640_s1  ;;  %s8644_s25 = smov 0  }
  0xdf   :  { %12213 = sst [smem:[#allocation249_spill]] %s8642_s10  ;;  %s8646_s16 = smov 0  }
  0xe0   :  { %12214 = sst [smem:[#allocation250_spill]] %s8644_s25  ;;  %s8648_s19 = smov 0  }
  0xe1   :  { %12215 = sst [smem:[#allocation251_spill]] %s8646_s16  ;;  %s8650_s8 = smov 0  }
  0xe2   :  { %12216 = sst [smem:[#allocation252_spill]] %s8648_s19  ;;  %s8652_s29 = smov 0  }
  0xe3   :  { %12217 = sst [smem:[#allocation253_spill]] %s8650_s8  ;;  %s8654_s21 = smov 0  }
  0xe4   :  { %12218 = sst [smem:[#allocation254_spill]] %s8652_s29  ;;  %s8656_s13 = smov 0  }
  0xe5   :  { %12219 = sst [smem:[#allocation255_spill]] %s8654_s21  ;;  %s8658_s22 = smov 0  }
  0xe6   :  { %12220 = sst [smem:[#allocation256_spill]] %s8656_s13  ;;  %s8660_s3 = smov 0  }
  0xe7   :  { %12221 = sst [smem:[#allocation257_spill]] %s8658_s22  ;;  %s8662_s1 = smov 0  }
  0xe8   :  { %12222 = sst [smem:[#allocation258_spill]] %s8660_s3  ;;  %s8664_s10 = smov 0  }
  0xe9   :  { %12223 = sst [smem:[#allocation259_spill]] %s8662_s1  ;;  %s8666_s25 = smov 0  }
  0xea   :  { %12224 = sst [smem:[#allocation260_spill]] %s8664_s10  ;;  %s8668_s16 = smov 0  }
  0xeb   :  { %12225 = sst [smem:[#allocation261_spill]] %s8666_s25  ;;  %s8670_s19 = smov 0  }
  0xec   :  { %12226 = sst [smem:[#allocation262_spill]] %s8668_s16  ;;  %s8672_s8 = smov 0  }
  0xed   :  { %12227 = sst [smem:[#allocation263_spill]] %s8670_s19 }
  0xee   :  { %12228 = sst [smem:[#allocation264_spill]] %s8672_s8 }
  0xef LB: > { %s12320_s7 = sld [smem:[#allocation174_spill]]  ;;  %s7817_s14 = sphi %s8496_s14, %s13173_s14   ;;  %s7805_s11 = sphi %s8490_s11, %s13170_s11   ;;  %s7797_s9 = sphi %s8486_s9, %s13168_s9   ;;  %s7793_s17 = sphi %s8484_s17, %s13167_s17   ;;  %s7789_s2 = sphi %s8482_s2, %s13166_s2   ;;  %s7785_s5 = sphi %s8480_s5, %s13165_s5   ;;  %s7781_s28 = sphi %s8478_s28, %s13164_s28   ;;  %s7777_s0 = sphi %s8476_s0, %s13163_s0  }
  0xf0   : > { %s12321_s15 = sld [smem:[#allocation175_spill]] }
  0xf1   : > { %s12322_s18 = sld [smem:[#allocation176_spill]] }
  0xf2   : > { %s12323_s20 = sld [smem:[#allocation177_spill]] }
  0xf3   : > { %s12324_s26 = sld [smem:[#allocation178_spill]] }
  0xf4   : > { %s12325_s23 = sld [smem:[#allocation179_spill]] }
  0xf5   : > { %s12326_s4 = sld [smem:[#allocation180_spill]] }
  0xf6   : > { %s12327_s24 = sld [smem:[#allocation181_spill]] }
  0xf7   : > { %12328 = sst [smem:[#allocation174_spill]] %s7777_s0 }
  0xf8   : > { %s12329_s6 = sld [smem:[#allocation182_spill]] }
  0xf9   : > { %12330 = sst [smem:[#allocation175_spill]] %s7781_s28 }
  0xfa   : > { %s12331_s27 = sld [smem:[#allocation183_spill]] }
  0xfb   : > { %12332 = sst [smem:[#allocation176_spill]] %s7785_s5 }
  0xfc   : > { %s12333_s12 = sld [smem:[#allocation184_spill]] }
  0xfd   : > { %12334 = sst [smem:[#allocation177_spill]] %s7789_s2 }
  0xfe   : > { %s12335_s30 = sld [smem:[#allocation185_spill]] }
  0xff   : > { %12336 = sst [smem:[#allocation178_spill]] %s7793_s17 }
 0x100   : > { %s12337_s8 = sld [smem:[#allocation186_spill]] }
 0x101   : > { %12338 = sst [smem:[#allocation179_spill]] %s7797_s9 }
 0x102   : > { %s12339_s19 = sld [smem:[#allocation187_spill]] }
 0x103   : > { %12340 = sst [smem:[#allocation180_spill]] %s12320_s7 }
 0x104   : > { %s12341_s16 = sld [smem:[#allocation188_spill]] }
 0x105   : > { %12342 = sst [smem:[#allocation181_spill]] %s7805_s11 }
 0x106   : > { %s12343_s0 = sld [smem:[#allocation189_spill]] }
 0x107   : > { %12344 = sst [smem:[#allocation182_spill]] %s12321_s15 }
 0x108   : > { %s12345_s28 = sld [smem:[#allocation190_spill]] }
 0x109   : > { %12346 = sst [smem:[#allocation183_spill]] %s12322_s18 }
 0x10a   : > { %s12347_s5 = sld [smem:[#allocation191_spill]] }
 0x10b   : > { %12348 = sst [smem:[#allocation184_spill]] %s7817_s14 }
 0x10c   : > { %s12349_s2 = sld [smem:[#allocation192_spill]] }
 0x10d   : > { %12350 = sst [smem:[#allocation185_spill]] %s12323_s20 }
 0x10e   : > { %s12351_s17 = sld [smem:[#allocation193_spill]] }
 0x10f   : > { %12352 = sst [smem:[#allocation186_spill]] %s12324_s26 }
 0x110   : > { %s12353_s9 = sld [smem:[#allocation194_spill]] }
 0x111   : > { %12354 = sst [smem:[#allocation187_spill]] %s12325_s23 }
 0x112   : > { %s12355_s7 = sld [smem:[#allocation195_spill]] }
 0x113   : > { %12356 = sst [smem:[#allocation188_spill]] %s12326_s4 }
 0x114   : > { %s12357_s11 = sld [smem:[#allocation196_spill]] }
 0x115   : > { %12358 = sst [smem:[#allocation189_spill]] %s12327_s24 }
 0x116   : > { %s12359_s15 = sld [smem:[#allocation197_spill]] }
 0x117   : > { %12360 = sst [smem:[#allocation190_spill]] %s12329_s6 }
 0x118   : > { %s12361_s18 = sld [smem:[#allocation198_spill]] }
 0x119   : > { %12362 = sst [smem:[#allocation191_spill]] %s12331_s27 }
 0x11a   : > { %s12363_s14 = sld [smem:[#allocation199_spill]] }
 0x11b   : > { %12364 = sst [smem:[#allocation192_spill]] %s12333_s12 }
 0x11c   : > { %s12365_s20 = sld [smem:[#allocation200_spill]] }
 0x11d   : > { %12366 = sst [smem:[#allocation193_spill]] %s12335_s30 }
 0x11e   : > { %s12367_s26 = sld [smem:[#allocation201_spill]] }
 0x11f   : > { %12368 = sst [smem:[#allocation194_spill]] %s12337_s8 }
 0x120   : > { %s12369_s23 = sld [smem:[#allocation202_spill]] }
 0x121   : > { %12370 = sst [smem:[#allocation195_spill]] %s12339_s19 }
 0x122   : > { %s12371_s4 = sld [smem:[#allocation203_spill]] }
 0x123   : > { %12372 = sst [smem:[#allocation196_spill]] %s12341_s16 }
 0x124   : > { %s12373_s24 = sld [smem:[#allocation204_spill]] }
 0x125   : > { %12374 = sst [smem:[#allocation197_spill]] %s12343_s0 }
 0x126   : > { %s12375_s25 = sld [smem:[#allocation205_spill]] }
 0x127   : > { %12376 = sst [smem:[#allocation198_spill]] %s12345_s28 }
 0x128   : > { %s12377_s27 = sld [smem:[#allocation206_spill]] }
 0x129   : > { %12378 = sst [smem:[#allocation199_spill]] %s12347_s5 }
 0x12a   : > { %s12379_s10 = sld [smem:[#allocation207_spill]] }
 0x12b   : > { %12380 = sst [smem:[#allocation200_spill]] %s12349_s2 }
 0x12c   : > { %s12381_s1 = sld [smem:[#allocation208_spill]] }
 0x12d   : > { %12382 = sst [smem:[#allocation201_spill]] %s12351_s17 }
 0x12e   : > { %s12383_s8 = sld [smem:[#allocation209_spill]] }
 0x12f   : > { %12384 = sst [smem:[#allocation202_spill]] %s12353_s9 }
 0x130   : > { %s12385_s3 = sld [smem:[#allocation210_spill]] }
 0x131   : > { %12386 = sst [smem:[#allocation203_spill]] %s12355_s7 }
 0x132   : > { %s12387_s22 = sld [smem:[#allocation211_spill]] }
 0x133   : > { %12388 = sst [smem:[#allocation204_spill]] %s12357_s11 }
 0x134   : > { %s12389_s0 = sld [smem:[#allocation212_spill]] }
 0x135   : > { %12390 = sst [smem:[#allocation205_spill]] %s12359_s15 }
 0x136   : > { %s12391_s28 = sld [smem:[#allocation213_spill]] }
 0x137   : > { %12392 = sst [smem:[#allocation206_spill]] %s12361_s18 }
 0x138   : > { %s12393_s5 = sld [smem:[#allocation214_spill]] }
 0x139   : > { %12394 = sst [smem:[#allocation207_spill]] %s12363_s14 }
 0x13a   : > { %s12395_s2 = sld [smem:[#allocation215_spill]] }
 0x13b   : > { %12396 = sst [smem:[#allocation208_spill]] %s12365_s20 }
 0x13c   : > { %s12397_s17 = sld [smem:[#allocation216_spill]] }
 0x13d   : > { %12398 = sst [smem:[#allocation209_spill]] %s12367_s26 }
 0x13e   : > { %s12399_s9 = sld [smem:[#allocation217_spill]] }
 0x13f   : > { %12400 = sst [smem:[#allocation210_spill]] %s12369_s23 }
 0x140   : > { %s12401_s7 = sld [smem:[#allocation218_spill]] }
 0x141   : > { %12402 = sst [smem:[#allocation211_spill]] %s12371_s4 }
 0x142   : > { %s12403_s11 = sld [smem:[#allocation219_spill]] }
 0x143   : > { %12404 = sst [smem:[#allocation212_spill]] %s12373_s24 }
 0x144   : > { %s12405_s15 = sld [smem:[#allocation220_spill]] }
 0x145   : > { %12406 = sst [smem:[#allocation213_spill]] %s12375_s25 }
 0x146   : > { %s12407_s18 = sld [smem:[#allocation221_spill]] }
 0x147   : > { %12408 = sst [smem:[#allocation214_spill]] %s12377_s27 }
 0x148   : > { %s12409_s6 = sld [smem:[#allocation222_spill]] }
 0x149   : > { %12410 = sst [smem:[#allocation215_spill]] %s12379_s10 }
 0x14a   : > { %s12411_s20 = sld [smem:[#allocation223_spill]] }
 0x14b   : > { %12412 = sst [smem:[#allocation216_spill]] %s12381_s1 }
 0x14c   : > { %s12413_s26 = sld [smem:[#allocation224_spill]] }
 0x14d   : > { %12414 = sst [smem:[#allocation217_spill]] %s12383_s8 }
 0x14e   : > { %s12415_s12 = sld [smem:[#allocation225_spill]] }
 0x14f   : > { %12416 = sst [smem:[#allocation218_spill]] %s12385_s3 }
 0x150   : > { %s12417_s4 = sld [smem:[#allocation226_spill]] }
 0x151   : > { %12418 = sst [smem:[#allocation219_spill]] %s12387_s22 }
 0x152   : > { %s12419_s24 = sld [smem:[#allocation227_spill]] }
 0x153   : > { %12420 = sst [smem:[#allocation220_spill]] %s12389_s0 }
 0x154   : > { %s12421_s14 = sld [smem:[#allocation228_spill]] }
 0x155   : > { %12422 = sst [smem:[#allocation221_spill]] %s12391_s28 }
 0x156   : > { %s12423_s27 = sld [smem:[#allocation229_spill]] }
 0x157   : > { %12424 = sst [smem:[#allocation222_spill]] %s12393_s5 }
 0x158   : > { %s12425_s30 = sld [smem:[#allocation230_spill]] }
 0x159   : > { %12426 = sst [smem:[#allocation223_spill]] %s12395_s2 }
 0x15a   : > { %s12427_s23 = sld [smem:[#allocation231_spill]] }
 0x15b   : > { %12428 = sst [smem:[#allocation224_spill]] %s12397_s17 }
 0x15c   : > { %s12429_s21 = sld [smem:[#allocation232_spill]] }
 0x15d   : > { %12430 = sst [smem:[#allocation225_spill]] %s12399_s9 }
 0x15e   : > { %s12431_s10 = sld [smem:[#allocation233_spill]] }
 0x15f   : > { %12432 = sst [smem:[#allocation226_spill]] %s12401_s7 }
 0x160   : > { %s12433_s8 = sld [smem:[#allocation234_spill]] }
 0x161   : > { %12434 = sst [smem:[#allocation227_spill]] %s12403_s11 }
 0x162   : > { %s12435_s0 = sld [smem:[#allocation235_spill]] }
 0x163   : > { %12436 = sst [smem:[#allocation228_spill]] %s12405_s15 }
 0x164   : > { %s12437_s28 = sld [smem:[#allocation236_spill]] }
 0x165   : > { %12438 = sst [smem:[#allocation229_spill]] %s12407_s18 }
 0x166   : > { %s12439_s19 = sld [smem:[#allocation237_spill]] }
 0x167   : > { %12440 = sst [smem:[#allocation230_spill]] %s12409_s6 }
 0x168   : > { %s12441_s2 = sld [smem:[#allocation238_spill]] }
 0x169   : > { %12442 = sst [smem:[#allocation231_spill]] %s12411_s20 }
 0x16a   : > { %s12443_s17 = sld [smem:[#allocation239_spill]] }
 0x16b   : > { %12444 = sst [smem:[#allocation232_spill]] %s12413_s26 }
 0x16c   : > { %s12445_s5 = sld [smem:[#allocation240_spill]] }
 0x16d   : > { %12446 = sst [smem:[#allocation233_spill]] %s12415_s12 }
 0x16e   : > { %s12447_s7 = sld [smem:[#allocation241_spill]] }
 0x16f   : > { %12448 = sst [smem:[#allocation234_spill]] %s12417_s4 }
 0x170   : > { %s12449_s11 = sld [smem:[#allocation242_spill]] }
 0x171   : > { %12450 = sst [smem:[#allocation235_spill]] %s12419_s24 }
 0x172   : > { %s12451_s9 = sld [smem:[#allocation243_spill]] }
 0x173   : > { %12452 = sst [smem:[#allocation236_spill]] %s12421_s14 }
 0x174   : > { %s12453_s18 = sld [smem:[#allocation244_spill]] }
 0x175   : > { %12454 = sst [smem:[#allocation237_spill]] %s12423_s27 }
 0x176   : > { %s12455_s6 = sld [smem:[#allocation245_spill]] }
 0x177   : > { %12456 = sst [smem:[#allocation238_spill]] %s12425_s30 }
 0x178   : > { %s12457_s15 = sld [smem:[#allocation246_spill]] }
 0x179   : > { %12458 = sst [smem:[#allocation239_spill]] %s12427_s23 }
 0x17a   : > { %s12459_s26 = sld [smem:[#allocation247_spill]] }
 0x17b   : > { %12460 = sst [smem:[#allocation240_spill]] %s12429_s21 }
 0x17c   : > { %s12461_s12 = sld [smem:[#allocation248_spill]] }
 0x17d   : > { %12462 = sst [smem:[#allocation241_spill]] %s12431_s10 }
 0x17e   : > { %s12463_s20 = sld [smem:[#allocation249_spill]] }
 0x17f   : > { %12464 = sst [smem:[#allocation242_spill]] %s12433_s8 }
 0x180   : > { %s12465_s24 = sld [smem:[#allocation250_spill]] }
 0x181   : > { %12466 = sst [smem:[#allocation243_spill]] %s12435_s0 }
 0x182   : > { %s12467_s14 = sld [smem:[#allocation251_spill]] }
 0x183   : > { %12468 = sst [smem:[#allocation251_spill]] %s12437_s28 }
 0x184   : > { %s12469_s25 = sld [smem:[#allocation252_spill]] }
 0x185   : > { %12470 = sst [smem:[#allocation252_spill]] %s12439_s19 }
 0x186   : > { %s12471_s30 = sld [smem:[#allocation253_spill]] }
 0x187   : > { %12472 = sst [smem:[#allocation253_spill]] %s12441_s2 }
 0x188   : > { %s12473_s29 = sld [smem:[#allocation254_spill]]  ;;  %s12493_s3 = smov %s12467_s14 }
 0x189   : > { %12474 = sst [smem:[#allocation254_spill]] %s12443_s17 }
 0x18a   : > { %s12475_s23 = sld [smem:[#allocation255_spill]] }
 0x18b   : > { %12476 = sst [smem:[#allocation255_spill]] %s12445_s5 }
 0x18c   : > { %s12477_s4 = sld [smem:[#allocation256_spill]] }
 0x18d   : > { %s12478_s27 = sld [smem:[#allocation257_spill]] }
 0x18e   : > { %12479 = sst [smem:[#allocation257_spill]] %s12449_s11 }
 0x18f   : > { %s12480_s16 = sld [smem:[#allocation258_spill]] }
 0x190   : > { %12481 = sst [smem:[#allocation258_spill]] %s12451_s9  ;;  %s12497_s22 = smov %s12475_s23 }
 0x191   : > { %s12482_s28 = sld [smem:[#allocation259_spill]]  ;;  %s8215_s9 = smov [#allocation57]  }
 0x192   : > { %s12483_s10 = sld [smem:[#allocation260_spill]] }
 0x193   : > { %12484 = sst [smem:[#allocation260_spill]] %s12455_s6  ;;  %s12499_s21 = smov %s12478_s27 }
 0x194   : > { %s12485_s0 = sld [smem:[#allocation261_spill]] }
 0x195   : > { %12486 = sst [smem:[#allocation261_spill]] %s12457_s15  ;;  %s1544_s15 = sshll.u32 %s8215_s9, 4  ;;  %s1545_s15 = int_to_ptr.vmem [resolvable:$true] %s1544_s15 }
 0x196   : > { %s12487_s17 = sld [smem:[#allocation262_spill]]  ;;  %p6264_p6 = scmp.lt.s32.totalorder %s1545_s15, %s1545_s15 }
 0x197   : > { %s12488_s5 = sld [smem:[#allocation263_spill]] }
 0x198   : > { %12489 = sst [smem:[#allocation263_spill]] %s12461_s12 }
 0x199   : > { %s12490_s2 = sld [smem:[#allocation264_spill]] }
 0x19a   : > { %12491 = sst [smem:[#allocation264_spill]] %s12463_s20  ;;  %s12503_s8 = smov %s12485_s0 }
 0x19b   : > { %12492 = sst [smem:[#allocation262_spill]] %s12467_s14  ;;  %s6256_s14 = scalar_lea.vmem %s1545_s15, 32 }
 0x19c   : > { %12494 = sst [smem:[#allocation259_spill]] %s12469_s25  ;;  %p6257_p3 = scmp.ne.s32.totalorder %s1545_s15, %s6256_s14 }
 0x19d   : > { %12495 = sst [smem:[#allocation256_spill]] %s12473_s29  ;;  %s12506_s13 = smov %s12488_s5 }
 0x19e   : > { %12496 = sst [smem:[#allocation244_spill]] %s12475_s23  ;;  %p6265_p7 = scmp.lt.s32.totalorder %s6256_s14, %s6256_s14 }
 0x19f   : > { %12498 = sst [smem:[#allocation245_spill]] %s12478_s27  ;;  %s12508_s19 = smov %s12490_s2 }
 0x1a0   : > { %12500 = sst [smem:[#allocation246_spill]] %s12480_s16  ;;  %s11782_s20 = sadd.s32 4294967295, %s12508_s19  }
 0x1a1   : > { %12501 = sst [smem:[#allocation247_spill]] %s12483_s10  ;;  %p4884_p10 = scmp.ge.s32.totalorder %s12508_s19, 1 }
 0x1a2   : > { %12502 = sst [smem:[#allocation248_spill]] %s12485_s0  ;;  %p8975_p11 = scmp.eq.s32.totalorder %s11782_s20, 0 }
 0x1a3   : > { %12504 = sst [smem:[#allocation249_spill]] %s12487_s17  ;;  %p1520_p12 = scmp.lt.s32.totalorder %s12508_s19, 9 }
 0x1a4   : > { %12505 = sst [smem:[#allocation250_spill]] %s12488_s5  ;;  %p6266_p8 = por %p6265_p7, %p6264_p6 }
 0x1a5   : > { %12507 = sst [smem:[#allocation265_spill]] %s12490_s2  ;;  %p8980_p13 = pnand %p4884_p10, %p1520_p12 }
 0x1a6   : > { %s12509_s27 = scalar_select %p8975_p11, 1, 0 }
 0x1a7   : > { %s12511_s0 = scalar_select %p8980_p13, 1, 0 }
 0x1a8   : > { %12510 = sst [smem:[#allocation266_spill]] %s12509_s27  ;;  %s8216_s2 = smov [#allocation60]  }
 0x1a9   : > { %12512 = sst [smem:[#allocation267_spill]] %s12511_s0  ;;  %s1568_s11 = sshll.u32 %s8216_s2, 4  ;;  %s1569_s11 = int_to_ptr.vmem [resolvable:$true] %s1568_s11 }
 0x1aa   : > { %p5341_p0 = pneg %p8980_p13 }
 0x1ac   : > { %p8988_p1 = pnand %p5341_p0, %p8975_p11 }
 0x1ae   : > { %s12513_s6 = scalar_select %p8988_p1, 1, 0 }
 0x1af   : > { %p8994_p2 = pneg %p8988_p1 }
 0x1b0   : > { %12514 = sst [smem:[#allocation268_spill]] %s12513_s6 }
 0x1b1   : > { %s12515_s12 = scalar_select %p8994_p2, 1, 0 }
 0x1b2   : > { %p6259_p4 = pnand %p6257_p3, %p8994_p2 }
 0x1b3   : > { %12516 = sst [smem:[#allocation269_spill]] %s12515_s12 }
 0x1b4   : > { %p6260_p5 = pneg %p6259_p4 }
 0x1b6   : > { %p6267_p9 = pnand %p6266_p8, %p6260_p5 }
 0x1b8   : > { %6270 = shalt.err (!%p6267_p9)
}
 0x1b9   : > { %s12517_s23 = sld [smem:[#allocation167_spill]]  ;;  %s6282_s5 = scalar_lea.vmem %s1569_s11, 512 }
 0x1ba   : > { %p6283_p10 = scmp.ne.s32.totalorder %s1569_s11, %s6282_s5  ;;  %p6290_p13 = scmp.lt.s32.totalorder %s1569_s11, %s1569_s11 }
 0x1bb   : > { %p6291_p11 = scmp.lt.s32.totalorder %s6282_s5, %s6282_s5 }
 0x1bc   : > { %p6285_p12 = pnand %p6283_p10, %p8994_p2 }
 0x1bd   : > { %p6292_p3 = por %p6291_p11, %p6290_p13 }
 0x1be   : > { %p6286_p0 = pneg %p6285_p12 }
 0x1bf   : > { %5347 = dma.hbm_to_vmem [thread:$0]  (!%p8988_p1), %s12517_s23, 32, %s1545_s15, [#allocation58]  }
 0x1c0   : > { %p6293_p4 = pnand %p6292_p3, %p6286_p0 }
 0x1c2   : > { %6296 = shalt.err (!%p6293_p4)
}
 0x1c3   : > { %s8217_s9 = smov 128   ;;  %s12518_s2 = sld [smem:[#allocation170_spill]] }
 0x1c4   : > { %s8218_s15 = smov 8   ;;  %s170_s14 = sadd.s32 1, %s12506_s13 }
 0x1c5   : > { %p171_p11 = scmp.ge.s32.totalorder %s170_s14, 8  ;;  %s9010_s23 = sshll.u32 %s12506_s13, 4 }
 0x1c6   : > { %12519 = sst [smem:[#allocation270_spill]] %s9010_s23  ;;  %s188_s20 = sadd.s32 1, %s12503_s8 }
 0x1c7   : > { %s180_s5 = sld [smem:[#allocation4 + %s9010_s23]]  ;;  %s13359_s14 = smov (%p171_p11, %s170_s14), 0 }
 0x1c8   : > { %12520 = sst [smem:[#allocation271_spill]] %s13359_s14  ;;  %s12521_s1 = smov %s13359_s14 }
 0x1c9   : > { %5353 = dma.hbm_to_vmem [thread:$0]  (!%p8988_p1), %s12518_s2, 512, %s1569_s11, [#allocation61], %s8217_s9, %s8217_s9, %s8218_s15  }
 0x1ca   : > { %p195_p13 = scmp.ne.s32.totalorder %s12503_s8, %s12483_s10  ;;  %p11915_p5 = scmp.eq.s32.totalorder %s12508_s19, 0 }
 0x1cb   : > { %s9020_s11 = sshll.u32 %s12521_s1, 4  ;;  %p201_p6 = scmp.ne.s32.totalorder %s12483_s10, %s12482_s28 }
 0x1cc   : > { %s184_s9 = sld [smem:[#allocation4 + %s9020_s11]]  ;;  %p9027_p7 = por %p11915_p5, %p195_p13 }
 0x1cd   : > { %p12524_p8 = scmp.ne.s32.totalorder %s12509_s27, 0  ;;  %s9038_s14 = sadd.s32 1, %s9010_s23 }
 0x1ce   : > { %s12522_s2 = scalar_select %p9027_p7, 1, 0 }
 0x1cf   : > { %p9033_p9 = por %p12524_p8, %p201_p6  ;;  %s215_s1 = sld [smem:[#allocation4 + %s9038_s14]] }
 0x1d0   : > { %12523 = sst [smem:[#allocation272_spill]] %s12522_s2  ;;  %s11793_s28 = sadd.s32 1, %s9020_s11 }
 0x1d1   : > { %s12525_s15 = scalar_select %p9033_p9, 1, 0 }
 0x1d2   : > { %s220_s13 = sld [smem:[#allocation4 + %s11793_s28]]  ;;  %s224_s17 = sadd.s32 1, %s12480_s16 }
 0x1d3   : > { %12526 = sst [smem:[#allocation273_spill]] %s12525_s15  ;;  %p231_p10 = scmp.ne.s32.totalorder %s12480_s16, %s12499_s21 }
 0x1d4   : > { %p237_p12 = scmp.ne.s32.totalorder %s12499_s21, %s12477_s4  ;;  %s9050_s10 = sadd.s32 2, %s9010_s23 }
 0x1d5   : > { %12527 = sst [smem:[#allocation274_spill]] %s9050_s10  ;;  %s185_s0 = ssub.s32 %s180_s5, %s184_s9 }
 0x1d6   : > { %p9055_p0 = por %p231_p10, %p11915_p5  ;;  %p186_p3 = scmp.eq.s32.totalorder %s185_s0, 0 }
 0x1d7   : > { %p9061_p4 = por %p237_p12, %p12524_p8  ;;  %s251_s4 = sld [smem:[#allocation4 + %s9050_s10]] }
 0x1d8   : > { %s12528_s2 = scalar_select %p9055_p0, 1, 0 }
 0x1d9   : > { %s12530_s28 = scalar_select %p9061_p4, 1, 0 }
 0x1da   : > { %12529 = sst [smem:[#allocation275_spill]] %s12528_s2  ;;  %s260_s21 = sadd.s32 1, %s12497_s22 }
 0x1db   : > { %12531 = sst [smem:[#allocation276_spill]] %s12530_s28  ;;  %s221_s5 = ssub.s32 %s215_s1, %s220_s13 }
 0x1dc   : > { %s9068_s6 = scalar_select %p186_p3, %s12503_s8, %s188_s20  }
 0x1dd   : > { %s12533_s9 = sadd.s32 2, %s9020_s11  ;;  %p222_p11 = scmp.eq.s32.totalorder %s221_s5, 0 }
 0x1de   : > { %12532 = sst [smem:[#allocation277_spill]] %s9068_s6  ;;  %p267_p13 = scmp.ne.s32.totalorder %s12497_s22, %s12473_s29 }
 0x1df   : > { %s256_s2 = sld [smem:[#allocation4 + %s12533_s9]]  ;;  %p273_p6 = scmp.ne.s32.totalorder %s12473_s29, %s12471_s30 }
 0x1e0   : > { %s9077_s0 = sadd.s32 3, %s9010_s23  ;;  %p9084_p10 = por %p267_p13, %p11915_p5 }
 0x1e1   : > { %s9080_s20 = scalar_select %p222_p11, %s12480_s16, %s224_s17  }
 0x1e2   : > { %s12535_s13 = scalar_select %p9084_p10, 1, 0 }
 0x1e3   : > { %12534 = sst [smem:[#allocation278_spill]] %s9080_s20  ;;  %p9090_p12 = por %p273_p6, %p12524_p8 }
 0x1e4   : > { %12536 = sst [smem:[#allocation279_spill]] %s12535_s13  ;;  %s11801_s30 = sadd.s32 3, %s9020_s11 }
 0x1e5   : > { %s12537_s1 = scalar_select %p9090_p12, 1, 0 }
 0x1e6   : > { %s287_s6 = sld [smem:[#allocation4 + %s9077_s0]]  ;;  %s257_s9 = ssub.s32 %s251_s4, %s256_s2 }
 0x1e7   : > { %12538 = sst [smem:[#allocation280_spill]] %s12537_s1  ;;  %p258_p3 = scmp.eq.s32.totalorder %s257_s9, 0 }
 0x1e8   : > { %s12539_s5 = sld [smem:[#allocation264_spill]]  ;;  %s296_s20 = sadd.s32 1, %s12469_s25 }
 0x1e9   : > { %s12540_s29 = sld [smem:[#allocation263_spill]]  ;;  %p303_p11 = scmp.ne.s32.totalorder %s12469_s25, %s12493_s3 }
 0x1ea   : > { %s292_s17 = sld [smem:[#allocation4 + %s11801_s30]]  ;;  %p309_p13 = scmp.ne.s32.totalorder %s12493_s3, %s12465_s24 }
 0x1eb   : > { %s9104_s15 = scalar_select %p258_p3, %s12497_s22, %s260_s21  }
 0x1ec   : > { %p9108_p6 = por %p303_p11, %p11915_p5  ;;  %p9114_p12 = por %p309_p13, %p12524_p8 }
 0x1ed   : > { %12541 = sst [smem:[#allocation281_spill]] %s9104_s15  ;;  %s9119_s9 = sadd.s32 4, %s9010_s23 }
 0x1ee   : > { %s12542_s2 = scalar_select %p9108_p6, 1, 0 }
 0x1ef   : > { %s12544_s4 = scalar_select %p9114_p12, 1, 0 }
 0x1f0   : > { %12543 = sst [smem:[#allocation282_spill]] %s12542_s2  ;;  %s11813_s30 = sadd.s32 4, %s9020_s11 }
 0x1f1   : > { %12545 = sst [smem:[#allocation283_spill]] %s12544_s4  ;;  %s293_s24 = ssub.s32 %s287_s6, %s292_s17 }
 0x1f2   : > { %12546 = sst [smem:[#allocation284_spill]] %s9119_s9  ;;  %p294_p3 = scmp.eq.s32.totalorder %s293_s24, 0 }
 0x1f3   : > { %s12547_s3 = sld [smem:[#allocation261_spill]]  ;;  %s332_s28 = sadd.s32 1, %s12539_s5 }
 0x1f4   : > { %s323_s21 = sld [smem:[#allocation4 + %s9119_s9]]  ;;  %p339_p11 = scmp.ne.s32.totalorder %s12539_s5, %s12540_s29 }
 0x1f5   : > { %s12548_s15 = sld [smem:[#allocation260_spill]]  ;;  %p345_p12 = scmp.ne.s32.totalorder %s12540_s29, %s12459_s26 }
 0x1f6   : > { %s328_s1 = sld [smem:[#allocation4 + %s11813_s30]]  ;;  %p9133_p13 = por %p339_p11, %p11915_p5 }
 0x1f7   : > { %s9129_s4 = scalar_select %p294_p3, %s12469_s25, %s296_s20  }
 0x1f8   : > { %s12550_s6 = scalar_select %p9133_p13, 1, 0 }
 0x1f9   : > { %12549 = sst [smem:[#allocation285_spill]] %s9129_s4  ;;  %s9140_s17 = sadd.s32 5, %s9010_s23 }
 0x1fa   : > { %12551 = sst [smem:[#allocation286_spill]] %s12550_s6  ;;  %s11821_s24 = sadd.s32 5, %s9020_s11 }
 0x1fb   : > { %p9145_p4 = por %p345_p12, %p12524_p8  ;;  %s359_s20 = sld [smem:[#allocation4 + %s9140_s17]] }
 0x1fc   : > { %s12554_s4 = sld [smem:[#allocation258_spill]]  ;;  %s329_s13 = ssub.s32 %s323_s21, %s328_s1 }
 0x1fd   : > { %s12552_s30 = scalar_select %p9145_p4, 1, 0 }
 0x1fe   : > { %s12555_s22 = sld [smem:[#allocation257_spill]]  ;;  %p330_p3 = scmp.eq.s32.totalorder %s329_s13, 0 }
 0x1ff   : > { %12553 = sst [smem:[#allocation287_spill]] %s12552_s30  ;;  %s368_s29 = sadd.s32 1, %s12547_s3 }
 0x200   : > { %s364_s8 = sld [smem:[#allocation4 + %s11821_s24]]  ;;  %p375_p11 = scmp.ne.s32.totalorder %s12547_s3, %s12548_s15 }
 0x201   : > { %p381_p12 = scmp.ne.s32.totalorder %s12548_s15, %s12453_s18  ;;  %s13361_s5 = smov (!%p330_p3, %s12539_s5), %s332_s28 }
 0x202   : > { %12556 = sst [smem:[#allocation288_spill]] %s13361_s5  ;;  %p9162_p4 = por %p375_p11, %p11915_p5 }
 0x203   : > { %p9168_p9 = por %p381_p12, %p12524_p8  ;;  %s9173_s13 = sadd.s32 6, %s9010_s23 }
 0x204   : > { %s12557_s26 = scalar_select %p9162_p4, 1, 0 }
 0x205   : > { %s12559_s1 = scalar_select %p9168_p9, 1, 0 }
 0x206   : > { %12558 = sst [smem:[#allocation289_spill]] %s12557_s26  ;;  %s11826_s21 = sadd.s32 6, %s9020_s11 }
 0x207   : > { %12560 = sst [smem:[#allocation290_spill]] %s12559_s1  ;;  %s365_s18 = ssub.s32 %s359_s20, %s364_s8 }
 0x208   : > { %12561 = sst [smem:[#allocation291_spill]] %s9173_s13  ;;  %p366_p3 = scmp.eq.s32.totalorder %s365_s18, 0 }
 0x209   : > { %s12562_s15 = sld [smem:[#allocation255_spill]]  ;;  %s404_s30 = sadd.s32 1, %s12554_s4 }
 0x20a   : > { %s395_s28 = sld [smem:[#allocation4 + %s9173_s13]]  ;;  %p411_p11 = scmp.ne.s32.totalorder %s12554_s4, %s12555_s22 }
 0x20b   : > { %s12563_s5 = sld [smem:[#allocation254_spill]]  ;;  %s13363_s3 = smov (!%p366_p3, %s12547_s3), %s368_s29 }
 0x20c   : > { %s12564_s24 = sld [smem:[#allocation253_spill]]  ;;  %p9187_p12 = por %p411_p11, %p11915_p5 }
 0x20d   : > { %s400_s25 = sld [smem:[#allocation4 + %s11826_s21]]  ;;  %p417_p9 = scmp.ne.s32.totalorder %s12555_s22, %s12447_s7 }
 0x20e   : > { %12565 = sst [smem:[#allocation253_spill]] %s13363_s3  ;;  %s9194_s20 = sadd.s32 7, %s9010_s23 }
 0x20f   : > { %s12566_s8 = scalar_select %p9187_p12, 1, 0 }
 0x210   : > { %s11837_s18 = sadd.s32 7, %s9020_s11  ;;  %p9199_p13 = por %p417_p9, %p12524_p8 }
 0x211   : > { %12567 = sst [smem:[#allocation292_spill]] %s12566_s8  ;;  %s440_s22 = sadd.s32 1, %s12562_s15 }
 0x212   : > { %s12568_s21 = scalar_select %p9199_p13, 1, 0 }
 0x213   : > { %s431_s29 = sld [smem:[#allocation4 + %s9194_s20]]  ;;  %s401_s1 = ssub.s32 %s395_s28, %s400_s25 }
 0x214   : > { %12569 = sst [smem:[#allocation293_spill]] %s12568_s21  ;;  %p402_p3 = scmp.eq.s32.totalorder %s401_s1, 0 }
 0x215   : > { %s12570_s3 = sld [smem:[#allocation252_spill]]  ;;  %p447_p11 = scmp.ne.s32.totalorder %s12562_s15, %s12563_s5 }
 0x216   : > { %s12571_s6 = sld [smem:[#allocation251_spill]]  ;;  %p453_p9 = scmp.ne.s32.totalorder %s12563_s5, %s12564_s24 }
 0x217   : > { %s436_s26 = sld [smem:[#allocation4 + %s11837_s18]]  ;;  %s13365_s4 = smov (!%p402_p3, %s12554_s4), %s404_s30 }
 0x218   : > { %s12572_s7 = sld [smem:[#allocation243_spill]]  ;;  %p9216_p13 = por %p447_p11, %p11915_p5 }
 0x219   : > { %12573 = sst [smem:[#allocation243_spill]] %s13365_s4  ;;  %p9222_p12 = por %p453_p9, %p12524_p8 }
 0x21a   : > { %s12574_s25 = scalar_select %p9216_p13, 1, 0 }
 0x21b   : > { %s12576_s28 = scalar_select %p9222_p12, 1, 0 }
 0x21c   : > { %12575 = sst [smem:[#allocation294_spill]] %s12574_s25  ;;  %s9227_s1 = sadd.s32 8, %s9010_s23 }
 0x21d   : > { %12577 = sst [smem:[#allocation295_spill]] %s12576_s28  ;;  %s11844_s18 = sadd.s32 8, %s9020_s11 }
 0x21e   : > { %12578 = sst [smem:[#allocation296_spill]] %s9227_s1  ;;  %s437_s24 = ssub.s32 %s431_s29, %s436_s26 }
 0x21f   : > { %s12579_s5 = sld [smem:[#allocation242_spill]]  ;;  %p438_p3 = scmp.eq.s32.totalorder %s437_s24, 0 }
 0x220   : > { %s467_s30 = sld [smem:[#allocation4 + %s9227_s1]]  ;;  %s476_s25 = sadd.s32 1, %s12570_s3 }
 0x221   : > { %s12580_s4 = sld [smem:[#allocation241_spill]]  ;;  %p483_p11 = scmp.ne.s32.totalorder %s12570_s3, %s12571_s6 }
 0x222   : > { %s12581_s21 = sld [smem:[#allocation240_spill]]  ;;  %s13367_s15 = smov (!%p438_p3, %s12562_s15), %s440_s22 }
 0x223   : > { %s472_s8 = sld [smem:[#allocation4 + %s11844_s18]]  ;;  %p9241_p9 = por %p483_p11, %p11915_p5 }
 0x224   : > { %12582 = sst [smem:[#allocation240_spill]] %s13367_s15  ;;  %p489_p12 = scmp.ne.s32.totalorder %s12571_s6, %s12572_s7 }
 0x225   : > { %s12583_s26 = scalar_select %p9241_p9, 1, 0 }
 0x226   : > { %s9248_s29 = sadd.s32 9, %s9010_s23  ;;  %s11852_s24 = sadd.s32 9, %s9020_s11 }
 0x227   : > { %12584 = sst [smem:[#allocation297_spill]] %s12583_s26  ;;  %p9253_p10 = por %p489_p12, %p12524_p8 }
 0x228   : > { %12585 = sst [smem:[#allocation298_spill]] %s9248_s29  ;;  %s512_s6 = sadd.s32 1, %s12579_s5 }
 0x229   : > { %s12586_s18 = scalar_select %p9253_p10, 1, 0 }
 0x22a   : > { %s503_s22 = sld [smem:[#allocation4 + %s9248_s29]]  ;;  %s473_s28 = ssub.s32 %s467_s30, %s472_s8 }
 0x22b   : > { %12587 = sst [smem:[#allocation299_spill]] %s12586_s18  ;;  %p474_p3 = scmp.eq.s32.totalorder %s473_s28, 0 }
 0x22c   : > { %s12588_s15 = sld [smem:[#allocation239_spill]]  ;;  %p519_p11 = scmp.ne.s32.totalorder %s12579_s5, %s12580_s4 }
 0x22d   : > { %s12589_s2 = sld [smem:[#allocation238_spill]]  ;;  %p525_p12 = scmp.ne.s32.totalorder %s12580_s4, %s12581_s21 }
 0x22e   : > { %s508_s16 = sld [smem:[#allocation4 + %s11852_s24]]  ;;  %s13369_s3 = smov (!%p474_p3, %s12570_s3), %s476_s25 }
 0x22f   : > { %s12590_s7 = sld [smem:[#allocation237_spill]]  ;;  %p9270_p10 = por %p519_p11, %p11915_p5 }
 0x230   : > { %12591 = sst [smem:[#allocation237_spill]] %s13369_s3  ;;  %p9276_p9 = por %p525_p12, %p12524_p8 }
 0x231   : > { %s12592_s8 = scalar_select %p9270_p10, 1, 0 }
 0x232   : > { %s12594_s30 = scalar_select %p9276_p9, 1, 0 }
 0x233   : > { %12593 = sst [smem:[#allocation300_spill]] %s12592_s8  ;;  %s9281_s28 = sadd.s32 10, %s9010_s23 }
 0x234   : > { %12595 = sst [smem:[#allocation301_spill]] %s12594_s30  ;;  %s11863_s24 = sadd.s32 10, %s9020_s11 }
 0x235   : > { %12596 = sst [smem:[#allocation302_spill]] %s9281_s28  ;;  %s509_s21 = ssub.s32 %s503_s22, %s508_s16 }
 0x236   : > { %s12597_s4 = sld [smem:[#allocation236_spill]]  ;;  %p510_p3 = scmp.eq.s32.totalorder %s509_s21, 0 }
 0x237   : > { %s539_s25 = sld [smem:[#allocation4 + %s9281_s28]]  ;;  %s548_s8 = sadd.s32 1, %s12588_s15 }
 0x238   : > { %s12598_s3 = sld [smem:[#allocation235_spill]]  ;;  %p555_p11 = scmp.ne.s32.totalorder %s12588_s15, %s12589_s2 }
 0x239   : > { %s12599_s18 = sld [smem:[#allocation234_spill]]  ;;  %s13371_s5 = smov (!%p510_p3, %s12579_s5), %s512_s6 }
 0x23a   : > { %s544_s26 = sld [smem:[#allocation4 + %s11863_s24]]  ;;  %p9295_p12 = por %p555_p11, %p11915_p5 }
 0x23b   : > { %12600 = sst [smem:[#allocation234_spill]] %s13371_s5  ;;  %p561_p9 = scmp.ne.s32.totalorder %s12589_s2, %s12590_s7 }
 0x23c   : > { %s12601_s16 = scalar_select %p9295_p12, 1, 0 }
 0x23d   : > { %s9302_s22 = sadd.s32 11, %s9010_s23  ;;  %s11870_s21 = sadd.s32 11, %s9020_s11 }
 0x23e   : > { %12602 = sst [smem:[#allocation303_spill]] %s12601_s16  ;;  %p9307_p7 = por %p561_p9, %p12524_p8 }
 0x23f   : > { %12603 = sst [smem:[#allocation304_spill]] %s9302_s22  ;;  %s584_s2 = sadd.s32 1, %s12597_s4 }
 0x240   : > { %s12604_s24 = scalar_select %p9307_p7, 1, 0 }
 0x241   : > { %s575_s6 = sld [smem:[#allocation4 + %s9302_s22]]  ;;  %s545_s29 = ssub.s32 %s539_s25, %s544_s26 }
 0x242   : > { %12605 = sst [smem:[#allocation305_spill]] %s12604_s24  ;;  %p546_p3 = scmp.eq.s32.totalorder %s545_s29, 0 }
 0x243   : > { %s12606_s5 = sld [smem:[#allocation233_spill]]  ;;  %p591_p11 = scmp.ne.s32.totalorder %s12597_s4, %s12598_s3 }
 0x244   : > { %s12607_s30 = sld [smem:[#allocation232_spill]]  ;;  %p597_p9 = scmp.ne.s32.totalorder %s12598_s3, %s12599_s18 }
 0x245   : > { %s580_s12 = sld [smem:[#allocation4 + %s11870_s21]]  ;;  %s13373_s15 = smov (!%p546_p3, %s12588_s15), %s548_s8 }
 0x246   : > { %s12608_s7 = sld [smem:[#allocation231_spill]]  ;;  %p9324_p7 = por %p591_p11, %p11915_p5 }
 0x247   : > { %12609 = sst [smem:[#allocation231_spill]] %s13373_s15  ;;  %p9330_p12 = por %p597_p9, %p12524_p8 }
 0x248   : > { %s12610_s26 = scalar_select %p9324_p7, 1, 0 }
 0x249   : > { %s12612_s25 = scalar_select %p9330_p12, 1, 0 }
 0x24a   : > { %12611 = sst [smem:[#allocation306_spill]] %s12610_s26  ;;  %s9335_s29 = sadd.s32 12, %s9010_s23 }
 0x24b   : > { %12613 = sst [smem:[#allocation307_spill]] %s12612_s25  ;;  %s11881_s21 = sadd.s32 12, %s9020_s11 }
 0x24c   : > { %12614 = sst [smem:[#allocation308_spill]] %s9335_s29  ;;  %s581_s3 = ssub.s32 %s575_s6, %s580_s12 }
 0x24d   : > { %s12615_s18 = sld [smem:[#allocation230_spill]]  ;;  %p582_p3 = scmp.eq.s32.totalorder %s581_s3, 0 }
 0x24e   : > { %s611_s8 = sld [smem:[#allocation4 + %s9335_s29]]  ;;  %s620_s26 = sadd.s32 1, %s12606_s5 }
 0x24f   : > { %s12616_s15 = sld [smem:[#allocation229_spill]]  ;;  %p627_p11 = scmp.ne.s32.totalorder %s12606_s5, %s12607_s30 }
 0x250   : > { %s12617_s24 = sld [smem:[#allocation228_spill]]  ;;  %s13375_s4 = smov (!%p582_p3, %s12597_s4), %s584_s2 }
 0x251   : > { %s616_s16 = sld [smem:[#allocation4 + %s11881_s21]]  ;;  %p9349_p9 = por %p627_p11, %p11915_p5 }
 0x252   : > { %12618 = sst [smem:[#allocation228_spill]] %s13375_s4  ;;  %p633_p12 = scmp.ne.s32.totalorder %s12607_s30, %s12608_s7 }
 0x253   : > { %s12619_s12 = scalar_select %p9349_p9, 1, 0 }
 0x254   : > { %s9356_s6 = sadd.s32 13, %s9010_s23  ;;  %s11890_s3 = sadd.s32 13, %s9020_s11 }
 0x255   : > { %12620 = sst [smem:[#allocation309_spill]] %s12619_s12  ;;  %p9361_p7 = por %p633_p12, %p12524_p8 }
 0x256   : > { %12621 = sst [smem:[#allocation310_spill]] %s9356_s6  ;;  %s656_s30 = sadd.s32 1, %s12615_s18 }
 0x257   : > { %s12622_s21 = scalar_select %p9361_p7, 1, 0 }
 0x258   : > { %s647_s2 = sld [smem:[#allocation4 + %s9356_s6]]  ;;  %s617_s25 = ssub.s32 %s611_s8, %s616_s16 }
 0x259   : > { %12623 = sst [smem:[#allocation311_spill]] %s12622_s21  ;;  %p618_p3 = scmp.eq.s32.totalorder %s617_s25, 0 }
 0x25a   : > { %s12624_s4 = sld [smem:[#allocation227_spill]]  ;;  %p663_p11 = scmp.ne.s32.totalorder %s12615_s18, %s12616_s15 }
 0x25b   : > { %s12625_s29 = sld [smem:[#allocation226_spill]]  ;;  %p669_p12 = scmp.ne.s32.totalorder %s12616_s15, %s12617_s24 }
 0x25c   : > { %s652_s22 = sld [smem:[#allocation4 + %s11890_s3]]  ;;  %s13377_s5 = smov (!%p618_p3, %s12606_s5), %s620_s26 }
 0x25d   : > { %s12626_s7 = sld [smem:[#allocation225_spill]]  ;;  %p9378_p7 = por %p663_p11, %p11915_p5 }
 0x25e   : > { %12627 = sst [smem:[#allocation225_spill]] %s13377_s5  ;;  %p9384_p9 = por %p669_p12, %p12524_p8 }
 0x25f   : > { %s12628_s16 = scalar_select %p9378_p7, 1, 0 }
 0x260   : > { %s12630_s8 = scalar_select %p9384_p9, 1, 0 }
 0x261   : > { %12629 = sst [smem:[#allocation312_spill]] %s12628_s16  ;;  %s9389_s25 = sadd.s32 14, %s9010_s23 }
 0x262   : > { %12631 = sst [smem:[#allocation313_spill]] %s12630_s8  ;;  %s11898_s3 = sadd.s32 14, %s9020_s11 }
 0x263   : > { %12632 = sst [smem:[#allocation314_spill]] %s9389_s25  ;;  %s653_s15 = ssub.s32 %s647_s2, %s652_s22 }
 0x264   : > { %s12633_s24 = sld [smem:[#allocation224_spill]]  ;;  %p654_p3 = scmp.eq.s32.totalorder %s653_s15, 0 }
 0x265   : > { %s683_s26 = sld [smem:[#allocation4 + %s9389_s25]]  ;;  %s692_s16 = sadd.s32 1, %s12624_s4 }
 0x266   : > { %s12634_s5 = sld [smem:[#allocation223_spill]]  ;;  %p699_p11 = scmp.ne.s32.totalorder %s12624_s4, %s12625_s29 }
 0x267   : > { %s12635_s21 = sld [smem:[#allocation222_spill]]  ;;  %s13379_s18 = smov (!%p654_p3, %s12615_s18), %s656_s30 }
 0x268   : > { %s688_s12 = sld [smem:[#allocation4 + %s11898_s3]]  ;;  %p9403_p12 = por %p699_p11, %p11915_p5 }
 0x269   : > { %12636 = sst [smem:[#allocation222_spill]] %s13379_s18  ;;  %p705_p9 = scmp.ne.s32.totalorder %s12625_s29, %s12626_s7 }
 0x26a   : > { %s12637_s22 = scalar_select %p9403_p12, 1, 0 }
 0x26b   : > { %s12639_s2 = sld [smem:[#allocation221_spill]]  ;;  %s9410_s15 = sadd.s32 15, %s9010_s23 }
 0x26c   : > { %12638 = sst [smem:[#allocation315_spill]] %s12637_s22  ;;  %s11912_s3 = sadd.s32 15, %s9020_s11 }
 0x26d   : > { %12640 = sst [smem:[#allocation316_spill]] %s9410_s15  ;;  %p9415_p7 = por %p705_p9, %p12524_p8 }
 0x26e   : > { %s12643_s30 = sld [smem:[#allocation220_spill]]  ;;  %s689_s6 = ssub.s32 %s683_s26, %s688_s12 }
 0x26f   : > { %s12641_s25 = scalar_select %p9415_p7, 1, 0 }
 0x270   : > { %s719_s18 = sld [smem:[#allocation4 + %s9410_s15]]  ;;  %p690_p3 = scmp.eq.s32.totalorder %s689_s6, 0 }
 0x271   : > { %12642 = sst [smem:[#allocation317_spill]] %s12641_s25  ;;  %s728_s29 = sadd.s32 1, %s12633_s24 }
 0x272   : > { %s12644_s8 = sld [smem:[#allocation219_spill]]  ;;  %p735_p11 = scmp.ne.s32.totalorder %s12633_s24, %s12634_s5 }
 0x273   : > { %s724_s22 = sld [smem:[#allocation4 + %s11912_s3]]  ;;  %p741_p9 = scmp.ne.s32.totalorder %s12634_s5, %s12635_s21 }
 0x274   : > { %s12645_s7 = sld [smem:[#allocation218_spill]]  ;;  %s13381_s4 = smov (!%p690_p3, %s12624_s4), %s692_s16 }
 0x275   : > { %12646 = sst [smem:[#allocation219_spill]] %s13381_s4  ;;  %p9432_p7 = por %p735_p11, %p11915_p5 }
 0x276   : > { %s12649_s12 = sld [smem:[#allocation217_spill]]  ;;  %p9438_p12 = por %p741_p9, %p12524_p8 }
 0x277   : > { %s12647_s15 = scalar_select %p9432_p7, 1, 0 }
 0x278   : > { %s12650_s26 = scalar_select %p9438_p12, 1, 0 }
 0x279   : > { %12648 = sst [smem:[#allocation318_spill]] %s12647_s15  ;;  %s762_s28 = sadd.s32 1, %s12639_s2 }
 0x27a   : > { %12651 = sst [smem:[#allocation319_spill]] %s12650_s26  ;;  %s725_s21 = ssub.s32 %s719_s18, %s724_s22 }
 0x27b   : > { %s754_s6 = sld [smem:[#allocation5 + %s9010_s23]]  ;;  %p726_p3 = scmp.eq.s32.totalorder %s725_s21, 0 }
 0x27c   : > { %s12652_s3 = sld [smem:[#allocation216_spill]]  ;;  %p769_p11 = scmp.ne.s32.totalorder %s12639_s2, %s12643_s30 }
 0x27d   : > { %s758_s4 = sld [smem:[#allocation5 + %s9020_s11]]  ;;  %p775_p5 = scmp.ne.s32.totalorder %s12643_s30, %s12644_s8 }
 0x27e   : > { %s789_s16 = sld [smem:[#allocation5 + %s9038_s14]]  ;;  %s13383_s24 = smov (!%p726_p3, %s12633_s24), %s728_s29 }
 0x27f   : > { %s12653_s5 = sld [smem:[#allocation215_spill]]  ;;  %p12655_p9 = scmp.eq.s32.totalorder %s12508_s19, 0 }
 0x280   : > { %12654 = sst [smem:[#allocation216_spill]] %s13383_s24  ;;  %p9461_p7 = por %p775_p5, %p12524_p8 }
 0x281   : > { %p9455_p12 = por %p769_p11, %p12655_p9  ;;  %s12658_s23 = sld [smem:[#allocation214_spill]] }
 0x282   : > { %s12659_s22 = scalar_select %p9461_p7, 1, 0 }
 0x283   : > { %s12656_s26 = scalar_select %p9455_p12, 1, 0 }
 0x284   : > { %12660 = sst [smem:[#allocation321_spill]] %s12659_s22  ;;  %s12661_s18 = sadd.s32 1, %s9020_s11 }
 0x285   : > { %12657 = sst [smem:[#allocation320_spill]] %s12656_s26  ;;  %s798_s30 = sadd.s32 1, %s12645_s7 }
 0x286   : > { %s12662_s21 = sld [smem:[#allocation213_spill]]  ;;  %s759_s24 = ssub.s32 %s754_s6, %s758_s4 }
 0x287   : > { %s794_s8 = sld [smem:[#allocation5 + %s12661_s18]]  ;;  %p805_p3 = scmp.ne.s32.totalorder %s12645_s7, %s12649_s12 }
 0x288   : > { %p760_p11 = scmp.eq.s32.totalorder %s759_s24, 0  ;;  %p811_p9 = scmp.ne.s32.totalorder %s12649_s12, %s12652_s3 }
 0x289   : > { %p12663_p12 = scmp.eq.s32.totalorder %s12508_s19, 0  ;;  %s825_s25 = sld [smem:[#allocation5 + %s9050_s10]] }
 0x28a   : > { %s12665_s22 = sld [smem:[#allocation212_spill]]  ;;  %s13385_s2 = smov (!%p760_p11, %s12639_s2), %s762_s28 }
 0x28b   : > { %p9474_p10 = por %p805_p3, %p12663_p12  ;;  %12666 = sst [smem:[#allocation213_spill]] %s13385_s2 }
 0x28c   : > { %s12667_s18 = sld [smem:[#allocation211_spill]]  ;;  %p9484_p5 = por %p811_p9, %p12524_p8 }
 0x28d   : > { %s12664_s29 = scalar_select %p9474_p10, 1, 0 }
 0x28e   : > { %s12668_s6 = scalar_select %p9484_p5, 1, 0 }
 0x28f   : > { %s12670_s4 = sadd.s32 2, %s9020_s11  ;;  %s12671_s24 = sld [smem:[#allocation210_spill]] }
 0x290   : > { %12669 = sst [smem:[#allocation322_spill]] %s12668_s6  ;;  %s795_s12 = ssub.s32 %s789_s16, %s794_s8 }
 0x291   : > { %s830_s3 = sld [smem:[#allocation5 + %s12670_s4]]  ;;  %s834_s26 = sadd.s32 1, %s12653_s5 }
 0x292   : > { %p796_p12 = scmp.eq.s32.totalorder %s795_s12, 0  ;;  %p841_p3 = scmp.ne.s32.totalorder %s12653_s5, %s12658_s23 }
 0x293   : > { %s12672_s28 = sld [smem:[#allocation209_spill]]  ;;  %p847_p11 = scmp.ne.s32.totalorder %s12658_s23, %s12662_s21 }
 0x294   : > { %s861_s2 = sld [smem:[#allocation5 + %s9077_s0]]  ;;  %s13387_s7 = smov (!%p796_p12, %s12645_s7), %s798_s30 }
 0x295   : > { %12673 = sst [smem:[#allocation210_spill]] %s13387_s7  ;;  %p12674_p9 = scmp.eq.s32.totalorder %s12508_s19, 0 }
 0x296   : > { %s12677_s4 = sld [smem:[#allocation208_spill]]  ;;  %p9507_p7 = por %p847_p11, %p12524_p8 }
 0x297   : > { %p9501_p5 = por %p841_p3, %p12674_p9  ;;  %s12680_s8 = sld [smem:[#allocation207_spill]] }
 0x298   : > { %s12678_s16 = scalar_select %p9507_p7, 1, 0 }
 0x299   : > { %s12675_s6 = scalar_select %p9501_p5, 1, 0 }
 0x29a   : > { %12679 = sst [smem:[#allocation324_spill]] %s12678_s16  ;;  %s831_s12 = ssub.s32 %s825_s25, %s830_s3 }
 0x29b   : > { %12676 = sst [smem:[#allocation323_spill]] %s12675_s6  ;;  %s12681_s23 = sadd.s32 3, %s9020_s11 }
 0x29c   : > { %s866_s21 = sld [smem:[#allocation5 + %s12681_s23]]  ;;  %p832_p12 = scmp.eq.s32.totalorder %s831_s12, 0 }
 0x29d   : > { %s870_s7 = sadd.s32 1, %s12665_s22  ;;  %p877_p3 = scmp.ne.s32.totalorder %s12665_s22, %s12667_s18 }
 0x29e   : > { %p883_p9 = scmp.ne.s32.totalorder %s12667_s18, %s12671_s24  ;;  %s12682_s30 = sld [smem:[#allocation206_spill]] }
 0x29f   : > { %s13389_s5 = smov (!%p832_p12, %s12653_s5), %s834_s26  ;;  %p12684_p11 = scmp.eq.s32.totalorder %s12508_s19, 0 }
 0x2a0   : > { %12683 = sst [smem:[#allocation207_spill]] %s13389_s5  ;;  %p9529_p7 = por %p883_p9, %p12524_p8 }
 0x2a1   : > { %p9523_p5 = por %p877_p3, %p12684_p11  ;;  %s12686_s25 = sld [smem:[#allocation205_spill]] }
 0x2a2   : > { %s12687_s3 = scalar_select %p9529_p7, 1, 0 }
 0x2a3   : > { %s12685_s16 = scalar_select %p9523_p5, 1, 0 }
 0x2a4   : > { %12688 = sst [smem:[#allocation325_spill]] %s12687_s3  ;;  %s906_s6 = sadd.s32 1, %s12672_s28 }
 0x2a5   : > { %s897_s12 = sld [smem:[#allocation5 + %s9119_s9]]  ;;  %s867_s18 = ssub.s32 %s861_s2, %s866_s21 }
 0x2a6   : > { %s12689_s23 = sld [smem:[#allocation204_spill]]  ;;  %s12690_s26 = sadd.s32 4, %s9020_s11 }
 0x2a7   : > { %s902_s5 = sld [smem:[#allocation5 + %s12690_s26]]  ;;  %p868_p12 = scmp.eq.s32.totalorder %s867_s18, 0 }
 0x2a8   : > { %p913_p3 = scmp.ne.s32.totalorder %s12672_s28, %s12677_s4  ;;  %p919_p11 = scmp.ne.s32.totalorder %s12677_s4, %s12680_s8 }
 0x2a9   : > { %s933_s24 = sld [smem:[#allocation5 + %s9140_s17]]  ;;  %s13391_s22 = smov (!%p868_p12, %s12665_s22), %s870_s7 }
 0x2aa   : > { %s12691_s15 = sld [smem:[#allocation203_spill]]  ;;  %p12693_p9 = scmp.eq.s32.totalorder %s12508_s19, 0 }
 0x2ab   : > { %12692 = sst [smem:[#allocation204_spill]] %s13391_s22  ;;  %p9553_p5 = por %p919_p11, %p12524_p8 }
 0x2ac   : > { %p9547_p7 = por %p913_p3, %p12693_p9  ;;  %s12696_s2 = sld [smem:[#allocation202_spill]] }
 0x2ad   : > { %s12697_s21 = scalar_select %p9553_p5, 1, 0 }
 0x2ae   : > { %s12694_s3 = scalar_select %p9547_p7, 1, 0 }
 0x2af   : > { %12698 = sst [smem:[#allocation327_spill]] %s12697_s21  ;;  %s12699_s18 = sadd.s32 5, %s9020_s11 }
 0x2b0   : > { %12695 = sst [smem:[#allocation326_spill]] %s12694_s3  ;;  %s942_s8 = sadd.s32 1, %s12682_s30 }
 0x2b1   : > { %s12700_s26 = sld [smem:[#allocation201_spill]]  ;;  %s903_s7 = ssub.s32 %s897_s12, %s902_s5 }
 0x2b2   : > { %s938_s4 = sld [smem:[#allocation5 + %s12699_s18]]  ;;  %p949_p12 = scmp.ne.s32.totalorder %s12682_s30, %s12686_s25 }
 0x2b3   : > { %p904_p3 = scmp.eq.s32.totalorder %s903_s7, 0  ;;  %p955_p9 = scmp.ne.s32.totalorder %s12686_s25, %s12689_s23 }
 0x2b4   : > { %p12701_p7 = scmp.eq.s32.totalorder %s12508_s19, 0  ;;  %s969_s21 = sld [smem:[#allocation5 + %s9173_s13]] }
 0x2b5   : > { %s12703_s3 = sld [smem:[#allocation200_spill]]  ;;  %s13393_s28 = smov (!%p904_p3, %s12672_s28), %s906_s6 }
 0x2b6   : > { %p9566_p10 = por %p949_p12, %p12701_p7  ;;  %12704 = sst [smem:[#allocation201_spill]] %s13393_s28 }
 0x2b7   : > { %s12705_s18 = sld [smem:[#allocation199_spill]]  ;;  %p9576_p11 = por %p955_p9, %p12524_p8 }
 0x2b8   : > { %s12702_s22 = scalar_select %p9566_p10, 1, 0 }
 0x2b9   : > { %s12706_s12 = scalar_select %p9576_p11, 1, 0 }
 0x2ba   : > { %s12708_s5 = sadd.s32 6, %s9020_s11  ;;  %s12709_s7 = sld [smem:[#allocation198_spill]] }
 0x2bb   : > { %12707 = sst [smem:[#allocation328_spill]] %s12706_s12  ;;  %s939_s23 = ssub.s32 %s933_s24, %s938_s4 }
 0x2bc   : > { %s974_s25 = sld [smem:[#allocation5 + %s12708_s5]]  ;;  %s978_s9 = sadd.s32 1, %s12691_s15 }
 0x2bd   : > { %p940_p7 = scmp.eq.s32.totalorder %s939_s23, 0  ;;  %p985_p12 = scmp.ne.s32.totalorder %s12691_s15, %s12696_s2 }
 0x2be   : > { %s12710_s6 = sld [smem:[#allocation197_spill]]  ;;  %p991_p3 = scmp.ne.s32.totalorder %s12696_s2, %s12700_s26 }
 0x2bf   : > { %s1005_s28 = sld [smem:[#allocation5 + %s9194_s20]]  ;;  %s13395_s30 = smov (!%p940_p7, %s12682_s30), %s942_s8 }
 0x2c0   : > { %12711 = sst [smem:[#allocation198_spill]] %s13395_s30  ;;  %p12712_p9 = scmp.eq.s32.totalorder %s12508_s19, 0 }
 0x2c1   : > { %s12715_s5 = sld [smem:[#allocation196_spill]]  ;;  %p9599_p5 = por %p991_p3, %p12524_p8 }
 0x2c2   : > { %p9593_p11 = por %p985_p12, %p12712_p9  ;;  %s12718_s4 = sld [smem:[#allocation195_spill]] }
 0x2c3   : > { %s12716_s24 = scalar_select %p9599_p5, 1, 0 }
 0x2c4   : > { %s12713_s10 = scalar_select %p9593_p11, 1, 0 }
 0x2c5   : > { %12717 = sst [smem:[#allocation330_spill]] %s12716_s24  ;;  %s975_s23 = ssub.s32 %s969_s21, %s974_s25 }
 0x2c6   : > { %12714 = sst [smem:[#allocation329_spill]] %s12713_s10  ;;  %s12719_s2 = sadd.s32 7, %s9020_s11 }
 0x2c7   : > { %s12720_s26 = sld [smem:[#allocation298_spill]]  ;;  %p976_p7 = scmp.eq.s32.totalorder %s975_s23, 0 }
 0x2c8   : > { %s1010_s12 = sld [smem:[#allocation5 + %s12719_s2]]  ;;  %s1014_s8 = sadd.s32 1, %s12703_s3 }
 0x2c9   : > { %p1021_p12 = scmp.ne.s32.totalorder %s12703_s3, %s12705_s18  ;;  %p1027_p9 = scmp.ne.s32.totalorder %s12705_s18, %s12709_s7 }
 0x2ca   : > { %s12721_s30 = sld [smem:[#allocation194_spill]]  ;;  %s13397_s15 = smov (!%p976_p7, %s12691_s15), %s978_s9 }
 0x2cb   : > { %12722 = sst [smem:[#allocation195_spill]] %s13397_s15  ;;  %p12723_p3 = scmp.eq.s32.totalorder %s12508_s19, 0 }
 0x2cc   : > { %s12726_s21 = sld [smem:[#allocation193_spill]]  ;;  %p9621_p5 = por %p1027_p9, %p12524_p8 }
 0x2cd   : > { %p9615_p11 = por %p1021_p12, %p12723_p3  ;;  %s1041_s23 = sld [smem:[#allocation5 + %s9227_s1]] }
 0x2ce   : > { %s12727_s25 = scalar_select %p9621_p5, 1, 0 }
 0x2cf   : > { %s12724_s24 = scalar_select %p9615_p11, 1, 0 }
 0x2d0   : > { %12728 = sst [smem:[#allocation332_spill]] %s12727_s25  ;;  %s1050_s10 = sadd.s32 1, %s12710_s6 }
 0x2d1   : > { %12725 = sst [smem:[#allocation331_spill]] %s12724_s24  ;;  %s1011_s18 = ssub.s32 %s1005_s28, %s1010_s12 }
 0x2d2   : > { %s12729_s2 = sld [smem:[#allocation192_spill]]  ;;  %s12730_s9 = sadd.s32 8, %s9020_s11 }
 0x2d3   : > { %s12731_s7 = sld [smem:[#allocation302_spill]]  ;;  %p1012_p7 = scmp.eq.s32.totalorder %s1011_s18, 0 }
 0x2d4   : > { %s1046_s15 = sld [smem:[#allocation5 + %s12730_s9]]  ;;  %p1057_p12 = scmp.ne.s32.totalorder %s12710_s6, %s12715_s5 }
 0x2d5   : > { %p1063_p3 = scmp.ne.s32.totalorder %s12715_s5, %s12718_s4  ;;  %s1077_s13 = sld [smem:[#allocation5 + %s12720_s26]] }
 0x2d6   : > { %s12732_s24 = sld [smem:[#allocation191_spill]]  ;;  %s13399_s3 = smov (!%p1012_p7, %s12703_s3), %s1014_s8 }
 0x2d7   : > { %12733 = sst [smem:[#allocation192_spill]] %s13399_s3  ;;  %p12734_p9 = scmp.eq.s32.totalorder %s12508_s19, 0 }
 0x2d8   : > { %s12737_s12 = sld [smem:[#allocation190_spill]]  ;;  %p9645_p11 = por %p1063_p3, %p12524_p8 }
 0x2d9   : > { %p9639_p5 = por %p1057_p12, %p12734_p9  ;;  %s12740_s18 = sadd.s32 9, %s9020_s11 }
 0x2da   : > { %s12738_s28 = scalar_select %p9645_p11, 1, 0 }
 0x2db   : > { %s12735_s25 = scalar_select %p9639_p5, 1, 0 }
 0x2dc   : > { %12739 = sst [smem:[#allocation334_spill]] %s12738_s28  ;;  %s1086_s26 = sadd.s32 1, %s12721_s30 }
 0x2dd   : > { %12736 = sst [smem:[#allocation333_spill]] %s12735_s25  ;;  %s1047_s8 = ssub.s32 %s1041_s23, %s1046_s15 }
 0x2de   : > { %s12741_s9 = sld [smem:[#allocation189_spill]]  ;;  %p1093_p7 = scmp.ne.s32.totalorder %s12721_s30, %s12726_s21 }
 0x2df   : > { %s1082_s5 = sld [smem:[#allocation5 + %s12740_s18]]  ;;  %p1048_p12 = scmp.eq.s32.totalorder %s1047_s8, 0 }
 0x2e0   : > { %s12742_s4 = sld [smem:[#allocation304_spill]]  ;;  %p1099_p9 = scmp.ne.s32.totalorder %s12726_s21, %s12729_s2 }
 0x2e1   : > { %p12743_p5 = scmp.eq.s32.totalorder %s12508_s19, 0  ;;  %s1113_s28 = sld [smem:[#allocation5 + %s12731_s7]] }
 0x2e2   : > { %s12746_s25 = sld [smem:[#allocation188_spill]]  ;;  %s13401_s6 = smov (!%p1048_p12, %s12710_s6), %s1050_s10 }
 0x2e3   : > { %p9658_p10 = por %p1093_p7, %p12743_p5  ;;  %12747 = sst [smem:[#allocation335_spill]] %s13401_s6 }
 0x2e4   : > { %s12748_s18 = sld [smem:[#allocation187_spill]]  ;;  %p9668_p3 = por %p1099_p9, %p12524_p8 }
 0x2e5   : > { %s12744_s3 = scalar_select %p9658_p10, 1, 0 }
 0x2e6   : > { %s12749_s15 = scalar_select %p9668_p3, 1, 0 }
 0x2e7   : > { %12745 = sst [smem:[#allocation189_spill]] %s12744_s3  ;;  %s12751_s23 = sadd.s32 10, %s9020_s11 }
 0x2e8   : > { %12750 = sst [smem:[#allocation336_spill]] %s12749_s15  ;;  %s1083_s2 = ssub.s32 %s1077_s13, %s1082_s5 }
 0x2e9   : > { %s12752_s8 = sld [smem:[#allocation186_spill]]  ;;  %s1122_s1 = sadd.s32 1, %s12732_s24 }
 0x2ea   : > { %s1118_s21 = sld [smem:[#allocation5 + %s12751_s23]]  ;;  %p1084_p5 = scmp.eq.s32.totalorder %s1083_s2, 0 }
 0x2eb   : > { %s12753_s7 = sld [smem:[#allocation308_spill]]  ;;  %p1129_p7 = scmp.ne.s32.totalorder %s12732_s24, %s12737_s12 }
 0x2ec   : > { %s12754_s10 = sld [smem:[#allocation185_spill]]  ;;  %p1135_p12 = scmp.ne.s32.totalorder %s12737_s12, %s12741_s9 }
 0x2ed   : > { %s1149_s6 = sld [smem:[#allocation5 + %s12742_s4]]  ;;  %s13403_s30 = smov (!%p1084_p5, %s12721_s30), %s1086_s26 }
 0x2ee   : > { %12755 = sst [smem:[#allocation186_spill]] %s13403_s30  ;;  %p12756_p9 = scmp.eq.s32.totalorder %s12508_s19, 0 }
 0x2ef   : > { %s12759_s23 = sld [smem:[#allocation184_spill]]  ;;  %p9691_p11 = por %p1135_p12, %p12524_p8 }
 0x2f0   : > { %p9685_p3 = por %p1129_p7, %p12756_p9  ;;  %s12762_s5 = sld [smem:[#allocation183_spill]] }
 0x2f1   : > { %s12760_s13 = scalar_select %p9691_p11, 1, 0 }
 0x2f2   : > { %s12757_s15 = scalar_select %p9685_p3, 1, 0 }
 0x2f3   : > { %12761 = sst [smem:[#allocation338_spill]] %s12760_s13  ;;  %s1119_s2 = ssub.s32 %s1113_s28, %s1118_s21 }
 0x2f4   : > { %12758 = sst [smem:[#allocation337_spill]] %s12757_s15  ;;  %s12763_s12 = sadd.s32 11, %s9020_s11 }
 0x2f5   : > { %s12764_s9 = sld [smem:[#allocation310_spill]]  ;;  %p1120_p5 = scmp.eq.s32.totalorder %s1119_s2, 0 }
 0x2f6   : > { %s1154_s4 = sld [smem:[#allocation5 + %s12763_s12]]  ;;  %s1158_s26 = sadd.s32 1, %s12746_s25 }
 0x2f7   : > { %p1165_p7 = scmp.ne.s32.totalorder %s12746_s25, %s12748_s18  ;;  %p1171_p9 = scmp.ne.s32.totalorder %s12748_s18, %s12752_s8 }
 0x2f8   : > { %s12765_s30 = sld [smem:[#allocation182_spill]]  ;;  %s13405_s24 = smov (!%p1120_p5, %s12732_s24), %s1122_s1 }
 0x2f9   : > { %12766 = sst [smem:[#allocation183_spill]] %s13405_s24  ;;  %p12767_p12 = scmp.eq.s32.totalorder %s12508_s19, 0 }
 0x2fa   : > { %s12770_s28 = sld [smem:[#allocation181_spill]]  ;;  %p9713_p11 = por %p1171_p9, %p12524_p8 }
 0x2fb   : > { %p9707_p3 = por %p1165_p7, %p12767_p12  ;;  %s1185_s2 = sld [smem:[#allocation5 + %s12753_s7]] }
 0x2fc   : > { %s12771_s21 = scalar_select %p9713_p11, 1, 0 }
 0x2fd   : > { %s12768_s13 = scalar_select %p9707_p3, 1, 0 }
 0x2fe   : > { %12772 = sst [smem:[#allocation340_spill]] %s12771_s21  ;;  %s1194_s15 = sadd.s32 1, %s12754_s10 }
 0x2ff   : > { %12769 = sst [smem:[#allocation339_spill]] %s12768_s13  ;;  %s1155_s18 = ssub.s32 %s1149_s6, %s1154_s4 }
 0x300   : > { %s12773_s12 = sld [smem:[#allocation180_spill]]  ;;  %s12774_s1 = sadd.s32 12, %s9020_s11 }
 0x301   : > { %s12775_s8 = sld [smem:[#allocation314_spill]]  ;;  %p1156_p5 = scmp.eq.s32.totalorder %s1155_s18, 0 }
 0x302   : > { %s1190_s24 = sld [smem:[#allocation5 + %s12774_s1]]  ;;  %p1201_p7 = scmp.ne.s32.totalorder %s12754_s10, %s12759_s23 }
 0x303   : > { %p1207_p12 = scmp.ne.s32.totalorder %s12759_s23, %s12762_s5  ;;  %s1221_s13 = sld [smem:[#allocation5 + %s12764_s9]] }
 0x304   : > { %s12776_s3 = sld [smem:[#allocation179_spill]]  ;;  %s13407_s25 = smov (!%p1156_p5, %s12746_s25), %s1158_s26 }
 0x305   : > { %12777 = sst [smem:[#allocation180_spill]] %s13407_s25  ;;  %p12778_p9 = scmp.eq.s32.totalorder %s12508_s19, 0 }
 0x306   : > { %s12781_s6 = sld [smem:[#allocation178_spill]]  ;;  %p9737_p3 = por %p1207_p12, %p12524_p8 }
 0x307   : > { %p9731_p11 = por %p1201_p7, %p12778_p9  ;;  %s12784_s18 = sadd.s32 13, %s9020_s11 }
 0x308   : > { %s12782_s4 = scalar_select %p9737_p3, 1, 0 }
 0x309   : > { %s12779_s7 = scalar_select %p9731_p11, 1, 0 }
 0x30a   : > { %12783 = sst [smem:[#allocation342_spill]] %s12782_s4  ;;  %s1230_s9 = sadd.s32 1, %s12765_s30 }
 0x30b   : > { %12780 = sst [smem:[#allocation341_spill]] %s12779_s7  ;;  %s1191_s26 = ssub.s32 %s1185_s2, %s1190_s24 }
 0x30c   : > { %s12785_s1 = sld [smem:[#allocation177_spill]]  ;;  %p1237_p5 = scmp.ne.s32.totalorder %s12765_s30, %s12770_s28 }
 0x30d   : > { %s1226_s23 = sld [smem:[#allocation5 + %s12784_s18]]  ;;  %p1192_p7 = scmp.eq.s32.totalorder %s1191_s26, 0 }
 0x30e   : > { %s12786_s5 = sld [smem:[#allocation316_spill]]  ;;  %p1243_p9 = scmp.ne.s32.totalorder %s12770_s28, %s12773_s12 }
 0x30f   : > { %p12787_p11 = scmp.eq.s32.totalorder %s12508_s19, 0  ;;  %s1257_s4 = sld [smem:[#allocation5 + %s12775_s8]] }
 0x310   : > { %s12790_s21 = sld [smem:[#allocation176_spill]]  ;;  %s13409_s10 = smov (!%p1192_p7, %s12754_s10), %s1194_s15 }
 0x311   : > { %p9750_p10 = por %p1237_p5, %p12787_p11  ;;  %12791 = sst [smem:[#allocation343_spill]] %s13409_s10 }
 0x312   : > { %s12792_s18 = sld [smem:[#allocation175_spill]]  ;;  %p9760_p12 = por %p1243_p9, %p12524_p8 }
 0x313   : > { %s12788_s25 = scalar_select %p9750_p10, 1, 0 }
 0x314   : > { %s12793_s24 = scalar_select %p9760_p12, 1, 0 }
 0x315   : > { %12789 = sst [smem:[#allocation177_spill]] %s12788_s25  ;;  %s12795_s2 = sadd.s32 14, %s9020_s11 }
 0x316   : > { %12794 = sst [smem:[#allocation344_spill]] %s12793_s24  ;;  %s1227_s12 = ssub.s32 %s1221_s13, %s1226_s23 }
 0x317   : > { %s12796_s26 = sld [smem:[#allocation174_spill]]  ;;  %s1266_s7 = sadd.s32 1, %s12776_s3 }
 0x318   : > { %s1262_s28 = sld [smem:[#allocation5 + %s12795_s2]]  ;;  %p1228_p11 = scmp.eq.s32.totalorder %s1227_s12, 0 }
 0x319   : > { %p1273_p5 = scmp.ne.s32.totalorder %s12776_s3, %s12781_s6  ;;  %p1279_p7 = scmp.ne.s32.totalorder %s12781_s6, %s12785_s1 }
 0x31a   : > { %s1293_s15 = sld [smem:[#allocation5 + %s12786_s5]]  ;;  %s13411_s30 = smov (!%p1228_p11, %s12765_s30), %s1230_s9 }
 0x31b   : > { %12797 = sst [smem:[#allocation174_spill]] %s13411_s30  ;;  %p12798_p3 = scmp.eq.s32.totalorder %s12508_s19, 0 }
 0x31c   : > { %p9783_p12 = por %p1279_p7, %p12524_p8  ;;  %s12803_s23 = sadd.s32 15, %s9020_s11 }
 0x31d   : > { %p9777_p9 = por %p1273_p5, %p12798_p3  ;;  %s1298_s10 = sld [smem:[#allocation5 + %s12803_s23]] }
 0x31e   : > { %s12801_s2 = scalar_select %p9783_p12, 1, 0 }
 0x31f   : > { %s12799_s8 = scalar_select %p9777_p9, 1, 0 }
 0x320   : > { %12802 = sst [smem:[#allocation346_spill]] %s12801_s2  ;;  %s1263_s13 = ssub.s32 %s1257_s4, %s1262_s28 }
 0x321   : > { %12800 = sst [smem:[#allocation345_spill]] %s12799_s8  ;;  %p1264_p10 = scmp.eq.s32.totalorder %s1263_s13, 0 }
 0x322   : > { %s1302_s6 = sadd.s32 1, %s12790_s21  ;;  %p1309_p13 = scmp.ne.s32.totalorder %s12790_s21, %s12792_s18 }
 0x323   : > { %p1315_p11 = scmp.ne.s32.totalorder %s12792_s18, %s12796_s26  ;;  %s13413_s3 = smov (!%p1264_p10, %s12776_s3), %s1266_s7 }
 0x324   : > { %12805 = sst [smem:[#allocation347_spill]] %s13413_s3  ;;  %p9799_p5 = por %p1309_p13, %p12798_p3 }
 0x325   : > { %p9805_p7 = por %p1315_p11, %p12524_p8  ;;  %s1299_s4 = ssub.s32 %s1293_s15, %s1298_s10 }
 0x326   : > { %s12806_s1 = scalar_select %p9799_p5, 1, 0 }
 0x327   : > { %s12808_s5 = scalar_select %p9805_p7, 1, 0 }
 0x328   : > { %12807 = sst [smem:[#allocation269_spill]] %s12806_s1  ;;  %s8219_s11 = smov [#allocation56]  }
 0x329   : > { %12809 = sst [smem:[#allocation348_spill]] %s12808_s5  ;;  %s1533_s9 = sshll.u32 %s8219_s11, 4  ;;  %s1534_s9 = int_to_ptr.vmem [resolvable:$true] %s1533_s9 }
 0x32a   : > { %p1300_p12 = scmp.eq.s32.totalorder %s1299_s4, 0  ;;  %s6308_s18 = scalar_lea.vmem %s1534_s9, 32 }
 0x32b   : > { %p6309_p10 = scmp.ne.s32.totalorder %s1534_s9, %s6308_s18  ;;  %p6316_p3 = scmp.lt.s32.totalorder %s1534_s9, %s1534_s9 }
 0x32c   : > { %s13415_s21 = smov (!%p1300_p12, %s12790_s21), %s1302_s6  ;;  %p6317_p4 = scmp.lt.s32.totalorder %s6308_s18, %s6308_s18 }
 0x32d   : > { %12810 = sst [smem:[#allocation349_spill]] %s13415_s21  ;;  %p6311_p9 = pnand %p6309_p10, %p8994_p2 }
 0x32e   : > { %p6318_p5 = por %p6317_p4, %p6316_p3 }
 0x32f   : > { %p6312_p13 = pneg %p6311_p9 }
 0x331   : > { %p6319_p6 = pnand %p6318_p5, %p6312_p13 }
 0x333   : > { %6322 = shalt.err (!%p6319_p6)
}
 0x334   : > { %s12812_s26 = sld [smem:[#allocation166_spill]]  ;;  %s8220_s10 = smov [#allocation59]  }
 0x335   : > { %s1558_s28 = sshll.u32 %s8220_s10, 4  ;;  %s8221_s15 = smov [#allocation62]   ;;  %s1559_s28 = int_to_ptr.vmem [resolvable:$true] %s1558_s28 }
 0x336   : > { %s1582_s13 = sshll.u32 %s8221_s15, 4  ;;  %s6334_s23 = scalar_lea.vmem %s1559_s28, 16  ;;  %s1583_s13 = int_to_ptr.vmem [resolvable:$true] %s1582_s13 }
 0x337   : > { %p6335_p8 = scmp.ne.s32.totalorder %s1559_s28, %s6334_s23  ;;  %s6341_s6 = scalar_lea.vmem %s1559_s28, 32 }
 0x338   : > { %p6342_p11 = scmp.lt.s32.totalorder %s1559_s28, %s1559_s28  ;;  %p6343_p4 = scmp.lt.s32.totalorder %s6341_s6, %s6334_s23 }
 0x339   : > { %p6337_p12 = pnand %p6335_p8, %p8994_p2 }
 0x33a   : > { %5344 = dma.hbm_to_vmem [thread:$0]  (!%p8988_p1), %s12812_s26, 32, %s1534_s9, [#allocation55]  }
 0x33b   : > { %p6338_p9 = pneg %p6337_p12  ;;  %p6344_p5 = por %p6343_p4, %p6342_p11 }
 0x33d   : > { %p6345_p6 = pnand %p6344_p5, %p6338_p9 }
 0x33f   : > { %6348 = shalt.err (!%p6345_p6)
}
 0x340   : > { %s12813_s4 = sld [smem:[#allocation169_spill]]  ;;  %s6360_s11 = scalar_lea.vmem %s1583_s13, 16 }
 0x341   : > { %p6361_p10 = scmp.ne.s32.totalorder %s1583_s13, %s6360_s11  ;;  %s6367_s9 = scalar_lea.vmem %s1583_s13, 32 }
 0x342   : > { %p6368_p8 = scmp.lt.s32.totalorder %s1583_s13, %s1583_s13  ;;  %p6369_p12 = scmp.lt.s32.totalorder %s6367_s9, %s6360_s11 }
 0x343   : > { %p6363_p13 = pnand %p6361_p10, %p8994_p2 }
 0x344   : > { %p6370_p7 = por %p6369_p12, %p6368_p8 }
 0x345   : > { %p6364_p3 = pneg %p6363_p13 }
 0x346   : > { %5350 = dma.hbm_to_vmem [thread:$0]  (!%p8988_p1), %s12813_s4, 16, %s1559_s28, [#allocation58]  }
 0x347   : > { %p6371_p0 = pnand %p6370_p7, %p6364_p3 }
 0x349   : > { %6374 = shalt.err (!%p6371_p0)
}
 0x34a   : > { %s12814_s18 = sld [smem:[#allocation171_spill]]  ;;  %s8222_s26 = smov [#allocation63]  }
 0x34b   : > { %s1593_s10 = sshll.u32 %s8222_s26, 4  ;;  %s1594_s10 = int_to_ptr.vmem [resolvable:$true] %s1593_s10 }
 0x34c   : > { %s6386_s28 = scalar_lea.vmem %s1594_s10, 16  ;;  %s6393_s15 = scalar_lea.vmem %s1594_s10, 32 }
 0x34d   : > { %p6387_p9 = scmp.ne.s32.totalorder %s1594_s10, %s6386_s28  ;;  %p6394_p5 = scmp.lt.s32.totalorder %s1594_s10, %s1594_s10 }
 0x34e   : > { %p6395_p6 = scmp.lt.s32.totalorder %s6393_s15, %s6386_s28 }
 0x34f   : > { %p6389_p11 = pnand %p6387_p9, %p8994_p2 }
 0x350   : > { %5356 = dma.hbm_to_vmem [thread:$0]  (!%p8988_p1), %s12814_s18, 16, %s1583_s13, [#allocation61]  }
 0x351   : > { %p6390_p4 = pneg %p6389_p11  ;;  %p6396_p10 = por %p6395_p6, %p6394_p5 }
 0x353   : > { %p6397_p13 = pnand %p6396_p10, %p6390_p4 }
 0x355   : > { %6400 = shalt.err (!%p6397_p13)
}
 0x356   : > { %s12815_s23 = sld [smem:[#allocation172_spill]]  ;;  %p4891_p0 = scmp.ge.s32.totalorder %s12508_s19, 8 }
 0x357   : > { %s12816_s13 = sld [smem:[#allocation246_spill]] (!%p4891_p0)  ;;  %s9834_s9 = sand.u32 (!%p4891_p0), 1, %s12508_s19  }
 0x358   : > { %1603 = sbr.rel (%p4891_p0) target bundleno = 1859 (0x743), region = 48  ;;  %s12817_s6 = sld [smem:[#allocation275_spill]] (!%p4891_p0) }
 0x359   : > { %s12818_s12 = sld [smem:[#allocation259_spill]] (!%p4891_p0) }
 0x35a   : > { %s12819_s4 = sld [smem:[#allocation261_spill]] (!%p4891_p0) }
 0x35b   : > { %s12820_s11 = sld [smem:[#allocation282_spill]] (!%p4891_p0) }
 0x35c   : > { %5359 = dma.hbm_to_vmem [thread:$0]  (!%p8988_p1), %s12815_s23, 16, %s1594_s10, [#allocation64]  }
 0x35d   : > { %s1632_s18 = sand.u32 1, %s12816_s13   ;;  %s12822_s10 = sld [smem:[#allocation135_spill]] }
 0x35e   : > { %s4896_s26 = sshll.u32 %s1632_s18, 1  ;;  %p12821_p2 = scmp.ne.s32.totalorder %s12817_s6, 0 }
 0x35f   : > { %s1634_s15 = scalar_lea.vmem [#allocation9], %s4896_s26  ;;  %s1680_s30 = sand.u32 1, %s12818_s12  }
 0x360   : > { %s5204_s7 = scalar_select %p12821_p2, [#allocation4], [#allocation66] }
 0x361   : > { %s5205_s28 = scalar_select %p12821_p2, %s9038_s14, 0 }
 0x362   : > { %s1647_s23 = sshll.u32 %s1634_s15, 4  ;;  %s4904_s21 = sshll.u32 %s1680_s30, 1  ;;  %s9843_s23 = int_to_ptr.vmem [resolvable:$true] %s1647_s23 }
 0x363   : > { %s1639_s3 = sld [smem:[%s5204_s7 + %s5205_s28]]  ;;  %s1728_s27 = sand.u32 1, %s12819_s4  }
 0x364   : > { %p12823_p1 = scmp.ne.s32.totalorder %s12820_s11, 0  ;;  %s1682_s5 = scalar_lea.vmem [#allocation12], %s4904_s21 }
 0x365   : > { %s9851_s2 = sshll.u32 %s1682_s5, 4  ;;  %s9853_s24 = sshll.u32 %s1728_s27, 1  ;;  %s9874_s2 = int_to_ptr.vmem [resolvable:$true] %s9851_s2 }
 0x366   : > { %s5210_s13 = scalar_select %p12823_p1, [#allocation4], [#allocation68] }
 0x367   : > { %s5211_s18 = scalar_select %p12823_p1, %s9077_s0, 0 }
 0x368   : > { %s12023_s7 = scalar_lea.sflag [#allocation10], %s9834_s9  ;;  %s6405_s30 = scalar_lea.hbm %s12822_s10, 1312800 }
 0x369   : > { %s5071_s26 = sshll.u32 %s1639_s3, 5  ;;  %s9855_s15 = sld [smem:[%s5210_s13 + %s5211_s18]] }
 0x36a   : > { %s1645_s12 = scalar_lea.hbm %s12822_s10, %s5071_s26 }
 0x36b   : > { %s6401_s28 = scalar_lea.hbm %s1645_s12, 32  ;;  %p6406_p12 = scmp.lt.s32.totalorder %s1645_s12, %s12822_s10 }
 0x36c   : > { %p6402_p7 = scmp.ne.s32.totalorder %s1645_s12, %s6401_s28  ;;  %p6407_p9 = scmp.lt.s32.totalorder %s6405_s30, %s6401_s28 }
 0x36e   : > { %p6403_p3 = pnand %p6402_p7, %p12821_p2  ;;  %p6408_p11 = por %p6407_p9, %p6406_p12 }
 0x370   : > { %p6404_p8 = pneg %p6403_p3 }
 0x372   : > { %p6409_p4 = pnand %p6408_p11, %p6404_p8 }
 0x374   : > { %6412 = shalt.err (!%p6409_p4)
}
 0x375   : > { %s6413_s27 = scalar_lea.vmem %s9843_s23, 32  ;;  %s8223_s3 = smov [#allocation9]  }
 0x376   : > { %p6414_p5 = scmp.ne.s32.totalorder %s9843_s23, %s6413_s27  ;;  %s6417_s21 = sshll.u32 %s8223_s3, 4  ;;  %s6418_s21 = int_to_ptr.vmem [resolvable:$false] %s6417_s21 }
 0x377   : > { %s6419_s5 = scalar_lea.vmem %s6418_s21, 64  ;;  %p6420_p13 = scmp.lt.s32.totalorder %s9843_s23, %s6418_s21 }
 0x378   : > { %p6415_p6 = pnand %p6414_p5, %p12821_p2  ;;  %p6421_p0 = scmp.lt.s32.totalorder %s6419_s5, %s6413_s27 }
 0x37a   : > { %p6416_p10 = pneg %p6415_p6  ;;  %p6422_p7 = por %p6421_p0, %p6420_p13 }
 0x37c   : > { %p6423_p3 = pnand %p6422_p7, %p6416_p10 }
 0x37e   : > { %6426 = shalt.err (!%p6423_p3)
}
 0x37f   : > { %s12824_s4 = sld [smem:[#allocation289_spill]]  ;;  %s5073_s26 = sshll.u32 %s9855_s15, 5 }
 0x380   : > { %s12825_s13 = sld [smem:[#allocation137_spill]]  ;;  %s1730_s28 = scalar_lea.vmem [#allocation15], %s9853_s24 }
 0x381   : > { %5206 = dma.hbm_to_vmem [thread:$0]  (%p12821_p2), %s1645_s12, 32, %s9843_s23, %s12023_s7  }
 0x382   : > { %s9883_s30 = sshll.u32 %s1730_s28, 4  ;;  %s12032_s21 = scalar_lea.sflag [#allocation13], %s9834_s9  ;;  %s9905_s30 = int_to_ptr.vmem [resolvable:$true] %s9883_s30 }
 0x385   : > { %p12826_p8 = scmp.ne.s32.totalorder %s12824_s4, 0 }
 0x386   : > { %s1693_s27 = scalar_lea.hbm %s12825_s13, %s5073_s26  ;;  %s6431_s23 = scalar_lea.hbm %s12825_s13, 1312800 }
 0x387   : > { %s5216_s18 = scalar_select %p12826_p8, [#allocation4], [#allocation70] }
 0x388   : > { %s5217_s6 = scalar_select %p12826_p8, %s9140_s17, 0 }
 0x389   : > { %s6427_s5 = scalar_lea.hbm %s1693_s27, 32  ;;  %p6432_p2 = scmp.lt.s32.totalorder %s1693_s27, %s12825_s13 }
 0x38a   : > { %s9886_s3 = sld [smem:[%s5216_s18 + %s5217_s6]]  ;;  %p6428_p12 = scmp.ne.s32.totalorder %s1693_s27, %s6427_s5 }
 0x38b   : > { %p6433_p4 = scmp.lt.s32.totalorder %s6431_s23, %s6427_s5 }
 0x38c   : > { %p6429_p9 = pnand %p6428_p12, %p12823_p1 }
 0x38d   : > { %p6434_p5 = por %p6433_p4, %p6432_p2 }
 0x38e   : > { %p6430_p11 = pneg %p6429_p9 }
 0x390   : > { %p6435_p6 = pnand %p6434_p5, %p6430_p11 }
 0x392   : > { %6438 = shalt.err (!%p6435_p6)
}
 0x393   : > { %s6439_s24 = scalar_lea.vmem %s9874_s2, 32  ;;  %s8224_s15 = smov [#allocation12]  }
 0x394   : > { %p6440_p10 = scmp.ne.s32.totalorder %s9874_s2, %s6439_s24  ;;  %s6443_s12 = sshll.u32 %s8224_s15, 4  ;;  %s6444_s12 = int_to_ptr.vmem [resolvable:$false] %s6443_s12 }
 0x395   : > { %s6445_s18 = scalar_lea.vmem %s6444_s12, 64  ;;  %p6446_p7 = scmp.lt.s32.totalorder %s9874_s2, %s6444_s12 }
 0x396   : > { %p6441_p13 = pnand %p6440_p10, %p12823_p1  ;;  %p6447_p3 = scmp.lt.s32.totalorder %s6445_s18, %s6439_s24 }
 0x398   : > { %p6442_p0 = pneg %p6441_p13  ;;  %p6448_p12 = por %p6447_p3, %p6446_p7 }
 0x39a   : > { %p6449_p9 = pnand %p6448_p12, %p6442_p0 }
 0x39c   : > { %6452 = shalt.err (!%p6449_p9)
}
 0x39d   : > { %s12827_s6 = sld [smem:[#allocation255_spill]]  ;;  %s5075_s15 = sshll.u32 %s9886_s3, 5 }
 0x39e   : > { %s12828_s26 = sld [smem:[#allocation294_spill]]  ;;  %s12033_s19 = scalar_lea.sflag [#allocation16], %s9834_s9 }
 0x39f   : > { %s12829_s28 = sld [smem:[#allocation242_spill]] }
 0x3a0   : > { %s12830_s5 = sld [smem:[#allocation139_spill]] }
 0x3a1   : > { %5212 = dma.hbm_to_vmem [thread:$0]  (%p12823_p1), %s1693_s27, 32, %s9874_s2, %s12032_s21  }
 0x3a3   : > { %s1776_s23 = sand.u32 1, %s12827_s6  }
 0x3a4   : > { %s4920_s24 = sshll.u32 %s1776_s23, 1  ;;  %p12832_p11 = scmp.ne.s32.totalorder %s12828_s26, 0 }
 0x3a5   : > { %s1824_s12 = sand.u32 1, %s12829_s28   ;;  %s1778_s10 = scalar_lea.vmem [#allocation18], %s4920_s24 }
 0x3a6   : > { %s12831_s7 = smov %s12830_s5  ;;  %s1741_s18 = scalar_lea.hbm %s12830_s5, %s5075_s15 }
 0x3a7   : > { %s5222_s11 = scalar_select %p12832_p11, [#allocation4], [#allocation72] }
 0x3a8   : > { %s1791_s13 = sshll.u32 %s1778_s10, 4  ;;  %s6453_s1 = scalar_lea.hbm %s1741_s18, 32  ;;  %s9930_s13 = int_to_ptr.vmem [resolvable:$true] %s1791_s13 }
 0x3a9   : > { %p6454_p2 = scmp.ne.s32.totalorder %s1741_s18, %s6453_s1  ;;  %s6457_s8 = scalar_lea.hbm %s12831_s7, 1312800 }
 0x3aa   : > { %p6458_p1 = scmp.lt.s32.totalorder %s1741_s18, %s12831_s7  ;;  %p6459_p6 = scmp.lt.s32.totalorder %s6457_s8, %s6453_s1 }
 0x3ab   : > { %p6455_p4 = pnand %p6454_p2, %p12826_p8 }
 0x3ac   : > { %p6460_p10 = por %p6459_p6, %p6458_p1 }
 0x3ad   : > { %p6456_p5 = pneg %p6455_p4 }
 0x3af   : > { %p6461_p13 = pnand %p6460_p10, %p6456_p5 }
 0x3b1   : > { %6464 = shalt.err (!%p6461_p13)
}
 0x3b2   : > { %s6465_s2 = scalar_lea.vmem %s9905_s30, 32  ;;  %s8225_s10 = smov [#allocation15]  }
 0x3b3   : > { %p6466_p0 = scmp.ne.s32.totalorder %s9905_s30, %s6465_s2  ;;  %s6469_s27 = sshll.u32 %s8225_s10, 4  ;;  %s6470_s27 = int_to_ptr.vmem [resolvable:$false] %s6469_s27 }
 0x3b4   : > { %s6471_s3 = scalar_lea.vmem %s6470_s27, 64  ;;  %p6472_p12 = scmp.lt.s32.totalorder %s9905_s30, %s6470_s27 }
 0x3b5   : > { %p6467_p7 = pnand %p6466_p0, %p12826_p8  ;;  %p6473_p9 = scmp.lt.s32.totalorder %s6471_s3, %s6465_s2 }
 0x3b7   : > { %p6468_p3 = pneg %p6467_p7  ;;  %p6474_p2 = por %p6473_p9, %p6472_p12 }
 0x3b9   : > { %p6475_p4 = pnand %p6474_p2, %p6468_p3 }
 0x3bb   : > { %6478 = shalt.err (!%p6475_p4)
}
 0x3bc   : > { %s12833_s8 = sld [smem:[#allocation300_spill]]  ;;  %s4928_s4 = sshll.u32 %s1824_s12, 1 }
 0x3bd   : > { %s12834_s1 = sld [smem:[#allocation298_spill]]  ;;  %s1826_s27 = scalar_lea.vmem [#allocation21], %s4928_s4 }
 0x3be   : > { %s12835_s6 = sld [smem:[#allocation236_spill]]  ;;  %s1839_s3 = sshll.u32 %s1826_s27, 4  ;;  %s9945_s3 = int_to_ptr.vmem [resolvable:$true] %s1839_s3 }
 0x3bf   : > { %s12836_s5 = sld [smem:[#allocation141_spill]] }
 0x3c0   : > { %5218 = dma.hbm_to_vmem [thread:$0]  (%p12826_p8), %s1741_s18, 32, %s9905_s30, %s12033_s19  }
 0x3c1   : > { %s5223_s23 = scalar_select %p12832_p11, %s9194_s20, 0 }
 0x3c2   : > { %p12838_p5 = scmp.ne.s32.totalorder %s12833_s8, 0  ;;  %s12035_s19 = scalar_lea.sflag [#allocation19], %s9834_s9 }
 0x3c3   : > { %s1783_s24 = sld [smem:[%s5222_s11 + %s5223_s23]] }
 0x3c4   : > { %s5228_s2 = scalar_select %p12838_p5, [#allocation4], [#allocation74] }
 0x3c5   : > { %s12837_s15 = smov %s12836_s5  ;;  %s1872_s21 = sand.u32 1, %s12835_s6  }
 0x3c6   : > { %s5229_s10 = scalar_select %p12838_p5, %s12834_s1, 0 }
 0x3c7   : > { %s9947_s18 = sshll.u32 %s1872_s21, 1  ;;  %s6483_s11 = scalar_lea.hbm %s12837_s15, 1312800 }
 0x3c8   : > { %s9943_s30 = sld [smem:[%s5228_s2 + %s5229_s10]] }
 0x3c9   : > { %s5077_s28 = sshll.u32 %s1783_s24, 5 }
 0x3ca   : > { %s1789_s12 = scalar_lea.hbm %s12836_s5, %s5077_s28 }
 0x3cb   : > { %s6479_s7 = scalar_lea.hbm %s1789_s12, 32  ;;  %p6484_p10 = scmp.lt.s32.totalorder %s1789_s12, %s12837_s15 }
 0x3cc   : > { %p6480_p8 = scmp.ne.s32.totalorder %s1789_s12, %s6479_s7  ;;  %p6485_p13 = scmp.lt.s32.totalorder %s6483_s11, %s6479_s7 }
 0x3ce   : > { %p6481_p1 = pnand %p6480_p8, %p12832_p11  ;;  %p6486_p0 = por %p6485_p13, %p6484_p10 }
 0x3d0   : > { %p6482_p6 = pneg %p6481_p1 }
 0x3d2   : > { %p6487_p7 = pnand %p6486_p0, %p6482_p6 }
 0x3d4   : > { %6490 = shalt.err (!%p6487_p7)
}
 0x3d5   : > { %s6491_s21 = scalar_lea.vmem %s9930_s13, 32  ;;  %s8226_s6 = smov [#allocation18]  }
 0x3d6   : > { %p6492_p3 = scmp.ne.s32.totalorder %s9930_s13, %s6491_s21  ;;  %s6495_s5 = sshll.u32 %s8226_s6, 4  ;;  %s6496_s5 = int_to_ptr.vmem [resolvable:$false] %s6495_s5 }
 0x3d7   : > { %s6497_s23 = scalar_lea.vmem %s6496_s5, 64  ;;  %p6498_p2 = scmp.lt.s32.totalorder %s9930_s13, %s6496_s5 }
 0x3d8   : > { %p6493_p12 = pnand %p6492_p3, %p12832_p11  ;;  %p6499_p4 = scmp.lt.s32.totalorder %s6497_s23, %s6491_s21 }
 0x3da   : > { %p6494_p9 = pneg %p6493_p12  ;;  %p6500_p8 = por %p6499_p4, %p6498_p2 }
 0x3dc   : > { %p6501_p1 = pnand %p6500_p8, %p6494_p9 }
 0x3de   : > { %6504 = shalt.err (!%p6501_p1)
}
 0x3df   : > { %s12839_s7 = sld [smem:[#allocation306_spill]]  ;;  %s5079_s27 = sshll.u32 %s9943_s30, 5 }
 0x3e0   : > { %s12840_s4 = sld [smem:[#allocation143_spill]]  ;;  %s1874_s28 = scalar_lea.vmem [#allocation24], %s9947_s18 }
 0x3e1   : > { %s12842_s24 = sld [smem:[#allocation230_spill]]  ;;  %s9969_s11 = sshll.u32 %s1874_s28, 4  ;;  %s9992_s11 = int_to_ptr.vmem [resolvable:$true] %s9969_s11 }
 0x3e2   : > { %5224 = dma.hbm_to_vmem [thread:$0]  (%p12832_p11), %s1789_s12, 32, %s9930_s13, %s12035_s19  }
 0x3e3   : > { %s12040_s6 = scalar_lea.sflag [#allocation22], %s9834_s9 }
 0x3e5   : > { %p12843_p6 = scmp.ne.s32.totalorder %s12839_s7, 0 }
 0x3e6   : > { %s12841_s10 = smov %s12840_s4  ;;  %s1837_s26 = scalar_lea.hbm %s12840_s4, %s5079_s27 }
 0x3e7   : > { %s5234_s2 = scalar_select %p12843_p6, [#allocation4], [#allocation76] }
 0x3e8   : > { %s1920_s21 = sand.u32 1, %s12842_s24   ;;  %s6505_s5 = scalar_lea.hbm %s1837_s26, 32 }
 0x3e9   : > { %p6506_p10 = scmp.ne.s32.totalorder %s1837_s26, %s6505_s5  ;;  %s6509_s23 = scalar_lea.hbm %s12841_s10, 1312800 }
 0x3ea   : > { %p6510_p7 = scmp.lt.s32.totalorder %s1837_s26, %s12841_s10  ;;  %p6511_p3 = scmp.lt.s32.totalorder %s6509_s23, %s6505_s5 }
 0x3eb   : > { %p6507_p13 = pnand %p6506_p10, %p12838_p5 }
 0x3ec   : > { %p6512_p12 = por %p6511_p3, %p6510_p7 }
 0x3ed   : > { %p6508_p0 = pneg %p6507_p13 }
 0x3ef   : > { %p6513_p9 = pnand %p6512_p12, %p6508_p0 }
 0x3f1   : > { %6516 = shalt.err (!%p6513_p9)
}
 0x3f2   : > { %s6517_s13 = scalar_lea.vmem %s9945_s3, 32  ;;  %s8227_s30 = smov [#allocation21]  }
 0x3f3   : > { %p6518_p11 = scmp.ne.s32.totalorder %s9945_s3, %s6517_s13  ;;  %s6521_s18 = sshll.u32 %s8227_s30, 4  ;;  %s6522_s18 = int_to_ptr.vmem [resolvable:$false] %s6521_s18 }
 0x3f4   : > { %s6523_s12 = scalar_lea.vmem %s6522_s18, 64  ;;  %p6524_p8 = scmp.lt.s32.totalorder %s9945_s3, %s6522_s18 }
 0x3f5   : > { %p6519_p2 = pnand %p6518_p11, %p12838_p5  ;;  %p6525_p1 = scmp.lt.s32.totalorder %s6523_s12, %s6517_s13 }
 0x3f7   : > { %p6520_p4 = pneg %p6519_p2  ;;  %p6526_p10 = por %p6525_p1, %p6524_p8 }
 0x3f9   : > { %p6527_p13 = pnand %p6526_p10, %p6520_p4 }
 0x3fb   : > { %6530 = shalt.err (!%p6527_p13)
}
 0x3fc   : > { %s12844_s4 = sld [smem:[#allocation304_spill]]  ;;  %s4944_s8 = sshll.u32 %s1920_s21, 1 }
 0x3fd   : > { %s12845_s24 = sld [smem:[#allocation312_spill]]  ;;  %s1922_s12 = scalar_lea.vmem [#allocation27], %s4944_s8 }
 0x3fe   : > { %s12846_s27 = sld [smem:[#allocation310_spill]]  ;;  %s1935_s10 = sshll.u32 %s1922_s12, 4  ;;  %s10005_s10 = int_to_ptr.vmem [resolvable:$true] %s1935_s10 }
 0x3ff   : > { %s12847_s28 = sld [smem:[#allocation224_spill]] }
 0x400   : > { %s12848_s5 = sld [smem:[#allocation145_spill]] }
 0x401   : > { %5230 = dma.hbm_to_vmem [thread:$0]  (%p12838_p5), %s1837_s26, 32, %s9945_s3, %s12040_s6  }
 0x402   : > { %s5235_s23 = scalar_select %p12843_p6, %s12844_s4, 0 }
 0x403   : > { %p12850_p0 = scmp.ne.s32.totalorder %s12845_s24, 0  ;;  %s12041_s6 = scalar_lea.sflag [#allocation25], %s9834_s9 }
 0x404   : > { %s1879_s13 = sld [smem:[%s5234_s2 + %s5235_s23]] }
 0x405   : > { %s5240_s30 = scalar_select %p12850_p0, [#allocation4], [#allocation78] }
 0x406   : > { %s12849_s19 = smov %s12848_s5  ;;  %s1968_s15 = sand.u32 1, %s12847_s28  }
 0x407   : > { %s5241_s18 = scalar_select %p12850_p0, %s12846_s27, 0 }
 0x408   : > { %s10007_s3 = sshll.u32 %s1968_s15, 1  ;;  %s6535_s2 = scalar_lea.hbm %s12849_s19, 1312800 }
 0x409   : > { %s10003_s25 = sld [smem:[%s5240_s30 + %s5241_s18]] }
 0x40a   : > { %s5081_s26 = sshll.u32 %s1879_s13, 5 }
 0x40b   : > { %s1885_s21 = scalar_lea.hbm %s12848_s5, %s5081_s26 }
 0x40c   : > { %s6531_s4 = scalar_lea.hbm %s1885_s21, 32  ;;  %p6536_p12 = scmp.lt.s32.totalorder %s1885_s21, %s12849_s19 }
 0x40d   : > { %p6532_p5 = scmp.ne.s32.totalorder %s1885_s21, %s6531_s4  ;;  %p6537_p9 = scmp.lt.s32.totalorder %s6535_s2, %s6531_s4 }
 0x40f   : > { %p6533_p7 = pnand %p6532_p5, %p12843_p6  ;;  %p6538_p11 = por %p6537_p9, %p6536_p12 }
 0x411   : > { %p6534_p3 = pneg %p6533_p7 }
 0x413   : > { %p6539_p2 = pnand %p6538_p11, %p6534_p3 }
 0x415   : > { %6542 = shalt.err (!%p6539_p2)
}
 0x416   : > { %s6543_s15 = scalar_lea.vmem %s9992_s11, 32  ;;  %s8228_s28 = smov [#allocation24]  }
 0x417   : > { %p6544_p4 = scmp.ne.s32.totalorder %s9992_s11, %s6543_s15  ;;  %s6547_s5 = sshll.u32 %s8228_s28, 4  ;;  %s6548_s5 = int_to_ptr.vmem [resolvable:$false] %s6547_s5 }
 0x418   : > { %s6549_s23 = scalar_lea.vmem %s6548_s5, 64  ;;  %p6550_p10 = scmp.lt.s32.totalorder %s9992_s11, %s6548_s5 }
 0x419   : > { %p6545_p8 = pnand %p6544_p4, %p12843_p6  ;;  %p6551_p13 = scmp.lt.s32.totalorder %s6549_s23, %s6543_s15 }
 0x41b   : > { %p6546_p1 = pneg %p6545_p8  ;;  %p6552_p5 = por %p6551_p13, %p6550_p10 }
 0x41d   : > { %p6553_p7 = pnand %p6552_p5, %p6546_p1 }
 0x41f   : > { %6556 = shalt.err (!%p6553_p7)
}
 0x420   : > { %s12851_s4 = sld [smem:[#allocation318_spill]]  ;;  %s5083_s18 = sshll.u32 %s10003_s25, 5 }
 0x421   : > { %s12852_s8 = sld [smem:[#allocation147_spill]]  ;;  %s1970_s12 = scalar_lea.vmem [#allocation30], %s10007_s3 }
 0x422   : > { %s12853_s13 = sld [smem:[#allocation218_spill]]  ;;  %s10029_s26 = sshll.u32 %s1970_s12, 4  ;;  %s10052_s26 = int_to_ptr.vmem [resolvable:$true] %s10029_s26 }
 0x423   : > { %5236 = dma.hbm_to_vmem [thread:$0]  (%p12843_p6), %s1885_s21, 32, %s9992_s11, %s12041_s6  }
 0x424   : > { %s12042_s15 = scalar_lea.sflag [#allocation28], %s9834_s9 }
 0x426   : > { %p12854_p3 = scmp.ne.s32.totalorder %s12851_s4, 0 }
 0x427   : > { %s1933_s7 = scalar_lea.hbm %s12852_s8, %s5083_s18  ;;  %s6561_s5 = scalar_lea.hbm %s12852_s8, 1312800 }
 0x428   : > { %s2015_s2 = sand.u32 1, %s12853_s13   ;;  %s6557_s28 = scalar_lea.hbm %s1933_s7, 32 }
 0x429   : > { %p6558_p12 = scmp.ne.s32.totalorder %s1933_s7, %s6557_s28  ;;  %p6562_p2 = scmp.lt.s32.totalorder %s1933_s7, %s12852_s8 }
 0x42a   : > { %p6563_p4 = scmp.lt.s32.totalorder %s6561_s5, %s6557_s28 }
 0x42b   : > { %p6559_p9 = pnand %p6558_p12, %p12850_p0 }
 0x42c   : > { %p6564_p8 = por %p6563_p4, %p6562_p2 }
 0x42d   : > { %p6560_p11 = pneg %p6559_p9 }
 0x42f   : > { %p6565_p1 = pnand %p6564_p8, %p6560_p11 }
 0x431   : > { %6568 = shalt.err (!%p6565_p1)
}
 0x432   : > { %s6569_s25 = scalar_lea.vmem %s10005_s10, 32  ;;  %s8229_s11 = smov [#allocation27]  }
 0x433   : > { %p6570_p6 = scmp.ne.s32.totalorder %s10005_s10, %s6569_s25  ;;  %s6573_s3 = sshll.u32 %s8229_s11, 4  ;;  %s6574_s3 = int_to_ptr.vmem [resolvable:$false] %s6573_s3 }
 0x434   : > { %s6575_s21 = scalar_lea.vmem %s6574_s3, 64  ;;  %p6576_p5 = scmp.lt.s32.totalorder %s10005_s10, %s6574_s3 }
 0x435   : > { %p6571_p10 = pnand %p6570_p6, %p12850_p0  ;;  %p6577_p7 = scmp.lt.s32.totalorder %s6575_s21, %s6569_s25 }
 0x437   : > { %p6572_p13 = pneg %p6571_p10  ;;  %p6578_p12 = por %p6577_p7, %p6576_p5 }
 0x439   : > { %p6579_p9 = pnand %p6578_p12, %p6572_p13 }
 0x43b   : > { %6582 = shalt.err (!%p6579_p9)
}
 0x43c   : > { %s12855_s23 = sld [smem:[#allocation316_spill]]  ;;  %s4960_s24 = sshll.u32 %s2015_s2, 1 }
 0x43d   : > { %s12856_s13 = sld [smem:[#allocation212_spill]]  ;;  %p12860_p11 = scmp.ne.s32.totalorder %s12664_s29, 0 }
 0x43e   : > { %s12857_s18 = sld [smem:[#allocation149_spill]]  ;;  %s2017_s11 = scalar_lea.vmem [#allocation33], %s4960_s24 }
 0x43f   : > { %5242 = dma.hbm_to_vmem [thread:$0]  (%p12850_p0), %s1933_s7, 32, %s10005_s10, %s12042_s15  }
 0x440   : > { %s12859_s28 = scalar_select %p12854_p3, [#allocation4], [#allocation80] }
 0x441   : > { %s5252_s25 = scalar_select %p12860_p11, [#allocation5], [#allocation82] }
 0x442   : > { %s5247_s12 = scalar_select %p12854_p3, %s12855_s23, 0 }
 0x443   : > { %s13417_s14 = smov (!%p12860_p11, %s9038_s14), 0  ;;  %s2030_s3 = sshll.u32 %s2017_s11, 4  ;;  %s10065_s3 = int_to_ptr.vmem [resolvable:$true] %s2030_s3 }
 0x444   : > { %s12858_s30 = smov %s12857_s18  ;;  %s1975_s5 = sld [smem:[%s12859_s28 + %s5247_s12]] }
 0x445   : > { %s2063_s21 = sand.u32 1, %s12856_s13   ;;  %s10063_s6 = sld [smem:[%s5252_s25 + %s13417_s14]] }
 0x446   : > { %s10067_s10 = sshll.u32 %s2063_s21, 1  ;;  %s12044_s15 = scalar_lea.sflag [#allocation31], %s9834_s9 }
 0x447   : > { %s6587_s12 = scalar_lea.hbm %s12858_s30, 1312800 }
 0x44a   : > { %s5085_s7 = sshll.u32 %s1975_s5, 5 }
 0x44b   : > { %s1981_s2 = scalar_lea.hbm %s12857_s18, %s5085_s7 }
 0x44c   : > { %s6583_s8 = scalar_lea.hbm %s1981_s2, 32  ;;  %p6588_p8 = scmp.lt.s32.totalorder %s1981_s2, %s12858_s30 }
 0x44d   : > { %p6584_p0 = scmp.ne.s32.totalorder %s1981_s2, %s6583_s8  ;;  %p6589_p1 = scmp.lt.s32.totalorder %s6587_s12, %s6583_s8 }
 0x44f   : > { %p6585_p2 = pnand %p6584_p0, %p12854_p3  ;;  %p6590_p6 = por %p6589_p1, %p6588_p8 }
 0x451   : > { %p6586_p4 = pneg %p6585_p2 }
 0x453   : > { %p6591_p10 = pnand %p6590_p6, %p6586_p4 }
 0x455   : > { %6594 = shalt.err (!%p6591_p10)
}
 0x456   : > { %s6595_s14 = scalar_lea.vmem %s10052_s26, 32  ;;  %s8230_s13 = smov [#allocation30]  }
 0x457   : > { %p6596_p13 = scmp.ne.s32.totalorder %s10052_s26, %s6595_s14  ;;  %s6599_s18 = sshll.u32 %s8230_s13, 4  ;;  %s6600_s18 = int_to_ptr.vmem [resolvable:$false] %s6599_s18 }
 0x458   : > { %s6601_s24 = scalar_lea.vmem %s6600_s18, 64  ;;  %p6602_p12 = scmp.lt.s32.totalorder %s10052_s26, %s6600_s18 }
 0x459   : > { %p6597_p5 = pnand %p6596_p13, %p12854_p3  ;;  %p6603_p9 = scmp.lt.s32.totalorder %s6601_s24, %s6595_s14 }
 0x45b   : > { %p6598_p7 = pneg %p6597_p5  ;;  %p6604_p0 = por %p6603_p9, %p6602_p12 }
 0x45d   : > { %p6605_p2 = pnand %p6604_p0, %p6598_p7 }
 0x45f   : > { %6608 = shalt.err (!%p6605_p2)
}
 0x460   : > { %s12861_s8 = sld [smem:[#allocation151_spill]]  ;;  %p12863_p4 = scmp.ne.s32.totalorder %s12685_s16, 0 }
 0x461   : > { %s12862_s28 = sld [smem:[#allocation206_spill]]  ;;  %s5087_s25 = sshll.u32 %s10063_s6, 5 }
 0x462   : > { %5248 = dma.hbm_to_vmem [thread:$0]  (%p12854_p3), %s1981_s2, 32, %s10052_s26, %s12044_s15  }
 0x463   : > { %s5258_s5 = scalar_select %p12863_p4, [#allocation5], [#allocation84] }
 0x464   : > { %s2065_s11 = scalar_lea.vmem [#allocation36], %s10067_s10  ;;  %s12049_s12 = scalar_lea.sflag [#allocation34], %s9834_s9 }
 0x465   : > { %s10089_s21 = sshll.u32 %s2065_s11, 4  ;;  %s10112_s21 = int_to_ptr.vmem [resolvable:$true] %s10089_s21 }
 0x466   : > { %s2028_s4 = scalar_lea.hbm %s12861_s8, %s5087_s25  ;;  %s6613_s13 = scalar_lea.hbm %s12861_s8, 1312800 }
 0x467   : > { %s2111_s7 = sand.u32 1, %s12862_s28   ;;  %s6609_s14 = scalar_lea.hbm %s2028_s4, 32 }
 0x468   : > { %p6610_p8 = scmp.ne.s32.totalorder %s2028_s4, %s6609_s14  ;;  %p6614_p10 = scmp.lt.s32.totalorder %s2028_s4, %s12861_s8 }
 0x469   : > { %p6615_p13 = scmp.lt.s32.totalorder %s6613_s13, %s6609_s14 }
 0x46a   : > { %p6611_p1 = pnand %p6610_p8, %p12860_p11 }
 0x46b   : > { %p6616_p5 = por %p6615_p13, %p6614_p10 }
 0x46c   : > { %p6612_p6 = pneg %p6611_p1 }
 0x46e   : > { %p6617_p7 = pnand %p6616_p5, %p6612_p6 }
 0x470   : > { %6620 = shalt.err (!%p6617_p7)
}
 0x471   : > { %s6621_s6 = scalar_lea.vmem %s10065_s3, 32  ;;  %s8231_s26 = smov [#allocation33]  }
 0x472   : > { %p6622_p3 = scmp.ne.s32.totalorder %s10065_s3, %s6621_s6  ;;  %s6625_s10 = sshll.u32 %s8231_s26, 4  ;;  %s6626_s10 = int_to_ptr.vmem [resolvable:$false] %s6625_s10 }
 0x473   : > { %s6627_s2 = scalar_lea.vmem %s6626_s10, 64  ;;  %p6628_p0 = scmp.lt.s32.totalorder %s10065_s3, %s6626_s10 }
 0x474   : > { %p6623_p12 = pnand %p6622_p3, %p12860_p11  ;;  %p6629_p2 = scmp.lt.s32.totalorder %s6627_s2, %s6621_s6 }
 0x476   : > { %p6624_p9 = pneg %p6623_p12  ;;  %p6630_p8 = por %p6629_p2, %p6628_p0 }
 0x478   : > { %p6631_p1 = pnand %p6630_p8, %p6624_p9 }
 0x47a   : > { %6634 = shalt.err (!%p6631_p1)
}
 0x47b   : > { %s12864_s18 = sld [smem:[#allocation200_spill]]  ;;  %s13419_s0 = smov (!%p12863_p4, %s9077_s0), 0 }
 0x47c   : > { %s12865_s24 = sld [smem:[#allocation153_spill]]  ;;  %s4976_s29 = sshll.u32 %s2111_s7, 1 }
 0x47d   : > { %5254 = dma.hbm_to_vmem [thread:$0]  (%p12860_p11), %s2028_s4, 32, %s10065_s3, %s12049_s12  }
 0x47e   : > { %s2070_s28 = sld [smem:[%s5258_s5 + %s13419_s0]]  ;;  %p12867_p6 = scmp.ne.s32.totalorder %s12702_s22, 0 }
 0x47f   : > { %s2113_s14 = scalar_lea.vmem [#allocation39], %s4976_s29  ;;  %s12045_s10 = scalar_lea.sflag [#allocation37], %s9834_s9 }
 0x480   : > { %s5264_s11 = scalar_select %p12867_p6, [#allocation5], [#allocation86] }
 0x481   : > { %s13421_s17 = smov (!%p12867_p6, %s9140_s17), 0  ;;  %s2126_s13 = sshll.u32 %s2113_s14, 4  ;;  %s10125_s13 = int_to_ptr.vmem [resolvable:$true] %s2126_s13 }
 0x482   : > { %s12866_s25 = smov %s12865_s24  ;;  %s2159_s6 = sand.u32 1, %s12864_s18  }
 0x483   : > { %s10123_s26 = sld [smem:[%s5264_s11 + %s13421_s17]]  ;;  %s10127_s3 = sshll.u32 %s2159_s6, 1 }
 0x484   : > { %s5089_s4 = sshll.u32 %s2070_s28, 5  ;;  %s6639_s0 = scalar_lea.hbm %s12866_s25, 1312800 }
 0x485   : > { %s2076_s7 = scalar_lea.hbm %s12865_s24, %s5089_s4 }
 0x486   : > { %s6635_s2 = scalar_lea.hbm %s2076_s7, 32  ;;  %p6640_p5 = scmp.lt.s32.totalorder %s2076_s7, %s12866_s25 }
 0x487   : > { %p6636_p11 = scmp.ne.s32.totalorder %s2076_s7, %s6635_s2  ;;  %p6641_p7 = scmp.lt.s32.totalorder %s6639_s0, %s6635_s2 }
 0x489   : > { %p6637_p10 = pnand %p6636_p11, %p12863_p4  ;;  %p6642_p3 = por %p6641_p7, %p6640_p5 }
 0x48b   : > { %p6638_p13 = pneg %p6637_p10 }
 0x48d   : > { %p6643_p12 = pnand %p6642_p3, %p6638_p13 }
 0x48f   : > { %6646 = shalt.err (!%p6643_p12)
}
 0x490   : > { %s6647_s17 = scalar_lea.vmem %s10112_s21, 32  ;;  %s8232_s5 = smov [#allocation36]  }
 0x491   : > { %p6648_p9 = scmp.ne.s32.totalorder %s10112_s21, %s6647_s17  ;;  %s6651_s18 = sshll.u32 %s8232_s5, 4  ;;  %s6652_s18 = int_to_ptr.vmem [resolvable:$false] %s6651_s18 }
 0x492   : > { %s6653_s24 = scalar_lea.vmem %s6652_s18, 64  ;;  %p6654_p8 = scmp.lt.s32.totalorder %s10112_s21, %s6652_s18 }
 0x493   : > { %p6649_p0 = pnand %p6648_p9, %p12863_p4  ;;  %p6655_p1 = scmp.lt.s32.totalorder %s6653_s24, %s6647_s17 }
 0x495   : > { %p6650_p2 = pneg %p6649_p0  ;;  %p6656_p11 = por %p6655_p1, %p6654_p8 }
 0x497   : > { %p6657_p10 = pnand %p6656_p11, %p6650_p2 }
 0x499   : > { %6660 = shalt.err (!%p6657_p10)
}
 0x49a   : > { %s12868_s29 = sld [smem:[#allocation331_spill]]  ;;  %s5091_s6 = sshll.u32 %s10123_s26, 5 }
 0x49b   : > { %s12869_s28 = sld [smem:[#allocation155_spill]]  ;;  %s2161_s4 = scalar_lea.vmem [#allocation42], %s10127_s3 }
 0x49c   : > { %s12871_s11 = sld [smem:[#allocation194_spill]]  ;;  %s10149_s2 = sshll.u32 %s2161_s4, 4  ;;  %s10172_s2 = int_to_ptr.vmem [resolvable:$true] %s10149_s2 }
 0x49d   : > { %5260 = dma.hbm_to_vmem [thread:$0]  (%p12863_p4), %s2076_s7, 32, %s10112_s21, %s12045_s10  }
 0x49e   : > { %s12048_s17 = scalar_lea.sflag [#allocation40], %s9834_s9 }
 0x4a0   : > { %p12872_p13 = scmp.ne.s32.totalorder %s12868_s29, 0 }
 0x4a1   : > { %s12870_s15 = smov %s12869_s28  ;;  %s2124_s16 = scalar_lea.hbm %s12869_s28, %s5091_s6 }
 0x4a2   : > { %s5270_s14 = scalar_select %p12872_p13, [#allocation5], [#allocation88] }
 0x4a3   : > { %s2207_s0 = sand.u32 1, %s12871_s11   ;;  %s6661_s5 = scalar_lea.hbm %s2124_s16, 32 }
 0x4a4   : > { %p6662_p5 = scmp.ne.s32.totalorder %s2124_s16, %s6661_s5  ;;  %s6665_s18 = scalar_lea.hbm %s12870_s15, 1312800 }
 0x4a5   : > { %p6666_p12 = scmp.lt.s32.totalorder %s2124_s16, %s12870_s15  ;;  %p6667_p9 = scmp.lt.s32.totalorder %s6665_s18, %s6661_s5 }
 0x4a6   : > { %p6663_p7 = pnand %p6662_p5, %p12867_p6 }
 0x4a7   : > { %p6668_p0 = por %p6667_p9, %p6666_p12 }
 0x4a8   : > { %p6664_p3 = pneg %p6663_p7 }
 0x4aa   : > { %p6669_p2 = pnand %p6668_p0, %p6664_p3 }
 0x4ac   : > { %6672 = shalt.err (!%p6669_p2)
}
 0x4ad   : > { %s6673_s21 = scalar_lea.vmem %s10125_s13, 32  ;;  %s8233_s26 = smov [#allocation39]  }
 0x4ae   : > { %p6674_p4 = scmp.ne.s32.totalorder %s10125_s13, %s6673_s21  ;;  %s6677_s3 = sshll.u32 %s8233_s26, 4  ;;  %s6678_s3 = int_to_ptr.vmem [resolvable:$false] %s6677_s3 }
 0x4af   : > { %s6679_s7 = scalar_lea.vmem %s6678_s3, 64  ;;  %p6680_p11 = scmp.lt.s32.totalorder %s10125_s13, %s6678_s3 }
 0x4b0   : > { %p6675_p8 = pnand %p6674_p4, %p12867_p6  ;;  %p6681_p10 = scmp.lt.s32.totalorder %s6679_s7, %s6673_s21 }
 0x4b2   : > { %p6676_p1 = pneg %p6675_p8  ;;  %p6682_p5 = por %p6681_p10, %p6680_p11 }
 0x4b4   : > { %p6683_p7 = pnand %p6682_p5, %p6676_p1 }
 0x4b6   : > { %6686 = shalt.err (!%p6683_p7)
}
 0x4b7   : > { %s12873_s24 = sld [smem:[#allocation189_spill]]  ;;  %s13423_s20 = smov (!%p12872_p13, %s9194_s20), 0 }
 0x4b8   : > { %s12874_s28 = sld [smem:[#allocation188_spill]]  ;;  %s4992_s22 = sshll.u32 %s2207_s0, 1 }
 0x4b9   : > { %s12875_s11 = sld [smem:[#allocation157_spill]]  ;;  %s2209_s5 = scalar_lea.vmem [#allocation45], %s4992_s22 }
 0x4ba   : > { %5266 = dma.hbm_to_vmem [thread:$0]  (%p12867_p6), %s2124_s16, 32, %s10125_s13, %s12048_s17  }
 0x4bb   : > { %s2166_s6 = sld [smem:[%s5270_s14 + %s13423_s20]]  ;;  %s2222_s18 = sshll.u32 %s2209_s5, 4  ;;  %s10185_s18 = int_to_ptr.vmem [resolvable:$true] %s2222_s18 }
 0x4bc   : > { %s12046_s3 = scalar_lea.sflag [#allocation43], %s9834_s9 }
 0x4bd   : > { %p12877_p3 = scmp.ne.s32.totalorder %s12873_s24, 0 }
 0x4be   : > { %s2255_s21 = sand.u32 1, %s12874_s28  }
 0x4bf   : > { %s12876_s10 = smov %s12875_s11  ;;  %s13425_s1 = smov (!%p12877_p3, %s12834_s1), 0 }
 0x4c0   : > { %s5276_s4 = scalar_select %p12877_p3, [#allocation5], [#allocation90] }
 0x4c1   : > { %s10187_s13 = sshll.u32 %s2255_s21, 1  ;;  %s5093_s16 = sshll.u32 %s2166_s6, 5 }
 0x4c2   : > { %s10183_s26 = sld [smem:[%s5276_s4 + %s13425_s1]]  ;;  %s2172_s0 = scalar_lea.hbm %s12875_s11, %s5093_s16 }
 0x4c3   : > { %s6687_s7 = scalar_lea.hbm %s2172_s0, 32  ;;  %s6691_s20 = scalar_lea.hbm %s12876_s10, 1312800 }
 0x4c4   : > { %p6688_p6 = scmp.ne.s32.totalorder %s2172_s0, %s6687_s7  ;;  %p6692_p0 = scmp.lt.s32.totalorder %s2172_s0, %s12876_s10 }
 0x4c5   : > { %p6693_p2 = scmp.lt.s32.totalorder %s6691_s20, %s6687_s7 }
 0x4c6   : > { %p6689_p12 = pnand %p6688_p6, %p12872_p13 }
 0x4c7   : > { %p6694_p4 = por %p6693_p2, %p6692_p0 }
 0x4c8   : > { %p6690_p9 = pneg %p6689_p12 }
 0x4ca   : > { %p6695_p8 = pnand %p6694_p4, %p6690_p9 }
 0x4cc   : > { %6698 = shalt.err (!%p6695_p8)
}
 0x4cd   : > { %s6699_s1 = scalar_lea.vmem %s10172_s2, 32  ;;  %s8234_s14 = smov [#allocation42]  }
 0x4ce   : > { %p6700_p1 = scmp.ne.s32.totalorder %s10172_s2, %s6699_s1  ;;  %s6703_s28 = sshll.u32 %s8234_s14, 4  ;;  %s6704_s28 = int_to_ptr.vmem [resolvable:$false] %s6703_s28 }
 0x4cf   : > { %s6705_s11 = scalar_lea.vmem %s6704_s28, 64  ;;  %p6706_p5 = scmp.lt.s32.totalorder %s10172_s2, %s6704_s28 }
 0x4d0   : > { %p6701_p11 = pnand %p6700_p1, %p12872_p13  ;;  %p6707_p7 = scmp.lt.s32.totalorder %s6705_s11, %s6699_s1 }
 0x4d2   : > { %p6702_p10 = pneg %p6701_p11  ;;  %p6708_p6 = por %p6707_p7, %p6706_p5 }
 0x4d4   : > { %p6709_p12 = pnand %p6708_p6, %p6702_p10 }
 0x4d6   : > { %6712 = shalt.err (!%p6709_p12)
}
 0x4d7   : > { %s12878_s22 = sld [smem:[#allocation339_spill]]  ;;  %s5095_s16 = sshll.u32 %s10183_s26, 5 }
 0x4d8   : > { %s12879_s6 = sld [smem:[#allocation159_spill]]  ;;  %s2257_s7 = scalar_lea.vmem [#allocation48], %s10187_s13 }
 0x4d9   : > { %s12881_s4 = sld [smem:[#allocation182_spill]]  ;;  %s10209_s20 = sshll.u32 %s2257_s7, 4  ;;  %s10241_s20 = int_to_ptr.vmem [resolvable:$true] %s10209_s20 }
 0x4da   : > { %5272 = dma.hbm_to_vmem [thread:$0]  (%p12872_p13), %s2172_s0, 32, %s10172_s2, %s12046_s3  }
 0x4db   : > { %s12047_s14 = scalar_lea.sflag [#allocation46], %s9834_s9 }
 0x4dd   : > { %p12882_p9 = scmp.ne.s32.totalorder %s12878_s22, 0 }
 0x4de   : > { %s12880_s21 = smov %s12879_s6  ;;  %s2220_s29 = scalar_lea.hbm %s12879_s6, %s5095_s16 }
 0x4df   : > { %s5282_s5 = scalar_select %p12882_p9, [#allocation5], [#allocation92] }
 0x4e0   : > { %s2303_s1 = sand.u32 1, %s12881_s4   ;;  %s6713_s28 = scalar_lea.hbm %s2220_s29, 32 }
 0x4e1   : > { %p6714_p0 = scmp.ne.s32.totalorder %s2220_s29, %s6713_s28  ;;  %s6717_s11 = scalar_lea.hbm %s12880_s21, 1312800 }
 0x4e2   : > { %p6718_p8 = scmp.lt.s32.totalorder %s2220_s29, %s12880_s21  ;;  %p6719_p1 = scmp.lt.s32.totalorder %s6717_s11, %s6713_s28 }
 0x4e3   : > { %p6715_p2 = pnand %p6714_p0, %p12877_p3 }
 0x4e4   : > { %p6720_p11 = por %p6719_p1, %p6718_p8 }
 0x4e5   : > { %p6716_p4 = pneg %p6715_p2 }
 0x4e7   : > { %p6721_p10 = pnand %p6720_p11, %p6716_p4 }
 0x4e9   : > { %6724 = shalt.err (!%p6721_p10)
}
 0x4ea   : > { %s6725_s2 = scalar_lea.vmem %s10185_s18, 32  ;;  %s8235_s26 = smov [#allocation45]  }
 0x4eb   : > { %p6726_p13 = scmp.ne.s32.totalorder %s10185_s18, %s6725_s2  ;;  %s6729_s13 = sshll.u32 %s8235_s26, 4  ;;  %s6730_s13 = int_to_ptr.vmem [resolvable:$false] %s6729_s13 }
 0x4ec   : > { %s6731_s0 = scalar_lea.vmem %s6730_s13, 64  ;;  %p6732_p6 = scmp.lt.s32.totalorder %s10185_s18, %s6730_s13 }
 0x4ed   : > { %p6727_p5 = pnand %p6726_p13, %p12877_p3  ;;  %p6733_p12 = scmp.lt.s32.totalorder %s6731_s0, %s6725_s2 }
 0x4ef   : > { %p6728_p7 = pneg %p6727_p5  ;;  %p6734_p0 = por %p6733_p12, %p6732_p6 }
 0x4f1   : > { %p6735_p2 = pnand %p6734_p0, %p6728_p7 }
 0x4f3   : > { %6738 = shalt.err (!%p6735_p2)
}
 0x4f4   : > { %s12883_s6 = sld [smem:[#allocation304_spill]]  ;;  %s5008_s11 = sshll.u32 %s2303_s1, 1 }
 0x4f5   : > { %s12884_s4 = sld [smem:[#allocation248_spill]]  ;;  %s2305_s0 = scalar_lea.vmem [#allocation51], %s5008_s11 }
 0x4f6   : > { %s12885_s16 = sld [smem:[#allocation177_spill]]  ;;  %s2318_s3 = sshll.u32 %s2305_s0, 4  ;;  %s10245_s3 = int_to_ptr.vmem [resolvable:$true] %s2318_s3 }
 0x4f7   : > { %s12886_s7 = sld [smem:[#allocation244_spill]] }
 0x4f8   : > { %s12887_s28 = sld [smem:[#allocation161_spill]] }
 0x4f9   : > { %5278 = dma.hbm_to_vmem [thread:$0]  (%p12877_p3), %s2220_s29, 32, %s10185_s18, %s12047_s14  }
 0x4fa   : > { %s13427_s6 = smov (!%p12882_p9, %s12883_s6), 0 }
 0x4fb   : > { %s12050_s24 = sand.u32 1, %s12884_s4   ;;  %s2262_s2 = sld [smem:[%s5282_s5 + %s13427_s6]] }
 0x4fc   : > { %p12889_p4 = scmp.ne.s32.totalorder %s12885_s16, 0  ;;  %s10249_s29 = sshll.u32 %s12050_s24, 1 }
 0x4fd   : > { %s1656_s14 = sand.u32 1, %s12886_s7   ;;  %s12052_s6 = scalar_lea.sflag [#allocation49], %s9834_s9 }
 0x4fe   : > { %s12888_s13 = smov %s12887_s28  ;;  %s13429_s27 = smov (!%p12889_p4, %s12846_s27), 0 }
 0x4ff   : > { %s5288_s26 = scalar_select %p12889_p4, [#allocation5], [#allocation94] }
 0x500   : > { %s6743_s12 = scalar_lea.hbm %s12888_s13, 1312800 }
 0x501   : > { %s10243_s18 = sld [smem:[%s5288_s26 + %s13429_s27]]  ;;  %s5097_s1 = sshll.u32 %s2262_s2, 5 }
 0x502   : > { %s2268_s5 = scalar_lea.hbm %s12887_s28, %s5097_s1 }
 0x503   : > { %s6739_s17 = scalar_lea.hbm %s2268_s5, 32  ;;  %p6744_p11 = scmp.lt.s32.totalorder %s2268_s5, %s12888_s13 }
 0x504   : > { %p6740_p3 = scmp.ne.s32.totalorder %s2268_s5, %s6739_s17  ;;  %p6745_p10 = scmp.lt.s32.totalorder %s6743_s12, %s6739_s17 }
 0x506   : > { %p6741_p8 = pnand %p6740_p3, %p12882_p9  ;;  %p6746_p13 = por %p6745_p10, %p6744_p11 }
 0x508   : > { %p6742_p1 = pneg %p6741_p8 }
 0x50a   : > { %p6747_p5 = pnand %p6746_p13, %p6742_p1 }
 0x50c   : > { %6750 = shalt.err (!%p6747_p5)
}
 0x50d   : > { %s6751_s27 = scalar_lea.vmem %s10241_s20, 32  ;;  %s8236_s28 = smov [#allocation48]  }
 0x50e   : > { %p6752_p7 = scmp.ne.s32.totalorder %s10241_s20, %s6751_s27  ;;  %s6755_s11 = sshll.u32 %s8236_s28, 4  ;;  %s6756_s11 = int_to_ptr.vmem [resolvable:$false] %s6755_s11 }
 0x50f   : > { %s6757_s2 = scalar_lea.vmem %s6756_s11, 64  ;;  %p6758_p0 = scmp.lt.s32.totalorder %s10241_s20, %s6756_s11 }
 0x510   : > { %p6753_p6 = pnand %p6752_p7, %p12882_p9  ;;  %p6759_p2 = scmp.lt.s32.totalorder %s6757_s2, %s6751_s27 }
 0x512   : > { %p6754_p12 = pneg %p6753_p6  ;;  %p6760_p3 = por %p6759_p2, %p6758_p0 }
 0x514   : > { %p6761_p8 = pnand %p6760_p3, %p6754_p12 }
 0x516   : > { %6764 = shalt.err (!%p6761_p8)
}
 0x517   : > { %s12890_s12 = sld [smem:[#allocation272_spill]]  ;;  %s5099_s0 = sshll.u32 %s10243_s18, 5 }
 0x518   : > { %s12891_s17 = sld [smem:[#allocation163_spill]]  ;;  %s1611_s27 = scalar_lea.vmem [#allocation7], %s10249_s29 }
 0x519   : > { %5284 = dma.hbm_to_vmem [thread:$0]  (%p12882_p9), %s2268_s5, 32, %s10241_s20, %s12052_s6  }
 0x51a   : > { %s10272_s28 = sshll.u32 %s1611_s27, 4  ;;  %s10277_s11 = sshll.u32 %s1656_s14, 1  ;;  %s10298_s28 = int_to_ptr.vmem [resolvable:$true] %s10272_s28 }
 0x51b   : > { %s12055_s2 = scalar_lea.sflag [#allocation52], %s9834_s9 }
 0x51d   : > { %p12893_p1 = scmp.ne.s32.totalorder %s12890_s12, 0 }
 0x51e   : > { %s12892_s1 = smov %s12891_s17  ;;  %s2316_s22 = scalar_lea.hbm %s12891_s17, %s5099_s0 }
 0x51f   : > { %s5201_s26 = scalar_select %p12893_p1, [#allocation4], [#allocation65] }
 0x520   : > { %s6765_s24 = scalar_lea.hbm %s2316_s22, 32  ;;  %s6769_s8 = scalar_lea.hbm %s12892_s1, 1312800 }
 0x521   : > { %p6766_p11 = scmp.ne.s32.totalorder %s2316_s22, %s6765_s24  ;;  %p6770_p5 = scmp.lt.s32.totalorder %s2316_s22, %s12892_s1 }
 0x522   : > { %p6771_p7 = scmp.lt.s32.totalorder %s6769_s8, %s6765_s24 }
 0x523   : > { %p6767_p10 = pnand %p6766_p11, %p12889_p4 }
 0x524   : > { %p6772_p9 = por %p6771_p7, %p6770_p5 }
 0x525   : > { %p6768_p13 = pneg %p6767_p10 }
 0x527   : > { %p6773_p6 = pnand %p6772_p9, %p6768_p13 }
 0x529   : > { %6776 = shalt.err (!%p6773_p6)
}
 0x52a   : > { %s6777_s20 = scalar_lea.vmem %s10245_s3, 32  ;;  %s8237_s14 = smov [#allocation51]  }
 0x52b   : > { %p6778_p12 = scmp.ne.s32.totalorder %s10245_s3, %s6777_s20  ;;  %s6781_s7 = sshll.u32 %s8237_s14, 4  ;;  %s6782_s7 = int_to_ptr.vmem [resolvable:$false] %s6781_s7 }
 0x52c   : > { %s6783_s18 = scalar_lea.vmem %s6782_s7, 64  ;;  %p6784_p3 = scmp.lt.s32.totalorder %s10245_s3, %s6782_s7 }
 0x52d   : > { %p6779_p0 = pnand %p6778_p12, %p12889_p4  ;;  %p6785_p8 = scmp.lt.s32.totalorder %s6783_s18, %s6777_s20 }
 0x52f   : > { %p6780_p2 = pneg %p6779_p0  ;;  %p6786_p11 = por %p6785_p8, %p6784_p3 }
 0x531   : > { %p6787_p10 = pnand %p6786_p11, %p6780_p2 }
 0x533   : > { %6790 = shalt.err (!%p6787_p10)
}
 0x534   : > { %s12894_s8 = sld [smem:[#allocation270_spill]]  ;;  %s1658_s6 = scalar_lea.vmem [#allocation11], %s10277_s11 }
 0x535   : > { %s12895_s24 = sld [smem:[#allocation264_spill]]  ;;  %s1671_s1 = sshll.u32 %s1658_s6, 4  ;;  %s10314_s1 = int_to_ptr.vmem [resolvable:$true] %s1671_s1 }
 0x536   : > { %s12896_s29 = sld [smem:[#allocation279_spill]] }
 0x537   : > { %s12897_s5 = sld [smem:[#allocation274_spill]] }
 0x538   : > { %s12898_s17 = sld [smem:[#allocation286_spill]] }
 0x539   : > { %s12899_s0 = sld [smem:[#allocation134_spill]] }
 0x53a   : > { %5290 = dma.hbm_to_vmem [thread:$0]  (%p12889_p4), %s2316_s22, 32, %s10245_s3, %s12055_s2  }
 0x53b   : > { %s5202_s27 = scalar_select %p12893_p1, %s12894_s8, 0 }
 0x53c   : > { %s1704_s20 = sand.u32 1, %s12895_s24   ;;  %p12901_p13 = scmp.ne.s32.totalorder %s12896_s29, 0 }
 0x53d   : > { %s1615_s16 = sld [smem:[%s5201_s26 + %s5202_s27]]  ;;  %s4908_s10 = sshll.u32 %s1704_s20, 1 }
 0x53e   : > { %s5207_s14 = scalar_select %p12901_p13, [#allocation4], [#allocation67] }
 0x53f   : > { %s12900_s7 = smov %s12899_s0  ;;  %p12902_p4 = scmp.ne.s32.totalorder %s12898_s17, 0 }
 0x540   : > { %s5208_s18 = scalar_select %p12901_p13, %s12897_s5, 0 }
 0x541   : > { %s5213_s22 = scalar_select %p12902_p4, [#allocation4], [#allocation69] }
 0x542   : > { %s10310_s3 = sld [smem:[%s5207_s14 + %s5208_s18]]  ;;  %s1706_s26 = scalar_lea.vmem [#allocation14], %s4908_s10 }
 0x543   : > { %s5070_s2 = sshll.u32 %s1615_s16, 5  ;;  %s10317_s24 = sshll.u32 %s1706_s26, 4  ;;  %s10359_s24 = int_to_ptr.vmem [resolvable:$true] %s10317_s24 }
 0x544   : > { %s1621_s13 = scalar_lea.hbm %s12899_s0, %s5070_s2  ;;  %s12903_s27 = sand.u32 1, %s12884_s4  }
 0x545   : > { %s1608_s15 = scalar_lea.sflag [#allocation8], %s12903_s27  ;;  %s6791_s19 = scalar_lea.hbm %s1621_s13, 32 }
 0x546   : > { %p6792_p5 = scmp.ne.s32.totalorder %s1621_s13, %s6791_s19  ;;  %s6795_s6 = scalar_lea.hbm %s12900_s7, 1312800 }
 0x547   : > { %p6796_p6 = scmp.lt.s32.totalorder %s1621_s13, %s12900_s7  ;;  %p6797_p12 = scmp.lt.s32.totalorder %s6795_s6, %s6791_s19 }
 0x548   : > { %p6793_p7 = pnand %p6792_p5, %p12893_p1 }
 0x549   : > { %p6798_p0 = por %p6797_p12, %p6796_p6 }
 0x54a   : > { %p6794_p9 = pneg %p6793_p7 }
 0x54c   : > { %p6799_p2 = pnand %p6798_p0, %p6794_p9 }
 0x54e   : > { %6802 = shalt.err (!%p6799_p2)
}
 0x54f   : > { %s6803_s10 = scalar_lea.vmem %s10298_s28, 32  ;;  %s8238_s4 = smov [#allocation7]  }
 0x550   : > { %p6804_p3 = scmp.ne.s32.totalorder %s10298_s28, %s6803_s10  ;;  %s6807_s11 = sshll.u32 %s8238_s4, 4  ;;  %s6808_s11 = int_to_ptr.vmem [resolvable:$false] %s6807_s11 }
 0x551   : > { %s6809_s2 = scalar_lea.vmem %s6808_s11, 64  ;;  %p6810_p10 = scmp.lt.s32.totalorder %s10298_s28, %s6808_s11 }
 0x552   : > { %p6805_p8 = pnand %p6804_p3, %p12893_p1  ;;  %p6811_p5 = scmp.lt.s32.totalorder %s6809_s2, %s6803_s10 }
 0x554   : > { %p6806_p11 = pneg %p6805_p8  ;;  %p6812_p7 = por %p6811_p5, %p6810_p10 }
 0x556   : > { %p6813_p13 = pnand %p6812_p7, %p6806_p11 }
 0x558   : > { %6816 = shalt.err (!%p6813_p13)
}
 0x559   : > { %s12904_s19 = sld [smem:[#allocation284_spill]]  ;;  %s5072_s14 = sshll.u32 %s10310_s3, 5 }
 0x55a   : > { %s12905_s0 = sld [smem:[#allocation258_spill]]  ;;  %p12907_p9 = scmp.ne.s32.totalorder %s12896_s29, 0 }
 0x55b   : > { %s12906_s16 = sld [smem:[#allocation136_spill]] }
 0x55c   : > { %5203 = dma.hbm_to_vmem [thread:$0]  (%p12893_p1), %s1621_s13, 32, %s10298_s28, %s1608_s15  }
 0x55f   : > { %s5214_s20 = scalar_select %p12902_p4, %s12904_s19, 0 }
 0x560   : > { %s1752_s18 = sand.u32 1, %s12905_s0  }
 0x561   : > { %s1669_s26 = scalar_lea.hbm %s12906_s16, %s5072_s14  ;;  %s10342_s27 = sld [smem:[%s5213_s22 + %s5214_s20]] }
 0x562   : > { %s6817_s12 = scalar_lea.hbm %s1669_s26, 32  ;;  %s6821_s6 = scalar_lea.hbm %s12906_s16, 1312800 }
 0x563   : > { %p6818_p13 = scmp.ne.s32.totalorder %s1669_s26, %s6817_s12  ;;  %p6822_p0 = scmp.lt.s32.totalorder %s1669_s26, %s12906_s16 }
 0x564   : > { %p6823_p2 = scmp.lt.s32.totalorder %s6821_s6, %s6817_s12 }
 0x565   : > { %p6819_p6 = pnand %p6818_p13, %p12907_p9 }
 0x566   : > { %p6824_p3 = por %p6823_p2, %p6822_p0 }
 0x567   : > { %p6820_p12 = pneg %p6819_p6 }
 0x569   : > { %p6825_p8 = pnand %p6824_p3, %p6820_p12 }
 0x56b   : > { %6828 = shalt.err (!%p6825_p8)
}
 0x56c   : > { %s6829_s15 = scalar_lea.vmem %s10314_s1, 32  ;;  %s8239_s13 = smov [#allocation11]  }
 0x56d   : > { %p6830_p1 = scmp.ne.s32.totalorder %s10314_s1, %s6829_s15  ;;  %s6833_s28 = sshll.u32 %s8239_s13, 4  ;;  %s6834_s28 = int_to_ptr.vmem [resolvable:$false] %s6833_s28 }
 0x56e   : > { %s6835_s3 = scalar_lea.vmem %s6834_s28, 64  ;;  %p6836_p5 = scmp.lt.s32.totalorder %s10314_s1, %s6834_s28 }
 0x56f   : > { %p6831_p11 = pnand %p6830_p1, %p12907_p9  ;;  %p6837_p7 = scmp.lt.s32.totalorder %s6835_s3, %s6829_s15 }
 0x571   : > { %p6832_p10 = pneg %p6831_p11  ;;  %p6838_p13 = por %p6837_p7, %p6836_p5 }
 0x573   : > { %p6839_p6 = pnand %p6838_p13, %p6832_p10 }
 0x575   : > { %6842 = shalt.err (!%p6839_p6)
}
 0x576   : > { %s12908_s22 = scalar_lea.sflag [#allocation10], %s9834_s9  ;;  %s12909_s10 = sld [smem:[#allocation252_spill]] }
 0x577   : > { %s12910_s4 = sld [smem:[#allocation292_spill]]  ;;  %s10361_s0 = sshll.u32 %s1752_s18, 1 }
 0x578   : > { %s12911_s11 = sld [smem:[#allocation291_spill]]  ;;  %s5074_s12 = sshll.u32 %s10342_s27, 5 }
 0x579   : > { %s12912_s2 = sld [smem:[#allocation138_spill]] }
 0x57a   : > { %5209 = dma.hbm_to_vmem [thread:$0]  (%p12907_p9), %s1669_s26, 32, %s10314_s1, %s12908_s22  }
 0x57c   : > { %s1800_s20 = sand.u32 1, %s12909_s10  }
 0x57d   : > { %p12914_p12 = scmp.ne.s32.totalorder %s12910_s4, 0  ;;  %s10370_s6 = sshll.u32 %s1800_s20, 1 }
 0x57f   : > { %s12913_s7 = smov %s12912_s2  ;;  %s1717_s15 = scalar_lea.hbm %s12912_s2, %s5074_s12 }
 0x580   : > { %s5219_s29 = scalar_select %p12914_p12, [#allocation4], [#allocation71] }
 0x581   : > { %s5220_s14 = scalar_select %p12914_p12, %s12911_s11, 0 }
 0x582   : > { %s6843_s28 = scalar_lea.hbm %s1717_s15, 32  ;;  %s6847_s1 = scalar_lea.hbm %s12913_s7, 1312800 }
 0x583   : > { %s10373_s13 = sld [smem:[%s5219_s29 + %s5220_s14]]  ;;  %p6844_p0 = scmp.ne.s32.totalorder %s1717_s15, %s6843_s28 }
 0x584   : > { %p6848_p3 = scmp.lt.s32.totalorder %s1717_s15, %s12913_s7  ;;  %p6849_p8 = scmp.lt.s32.totalorder %s6847_s1, %s6843_s28 }
 0x585   : > { %p6845_p2 = pnand %p6844_p0, %p12902_p4 }
 0x586   : > { %p6850_p1 = por %p6849_p8, %p6848_p3 }
 0x587   : > { %p6846_p9 = pneg %p6845_p2 }
 0x589   : > { %p6851_p11 = pnand %p6850_p1, %p6846_p9 }
 0x58b   : > { %6854 = shalt.err (!%p6851_p11)
}
 0x58c   : > { %s6855_s18 = scalar_lea.vmem %s10359_s24, 32  ;;  %s8240_s26 = smov [#allocation14]  }
 0x58d   : > { %p6856_p10 = scmp.ne.s32.totalorder %s10359_s24, %s6855_s18  ;;  %s6859_s27 = sshll.u32 %s8240_s26, 4  ;;  %s6860_s27 = int_to_ptr.vmem [resolvable:$false] %s6859_s27 }
 0x58e   : > { %s6861_s3 = scalar_lea.vmem %s6860_s27, 64  ;;  %p6862_p13 = scmp.lt.s32.totalorder %s10359_s24, %s6860_s27 }
 0x58f   : > { %p6857_p5 = pnand %p6856_p10, %p12902_p4  ;;  %p6863_p6 = scmp.lt.s32.totalorder %s6861_s3, %s6855_s18 }
 0x591   : > { %p6858_p7 = pneg %p6857_p5  ;;  %p6864_p0 = por %p6863_p6, %p6862_p13 }
 0x593   : > { %p6865_p2 = pnand %p6864_p0, %p6858_p7 }
 0x595   : > { %6868 = shalt.err (!%p6865_p2)
}
 0x596   : > { %s12915_s22 = scalar_lea.sflag [#allocation13], %s9834_s9  ;;  %s12916_s10 = sld [smem:[#allocation297_spill]] }
 0x597   : > { %s12917_s2 = sld [smem:[#allocation296_spill]]  ;;  %s1754_s14 = scalar_lea.vmem [#allocation17], %s10361_s0 }
 0x598   : > { %s12918_s20 = sld [smem:[#allocation239_spill]]  ;;  %s1767_s12 = sshll.u32 %s1754_s14, 4  ;;  %s10395_s12 = int_to_ptr.vmem [resolvable:$true] %s1767_s12 }
 0x599   : > { %s12919_s29 = sld [smem:[#allocation140_spill]]  ;;  %s5076_s26 = sshll.u32 %s10373_s13, 5 }
 0x59a   : > { %5215 = dma.hbm_to_vmem [thread:$0]  (%p12902_p4), %s1717_s15, 32, %s10359_s24, %s12915_s22  }
 0x59b   : > { %s1802_s7 = scalar_lea.vmem [#allocation20], %s10370_s6 }
 0x59c   : > { %p12921_p9 = scmp.ne.s32.totalorder %s12916_s10, 0  ;;  %s1815_s16 = sshll.u32 %s1802_s7, 4  ;;  %s10420_s16 = int_to_ptr.vmem [resolvable:$true] %s1815_s16 }
 0x59e   : > { %s5225_s28 = scalar_select %p12921_p9, [#allocation4], [#allocation73] }
 0x59f   : > { %s12920_s1 = smov %s12919_s29  ;;  %s1765_s3 = scalar_lea.hbm %s12919_s29, %s5076_s26 }
 0x5a0   : > { %s5226_s17 = scalar_select %p12921_p9, %s12917_s2, 0 }
 0x5a1   : > { %s6869_s21 = scalar_lea.hbm %s1765_s3, 32  ;;  %s6873_s24 = scalar_lea.hbm %s12920_s1, 1312800 }
 0x5a2   : > { %s10399_s27 = sld [smem:[%s5225_s28 + %s5226_s17]]  ;;  %p6870_p3 = scmp.ne.s32.totalorder %s1765_s3, %s6869_s21 }
 0x5a3   : > { %p6874_p1 = scmp.lt.s32.totalorder %s1765_s3, %s12920_s1  ;;  %p6875_p11 = scmp.lt.s32.totalorder %s6873_s24, %s6869_s21 }
 0x5a4   : > { %p6871_p4 = pnand %p6870_p3, %p12914_p12 }
 0x5a5   : > { %p6876_p10 = por %p6875_p11, %p6874_p1 }
 0x5a6   : > { %p6872_p8 = pneg %p6871_p4 }
 0x5a8   : > { %p6877_p5 = pnand %p6876_p10, %p6872_p8 }
 0x5aa   : > { %6880 = shalt.err (!%p6877_p5)
}
 0x5ab   : > { %s6881_s0 = scalar_lea.vmem %s10395_s12, 32  ;;  %s8241_s7 = smov [#allocation17]  }
 0x5ac   : > { %p6882_p7 = scmp.ne.s32.totalorder %s10395_s12, %s6881_s0  ;;  %s6885_s6 = sshll.u32 %s8241_s7, 4  ;;  %s6886_s6 = int_to_ptr.vmem [resolvable:$false] %s6885_s6 }
 0x5ad   : > { %s6887_s15 = scalar_lea.vmem %s6886_s6, 64  ;;  %p6888_p0 = scmp.lt.s32.totalorder %s10395_s12, %s6886_s6 }
 0x5ae   : > { %p6883_p13 = pnand %p6882_p7, %p12914_p12  ;;  %p6889_p2 = scmp.lt.s32.totalorder %s6887_s15, %s6881_s0 }
 0x5b0   : > { %p6884_p6 = pneg %p6883_p13  ;;  %p6890_p3 = por %p6889_p2, %p6888_p0 }
 0x5b2   : > { %p6891_p4 = pnand %p6890_p3, %p6884_p6 }
 0x5b4   : > { %6894 = shalt.err (!%p6891_p4)
}
 0x5b5   : > { %s12922_s21 = scalar_lea.sflag [#allocation16], %s9834_s9  ;;  %s12923_s13 = sld [smem:[#allocation233_spill]] }
 0x5b6   : > { %s12924_s22 = sld [smem:[#allocation303_spill]]  ;;  %s12927_s14 = sand.u32 1, %s12918_s20  }
 0x5b7   : > { %s12925_s29 = sld [smem:[#allocation142_spill]]  ;;  %s4932_s28 = sshll.u32 %s12927_s14, 1 }
 0x5b8   : > { %5221 = dma.hbm_to_vmem [thread:$0]  (%p12914_p12), %s1765_s3, 32, %s10395_s12, %s12922_s21  }
 0x5b9   : > { %s5078_s4 = sshll.u32 %s10399_s27, 5  ;;  %s1850_s7 = scalar_lea.vmem [#allocation23], %s4932_s28 }
 0x5ba   : > { %s1863_s6 = sshll.u32 %s1850_s7, 4  ;;  %s10445_s6 = int_to_ptr.vmem [resolvable:$true] %s1863_s6 }
 0x5bb   : > { %s1896_s17 = sand.u32 1, %s12923_s13  }
 0x5bc   : > { %p12928_p8 = scmp.ne.s32.totalorder %s12924_s22, 0  ;;  %s10425_s24 = sshll.u32 %s1896_s17, 1 }
 0x5bd   : > { %s12926_s18 = smov %s12925_s29  ;;  %s1813_s0 = scalar_lea.hbm %s12925_s29, %s5078_s4 }
 0x5be   : > { %s5231_s26 = scalar_select %p12928_p8, [#allocation4], [#allocation75] }
 0x5bf   : > { %s6895_s15 = scalar_lea.hbm %s1813_s0, 32  ;;  %s6899_s1 = scalar_lea.hbm %s12926_s18, 1312800 }
 0x5c0   : > { %p6896_p1 = scmp.ne.s32.totalorder %s1813_s0, %s6895_s15  ;;  %p6900_p12 = scmp.lt.s32.totalorder %s1813_s0, %s12926_s18 }
 0x5c1   : > { %p6901_p5 = scmp.lt.s32.totalorder %s6899_s1, %s6895_s15 }
 0x5c2   : > { %p6897_p11 = pnand %p6896_p1, %p12921_p9 }
 0x5c3   : > { %p6902_p7 = por %p6901_p5, %p6900_p12 }
 0x5c4   : > { %p6898_p10 = pneg %p6897_p11 }
 0x5c6   : > { %p6903_p13 = pnand %p6902_p7, %p6898_p10 }
 0x5c8   : > { %6906 = shalt.err (!%p6903_p13)
}
 0x5c9   : > { %s6907_s20 = scalar_lea.vmem %s10420_s16, 32  ;;  %s8242_s12 = smov [#allocation20]  }
 0x5ca   : > { %p6908_p6 = scmp.ne.s32.totalorder %s10420_s16, %s6907_s20  ;;  %s6911_s27 = sshll.u32 %s8242_s12, 4  ;;  %s6912_s27 = int_to_ptr.vmem [resolvable:$false] %s6911_s27 }
 0x5cb   : > { %s6913_s3 = scalar_lea.vmem %s6912_s27, 64  ;;  %p6914_p3 = scmp.lt.s32.totalorder %s10420_s16, %s6912_s27 }
 0x5cc   : > { %p6909_p0 = pnand %p6908_p6, %p12921_p9  ;;  %p6915_p4 = scmp.lt.s32.totalorder %s6913_s3, %s6907_s20 }
 0x5ce   : > { %p6910_p2 = pneg %p6909_p0  ;;  %p6916_p1 = por %p6915_p4, %p6914_p3 }
 0x5d0   : > { %p6917_p11 = pnand %p6916_p1, %p6910_p2 }
 0x5d2   : > { %6920 = shalt.err (!%p6917_p11)
}
 0x5d3   : > { %s12929_s1 = scalar_lea.sflag [#allocation19], %s9834_s9  ;;  %s12930_s21 = sld [smem:[#allocation302_spill]] }
 0x5d4   : > { %s12931_s13 = sld [smem:[#allocation227_spill]]  ;;  %s1898_s27 = scalar_lea.vmem [#allocation26], %s10425_s24 }
 0x5d5   : > { %s12932_s29 = sld [smem:[#allocation309_spill]]  ;;  %s1911_s3 = sshll.u32 %s1898_s27, 4  ;;  %s10461_s3 = int_to_ptr.vmem [resolvable:$true] %s1911_s3 }
 0x5d6   : > { %s12933_s14 = sld [smem:[#allocation308_spill]] }
 0x5d7   : > { %s12934_s28 = sld [smem:[#allocation315_spill]] }
 0x5d8   : > { %s12935_s17 = sld [smem:[#allocation144_spill]] }
 0x5d9   : > { %5227 = dma.hbm_to_vmem [thread:$0]  (%p12921_p9), %s1813_s0, 32, %s10420_s16, %s12929_s1  }
 0x5da   : > { %s5232_s4 = scalar_select %p12928_p8, %s12930_s21, 0 }
 0x5db   : > { %s1944_s15 = sand.u32 1, %s12931_s13   ;;  %p12937_p10 = scmp.ne.s32.totalorder %s12932_s29, 0 }
 0x5dc   : > { %s1855_s10 = sld [smem:[%s5231_s26 + %s5232_s4]]  ;;  %s4948_s18 = sshll.u32 %s1944_s15, 1 }
 0x5dd   : > { %s5237_s20 = scalar_select %p12937_p10, [#allocation4], [#allocation77] }
 0x5de   : > { %s12936_s7 = smov %s12935_s17  ;;  %p12938_p9 = scmp.ne.s32.totalorder %s12934_s28, 0 }
 0x5df   : > { %s5238_s12 = scalar_select %p12937_p10, %s12933_s14, 0 }
 0x5e0   : > { %s5243_s16 = scalar_select %p12938_p9, [#allocation4], [#allocation79] }
 0x5e1   : > { %s10457_s25 = sld [smem:[%s5237_s20 + %s5238_s12]]  ;;  %s1946_s26 = scalar_lea.vmem [#allocation29], %s4948_s18 }
 0x5e2   : > { %s5080_s0 = sshll.u32 %s1855_s10, 5  ;;  %s10464_s4 = sshll.u32 %s1946_s26, 4  ;;  %s10506_s4 = int_to_ptr.vmem [resolvable:$true] %s10464_s4 }
 0x5e3   : > { %s1861_s1 = scalar_lea.hbm %s12935_s17, %s5080_s0  ;;  %s6925_s30 = scalar_lea.hbm %s12936_s7, 1312800 }
 0x5e4   : > { %s6921_s13 = scalar_lea.hbm %s1861_s1, 32  ;;  %p6926_p13 = scmp.lt.s32.totalorder %s1861_s1, %s12936_s7 }
 0x5e5   : > { %p6922_p12 = scmp.ne.s32.totalorder %s1861_s1, %s6921_s13  ;;  %p6927_p6 = scmp.lt.s32.totalorder %s6925_s30, %s6921_s13 }
 0x5e7   : > { %p6923_p5 = pnand %p6922_p12, %p12928_p8  ;;  %p6928_p0 = por %p6927_p6, %p6926_p13 }
 0x5e9   : > { %p6924_p7 = pneg %p6923_p5 }
 0x5eb   : > { %p6929_p2 = pnand %p6928_p0, %p6924_p7 }
 0x5ed   : > { %6932 = shalt.err (!%p6929_p2)
}
 0x5ee   : > { %s6933_s24 = scalar_lea.vmem %s10445_s6, 32  ;;  %s8243_s18 = smov [#allocation23]  }
 0x5ef   : > { %p6934_p3 = scmp.ne.s32.totalorder %s10445_s6, %s6933_s24  ;;  %s6937_s17 = sshll.u32 %s8243_s18, 4  ;;  %s6938_s17 = int_to_ptr.vmem [resolvable:$false] %s6937_s17 }
 0x5f0   : > { %s6939_s10 = scalar_lea.vmem %s6938_s17, 64  ;;  %p6940_p11 = scmp.lt.s32.totalorder %s10445_s6, %s6938_s17 }
 0x5f1   : > { %p6935_p4 = pnand %p6934_p3, %p12928_p8  ;;  %p6941_p12 = scmp.lt.s32.totalorder %s6939_s10, %s6933_s24 }
 0x5f3   : > { %p6936_p1 = pneg %p6935_p4  ;;  %p6942_p5 = por %p6941_p12, %p6940_p11 }
 0x5f5   : > { %p6943_p10 = pnand %p6942_p5, %p6936_p1 }
 0x5f7   : > { %6946 = shalt.err (!%p6943_p10)
}
 0x5f8   : > { %s12939_s30 = scalar_lea.sflag [#allocation22], %s9834_s9  ;;  %s12940_s15 = sld [smem:[#allocation314_spill]] }
 0x5f9   : > { %s12941_s20 = sld [smem:[#allocation221_spill]]  ;;  %s5082_s0 = sshll.u32 %s10457_s25, 5 }
 0x5fa   : > { %s12942_s12 = sld [smem:[#allocation146_spill]]  ;;  %p12944_p7 = scmp.ne.s32.totalorder %s12932_s29, 0 }
 0x5fb   : > { %5233 = dma.hbm_to_vmem [thread:$0]  (%p12928_p8), %s1861_s1, 32, %s10445_s6, %s12939_s30  }
 0x5fe   : > { %s5244_s27 = scalar_select %p12938_p9, %s12940_s15, 0 }
 0x5ff   : > { %s1992_s26 = sand.u32 1, %s12941_s20  }
 0x600   : > { %s12943_s13 = smov %s12942_s12  ;;  %s1909_s24 = scalar_lea.hbm %s12942_s12, %s5082_s0 }
 0x601   : > { %s10489_s22 = sld [smem:[%s5243_s16 + %s5244_s27]]  ;;  %s6947_s18 = scalar_lea.hbm %s1909_s24, 32 }
 0x602   : > { %p6948_p10 = scmp.ne.s32.totalorder %s1909_s24, %s6947_s18  ;;  %s6951_s17 = scalar_lea.hbm %s12943_s13, 1312800 }
 0x603   : > { %p6952_p0 = scmp.lt.s32.totalorder %s1909_s24, %s12943_s13  ;;  %p6953_p2 = scmp.lt.s32.totalorder %s6951_s17, %s6947_s18 }
 0x604   : > { %p6949_p13 = pnand %p6948_p10, %p12944_p7 }
 0x605   : > { %p6954_p3 = por %p6953_p2, %p6952_p0 }
 0x606   : > { %p6950_p6 = pneg %p6949_p13 }
 0x608   : > { %p6955_p4 = pnand %p6954_p3, %p6950_p6 }
 0x60a   : > { %6958 = shalt.err (!%p6955_p4)
}
 0x60b   : > { %s6959_s25 = scalar_lea.vmem %s10461_s3, 32  ;;  %s8244_s6 = smov [#allocation26]  }
 0x60c   : > { %p6960_p8 = scmp.ne.s32.totalorder %s10461_s3, %s6959_s25  ;;  %s6963_s16 = sshll.u32 %s8244_s6, 4  ;;  %s6964_s16 = int_to_ptr.vmem [resolvable:$false] %s6963_s16 }
 0x60d   : > { %s6965_s1 = scalar_lea.vmem %s6964_s16, 64  ;;  %p6966_p12 = scmp.lt.s32.totalorder %s10461_s3, %s6964_s16 }
 0x60e   : > { %p6961_p1 = pnand %p6960_p8, %p12944_p7  ;;  %p6967_p5 = scmp.lt.s32.totalorder %s6965_s1, %s6959_s25 }
 0x610   : > { %p6962_p11 = pneg %p6961_p1  ;;  %p6968_p10 = por %p6967_p5, %p6966_p12 }
 0x612   : > { %p6969_p13 = pnand %p6968_p10, %p6962_p11 }
 0x614   : > { %6972 = shalt.err (!%p6969_p13)
}
 0x615   : > { %s12945_s10 = scalar_lea.sflag [#allocation25], %s9834_s9  ;;  %s12946_s30 = sld [smem:[#allocation215_spill]] }
 0x616   : > { %s12947_s20 = sld [smem:[#allocation320_spill]]  ;;  %s10508_s27 = sshll.u32 %s1992_s26, 1 }
 0x617   : > { %s12948_s12 = sld [smem:[#allocation148_spill]]  ;;  %s5084_s17 = sshll.u32 %s10489_s22, 5 }
 0x618   : > { %5239 = dma.hbm_to_vmem [thread:$0]  (%p12944_p7), %s1909_s24, 32, %s10461_s3, %s12945_s10  }
 0x61b   : > { %s2039_s0 = sand.u32 1, %s12946_s30  }
 0x61c   : > { %p12950_p6 = scmp.ne.s32.totalorder %s12947_s20, 0  ;;  %s10517_s25 = sshll.u32 %s2039_s0, 1 }
 0x61d   : > { %s12949_s18 = smov %s12948_s12  ;;  %s1957_s6 = scalar_lea.hbm %s12948_s12, %s5084_s17 }
 0x61e   : > { %s5249_s29 = scalar_select %p12950_p6, [#allocation5], [#allocation81] }
 0x61f   : > { %s13431_s8 = smov (!%p12950_p6, %s12894_s8), 0  ;;  %s6973_s1 = scalar_lea.hbm %s1957_s6, 32 }
 0x620   : > { %s10520_s16 = sld [smem:[%s5249_s29 + %s13431_s8]]  ;;  %p6974_p0 = scmp.ne.s32.totalorder %s1957_s6, %s6973_s1 }
 0x621   : > { %s6977_s3 = scalar_lea.hbm %s12949_s18, 1312800  ;;  %p6978_p3 = scmp.lt.s32.totalorder %s1957_s6, %s12949_s18 }
 0x622   : > { %p6975_p2 = pnand %p6974_p0, %p12938_p9  ;;  %p6979_p4 = scmp.lt.s32.totalorder %s6977_s3, %s6973_s1 }
 0x624   : > { %p6976_p7 = pneg %p6975_p2  ;;  %p6980_p8 = por %p6979_p4, %p6978_p3 }
 0x626   : > { %p6981_p1 = pnand %p6980_p8, %p6976_p7 }
 0x628   : > { %6984 = shalt.err (!%p6981_p1)
}
 0x629   : > { %s6985_s26 = scalar_lea.vmem %s10506_s4, 32  ;;  %s8245_s8 = smov [#allocation29]  }
 0x62a   : > { %p6986_p11 = scmp.ne.s32.totalorder %s10506_s4, %s6985_s26  ;;  %s6989_s24 = sshll.u32 %s8245_s8, 4  ;;  %s6990_s24 = int_to_ptr.vmem [resolvable:$false] %s6989_s24 }
 0x62b   : > { %s6991_s22 = scalar_lea.vmem %s6990_s24, 64  ;;  %p6992_p10 = scmp.lt.s32.totalorder %s10506_s4, %s6990_s24 }
 0x62c   : > { %p6987_p12 = pnand %p6986_p11, %p12938_p9  ;;  %p6993_p13 = scmp.lt.s32.totalorder %s6991_s22, %s6985_s26 }
 0x62e   : > { %p6988_p5 = pneg %p6987_p12  ;;  %p6994_p0 = por %p6993_p13, %p6992_p10 }
 0x630   : > { %p6995_p2 = pnand %p6994_p0, %p6988_p5 }
 0x632   : > { %6998 = shalt.err (!%p6995_p2)
}
 0x633   : > { %s12951_s10 = scalar_lea.sflag [#allocation28], %s9834_s9  ;;  %s12952_s30 = sld [smem:[#allocation323_spill]] }
 0x634   : > { %s12953_s12 = sld [smem:[#allocation209_spill]]  ;;  %s1994_s29 = scalar_lea.vmem [#allocation32], %s10508_s27 }
 0x635   : > { %s12954_s0 = sld [smem:[#allocation150_spill]]  ;;  %s2006_s17 = sshll.u32 %s1994_s29, 4  ;;  %s10542_s17 = int_to_ptr.vmem [resolvable:$true] %s2006_s17 }
 0x636   : > { %5245 = dma.hbm_to_vmem [thread:$0]  (%p12938_p9), %s1957_s6, 32, %s10506_s4, %s12951_s10  }
 0x637   : > { %s5086_s26 = sshll.u32 %s10520_s16, 5  ;;  %s2041_s22 = scalar_lea.vmem [#allocation35], %s10517_s25 }
 0x638   : > { %s2054_s7 = sshll.u32 %s2041_s22, 4  ;;  %s10567_s7 = int_to_ptr.vmem [resolvable:$true] %s2054_s7 }
 0x639   : > { %p12956_p7 = scmp.ne.s32.totalorder %s12952_s30, 0 }
 0x63a   : > { %s2087_s28 = sand.u32 1, %s12953_s12  }
 0x63b   : > { %s12955_s1 = smov %s12954_s0  ;;  %s13433_s5 = smov (!%p12956_p7, %s12897_s5), 0 }
 0x63c   : > { %s5255_s3 = scalar_select %p12956_p7, [#allocation5], [#allocation83] }
 0x63d   : > { %s2004_s24 = scalar_lea.hbm %s12954_s0, %s5086_s26  ;;  %s7003_s4 = scalar_lea.hbm %s12955_s1, 1312800 }
 0x63e   : > { %s10546_s8 = sld [smem:[%s5255_s3 + %s13433_s5]]  ;;  %s6999_s13 = scalar_lea.hbm %s2004_s24, 32 }
 0x63f   : > { %p7000_p3 = scmp.ne.s32.totalorder %s2004_s24, %s6999_s13  ;;  %p7004_p8 = scmp.lt.s32.totalorder %s2004_s24, %s12955_s1 }
 0x640   : > { %p7005_p1 = scmp.lt.s32.totalorder %s7003_s4, %s6999_s13 }
 0x641   : > { %p7001_p9 = pnand %p7000_p3, %p12950_p6 }
 0x642   : > { %p7006_p11 = por %p7005_p1, %p7004_p8 }
 0x643   : > { %p7002_p4 = pneg %p7001_p9 }
 0x645   : > { %p7007_p12 = pnand %p7006_p11, %p7002_p4 }
 0x647   : > { %7010 = shalt.err (!%p7007_p12)
}
 0x648   : > { %s7011_s5 = scalar_lea.vmem %s10542_s17, 32  ;;  %s8246_s27 = smov [#allocation32]  }
 0x649   : > { %p7012_p5 = scmp.ne.s32.totalorder %s10542_s17, %s7011_s5  ;;  %s7015_s25 = sshll.u32 %s8246_s27, 4  ;;  %s7016_s25 = int_to_ptr.vmem [resolvable:$false] %s7015_s25 }
 0x64a   : > { %s7017_s6 = scalar_lea.vmem %s7016_s25, 64  ;;  %p7018_p0 = scmp.lt.s32.totalorder %s10542_s17, %s7016_s25 }
 0x64b   : > { %p7013_p10 = pnand %p7012_p5, %p12950_p6  ;;  %p7019_p2 = scmp.lt.s32.totalorder %s7017_s6, %s7011_s5 }
 0x64d   : > { %p7014_p13 = pneg %p7013_p10  ;;  %p7020_p3 = por %p7019_p2, %p7018_p0 }
 0x64f   : > { %p7021_p9 = pnand %p7020_p3, %p7014_p13 }
 0x651   : > { %7024 = shalt.err (!%p7021_p9)
}
 0x652   : > { %s12957_s13 = scalar_lea.sflag [#allocation31], %s9834_s9  ;;  %s12958_s16 = sld [smem:[#allocation203_spill]] }
 0x653   : > { %s12959_s10 = sld [smem:[#allocation326_spill]]  ;;  %s4972_s29 = sshll.u32 %s2087_s28, 1 }
 0x654   : > { %s12960_s0 = sld [smem:[#allocation152_spill]]  ;;  %s5088_s20 = sshll.u32 %s10546_s8, 5 }
 0x655   : > { %5251 = dma.hbm_to_vmem [thread:$0]  (%p12950_p6), %s2004_s24, 32, %s10542_s17, %s12957_s13  }
 0x656   : > { %s2089_s27 = scalar_lea.vmem [#allocation38], %s4972_s29 }
 0x657   : > { %s2102_s25 = sshll.u32 %s2089_s27, 4  ;;  %s10592_s25 = int_to_ptr.vmem [resolvable:$true] %s2102_s25 }
 0x658   : > { %s2135_s26 = sand.u32 1, %s12958_s16  }
 0x659   : > { %p12962_p4 = scmp.ne.s32.totalorder %s12959_s10, 0  ;;  %s10572_s4 = sshll.u32 %s2135_s26, 1 }
 0x65a   : > { %s12961_s3 = smov %s12960_s0  ;;  %s2052_s5 = scalar_lea.hbm %s12960_s0, %s5088_s20 }
 0x65b   : > { %s7025_s6 = scalar_lea.hbm %s2052_s5, 32  ;;  %s7029_s1 = scalar_lea.hbm %s12961_s3, 1312800 }
 0x65c   : > { %p7026_p8 = scmp.ne.s32.totalorder %s2052_s5, %s7025_s6  ;;  %p7030_p6 = scmp.lt.s32.totalorder %s2052_s5, %s12961_s3 }
 0x65d   : > { %p7031_p12 = scmp.lt.s32.totalorder %s7029_s1, %s7025_s6 }
 0x65e   : > { %p7027_p1 = pnand %p7026_p8, %p12956_p7 }
 0x65f   : > { %p7032_p5 = por %p7031_p12, %p7030_p6 }
 0x660   : > { %p7028_p11 = pneg %p7027_p1 }
 0x662   : > { %p7033_p10 = pnand %p7032_p5, %p7028_p11 }
 0x664   : > { %7036 = shalt.err (!%p7033_p10)
}
 0x665   : > { %s7037_s12 = scalar_lea.vmem %s10567_s7, 32  ;;  %s8247_s17 = smov [#allocation35]  }
 0x666   : > { %p7038_p13 = scmp.ne.s32.totalorder %s10567_s7, %s7037_s12  ;;  %s7041_s28 = sshll.u32 %s8247_s17, 4  ;;  %s7042_s28 = int_to_ptr.vmem [resolvable:$false] %s7041_s28 }
 0x667   : > { %s7043_s8 = scalar_lea.vmem %s7042_s28, 64  ;;  %p7044_p3 = scmp.lt.s32.totalorder %s10567_s7, %s7042_s28 }
 0x668   : > { %p7039_p0 = pnand %p7038_p13, %p12956_p7  ;;  %p7045_p9 = scmp.lt.s32.totalorder %s7043_s8, %s7037_s12 }
 0x66a   : > { %p7040_p2 = pneg %p7039_p0  ;;  %p7046_p8 = por %p7045_p9, %p7044_p3 }
 0x66c   : > { %p7047_p1 = pnand %p7046_p8, %p7040_p2 }
 0x66e   : > { %7050 = shalt.err (!%p7047_p1)
}
 0x66f   : > { %s12963_s1 = scalar_lea.sflag [#allocation34], %s9834_s9  ;;  %s12964_s24 = sld [smem:[#allocation197_spill]] }
 0x670   : > { %s12965_s13 = sld [smem:[#allocation329_spill]]  ;;  %s13435_s19 = smov (!%p12962_p4, %s12904_s19), 0 }
 0x671   : > { %s12966_s16 = sld [smem:[#allocation333_spill]]  ;;  %s2137_s27 = scalar_lea.vmem [#allocation41], %s10572_s4 }
 0x672   : > { %s12967_s0 = sld [smem:[#allocation154_spill]]  ;;  %s2150_s6 = sshll.u32 %s2137_s27, 4  ;;  %s10608_s6 = int_to_ptr.vmem [resolvable:$true] %s2150_s6 }
 0x673   : > { %5257 = dma.hbm_to_vmem [thread:$0]  (%p12956_p7), %s2052_s5, 32, %s10567_s7, %s12963_s1  }
 0x674   : > { %s12969_s30 = scalar_select %p12962_p4, [#allocation5], [#allocation85] }
 0x675   : > { %s2183_s26 = sand.u32 1, %s12964_s24  }
 0x676   : > { %s2094_s29 = sld [smem:[%s12969_s30 + %s13435_s19]]  ;;  %p12970_p11 = scmp.ne.s32.totalorder %s12965_s13, 0 }
 0x677   : > { %s4988_s12 = sshll.u32 %s2183_s26, 1  ;;  %p12971_p7 = scmp.ne.s32.totalorder %s12966_s16, 0 }
 0x678   : > { %s12968_s22 = smov %s12967_s0  ;;  %s13437_s11 = smov (!%p12970_p11, %s12911_s11), 0 }
 0x679   : > { %s5267_s20 = scalar_select %p12970_p11, [#allocation5], [#allocation87] }
 0x67a   : > { %s5273_s7 = scalar_select %p12971_p7, [#allocation5], [#allocation89] }
 0x67b   : > { %s10604_s17 = sld [smem:[%s5267_s20 + %s13437_s11]]  ;;  %s2185_s19 = scalar_lea.vmem [#allocation44], %s4988_s12 }
 0x67c   : > { %s5090_s5 = sshll.u32 %s2094_s29, 5  ;;  %s10611_s8 = sshll.u32 %s2185_s19, 4  ;;  %s10653_s8 = int_to_ptr.vmem [resolvable:$true] %s10611_s8 }
 0x67d   : > { %s2100_s28 = scalar_lea.hbm %s12967_s0, %s5090_s5  ;;  %s7055_s24 = scalar_lea.hbm %s12968_s22, 1312800 }
 0x67e   : > { %s7051_s1 = scalar_lea.hbm %s2100_s28, 32  ;;  %p7056_p10 = scmp.lt.s32.totalorder %s2100_s28, %s12968_s22 }
 0x67f   : > { %p7052_p6 = scmp.ne.s32.totalorder %s2100_s28, %s7051_s1  ;;  %p7057_p13 = scmp.lt.s32.totalorder %s7055_s24, %s7051_s1 }
 0x681   : > { %p7053_p12 = pnand %p7052_p6, %p12962_p4  ;;  %p7058_p0 = por %p7057_p13, %p7056_p10 }
 0x683   : > { %p7054_p5 = pneg %p7053_p12 }
 0x685   : > { %p7059_p2 = pnand %p7058_p0, %p7054_p5 }
 0x687   : > { %7062 = shalt.err (!%p7059_p2)
}
 0x688   : > { %s7063_s11 = scalar_lea.vmem %s10592_s25, 32  ;;  %s8248_s4 = smov [#allocation38]  }
 0x689   : > { %p7064_p3 = scmp.ne.s32.totalorder %s10592_s25, %s7063_s11  ;;  %s7067_s0 = sshll.u32 %s8248_s4, 4  ;;  %s7068_s0 = int_to_ptr.vmem [resolvable:$false] %s7067_s0 }
 0x68a   : > { %s7069_s30 = scalar_lea.vmem %s7068_s0, 64  ;;  %p7070_p1 = scmp.lt.s32.totalorder %s10592_s25, %s7068_s0 }
 0x68b   : > { %p7065_p9 = pnand %p7064_p3, %p12962_p4  ;;  %p7071_p6 = scmp.lt.s32.totalorder %s7069_s30, %s7063_s11 }
 0x68d   : > { %p7066_p8 = pneg %p7065_p9  ;;  %p7072_p12 = por %p7071_p6, %p7070_p1 }
 0x68f   : > { %p7073_p11 = pnand %p7072_p12, %p7066_p8 }
 0x691   : > { %7076 = shalt.err (!%p7073_p11)
}
 0x692   : > { %s12972_s29 = scalar_lea.sflag [#allocation37], %s9834_s9  ;;  %s12973_s26 = sld [smem:[#allocation191_spill]] }
 0x693   : > { %s12974_s20 = sld [smem:[#allocation156_spill]]  ;;  %s13439_s2 = smov (!%p12971_p7, %s12917_s2), 0 }
 0x694   : > { %5263 = dma.hbm_to_vmem [thread:$0]  (%p12962_p4), %s2100_s28, 32, %s10592_s25, %s12972_s29  }
 0x695   : > { %s5092_s27 = sshll.u32 %s10604_s17, 5  ;;  %s10636_s10 = sld [smem:[%s5273_s7 + %s13439_s2]] }
 0x696   : > { %p12976_p5 = scmp.ne.s32.totalorder %s12965_s13, 0 }
 0x698   : > { %s2231_s12 = sand.u32 1, %s12973_s26  }
 0x699   : > { %s12975_s19 = smov %s12974_s20  ;;  %s2148_s5 = scalar_lea.hbm %s12974_s20, %s5092_s27 }
 0x69a   : > { %s7077_s1 = scalar_lea.hbm %s2148_s5, 32  ;;  %s7081_s24 = scalar_lea.hbm %s12975_s19, 1312800 }
 0x69b   : > { %p7078_p11 = scmp.ne.s32.totalorder %s2148_s5, %s7077_s1  ;;  %p7082_p0 = scmp.lt.s32.totalorder %s2148_s5, %s12975_s19 }
 0x69c   : > { %p7083_p2 = scmp.lt.s32.totalorder %s7081_s24, %s7077_s1 }
 0x69d   : > { %p7079_p10 = pnand %p7078_p11, %p12976_p5 }
 0x69e   : > { %p7084_p3 = por %p7083_p2, %p7082_p0 }
 0x69f   : > { %p7080_p13 = pneg %p7079_p10 }
 0x6a1   : > { %p7085_p9 = pnand %p7084_p3, %p7080_p13 }
 0x6a3   : > { %7088 = shalt.err (!%p7085_p9)
}
 0x6a4   : > { %s7089_s25 = scalar_lea.vmem %s10608_s6, 32  ;;  %s8249_s2 = smov [#allocation41]  }
 0x6a5   : > { %p7090_p4 = scmp.ne.s32.totalorder %s10608_s6, %s7089_s25  ;;  %s7093_s17 = sshll.u32 %s8249_s2, 4  ;;  %s7094_s17 = int_to_ptr.vmem [resolvable:$false] %s7093_s17 }
 0x6a6   : > { %s7095_s7 = scalar_lea.vmem %s7094_s17, 64  ;;  %p7096_p6 = scmp.lt.s32.totalorder %s10608_s6, %s7094_s17 }
 0x6a7   : > { %p7091_p8 = pnand %p7090_p4, %p12976_p5  ;;  %p7097_p12 = scmp.lt.s32.totalorder %s7095_s7, %s7089_s25 }
 0x6a9   : > { %p7092_p1 = pneg %p7091_p8  ;;  %p7098_p11 = por %p7097_p12, %p7096_p6 }
 0x6ab   : > { %p7099_p10 = pnand %p7098_p11, %p7092_p1 }
 0x6ad   : > { %7102 = shalt.err (!%p7099_p10)
}
 0x6ae   : > { %s12977_s28 = scalar_lea.sflag [#allocation40], %s9834_s9  ;;  %s12978_s11 = sld [smem:[#allocation185_spill]] }
 0x6af   : > { %s12979_s4 = sld [smem:[#allocation337_spill]]  ;;  %s10655_s29 = sshll.u32 %s2231_s12, 1 }
 0x6b0   : > { %s12980_s0 = sld [smem:[#allocation158_spill]]  ;;  %s5094_s20 = sshll.u32 %s10636_s10, 5 }
 0x6b1   : > { %5269 = dma.hbm_to_vmem [thread:$0]  (%p12976_p5), %s2148_s5, 32, %s10608_s6, %s12977_s28  }
 0x6b4   : > { %s2279_s26 = sand.u32 1, %s12978_s11  }
 0x6b5   : > { %p12982_p13 = scmp.ne.s32.totalorder %s12979_s4, 0  ;;  %s10664_s27 = sshll.u32 %s2279_s26, 1 }
 0x6b6   : > { %s12981_s30 = smov %s12980_s0  ;;  %s2196_s1 = scalar_lea.hbm %s12980_s0, %s5094_s20 }
 0x6b7   : > { %s5279_s13 = scalar_select %p12982_p13, [#allocation5], [#allocation91] }
 0x6b8   : > { %s13441_s21 = smov (!%p12982_p13, %s12930_s21), 0  ;;  %s7103_s25 = scalar_lea.hbm %s2196_s1, 32 }
 0x6b9   : > { %s10667_s24 = sld [smem:[%s5279_s13 + %s13441_s21]]  ;;  %p7104_p0 = scmp.ne.s32.totalorder %s2196_s1, %s7103_s25 }
 0x6ba   : > { %s7107_s6 = scalar_lea.hbm %s12981_s30, 1312800  ;;  %p7108_p3 = scmp.lt.s32.totalorder %s2196_s1, %s12981_s30 }
 0x6bb   : > { %p7105_p2 = pnand %p7104_p0, %p12971_p7  ;;  %p7109_p9 = scmp.lt.s32.totalorder %s7107_s6, %s7103_s25 }
 0x6bd   : > { %p7106_p5 = pneg %p7105_p2  ;;  %p7110_p4 = por %p7109_p9, %p7108_p3 }
 0x6bf   : > { %p7111_p8 = pnand %p7110_p4, %p7106_p5 }
 0x6c1   : > { %7114 = shalt.err (!%p7111_p8)
}
 0x6c2   : > { %s7115_s12 = scalar_lea.vmem %s10653_s8, 32  ;;  %s8250_s21 = smov [#allocation44]  }
 0x6c3   : > { %p7116_p1 = scmp.ne.s32.totalorder %s10653_s8, %s7115_s12  ;;  %s7119_s5 = sshll.u32 %s8250_s21, 4  ;;  %s7120_s5 = int_to_ptr.vmem [resolvable:$false] %s7119_s5 }
 0x6c4   : > { %s7121_s10 = scalar_lea.vmem %s7120_s5, 64  ;;  %p7122_p11 = scmp.lt.s32.totalorder %s10653_s8, %s7120_s5 }
 0x6c5   : > { %p7117_p6 = pnand %p7116_p1, %p12971_p7  ;;  %p7123_p10 = scmp.lt.s32.totalorder %s7121_s10, %s7115_s12 }
 0x6c7   : > { %p7118_p12 = pneg %p7117_p6  ;;  %p7124_p0 = por %p7123_p10, %p7122_p11 }
 0x6c9   : > { %p7125_p2 = pnand %p7124_p0, %p7118_p12 }
 0x6cb   : > { %7128 = shalt.err (!%p7125_p2)
}
 0x6cc   : > { %s12983_s2 = scalar_lea.sflag [#allocation43], %s9834_s9  ;;  %s12984_s17 = sld [smem:[#allocation341_spill]] }
 0x6cd   : > { %s12985_s7 = sld [smem:[#allocation179_spill]]  ;;  %s2233_s11 = scalar_lea.vmem [#allocation47], %s10655_s29 }
 0x6ce   : > { %s12986_s28 = sld [smem:[#allocation160_spill]]  ;;  %s2246_s0 = sshll.u32 %s2233_s11, 4  ;;  %s10689_s0 = int_to_ptr.vmem [resolvable:$true] %s2246_s0 }
 0x6cf   : > { %5275 = dma.hbm_to_vmem [thread:$0]  (%p12971_p7), %s2196_s1, 32, %s10653_s8, %s12983_s2  }
 0x6d0   : > { %s5096_s20 = sshll.u32 %s10667_s24, 5  ;;  %s2281_s12 = scalar_lea.vmem [#allocation50], %s10664_s27 }
 0x6d1   : > { %s2294_s21 = sshll.u32 %s2281_s12, 4  ;;  %s10715_s21 = int_to_ptr.vmem [resolvable:$true] %s2294_s21 }
 0x6d2   : > { %p12988_p5 = scmp.ne.s32.totalorder %s12984_s17, 0 }
 0x6d3   : > { %s2327_s16 = sand.u32 1, %s12985_s7  }
 0x6d4   : > { %s12987_s13 = smov %s12986_s28  ;;  %s13443_s14 = smov (!%p12988_p5, %s12933_s14), 0 }
 0x6d5   : > { %s5285_s26 = scalar_select %p12988_p5, [#allocation5], [#allocation93] }
 0x6d6   : > { %s2244_s6 = scalar_lea.hbm %s12986_s28, %s5096_s20  ;;  %s7133_s8 = scalar_lea.hbm %s12987_s13, 1312800 }
 0x6d7   : > { %s10693_s25 = sld [smem:[%s5285_s26 + %s13443_s14]]  ;;  %s7129_s5 = scalar_lea.hbm %s2244_s6, 32 }
 0x6d8   : > { %p7130_p3 = scmp.ne.s32.totalorder %s2244_s6, %s7129_s5  ;;  %p7134_p4 = scmp.lt.s32.totalorder %s2244_s6, %s12987_s13 }
 0x6d9   : > { %p7135_p8 = scmp.lt.s32.totalorder %s7133_s8, %s7129_s5 }
 0x6da   : > { %p7131_p7 = pnand %p7130_p3, %p12982_p13 }
 0x6db   : > { %p7136_p1 = por %p7135_p8, %p7134_p4 }
 0x6dc   : > { %p7132_p9 = pneg %p7131_p7 }
 0x6de   : > { %p7137_p6 = pnand %p7136_p1, %p7132_p9 }
 0x6e0   : > { %7140 = shalt.err (!%p7137_p6)
}
 0x6e1   : > { %s7141_s14 = scalar_lea.vmem %s10689_s0, 32  ;;  %s8251_s29 = smov [#allocation47]  }
 0x6e2   : > { %p7142_p12 = scmp.ne.s32.totalorder %s10689_s0, %s7141_s14  ;;  %s7145_s27 = sshll.u32 %s8251_s29, 4  ;;  %s7146_s27 = int_to_ptr.vmem [resolvable:$false] %s7145_s27 }
 0x6e3   : > { %s7147_s1 = scalar_lea.vmem %s7146_s27, 64  ;;  %p7148_p0 = scmp.lt.s32.totalorder %s10689_s0, %s7146_s27 }
 0x6e4   : > { %p7143_p11 = pnand %p7142_p12, %p12982_p13  ;;  %p7149_p2 = scmp.lt.s32.totalorder %s7147_s1, %s7141_s14 }
 0x6e6   : > { %p7144_p10 = pneg %p7143_p11  ;;  %p7150_p3 = por %p7149_p2, %p7148_p0 }
 0x6e8   : > { %p7151_p7 = pnand %p7150_p3, %p7144_p10 }
 0x6ea   : > { %7154 = shalt.err (!%p7151_p7)
}
 0x6eb   : > { %s12989_s24 = scalar_lea.sflag [#allocation46], %s9834_s9  ;;  %s12990_s10 = sld [smem:[#allocation345_spill]] }
 0x6ec   : > { %s12991_s2 = sld [smem:[#allocation162_spill]]  ;;  %s10713_s11 = sshll.u32 %s2327_s16, 1 }
 0x6ed   : > { %s12993_s28 = sld [smem:[#allocation176_spill]]  ;;  %s5098_s4 = sshll.u32 %s10693_s25, 5 }
 0x6ee   : > { %5281 = dma.hbm_to_vmem [thread:$0]  (%p12982_p13), %s2244_s6, 32, %s10689_s0, %s12989_s24  }
 0x6f1   : > { %p12994_p9 = scmp.ne.s32.totalorder %s12990_s10, 0 }
 0x6f2   : > { %s12992_s8 = smov %s12991_s2  ;;  %s2292_s20 = scalar_lea.hbm %s12991_s2, %s5098_s4 }
 0x6f3   : > { %s5291_s26 = scalar_select %p12994_p9, [#allocation5], [#allocation95] }
 0x6f4   : > { %s2351_s12 = sand.u32 1, %s12993_s28   ;;  %s7155_s5 = scalar_lea.hbm %s2292_s20, 32 }
 0x6f5   : > { %p7156_p4 = scmp.ne.s32.totalorder %s2292_s20, %s7155_s5  ;;  %s7159_s14 = scalar_lea.hbm %s12992_s8, 1312800 }
 0x6f6   : > { %p7160_p6 = scmp.lt.s32.totalorder %s2292_s20, %s12992_s8  ;;  %p7161_p12 = scmp.lt.s32.totalorder %s7159_s14, %s7155_s5 }
 0x6f7   : > { %p7157_p8 = pnand %p7156_p4, %p12988_p5 }
 0x6f8   : > { %p7162_p11 = por %p7161_p12, %p7160_p6 }
 0x6f9   : > { %p7158_p1 = pneg %p7157_p8 }
 0x6fb   : > { %p7163_p13 = pnand %p7162_p11, %p7158_p1 }
 0x6fd   : > { %7166 = shalt.err (!%p7163_p13)
}
 0x6fe   : > { %s7167_s7 = scalar_lea.vmem %s10715_s21, 32  ;;  %s8252_s0 = smov [#allocation50]  }
 0x6ff   : > { %p7168_p10 = scmp.ne.s32.totalorder %s10715_s21, %s7167_s7  ;;  %s7171_s16 = sshll.u32 %s8252_s0, 4  ;;  %s7172_s16 = int_to_ptr.vmem [resolvable:$false] %s7171_s16 }
 0x700   : > { %s7173_s25 = scalar_lea.vmem %s7172_s16, 64  ;;  %p7174_p3 = scmp.lt.s32.totalorder %s10715_s21, %s7172_s16 }
 0x701   : > { %p7169_p0 = pnand %p7168_p10, %p12988_p5  ;;  %p7175_p7 = scmp.lt.s32.totalorder %s7173_s25, %s7167_s7 }
 0x703   : > { %p7170_p2 = pneg %p7169_p0  ;;  %p7176_p4 = por %p7175_p7, %p7174_p3 }
 0x705   : > { %p7177_p8 = pnand %p7176_p4, %p7170_p2 }
 0x707   : > { %7180 = shalt.err (!%p7177_p8)
}
 0x708   : > { %s12995_s6 = scalar_lea.sflag [#allocation49], %s9834_s9  ;;  %s12996_s29 = sld [smem:[#allocation269_spill]] }
 0x709   : > { %s12997_s27 = sld [smem:[#allocation164_spill]]  ;;  %s13445_s15 = smov (!%p12994_p9, %s12940_s15), 0 }
 0x70a   : > { %5287 = dma.hbm_to_vmem [thread:$0]  (%p12988_p5), %s2292_s20, 32, %s10715_s21, %s12995_s6  }
 0x70b   : > { %s2329_s24 = scalar_lea.vmem [#allocation53], %s10713_s11  ;;  %s2334_s17 = sld [smem:[%s5291_s26 + %s13445_s15]] }
 0x70c   : > { %s2342_s2 = sshll.u32 %s2329_s24, 4  ;;  %s5016_s4 = sshll.u32 %s2351_s12, 1  ;;  %s10752_s2 = int_to_ptr.vmem [resolvable:$true] %s2342_s2 }
 0x70d   : > { %s2353_s20 = scalar_lea.vmem [#allocation54], %s5016_s4 }
 0x70e   : > { %p12999_p1 = scmp.ne.s32.totalorder %s12996_s29, 0  ;;  %s2366_s7 = sshll.u32 %s2353_s20, 4  ;;  %s2367_s7 = int_to_ptr.vmem [resolvable:$true] %s2366_s7 }
 0x70f   : > { %s12998_s1 = smov %s12997_s27 }
 0x710   : > { %s5294_s5 = scalar_select %p12999_p1, [#allocation5], [#allocation96] }
 0x711   : > { %s13447_s23 = smov (!%p12999_p1, %s12855_s23), 0  ;;  %s5100_s21 = sshll.u32 %s2334_s17, 5 }
 0x712   : > { %s10750_s14 = sld [smem:[%s5294_s5 + %s13447_s23]]  ;;  %s2340_s11 = scalar_lea.hbm %s12997_s27, %s5100_s21 }
 0x713   : > { %s7181_s0 = scalar_lea.hbm %s2340_s11, 32  ;;  %s7185_s15 = scalar_lea.hbm %s12998_s1, 1312800 }
 0x714   : > { %p7182_p5 = scmp.ne.s32.totalorder %s2340_s11, %s7181_s0  ;;  %p7186_p11 = scmp.lt.s32.totalorder %s2340_s11, %s12998_s1 }
 0x715   : > { %p7187_p13 = scmp.lt.s32.totalorder %s7185_s15, %s7181_s0 }
 0x716   : > { %p7183_p6 = pnand %p7182_p5, %p12994_p9 }
 0x717   : > { %p7188_p10 = por %p7187_p13, %p7186_p11 }
 0x718   : > { %p7184_p12 = pneg %p7183_p6 }
 0x71a   : > { %p7189_p0 = pnand %p7188_p10, %p7184_p12 }
 0x71c   : > { %7192 = shalt.err (!%p7189_p0)
}
 0x71d   : > { %s7193_s23 = scalar_lea.vmem %s10752_s2, 32  ;;  %s8253_s28 = smov [#allocation53]  }
 0x71e   : > { %p7194_p2 = scmp.ne.s32.totalorder %s10752_s2, %s7193_s23  ;;  %s7197_s26 = sshll.u32 %s8253_s28, 4  ;;  %s7198_s26 = int_to_ptr.vmem [resolvable:$false] %s7197_s26 }
 0x71f   : > { %s7199_s12 = scalar_lea.vmem %s7198_s26, 64  ;;  %p7200_p4 = scmp.lt.s32.totalorder %s10752_s2, %s7198_s26 }
 0x720   : > { %p7195_p3 = pnand %p7194_p2, %p12994_p9  ;;  %p7201_p8 = scmp.lt.s32.totalorder %s7199_s12, %s7193_s23 }
 0x722   : > { %p7196_p7 = pneg %p7195_p3  ;;  %p7202_p5 = por %p7201_p8, %p7200_p4 }
 0x724   : > { %p7203_p6 = pnand %p7202_p5, %p7196_p7 }
 0x726   : > { %7206 = shalt.err (!%p7203_p6)
}
 0x727   : > { %s13000_s16 = scalar_lea.sflag [#allocation52], %s9834_s9  ;;  %s13001_s25 = sld [smem:[#allocation165_spill]] }
 0x728   : > { %5293 = dma.hbm_to_vmem [thread:$0]  (%p12994_p9), %s2340_s11, 32, %s10752_s2, %s13000_s16  }
 0x729   : > { %s5101_s6 = sshll.u32 %s10750_s14, 5  ;;  %s2350_s24 = scalar_lea.sflag [#allocation55], %s9834_s9 }
 0x72d   : > { %s2364_s27 = scalar_lea.hbm %s13001_s25, %s5101_s6  ;;  %s7211_s10 = scalar_lea.hbm %s13001_s25, 1312800 }
 0x72e   : > { %s7207_s17 = scalar_lea.hbm %s2364_s27, 32  ;;  %p7212_p10 = scmp.lt.s32.totalorder %s2364_s27, %s13001_s25 }
 0x72f   : > { %p7208_p12 = scmp.ne.s32.totalorder %s2364_s27, %s7207_s17  ;;  %p7213_p0 = scmp.lt.s32.totalorder %s7211_s10, %s7207_s17 }
 0x731   : > { %p7209_p11 = pnand %p7208_p12, %p12999_p1  ;;  %p7214_p2 = por %p7213_p0, %p7212_p10 }
 0x733   : > { %p7210_p13 = pneg %p7209_p11 }
 0x735   : > { %p7215_p3 = pnand %p7214_p2, %p7210_p13 }
 0x737   : > { %7218 = shalt.err (!%p7215_p3)
}
 0x738   : > { %s7219_s4 = scalar_lea.vmem %s2367_s7, 32  ;;  %s8254_s2 = smov [#allocation54]  }
 0x739   : > { %p7220_p7 = scmp.ne.s32.totalorder %s2367_s7, %s7219_s4  ;;  %s7223_s5 = sshll.u32 %s8254_s2, 4  ;;  %s7224_s5 = int_to_ptr.vmem [resolvable:$false] %s7223_s5 }
 0x73a   : > { %s7225_s9 = scalar_lea.vmem %s7224_s5, 64  ;;  %p7226_p8 = scmp.lt.s32.totalorder %s2367_s7, %s7224_s5 }
 0x73b   : > { %p7221_p9 = pnand %p7220_p7, %p12999_p1  ;;  %p7227_p5 = scmp.lt.s32.totalorder %s7225_s9, %s7219_s4 }
 0x73d   : > { %p7222_p4 = pneg %p7221_p9  ;;  %p7228_p6 = por %p7227_p5, %p7226_p8 }
 0x73f   : > { %p7229_p12 = pnand %p7228_p6, %p7222_p4 }
 0x741   : > { %7232 = shalt.err (!%p7229_p12)
}
 0x742   : > { %5296 = dma.hbm_to_vmem [thread:$0]  (%p12999_p1), %s2364_s27, 32, %s2367_s7, %s2350_s24  }
 0x743 PF: > { %s13002_s14 = sld [smem:[#allocation267_spill]] }
 0x749   : > { %p13003_p11 = scmp.ne.s32.totalorder %s13002_s14, 0 }
 0x74b   : > { %2375 = sbr.rel (%p13003_p11) target bundleno = 2976 (0xba0), region = 180 }
 0x750   : > { %s13004_s21 = sld [smem:[#allocation247_spill]] }
 0x751   : > { %s13005_s20 = sld [smem:[#allocation273_spill]] }
 0x756   : > { %s2377_s11 = sand.u32 1, %s13004_s21  }
 0x757   : > { %s10783_s0 = sshll.u32 %s2377_s11, 1  ;;  %s2378_s15 = scalar_lea.sflag [#allocation8], %s2377_s11 }
 0x758   : > { %p13006_p13 = scmp.ne.s32.totalorder %s13005_s20, 0 }
 0x75a   : > { %7632 = dma.done.wait (%p13006_p13), %s2378_s15, 32  }
 0x75b   : > { %7634 = vsyncadd (%p13006_p13), %s2378_s15, 4294967264  ;;  %s13007_s28 = sld [smem:[#allocation265_spill]] }
 0x75c   : > { %s13009_s7 = sld [smem:[#allocation245_spill]] }
 0x75d   : > { %s13010_s26 = sld [smem:[#allocation276_spill]] }
 0x761   : > { %s13008_s29 = sadd.s32 4294967295, %s13007_s28  }
 0x762   : > { %s10792_s12 = sand.u32 1, %s13008_s29   ;;  %s2388_s16 = sand.u32 1, %s13009_s7  }
 0x763   : > { %s10795_s6 = sshll.u32 %s2388_s16, 1  ;;  %s2387_s27 = scalar_lea.sflag [#allocation10], %s10792_s12 }
 0x764   : > { %p13011_p1 = scmp.ne.s32.totalorder %s13010_s26, 0 }
 0x766   : > { %7636 = dma.done.wait (%p13011_p1), %s2387_s27, 32  }
 0x767   : > { %7638 = vsyncadd (%p13011_p1), %s2387_s27, 4294967264  ;;  %s13012_s17 = sld [smem:[#allocation256_spill]] }
 0x768   : > { %s13013_s10 = sld [smem:[#allocation280_spill]] }
 0x76d   : > { %s2397_s4 = sand.u32 1, %s13012_s17  }
 0x76e   : > { %s10804_s2 = sshll.u32 %s2397_s4, 1  ;;  %p13014_p10 = scmp.ne.s32.totalorder %s13013_s10, 0 }
 0x770   : > { %7640 = dma.done.wait (%p13014_p10), %s2387_s27, 32  }
 0x771   : > { %7642 = vsyncadd (%p13014_p10), %s2387_s27, 4294967264  ;;  %s13015_s9 = sld [smem:[#allocation262_spill]]  ;;  %s2405_s11 = scalar_lea.sflag [#allocation13], %s10792_s12 }
 0x772   : > { %s13016_s14 = sld [smem:[#allocation283_spill]] }
 0x777   : > { %s2406_s21 = sand.u32 1, %s13015_s9  }
 0x778   : > { %s10812_s20 = sshll.u32 %s2406_s21, 1  ;;  %p13017_p0 = scmp.ne.s32.totalorder %s13016_s14, 0 }
 0x77a   : > { %7644 = dma.done.wait (%p13017_p0), %s2405_s11, 32  }
 0x77b   : > { %7646 = vsyncadd (%p13017_p0), %s2405_s11, 4294967264  ;;  %s13018_s28 = sld [smem:[#allocation263_spill]] }
 0x77c   : > { %s13019_s29 = sld [smem:[#allocation287_spill]] }
 0x781   : > { %s2415_s7 = sand.u32 1, %s13018_s28  }
 0x782   : > { %s10821_s26 = sshll.u32 %s2415_s7, 1  ;;  %p13020_p2 = scmp.ne.s32.totalorder %s13019_s29, 0 }
 0x784   : > { %7648 = dma.done.wait (%p13020_p2), %s2405_s11, 32  }
 0x785   : > { %7650 = vsyncadd (%p13020_p2), %s2405_s11, 4294967264  ;;  %s13021_s27 = sld [smem:[#allocation260_spill]]  ;;  %s2423_s9 = scalar_lea.sflag [#allocation16], %s10792_s12 }
 0x786   : > { %s13022_s17 = sld [smem:[#allocation290_spill]] }
 0x78b   : > { %s2424_s10 = sand.u32 1, %s13021_s27  }
 0x78c   : > { %s10829_s4 = sshll.u32 %s2424_s10, 1  ;;  %p13023_p3 = scmp.ne.s32.totalorder %s13022_s17, 0 }
 0x78e   : > { %7652 = dma.done.wait (%p13023_p3), %s2423_s9, 32  }
 0x78f   : > { %7654 = vsyncadd (%p13023_p3), %s2423_s9, 4294967264  ;;  %s13024_s21 = sld [smem:[#allocation257_spill]] }
 0x790   : > { %s13025_s28 = sld [smem:[#allocation293_spill]] }
 0x795   : > { %s2433_s7 = sand.u32 1, %s13024_s21  }
 0x796   : > { %s10838_s16 = sshll.u32 %s2433_s7, 1  ;;  %p13026_p7 = scmp.ne.s32.totalorder %s13025_s28, 0 }
 0x798   : > { %7656 = dma.done.wait (%p13026_p7), %s2423_s9, 32  }
 0x799   : > { %7658 = vsyncadd (%p13026_p7), %s2423_s9, 4294967264  ;;  %s13027_s29 = sld [smem:[#allocation254_spill]]  ;;  %s2441_s17 = scalar_lea.sflag [#allocation19], %s10792_s12 }
 0x79a   : > { %s13028_s27 = sld [smem:[#allocation295_spill]] }
 0x79f   : > { %s2442_s10 = sand.u32 1, %s13027_s29  }
 0x7a0   : > { %s10846_s14 = sshll.u32 %s2442_s10, 1  ;;  %p13029_p9 = scmp.ne.s32.totalorder %s13028_s27, 0 }
 0x7a2   : > { %7660 = dma.done.wait (%p13029_p9), %s2441_s17, 32  }
 0x7a3   : > { %7662 = vsyncadd (%p13029_p9), %s2441_s17, 4294967264  ;;  %s13030_s21 = sld [smem:[#allocation251_spill]] }
 0x7a4   : > { %s13031_s7 = sld [smem:[#allocation299_spill]] }
 0x7a9   : > { %s2451_s11 = sand.u32 1, %s13030_s21  }
 0x7aa   : > { %s10855_s5 = sshll.u32 %s2451_s11, 1  ;;  %p13032_p4 = scmp.ne.s32.totalorder %s13031_s7, 0 }
 0x7ac   : > { %7664 = dma.done.wait (%p13032_p4), %s2441_s17, 32  }
 0x7ad   : > { %7666 = vsyncadd (%p13032_p4), %s2441_s17, 4294967264  ;;  %s13033_s28 = sld [smem:[#allocation241_spill]]  ;;  %s2459_s27 = scalar_lea.sflag [#allocation22], %s10792_s12 }
 0x7ae   : > { %s13034_s29 = sld [smem:[#allocation301_spill]] }
 0x7b3   : > { %s2460_s10 = sand.u32 1, %s13033_s28  }
 0x7b4   : > { %s10863_s15 = sshll.u32 %s2460_s10, 1  ;;  %p13035_p8 = scmp.ne.s32.totalorder %s13034_s29, 0 }
 0x7b6   : > { %7668 = dma.done.wait (%p13035_p8), %s2459_s27, 32  }
 0x7b7   : > { %7670 = vsyncadd (%p13035_p8), %s2459_s27, 4294967264  ;;  %s13036_s11 = sld [smem:[#allocation238_spill]] }
 0x7b8   : > { %s13037_s21 = sld [smem:[#allocation305_spill]] }
 0x7bd   : > { %s2469_s9 = sand.u32 1, %s13036_s11  }
 0x7be   : > { %s10872_s23 = sshll.u32 %s2469_s9, 1  ;;  %p13038_p5 = scmp.ne.s32.totalorder %s13037_s21, 0 }
 0x7c0   : > { %7672 = dma.done.wait (%p13038_p5), %s2459_s27, 32  }
 0x7c1   : > { %7674 = vsyncadd (%p13038_p5), %s2459_s27, 4294967264  ;;  %s13039_s7 = sld [smem:[#allocation235_spill]]  ;;  %s2477_s29 = scalar_lea.sflag [#allocation25], %s10792_s12 }
 0x7c2   : > { %s13040_s28 = sld [smem:[#allocation307_spill]] }
 0x7c7   : > { %s2478_s10 = sand.u32 1, %s13039_s7  }
 0x7c8   : > { %s10880_s24 = sshll.u32 %s2478_s10, 1  ;;  %p13041_p6 = scmp.ne.s32.totalorder %s13040_s28, 0 }
 0x7ca   : > { %7676 = dma.done.wait (%p13041_p6), %s2477_s29, 32  }
 0x7cb   : > { %7678 = vsyncadd (%p13041_p6), %s2477_s29, 4294967264  ;;  %s13042_s9 = sld [smem:[#allocation232_spill]] }
 0x7cc   : > { %s13043_s11 = sld [smem:[#allocation311_spill]] }
 0x7d1   : > { %s2487_s17 = sand.u32 1, %s13042_s9  }
 0x7d2   : > { %s10889_s3 = sshll.u32 %s2487_s17, 1  ;;  %p13044_p12 = scmp.ne.s32.totalorder %s13043_s11, 0 }
 0x7d4   : > { %7680 = dma.done.wait (%p13044_p12), %s2477_s29, 32  }
 0x7d5   : > { %7682 = vsyncadd (%p13044_p12), %s2477_s29, 4294967264  ;;  %s13045_s21 = sld [smem:[#allocation229_spill]]  ;;  %s2495_s28 = scalar_lea.sflag [#allocation28], %s10792_s12 }
 0x7d6   : > { %s13046_s7 = sld [smem:[#allocation313_spill]] }
 0x7db   : > { %s2496_s10 = sand.u32 1, %s13045_s21  }
 0x7dc   : > { %s10897_s1 = sshll.u32 %s2496_s10, 1  ;;  %p13047_p11 = scmp.ne.s32.totalorder %s13046_s7, 0 }
 0x7de   : > { %7684 = dma.done.wait (%p13047_p11), %s2495_s28, 32  }
 0x7df   : > { %7686 = vsyncadd (%p13047_p11), %s2495_s28, 4294967264  ;;  %s13048_s17 = sld [smem:[#allocation226_spill]] }
 0x7e0   : > { %s13049_s9 = sld [smem:[#allocation317_spill]] }
 0x7e5   : > { %s2505_s27 = sand.u32 1, %s13048_s17  }
 0x7e6   : > { %s10906_s13 = sshll.u32 %s2505_s27, 1  ;;  %p13050_p13 = scmp.ne.s32.totalorder %s13049_s9, 0 }
 0x7e8   : > { %7688 = dma.done.wait (%p13050_p13), %s2495_s28, 32  }
 0x7e9   : > { %7690 = vsyncadd (%p13050_p13), %s2495_s28, 4294967264  ;;  %s13051_s11 = sld [smem:[#allocation223_spill]]  ;;  %s2513_s7 = scalar_lea.sflag [#allocation31], %s10792_s12 }
 0x7ea   : > { %s13052_s21 = sld [smem:[#allocation319_spill]] }
 0x7ef   : > { %s2514_s10 = sand.u32 1, %s13051_s11  }
 0x7f0   : > { %s10914_s8 = sshll.u32 %s2514_s10, 1  ;;  %p13053_p1 = scmp.ne.s32.totalorder %s13052_s21, 0 }
 0x7f2   : > { %7692 = dma.done.wait (%p13053_p1), %s2513_s7, 32  }
 0x7f3   : > { %7694 = vsyncadd (%p13053_p1), %s2513_s7, 4294967264  ;;  %s13054_s27 = sld [smem:[#allocation220_spill]] }
 0x7f4   : > { %s13055_s17 = sld [smem:[#allocation321_spill]] }
 0x7f9   : > { %s2523_s29 = sand.u32 1, %s13054_s27  }
 0x7fa   : > { %s10923_s19 = sshll.u32 %s2523_s29, 1  ;;  %p13056_p10 = scmp.ne.s32.totalorder %s13055_s17, 0 }
 0x7fc   : > { %7696 = dma.done.wait (%p13056_p10), %s2513_s7, 32  }
 0x7fd   : > { %7698 = vsyncadd (%p13056_p10), %s2513_s7, 4294967264  ;;  %s13057_s9 = sld [smem:[#allocation217_spill]]  ;;  %s2531_s21 = scalar_lea.sflag [#allocation34], %s10792_s12 }
 0x7fe   : > { %s13058_s11 = sld [smem:[#allocation322_spill]] }
 0x803   : > { %s2532_s10 = sand.u32 1, %s13057_s9  }
 0x804   : > { %s10931_s18 = sshll.u32 %s2532_s10, 1  ;;  %p13059_p0 = scmp.ne.s32.totalorder %s13058_s11, 0 }
 0x806   : > { %7700 = dma.done.wait (%p13059_p0), %s2531_s21, 32  }
 0x807   : > { %7702 = vsyncadd (%p13059_p0), %s2531_s21, 4294967264  ;;  %s13060_s29 = sld [smem:[#allocation214_spill]] }
 0x808   : > { %s13061_s27 = sld [smem:[#allocation324_spill]] }
 0x80d   : > { %s2541_s28 = sand.u32 1, %s13060_s29  }
 0x80e   : > { %s10940_s25 = sshll.u32 %s2541_s28, 1  ;;  %p13063_p2 = scmp.ne.s32.totalorder %s13061_s27, 0 }
 0x80f   : > { %13062 = sst [smem:[#allocation177_spill]] %s10940_s25 }
 0x810   : > { %7704 = dma.done.wait (%p13063_p2), %s2531_s21, 32  }
 0x811   : > { %7706 = vsyncadd (%p13063_p2), %s2531_s21, 4294967264  ;;  %s13064_s17 = sld [smem:[#allocation211_spill]]  ;;  %s2549_s11 = scalar_lea.sflag [#allocation37], %s10792_s12 }
 0x812   : > { %s13065_s9 = sld [smem:[#allocation325_spill]] }
 0x817   : > { %s2550_s10 = sand.u32 1, %s13064_s17  }
 0x818   : > { %s10948_s22 = sshll.u32 %s2550_s10, 1  ;;  %p13067_p3 = scmp.ne.s32.totalorder %s13065_s9, 0 }
 0x819   : > { %13066 = sst [smem:[#allocation189_spill]] %s10948_s22 }
 0x81a   : > { %7708 = dma.done.wait (%p13067_p3), %s2549_s11, 32  }
 0x81b   : > { %7710 = vsyncadd (%p13067_p3), %s2549_s11, 4294967264  ;;  %s13068_s28 = sld [smem:[#allocation208_spill]] }
 0x81c   : > { %s13069_s29 = sld [smem:[#allocation327_spill]] }
 0x821   : > { %s2559_s7 = sand.u32 1, %s13068_s28  }
 0x822   : > { %s10957_s25 = sshll.u32 %s2559_s7, 1  ;;  %p13071_p7 = scmp.ne.s32.totalorder %s13069_s29, 0 }
 0x823   : > { %13070 = sst [smem:[#allocation350_spill]] %s10957_s25 }
 0x824   : > { %7712 = dma.done.wait (%p13071_p7), %s2549_s11, 32  }
 0x825   : > { %7714 = vsyncadd (%p13071_p7), %s2549_s11, 4294967264  ;;  %s13072_s27 = sld [smem:[#allocation205_spill]]  ;;  %s2567_s9 = scalar_lea.sflag [#allocation40], %s10792_s12 }
 0x826   : > { %s13073_s17 = sld [smem:[#allocation328_spill]] }
 0x82b   : > { %s2568_s10 = sand.u32 1, %s13072_s27  }
 0x82c   : > { %s10965_s30 = sshll.u32 %s2568_s10, 1  ;;  %p13075_p9 = scmp.ne.s32.totalorder %s13073_s17, 0 }
 0x82d   : > { %13074 = sst [smem:[#allocation351_spill]] %s10965_s30 }
 0x82e   : > { %7716 = dma.done.wait (%p13075_p9), %s2567_s9, 32  }
 0x82f   : > { %7718 = vsyncadd (%p13075_p9), %s2567_s9, 4294967264  ;;  %s13076_s7 = sld [smem:[#allocation202_spill]] }
 0x830   : > { %s13077_s28 = sld [smem:[#allocation330_spill]] }
 0x835   : > { %s2577_s21 = sand.u32 1, %s13076_s7  }
 0x836   : > { %s10974_s25 = sshll.u32 %s2577_s21, 1  ;;  %p13079_p4 = scmp.ne.s32.totalorder %s13077_s28, 0 }
 0x837   : > { %13078 = sst [smem:[#allocation352_spill]] %s10974_s25 }
 0x838   : > { %7720 = dma.done.wait (%p13079_p4), %s2567_s9, 32  }
 0x839   : > { %7722 = vsyncadd (%p13079_p4), %s2567_s9, 4294967264  ;;  %s13080_s29 = sld [smem:[#allocation199_spill]]  ;;  %s2585_s17 = scalar_lea.sflag [#allocation43], %s10792_s12 }
 0x83a   : > { %s13081_s27 = sld [smem:[#allocation332_spill]] }
 0x83f   : > { %s2586_s10 = sand.u32 1, %s13080_s29  }
 0x840   : > { %s10982_s22 = sshll.u32 %s2586_s10, 1  ;;  %p13083_p8 = scmp.ne.s32.totalorder %s13081_s27, 0 }
 0x841   : > { %13082 = sst [smem:[#allocation353_spill]] %s10982_s22 }
 0x842   : > { %7724 = dma.done.wait (%p13083_p8), %s2585_s17, 32  }
 0x843   : > { %7726 = vsyncadd (%p13083_p8), %s2585_s17, 4294967264  ;;  %s13084_s21 = sld [smem:[#allocation196_spill]] }
 0x844   : > { %s13085_s7 = sld [smem:[#allocation334_spill]] }
 0x849   : > { %s2595_s11 = sand.u32 1, %s13084_s21  }
 0x84a   : > { %s10991_s25 = sshll.u32 %s2595_s11, 1  ;;  %p13087_p5 = scmp.ne.s32.totalorder %s13085_s7, 0 }
 0x84b   : > { %13086 = sst [smem:[#allocation354_spill]] %s10991_s25 }
 0x84c   : > { %7728 = dma.done.wait (%p13087_p5), %s2585_s17, 32  }
 0x84d   : > { %7730 = vsyncadd (%p13087_p5), %s2585_s17, 4294967264  ;;  %s13088_s28 = sld [smem:[#allocation193_spill]]  ;;  %s2603_s27 = scalar_lea.sflag [#allocation46], %s10792_s12 }
 0x84e   : > { %s13089_s29 = sld [smem:[#allocation336_spill]] }
 0x853   : > { %s2604_s10 = sand.u32 1, %s13088_s28  }
 0x854   : > { %s10999_s30 = sshll.u32 %s2604_s10, 1  ;;  %p13091_p6 = scmp.ne.s32.totalorder %s13089_s29, 0 }
 0x855   : > { %13090 = sst [smem:[#allocation355_spill]] %s10999_s30 }
 0x856   : > { %7732 = dma.done.wait (%p13091_p6), %s2603_s27, 32  }
 0x857   : > { %7734 = vsyncadd (%p13091_p6), %s2603_s27, 4294967264  ;;  %s13092_s11 = sld [smem:[#allocation190_spill]] }
 0x858   : > { %s13093_s21 = sld [smem:[#allocation338_spill]] }
 0x85d   : > { %s2613_s9 = sand.u32 1, %s13092_s11  }
 0x85e   : > { %s11008_s25 = sshll.u32 %s2613_s9, 1  ;;  %p13095_p12 = scmp.ne.s32.totalorder %s13093_s21, 0 }
 0x85f   : > { %13094 = sst [smem:[#allocation356_spill]] %s11008_s25 }
 0x860   : > { %7736 = dma.done.wait (%p13095_p12), %s2603_s27, 32  }
 0x861   : > { %7738 = vsyncadd (%p13095_p12), %s2603_s27, 4294967264  ;;  %s13096_s7 = sld [smem:[#allocation187_spill]]  ;;  %s2621_s29 = scalar_lea.sflag [#allocation49], %s10792_s12 }
 0x862   : > { %s13097_s28 = sld [smem:[#allocation340_spill]] }
 0x867   : > { %s2622_s10 = sand.u32 1, %s13096_s7  }
 0x868   : > { %s11016_s22 = sshll.u32 %s2622_s10, 1  ;;  %p13099_p11 = scmp.ne.s32.totalorder %s13097_s28, 0 }
 0x869   : > { %13098 = sst [smem:[#allocation357_spill]] %s11016_s22 }
 0x86a   : > { %7740 = dma.done.wait (%p13099_p11), %s2621_s29, 32  }
 0x86b   : > { %7742 = vsyncadd (%p13099_p11), %s2621_s29, 4294967264  ;;  %s13100_s9 = sld [smem:[#allocation184_spill]] }
 0x86c   : > { %s13101_s11 = sld [smem:[#allocation342_spill]] }
 0x871   : > { %s2631_s17 = sand.u32 1, %s13100_s9  }
 0x872   : > { %s11025_s25 = sshll.u32 %s2631_s17, 1  ;;  %p13103_p13 = scmp.ne.s32.totalorder %s13101_s11, 0 }
 0x873   : > { %13102 = sst [smem:[#allocation358_spill]] %s11025_s25 }
 0x874   : > { %7744 = dma.done.wait (%p13103_p13), %s2621_s29, 32  }
 0x875   : > { %7746 = vsyncadd (%p13103_p13), %s2621_s29, 4294967264  ;;  %s13104_s21 = sld [smem:[#allocation181_spill]]  ;;  %s2639_s28 = scalar_lea.sflag [#allocation52], %s10792_s12 }
 0x876   : > { %s13105_s7 = sld [smem:[#allocation344_spill]] }
 0x87b   : > { %s2640_s10 = sand.u32 1, %s13104_s21  }
 0x87c   : > { %s11033_s30 = sshll.u32 %s2640_s10, 1  ;;  %p13107_p1 = scmp.ne.s32.totalorder %s13105_s7, 0 }
 0x87d   : > { %13106 = sst [smem:[#allocation359_spill]] %s11033_s30 }
 0x87e   : > { %7748 = dma.done.wait (%p13107_p1), %s2639_s28, 32  }
 0x87f   : > { %7750 = vsyncadd (%p13107_p1), %s2639_s28, 4294967264  ;;  %s13108_s17 = sld [smem:[#allocation178_spill]] }
 0x880   : > { %s13109_s9 = sld [smem:[#allocation346_spill]] }
 0x885   : > { %s2649_s27 = sand.u32 1, %s13108_s17  }
 0x886   : > { %s11042_s25 = sshll.u32 %s2649_s27, 1  ;;  %p13110_p10 = scmp.ne.s32.totalorder %s13109_s9, 0 }
 0x887   : > { %s2651_s29 = scalar_lea.vmem [#allocation53], %s11042_s25 }
 0x888   : > { %7752 = dma.done.wait (%p13110_p10), %s2639_s28, 32  }
 0x889   : > { %7754 = vsyncadd (%p13110_p10), %s2639_s28, 4294967264  ;;  %s13111_s11 = sld [smem:[#allocation175_spill]]  ;;  %s2657_s7 = scalar_lea.sflag [#allocation55], %s10792_s12 }
 0x88a   : > { %s13112_s21 = sld [smem:[#allocation348_spill]] }
 0x88f   : > { %s2658_s10 = sand.u32 1, %s13111_s11  }
 0x890   : > { %s11050_s22 = sshll.u32 %s2658_s10, 1  ;;  %p13113_p0 = scmp.ne.s32.totalorder %s13112_s21, 0 }
 0x891   : > { %s2660_s30 = scalar_lea.vmem [#allocation54], %s11050_s22 }
 0x892   : > { %7756 = dma.done.wait (%p13113_p0), %s2657_s7, 32  }
 0x893   : > { %7758 = vsyncadd (%p13113_p0), %s2657_s7, 4294967264  ;;  %s13114_s27 = sld [smem:[#allocation266_spill]] }
 0x899   : > { %p13115_p2 = scmp.ne.s32.totalorder %s13114_s27, 0 }
 0x89b   : > { %7760 = dma.done.wait (%p13115_p2), [#allocation55], 32  }
 0x89c   : > { %7762 = vsyncadd (%p13115_p2), [#allocation55], 4294967264 }
 0x89d   : > { %7764 = dma.done.wait (%p13115_p2), [#allocation58], 48  }
 0x89e   : > { %7766 = vsyncadd (%p13115_p2), [#allocation58], 4294967248 }
 0x89f   : > { %7768 = dma.done.wait (%p13115_p2), [#allocation61], 528  }
 0x8a0   : > { %7770 = vsyncadd (%p13115_p2), [#allocation61], 4294966768 }
 0x8a1   : > { %7772 = dma.done.wait (%p13115_p2), [#allocation64], 16  }
 0x8a2   : > { %7774 = vsyncadd (%p13115_p2), [#allocation64], 4294967280  ;;  %v3114_v1 = vlaneseq  ;;  %vm3289_vm0 = vcmask 1040384   ;;  %vm3292_vm1 = vcmask 1041408   ;;  %s13116_s12 = scalar_lea.vmem [#allocation7], %s10783_s0  ;;  %s13117_s28 = scalar_lea.vmem [#allocation9], %s10795_s6 }
 0x8a3   : > { %v3097_v5 = vld [vmem:[%s13116_s12] sm:$0x3]  ;;  %v3098_v6 = vld [vmem:[%s13117_s28] sm:$0x3]  ;;  %s13118_s17 = scalar_lea.vmem [#allocation11], %s10804_s2  ;;  %vm3295_vm2 = vcmask 1042432  }
 0x8a4   : > { %v11075_v2 = vshrl.u32 %v3114_v1, 7  ;;  %v3099_v7 = vld [vmem:[%s13118_s17] sm:$0x3]  ;;  %s13119_s9 = scalar_lea.vmem [#allocation12], %s10812_s20  ;;  %s13120_s11 = scalar_lea.vmem [#allocation14], %s10821_s26  ;;  %vm3298_vm3 = vcmask 1043456  }
 0x8a5   : > { %v3100_v8 = vld [vmem:[%s13119_s9] sm:$0x3]  ;;  %v11093_v9 = vld [vmem:[%s13120_s11] sm:$0x3]  ;;  %s13121_s21 = scalar_lea.vmem [#allocation15], %s10829_s4  ;;  %s13122_s0 = scalar_lea.vmem [#allocation17], %s10838_s16 }
 0x8a6   : > { %v11078_v3 = vsub.s32 0, %v11075_v2  ;;  %v11081_v4 = vsub.s32 1, %v11075_v2  ;;  %v11097_v10 = vld [vmem:[%s13121_s21] sm:$0x3]  ;;  %v11105_v15 = vld [vmem:[%s13122_s0] sm:$0x3] }
 0x8a7   : > { %s13123_s6 = scalar_lea.vmem [#allocation18], %s10846_s14  ;;  %s13124_s2 = scalar_lea.vmem [#allocation20], %s10855_s5  ;;  %vm3301_vm4 = vcmask 1044480   ;;  %vm3304_vm5 = vcmask 1045504   ;;  %vm3307_vm6 = vcmask 1046528   ;;  %vm3603_vm7 = vcmp.lt.s32.totalorder %v3114_v1, 512 }
 0x8a8   : > { %v3117_v11 = vrot.slane %v3097_v5, %v11078_v3  ;;  %v3121_v12 = vrot.slane %v3097_v5, %v11081_v4  ;;  %v3128_v13 = vrot.slane %v3098_v6, %v11078_v3  ;;  %v3132_v14 = vrot.slane %v3098_v6, %v11081_v4  ;;  %v11109_v16 = vld [vmem:[%s13123_s6] sm:$0x3]  ;;  %v3105_v17 = vld [vmem:[%s13124_s2] sm:$0x3]  ;;  %s13125_s20 = scalar_lea.vmem [#allocation21], %s10863_s15  ;;  %s13126_s26 = scalar_lea.vmem [#allocation23], %s10872_s23 }
 0x8a9   : > { %v3139_v18 = vrot.slane %v3099_v7, %v11078_v3  ;;  %v3143_v19 = vrot.slane %v3099_v7, %v11081_v4  ;;  %v3150_v20 = vrot.slane %v3100_v8, %v11078_v3  ;;  %v3154_v21 = vrot.slane %v3100_v8, %v11081_v4  ;;  %v3106_v22 = vld [vmem:[%s13125_s20] sm:$0x3]  ;;  %v3107_v23 = vld [vmem:[%s13126_s26] sm:$0x3]  ;;  %s13127_s16 = scalar_lea.vmem [#allocation24], %s10880_s24  ;;  %s13128_s5 = scalar_lea.vmem [#allocation26], %s10889_s3 }
 0x8aa   : > { %v3108_v24 = vld [vmem:[%s13127_s16] sm:$0x3]  ;;  %v3161_v25 = vrot.slane %v11093_v9, %v11078_v3  ;;  %v3165_v26 = vrot.slane %v11093_v9, %v11081_v4  ;;  %v3172_v27 = vrot.slane %v11097_v10, %v11078_v3  ;;  %v3176_v28 = vrot.slane %v11097_v10, %v11081_v4  ;;  %v3109_v29 = vld [vmem:[%s13128_s5] sm:$0x3]  ;;  %s13129_s23 = scalar_lea.vmem [#allocation27], %s10897_s1  ;;  %s13130_s24 = scalar_lea.vmem [#allocation29], %s10906_s13 }
 0x8ab   : > { %v3110_v30 = vld [vmem:[%s13129_s23] sm:$0x3]  ;;  %v3183_v31 = vrot.slane %v11105_v15, %v11078_v3  ;;  %v3187_v32 = vrot.slane %v11105_v15, %v11081_v4  ;;  %v3194_v33 = vrot.slane %v11109_v16, %v11078_v3  ;;  %v3198_v34 = vrot.slane %v11109_v16, %v11081_v4  ;;  %v3111_v35 = vld [vmem:[%s13130_s24] sm:$0x3]  ;;  %s13131_s15 = scalar_lea.vmem [#allocation30], %s10914_s8  ;;  %s13132_s3 = sld [smem:[#allocation177_spill]] }
 0x8ac   : > { %v3112_v36 = vld [vmem:[%s13131_s15] sm:$0x3]  ;;  %v3205_v37 = vrot.slane %v3105_v17, %v11078_v3  ;;  %v3209_v38 = vrot.slane %v3105_v17, %v11081_v4  ;;  %v3216_v39 = vrot.slane %v3106_v22, %v11078_v3  ;;  %v3220_v40 = vrot.slane %v3106_v22, %v11081_v4  ;;  %s13133_s13 = sld [smem:[#allocation189_spill]]  ;;  %s13135_s1 = scalar_lea.vmem [#allocation32], %s10923_s19 }
 0x8ad   : > { %v3227_v41 = vrot.slane %v3107_v23, %v11078_v3  ;;  %v3231_v42 = vrot.slane %v3107_v23, %v11081_v4  ;;  %v3238_v43 = vrot.slane %v3108_v24, %v11078_v3  ;;  %v3242_v44 = vrot.slane %v3108_v24, %v11081_v4  ;;  %s13134_s8 = sld [smem:[#allocation350_spill]]  ;;  %v11189_v17 = vld [vmem:[%s13135_s1] sm:$0x3]  ;;  %s13139_s7 = scalar_lea.vmem [#allocation33], %s10931_s18 }
 0x8ae   : > { %v3249_v45 = vrot.slane %v3109_v29, %v11078_v3  ;;  %v3253_v46 = vrot.slane %v3109_v29, %v11081_v4  ;;  %v3260_v47 = vrot.slane %v3110_v30, %v11078_v3  ;;  %v3264_v48 = vrot.slane %v3110_v30, %v11081_v4  ;;  %s13136_s4 = sld [smem:[#allocation351_spill]]  ;;  %v3339_v22 = vld [vmem:[%s13139_s7] sm:$0x3] }
 0x8af   : > { %v3271_v49 = vrot.slane %v3111_v35, %v11078_v3  ;;  %v3275_v50 = vrot.slane %v3111_v35, %v11081_v4  ;;  %v3282_v51 = vrot.slane %v3112_v36, %v11078_v3  ;;  %v3286_v52 = vrot.slane %v3112_v36, %v11081_v4  ;;  %s13137_s14 = sld [smem:[#allocation352_spill]] }
 0x8b0   : > { %v3290_v53 = vsel %vm3289_vm0, %v3117_v11, %v3128_v13  ;;  %v3291_v54 = vsel %vm3289_vm0, %v3121_v12, %v3132_v14  ;;  %v3310_v55 = vsel %vm3289_vm0, %v3205_v37, %v3216_v39  ;;  %v3311_v56 = vsel %vm3289_vm0, %v3209_v38, %v3220_v40  ;;  %s13138_s10 = sld [smem:[#allocation353_spill]] }
 0x8b1   : > { %v3293_v57 = vsel %vm3292_vm1, %v3290_v53, %v3139_v18  ;;  %v3294_v58 = vsel %vm3292_vm1, %v3291_v54, %v3143_v19  ;;  %v3312_v59 = vsel %vm3292_vm1, %v3310_v55, %v3227_v41  ;;  %v3313_v60 = vsel %vm3292_vm1, %v3311_v56, %v3231_v42  ;;  %s13140_s27 = scalar_lea.vmem [#allocation35], %s13132_s3  ;;  %s13143_s28 = sld [smem:[#allocation354_spill]] }
 0x8b2   : > { %v3296_v61 = vsel %vm3295_vm2, %v3293_v57, %v3150_v20  ;;  %v3297_v62 = vsel %vm3295_vm2, %v3294_v58, %v3154_v21  ;;  %v3314_v63 = vsel %vm3295_vm2, %v3312_v59, %v3238_v43  ;;  %v3315_v0 = vsel %vm3295_vm2, %v3313_v60, %v3242_v44  ;;  %s13141_s19 = scalar_lea.vmem [#allocation36], %s13133_s13  ;;  %s13144_s17 = sld [smem:[#allocation355_spill]]  ;;  %v3352_v59 = vld [vmem:[%s2651_s29] sm:$0x3] }
 0x8b3   : > { %v3299_v5 = vsel %vm3298_vm3, %v3296_v61, %v3161_v25  ;;  %v3300_v6 = vsel %vm3298_vm3, %v3297_v62, %v3165_v26  ;;  %v3316_v7 = vsel %vm3298_vm3, %v3314_v63, %v3249_v45  ;;  %v3317_v8 = vsel %vm3298_vm3, %v3315_v0, %v3253_v46  ;;  %v3340_v25 = vld [vmem:[%s13140_s27] sm:$0x3]  ;;  %s13142_s12 = scalar_lea.vmem [#allocation38], %s13134_s8  ;;  %s13146_s9 = sld [smem:[#allocation356_spill]] }
 0x8b4   : > { %v3302_v9 = vsel %vm3301_vm4, %v3299_v5, %v3172_v27  ;;  %v3303_v10 = vsel %vm3301_vm4, %v3300_v6, %v3176_v28  ;;  %v3318_v11 = vsel %vm3301_vm4, %v3316_v7, %v3260_v47  ;;  %v3319_v12 = vsel %vm3301_vm4, %v3317_v8, %v3264_v48  ;;  %v3341_v26 = vld [vmem:[%s13141_s19] sm:$0x3]  ;;  %s13145_s18 = scalar_lea.vmem [#allocation39], %s13136_s4  ;;  %s13148_s21 = sld [smem:[#allocation357_spill]] }
 0x8b5   : > { %v3305_v13 = vsel %vm3304_vm5, %v3302_v9, %v3183_v31  ;;  %v3306_v14 = vsel %vm3304_vm5, %v3303_v10, %v3187_v32  ;;  %v3320_v15 = vsel %vm3304_vm5, %v3318_v11, %v3271_v49  ;;  %v3321_v16 = vsel %vm3304_vm5, %v3319_v12, %v3275_v50  ;;  %v11203_v27 = vld [vmem:[%s13142_s12] sm:$0x3]  ;;  %s13147_s11 = scalar_lea.vmem [#allocation41], %s13137_s14  ;;  %s13150_s6 = sld [smem:[#allocation358_spill]] }
 0x8b6   : > { %v3308_v18 = vsel %vm3307_vm6, %v3305_v13, %v3194_v33  ;;  %v3309_v19 = vsel %vm3307_vm6, %v3306_v14, %v3198_v34  ;;  %v3322_v20 = vsel %vm3307_vm6, %v3320_v15, %v3282_v51  ;;  %v3323_v21 = vsel %vm3307_vm6, %v3321_v16, %v3286_v52  ;;  %v11211_v32 = vld [vmem:[%s13145_s18] sm:$0x3]  ;;  %s13149_s0 = scalar_lea.vmem [#allocation42], %s13138_s10  ;;  %s13152_s20 = sld [smem:[#allocation359_spill]] }
 0x8b7   : > { %v3324_v23 = vadd.f32 %v3322_v20, %v3308_v18  ;;  %v3331_v24 = vadd.f32 %v3323_v21, %v3309_v19  ;;  %v3358_v28 = vrot.slane %v11189_v17, %v11078_v3  ;;  %v3362_v29 = vrot.slane %v11189_v17, %v11081_v4  ;;  %v11215_v33 = vld [vmem:[%s13147_s11] sm:$0x3]  ;;  %s13151_s2 = scalar_lea.vmem [#allocation44], %s13143_s28  ;;  %s13158_s22 = sld [smem:[#allocation249_spill]] }
 0x8b8   : > { %v3369_v34 = vrot.slane %v3339_v22, %v11078_v3  ;;  %v3373_v35 = vrot.slane %v3339_v22, %v11081_v4  ;;  %v11221_v36 = vld [vmem:[%s13149_s0] sm:$0x3]  ;;  %v3380_v37 = vrot.slane %v3340_v25, %v11078_v3  ;;  %v3384_v38 = vrot.slane %v3340_v25, %v11081_v4  ;;  %s13153_s26 = scalar_lea.vmem [#allocation45], %s13144_s17 }
 0x8b9   : > { %v3325_v30 = vrot.slane %v3324_v23, 4  ;;  %v3332_v31 = vrot.slane %v3331_v24, 4  ;;  %v3391_v39 = vrot.slane %v3341_v26, %v11078_v3  ;;  %v3395_v40 = vrot.slane %v3341_v26, %v11081_v4  ;;  %v3346_v43 = vld [vmem:[%s13151_s2] sm:$0x3]  ;;  %s13154_s16 = scalar_lea.vmem [#allocation47], %s13146_s9 }
 0x8ba   : > { %v3347_v44 = vld [vmem:[%s13153_s26] sm:$0x3]  ;;  %v3402_v45 = vrot.slane %v11203_v27, %v11078_v3  ;;  %v3406_v46 = vrot.slane %v11203_v27, %v11081_v4  ;;  %s13155_s5 = scalar_lea.vmem [#allocation48], %s13148_s21  ;;  %v3413_v49 = vrot.slane %v11211_v32, %v11078_v3  ;;  %v3417_v50 = vrot.slane %v11211_v32, %v11081_v4 }
 0x8bb   : > { %v3326_v41 = vadd.f32 %v3325_v30, %v3324_v23  ;;  %v3333_v42 = vadd.f32 %v3332_v31, %v3331_v24  ;;  %v3348_v47 = vld [vmem:[%s13154_s16] sm:$0x3]  ;;  %v3424_v51 = vrot.slane %v11215_v33, %v11078_v3  ;;  %v3428_v52 = vrot.slane %v11215_v33, %v11081_v4  ;;  %s13156_s23 = scalar_lea.vmem [#allocation50], %s13150_s6 }
 0x8bc   : > { %v3349_v48 = vld [vmem:[%s13155_s5] sm:$0x3]  ;;  %v3435_v56 = vrot.slane %v11221_v36, %v11078_v3  ;;  %v3439_v57 = vrot.slane %v11221_v36, %v11081_v4  ;;  %s13157_s24 = scalar_lea.vmem [#allocation51], %s13152_s20  ;;  %v3446_v60 = vrot.slane %v3346_v43, %v11078_v3  ;;  %v3450_v61 = vrot.slane %v3346_v43, %v11081_v4 }
 0x8bd   : > { %v3327_v53 = vrot.slane %v3326_v41, 2  ;;  %v3334_v54 = vrot.slane %v3333_v42, 2  ;;  %v3350_v55 = vld [vmem:[%s13156_s23] sm:$0x3]  ;;  %v3457_v62 = vrot.slane %v3347_v44, %v11078_v3  ;;  %v3461_v63 = vrot.slane %v3347_v44, %v11081_v4  ;;  %s3608_s25 = sand.u32 7, %s13158_s22  ;;  %p5061_p3 = scmp.ne.s32.totalorder %s13158_s22, 7 }
 0x8be   : > { %v3351_v58 = vld [vmem:[%s13157_s24] sm:$0x3]  ;;  %v3468_v0 = vrot.slane %v3348_v47, %v11078_v3  ;;  %v3472_v5 = vrot.slane %v3348_v47, %v11081_v4  ;;  %v3479_v6 = vrot.slane %v3349_v48, %v11078_v3  ;;  %v3483_v7 = vrot.slane %v3349_v48, %v11081_v4  ;;  %s13159_s13 = sld [smem:[#allocation168_spill]] (!%p5061_p3) }
 0x8bf   : > { %v3328_v8 = vadd.f32 %v3327_v53, %v3326_v41  ;;  %v3335_v9 = vadd.f32 %v3334_v54, %v3333_v42  ;;  %v3353_v10 = vld [vmem:[%s2660_s30] sm:$0x3]  ;;  %v3490_v11 = vrot.slane %v3350_v55, %v11078_v3  ;;  %v3494_v12 = vrot.slane %v3350_v55, %v11081_v4  ;;  %s3605_s30 = sshra.s32 %s13158_s22, 3  ;;  %s13160_s8 = sld [smem:[#allocation173_spill]] (!%p5061_p3) }
 0x8c0   : > { %v3501_v13 = vrot.slane %v3351_v58, %v11078_v3  ;;  %v3505_v14 = vrot.slane %v3351_v58, %v11081_v4  ;;  %v3512_v15 = vrot.slane %v3352_v59, %v11078_v3  ;;  %v3516_v16 = vrot.slane %v3352_v59, %v11081_v4  ;;  %s5102_s29 = sshll.u32 %s3605_s30, 5 }
 0x8c1   : > { %v3530_v17 = vsel %vm3289_vm0, %v3358_v28, %v3369_v34  ;;  %v3531_v18 = vsel %vm3289_vm0, %v3362_v29, %v3373_v35  ;;  %v3544_v19 = vsel %vm3289_vm0, %v3446_v60, %v3457_v62  ;;  %v3545_v20 = vsel %vm3289_vm0, %v3450_v61, %v3461_v63  ;;  %s3611_s15 = sadd.s32 %s5102_s29, %s3608_s25 }
 0x8c2   : > { %v3523_v21 = vrot.slane %v3353_v10, %v11078_v3  ;;  %v3527_v22 = vrot.slane %v3353_v10, %v11081_v4  ;;  %v3532_v23 = vsel %vm3292_vm1, %v3530_v17, %v3380_v37  ;;  %v3533_v24 = vsel %vm3292_vm1, %v3531_v18, %v3384_v38  ;;  %s3612_s3 = scalar_lea.vmem [#allocation2], %s3611_s15 }
 0x8c3   : > { %v3534_v25 = vsel %vm3295_vm2, %v3532_v23, %v3391_v39  ;;  %v3535_v26 = vsel %vm3295_vm2, %v3533_v24, %v3395_v40  ;;  %v3546_v27 = vsel %vm3292_vm1, %v3544_v19, %v3468_v0  ;;  %v3547_v28 = vsel %vm3292_vm1, %v3545_v20, %v3472_v5 }
 0x8c4   : > { %v3536_v29 = vsel %vm3298_vm3, %v3534_v25, %v3402_v45  ;;  %v3537_v30 = vsel %vm3298_vm3, %v3535_v26, %v3406_v46  ;;  %v3548_v31 = vsel %vm3295_vm2, %v3546_v27, %v3479_v6  ;;  %v3549_v32 = vsel %vm3295_vm2, %v3547_v28, %v3483_v7 }
 0x8c5   : > { %v3538_v33 = vsel %vm3301_vm4, %v3536_v29, %v3413_v49  ;;  %v3539_v34 = vsel %vm3301_vm4, %v3537_v30, %v3417_v50  ;;  %v3550_v35 = vsel %vm3298_vm3, %v3548_v31, %v3490_v11  ;;  %v3551_v36 = vsel %vm3298_vm3, %v3549_v32, %v3494_v12 }
 0x8c6   : > { %v3540_v37 = vsel %vm3304_vm5, %v3538_v33, %v3424_v51  ;;  %v3541_v38 = vsel %vm3304_vm5, %v3539_v34, %v3428_v52  ;;  %v3552_v39 = vsel %vm3301_vm4, %v3550_v35, %v3501_v13  ;;  %v3553_v40 = vsel %vm3301_vm4, %v3551_v36, %v3505_v14 }
 0x8c7   : > { %v3542_v41 = vsel %vm3307_vm6, %v3540_v37, %v3435_v56  ;;  %v3543_v42 = vsel %vm3307_vm6, %v3541_v38, %v3439_v57  ;;  %v3554_v43 = vsel %vm3304_vm5, %v3552_v39, %v3512_v15  ;;  %v3555_v44 = vsel %vm3304_vm5, %v3553_v40, %v3516_v16 }
 0x8c8   : > { %v3556_v45 = vsel %vm3307_vm6, %v3554_v43, %v3523_v21  ;;  %v3557_v46 = vsel %vm3307_vm6, %v3555_v44, %v3527_v22  ;;  %v8255_v49 = vmov 1966171168   ;;  %v3329_v51 = vrot.slane %v3328_v8, 1 }
 0x8c9   : > { %v3558_v47 = vadd.f32 %v3556_v45, %v3542_v41  ;;  %v3565_v48 = vadd.f32 %v3557_v46, %v3543_v42  ;;  %v3579_v50 = vunpack.c.l.s4 %v8255_v49  ;;  %v3336_v52 = vrot.slane %v3335_v9, 1 }
 0x8ca   : > { %v3330_v58 = vadd.f32 %v3329_v51, %v3328_v8 }
 0x8cb   : > { %v3559_v53 = vrot.slane %v3558_v47, 4  ;;  %v3566_v54 = vrot.slane %v3565_v48, 4  ;;  %v3580_v57 = vunpack.c.0.s8 %v3579_v50  ;;  %v3337_v59 = vadd.f32 %v3336_v52, %v3335_v9 }
 0x8cd   : > { %v3560_v55 = vadd.f32 %v3559_v53, %v3558_v47  ;;  %v3567_v56 = vadd.f32 %v3566_v54, %v3565_v48  ;;  %v3576_v6 = vcombine.low %v3330_v58, %v3337_v59  ;;  %v3583_v7 = vsub.s32 %v3580_v57, %v11075_v2 }
 0x8cf   : > { %v3561_v60 = vrot.slane %v3560_v55, 2  ;;  %v3568_v61 = vrot.slane %v3567_v56, 2  ;;  %v3584_v13 = vrot.slane %v3576_v6, %v3583_v7 }
 0x8d1   : > { %v3562_v62 = vadd.f32 %v3561_v60, %v3560_v55  ;;  %v3569_v63 = vadd.f32 %v3568_v61, %v3567_v56 }
 0x8d3   : > { %v3563_v0 = vrot.slane %v3562_v62, 1  ;;  %v3570_v5 = vrot.slane %v3569_v63, 1 }
 0x8d5   : > { %v3564_v10 = vadd.f32 %v3563_v0, %v3562_v62  ;;  %v3571_v11 = vadd.f32 %v3570_v5, %v3569_v63 }
 0x8d7   : > { %v3577_v12 = vcombine.low %v3564_v10, %v3571_v11 }
 0x8d9   : > { %v3591_v14 = vrot.slane %v3577_v12, %v3583_v7 }
 0x8db   : > { %v3592_v8 = vcombine.low %v3584_v13, %v3591_v14  ;;  %3618 = sbr.rel (%p5061_p3) target bundleno = 2976 (0xba0), region = 336 }
 0x8dd   : > { %v3599_v9 = vrot.slane %v3592_v8, %v3583_v7 }
 0x8df   : > { %3613 = vst.msk [vmem:[%s3612_s3] ss:$8 sm:$0xf] %vm3603_vm7, %v3599_v9 }
 0x8e0   : > { %v3718_v2 = vld [vmem:[%s13159_s13 + $0x1f8] sm:$0xff]  ;;  %v3717_v17 = vld [vmem:[%s13159_s13 + $0x1f0] sm:$0xff]  ;;  %v3716_v21 = vld [vmem:[%s13159_s13 + $0x1e8] sm:$0xff]  ;;  %vm8257_vm8 = vmmov 0   ;;  %vm3879_vm9 = vcmask 261120  }
 0x8e1   : > { %v3686_v15 = vld [vmem:[%s13159_s13 + $0xf8] sm:$0xff]  ;;  %5103 = vmatprep.subr.mxu0 %v3718_v2  ;;  %v3685_v18 = vld [vmem:[%s13159_s13 + $0xf0] sm:$0xff]  ;;  %v3684_v22 = vld [vmem:[%s13159_s13 + $0xe8] sm:$0xff] }
 0x8e2   : > { %v3702_v1 = vld [vmem:[%s13159_s13 + $0x178] sm:$0xff]  ;;  %5138 = vmatprep.subr.mxu1 %v3686_v15  ;;  %v3701_v19 = vld [vmem:[%s13159_s13 + $0x170] sm:$0xff]  ;;  %v3700_v23 = vld [vmem:[%s13159_s13 + $0x168] sm:$0xff] }
 0x8e3   : > { %v3670_v16 = vld [vmem:[%s13159_s13 + $0x78] sm:$0xff]  ;;  %5104 = vmatpush3.msra.mxu0 %v3702_v1  ;;  %v3669_v20 = vld [vmem:[%s13159_s13 + $0x70] sm:$0xff]  ;;  %v3668_v24 = vld [vmem:[%s13159_s13 + $0x68] sm:$0xff] }
 0x8e4   : > { %5139 = vmatpush3.msra.mxu1 %v3670_v16  ;;  %5105 = vmatprep.subr.mxu0 %v3717_v17  ;;  %v3715_v25 = vld [vmem:[%s13159_s13 + $0x1e0] sm:$0xff]  ;;  %v3714_v29 = vld [vmem:[%s13159_s13 + $0x1d8] sm:$0xff]  ;;  %v3713_v33 = vld [vmem:[%s13159_s13 + $0x1d0] sm:$0xff] }
 0x8e5   : > { %5140 = vmatprep.subr.mxu1 %v3685_v18  ;;  %5106 = vmatpush3.msra.mxu0 %v3701_v19  ;;  %v3683_v26 = vld [vmem:[%s13159_s13 + $0xe0] sm:$0xff]  ;;  %v3682_v30 = vld [vmem:[%s13159_s13 + $0xd8] sm:$0xff]  ;;  %v3681_v34 = vld [vmem:[%s13159_s13 + $0xd0] sm:$0xff] }
 0x8e6   : > { %5141 = vmatpush3.msra.mxu1 %v3669_v20  ;;  %5107 = vmatprep.subr.mxu0 %v3716_v21  ;;  %v3699_v27 = vld [vmem:[%s13159_s13 + $0x160] sm:$0xff]  ;;  %v3698_v31 = vld [vmem:[%s13159_s13 + $0x158] sm:$0xff]  ;;  %v3697_v35 = vld [vmem:[%s13159_s13 + $0x150] sm:$0xff] }
 0x8e7   : > { %5142 = vmatprep.subr.mxu1 %v3684_v22  ;;  %v3667_v28 = vld [vmem:[%s13159_s13 + $0x60] sm:$0xff]  ;;  %5108 = vmatpush3.msra.mxu0 %v3700_v23  ;;  %v3666_v32 = vld [vmem:[%s13159_s13 + $0x58] sm:$0xff]  ;;  %v3665_v36 = vld [vmem:[%s13159_s13 + $0x50] sm:$0xff] }
 0x8e8   : > { %5143 = vmatpush3.msra.mxu1 %v3668_v24  ;;  %5109 = vmatprep.subr.mxu0 %v3715_v25  ;;  %v3712_v37 = vld [vmem:[%s13159_s13 + $0x1c8] sm:$0xff]  ;;  %v3711_v41 = vld [vmem:[%s13159_s13 + $0x1c0] sm:$0xff]  ;;  %v3710_v45 = vld [vmem:[%s13159_s13 + $0x1b8] sm:$0xff] }
 0x8e9   : > { %5144 = vmatprep.subr.mxu1 %v3683_v26  ;;  %5110 = vmatpush3.msra.mxu0 %v3699_v27  ;;  %v3680_v38 = vld [vmem:[%s13159_s13 + $0xc8] sm:$0xff]  ;;  %v3679_v42 = vld [vmem:[%s13159_s13 + $0xc0] sm:$0xff]  ;;  %v3678_v46 = vld [vmem:[%s13159_s13 + $0xb8] sm:$0xff] }
 0x8ea   : > { %5145 = vmatpush3.msra.mxu1 %v3667_v28  ;;  %5111 = vmatprep.subr.mxu0 %v3714_v29  ;;  %v3696_v39 = vld [vmem:[%s13159_s13 + $0x148] sm:$0xff]  ;;  %v3695_v43 = vld [vmem:[%s13159_s13 + $0x140] sm:$0xff]  ;;  %v3694_v47 = vld [vmem:[%s13159_s13 + $0x138] sm:$0xff] }
 0x8eb   : > { %5146 = vmatprep.subr.mxu1 %v3682_v30  ;;  %5112 = vmatpush3.msra.mxu0 %v3698_v31  ;;  %v3664_v40 = vld [vmem:[%s13159_s13 + $0x48] sm:$0xff]  ;;  %v3663_v44 = vld [vmem:[%s13159_s13 + $0x40] sm:$0xff]  ;;  %v3662_v48 = vld [vmem:[%s13159_s13 + $0x38] sm:$0xff]  ;;  %v8256_v31 = vmov 0.0  }
 0x8ec   : > { %5147 = vmatpush3.msra.mxu1 %v3666_v32  ;;  %5113 = vmatprep.subr.mxu0 %v3713_v33  ;;  %v3709_v49 = vld [vmem:[%s13159_s13 + $0x1b0] sm:$0xff]  ;;  %v3708_v53 = vld [vmem:[%s13159_s13 + $0x1a8] sm:$0xff]  ;;  %v3707_v57 = vld [vmem:[%s13159_s13 + $0x1a0] sm:$0xff] }
 0x8ed   : > { %5148 = vmatprep.subr.mxu1 %v3681_v34  ;;  %5114 = vmatpush3.msra.mxu0 %v3697_v35  ;;  %v3677_v50 = vld [vmem:[%s13159_s13 + $0xb0] sm:$0xff]  ;;  %v3676_v54 = vld [vmem:[%s13159_s13 + $0xa8] sm:$0xff]  ;;  %v3675_v58 = vld [vmem:[%s13159_s13 + $0xa0] sm:$0xff] }
 0x8ee   : > { %5149 = vmatpush3.msra.mxu1 %v3665_v36  ;;  %5115 = vmatprep.subr.mxu0 %v3712_v37  ;;  %v3693_v51 = vld [vmem:[%s13159_s13 + $0x130] sm:$0xff]  ;;  %v3692_v55 = vld [vmem:[%s13159_s13 + $0x128] sm:$0xff]  ;;  %v3691_v59 = vld [vmem:[%s13159_s13 + $0x120] sm:$0xff] }
 0x8ef   : > { %5150 = vmatprep.subr.mxu1 %v3680_v38  ;;  %5116 = vmatpush3.msra.mxu0 %v3696_v39  ;;  %v3661_v52 = vld [vmem:[%s13159_s13 + $0x30] sm:$0xff]  ;;  %v3660_v56 = vld [vmem:[%s13159_s13 + $0x28] sm:$0xff]  ;;  %v3659_v60 = vld [vmem:[%s13159_s13 + $0x20] sm:$0xff] }
 0x8f0   : > { %5151 = vmatpush3.msra.mxu1 %v3664_v40  ;;  %5117 = vmatprep.subr.mxu0 %v3711_v41  ;;  %v3706_v61 = vld [vmem:[%s13159_s13 + $0x198] sm:$0xff]  ;;  %v3639_v0 = vld [vmem:[#allocation57] sm:$0x3]  ;;  %v3620_v10 = vld [vmem:[#allocation2 + $0x8] sm:$0xff] }
 0x8f1   : > { %5152 = vmatprep.subr.mxu1 %v3679_v42  ;;  %5118 = vmatpush3.msra.mxu0 %v3695_v43  ;;  %v3674_v62 = vld [vmem:[%s13159_s13 + $0x98] sm:$0xff]  ;;  %v3644_v6 = vrot.slane %v3639_v0, %v11078_v3  ;;  %v3648_v7 = vrot.slane %v3639_v0, %v11081_v4  ;;  %v3623_v11 = vld [vmem:[#allocation56] sm:$0x3]  ;;  %v3621_v8 = vld [vmem:[#allocation2 + $0x10] sm:$0xff] }
 0x8f2   : > { %5153 = vmatpush3.msra.mxu1 %v3663_v44  ;;  %5119 = vmatprep.subr.mxu0 %v3710_v45  ;;  %v3622_v63 = vld [vmem:[#allocation2 + $0x18] sm:$0xff]  ;;  %v3628_v13 = vrot.slane %v3623_v11, %v11078_v3  ;;  %v3632_v14 = vrot.slane %v3623_v11, %v11081_v4  ;;  %v3619_v9 = vld [vmem:[#allocation2] sm:$0xff]  ;;  %v3705_v2 = vld [vmem:[%s13159_s13 + $0x190] sm:$0xff] }
 0x8f3   : > { %5154 = vmatprep.subr.mxu1 %v3678_v46  ;;  %5120 = vmatpush3.msra.mxu0 %v3694_v47  ;;  %v3690_v5 = vld [vmem:[%s13159_s13 + $0x118] sm:$0xff]  ;;  %v3673_v15 = vld [vmem:[%s13159_s13 + $0x90] sm:$0xff]  ;;  %v3652_v1 = vadd.f32 %v3648_v7, %v3622_v63  ;;  %v3704_v4 = vld [vmem:[%s13159_s13 + $0x188] sm:$0xff]  ;;  %v3651_v19 = vadd.f32 %v3644_v6, %v3621_v8 }
 0x8f4   : > { %5155 = vmatpush3.msra.mxu1 %v3662_v48  ;;  %5121 = vmatprep.subr.mxu0 %v3709_v49  ;;  %v3658_v12 = vld [vmem:[%s13159_s13 + $0x18] sm:$0xff]  ;;  %v3689_v16 = vld [vmem:[%s13159_s13 + $0x110] sm:$0xff]  ;;  %v3636_v3 = vadd.f32 %v3632_v14, %v3620_v10  ;;  %v3672_v18 = vld [vmem:[%s13159_s13 + $0x88] sm:$0xff]  ;;  %v3635_v20 = vadd.f32 %v3628_v13, %v3619_v9 }
 0x8f5   : > { %5156 = vmatprep.subr.mxu1 %v3677_v50  ;;  %5122 = vmatpush3.msra.mxu0 %v3693_v51  ;;  %v3657_v17 = vld [vmem:[%s13159_s13 + $0x10] sm:$0xff]  ;;  %v3688_v21 = vld [vmem:[%s13159_s13 + $0x108] sm:$0xff]  ;;  %v3703_v23 = vld [vmem:[%s13159_s13 + $0x180] sm:$0xff]  ;;  %v3654_v25 = vmax.f32 %v3652_v1, 0.0  ;;  %v3653_v29 = vmax.f32 %v3651_v19, 0.0 }
 0x8f6   : > { %5157 = vmatpush3.msra.mxu1 %v3661_v52  ;;  %5123 = vmatprep.subr.mxu0 %v3708_v53  ;;  %v3656_v22 = vld [vmem:[%s13159_s13 + $0x8] sm:$0xff]  ;;  %v3671_v24 = vld [vmem:[%s13159_s13 + $0x80] sm:$0xff]  ;;  %v3638_v27 = vmax.f32 %v3636_v3, 0.0  ;;  %v3637_v30 = vmax.f32 %v3635_v20, 0.0  ;;  %v3870_v33 = vld [vmem:[#allocation60 + $0x10] sm:$0xff] }
 0x8f7   : > { %5158 = vmatprep.subr.mxu1 %v3676_v54  ;;  %5124 = vmatpush3.msra.mxu0 %v3692_v55  ;;  %v3687_v26 = vld [vmem:[%s13159_s13 + $0x100] sm:$0xff]  ;;  %v3869_v34 = vld [vmem:[#allocation60 + $0x8] sm:$0xff]  ;;  %v5065_v50 = vld [vmem:[#allocation63] ss:$0 sm:$0xff]  ;;  %v8258_v54 = vmov 0  }
 0x8f8   : > { %5159 = vmatpush3.msra.mxu1 %v3660_v56  ;;  %5125 = vmatprep.subr.mxu0 %v3707_v57  ;;  %v3655_v28 = vld [vmem:[%s13159_s13] sm:$0xff] }
 0x8f9   : > { %5160 = vmatprep.subr.mxu1 %v3675_v58  ;;  %5126 = vmatpush3.msra.mxu0 %v3691_v59  ;;  %v3871_v32 = vld [vmem:[#allocation60 + $0x18] sm:$0xff]  ;;  %v3868_v35 = vld [vmem:[#allocation60] sm:$0xff] }
 0x8fa   : > { %5161 = vmatpush3.msra.mxu1 %v3659_v60  ;;  %5127 = vmatprep.subr.mxu0 %v3706_v61  ;;  %v5062_v42 = vld [vmem:[#allocation59] ss:$0 sm:$0xff]  ;;  %v5063_v46 = vld [vmem:[#allocation62] ss:$0 sm:$0xff]  ;;  %v5066_v55 = vld [vmem:[#allocation6] ss:$0 sm:$0xff] }
 0x8fb   : > { %5162 = vmatprep.subr.mxu1 %v3674_v62  ;;  %5128 = vmatpush3.msra.mxu0 %v3690_v5 }
 0x8fc   : > { %5163 = vmatpush3.msra.mxu1 %v3658_v12  ;;  %5129 = vmatprep.subr.mxu0 %v3705_v2 }
 0x8fd   : > { %5164 = vmatprep.subr.mxu1 %v3673_v15  ;;  %5130 = vmatpush3.msra.mxu0 %v3689_v16 }
 0x8fe   : > { %5165 = vmatpush3.msra.mxu1 %v3657_v17  ;;  %5131 = vmatprep.subr.mxu0 %v3704_v4 }
 0x8ff   : > { %5166 = vmatprep.subr.mxu1 %v3672_v18  ;;  %5132 = vmatpush3.msra.mxu0 %v3688_v21 }
 0x900   : > { %5167 = vmatpush3.msra.mxu1 %v3656_v22  ;;  %5133 = vmatprep.subr.mxu0 %v3703_v23 }
 0x901   : > { %5168 = vmatprep.subr.mxu1 %v3671_v24  ;;  %5134 = vmatpush3.msra.mxu0 %v3687_v26 }
 0x902   : > { %3783 = vmatprep.mubr.f32.mxu0 %v3654_v25  ;;  %5169 = vmatpush3.msra.mxu1 %v3655_v28 }
 0x903   : > { %3853 = vmatprep.mubr.f32.mxu1 %v3638_v27  ;;  %3784 = vmatmul.mubr.f32.vlgmr.msra.gmra.mxu0 %v3653_v29 }
 0x904   : > { %3854 = vmatmul.mubr.f32.vlgmr.msra.gmra.mxu1 %v3637_v30  ;;  %5178 = vmatprep.subr.mxu0 %v8256_v31 }
 0x905   : > { %5179 = vmatpush3.msra.mxu0 %v3871_v32  ;;  %5186 = vmatprep.mubr.msk.f32.mxu0 %vm8257_vm8, %v8256_v31 }
 0x906   : > { %5180 = vmatprep.subr.mxu0 %v8256_v31  ;;  %6220 = vset.pattern.permute.xlu0 %v8258_v54 }
 0x907   : > { %5181 = vmatpush3.msra.mxu0 %v3870_v33 }
 0x908   : > { %5182 = vmatprep.subr.mxu0 %v8256_v31 }
 0x909   : > { %5183 = vmatpush3.msra.mxu0 %v3869_v34 }
 0x90a   : > { %5184 = vmatprep.subr.mxu0 %v8256_v31 }
 0x90b   : > { %5185 = vmatpush3.msra.mxu0 %v3868_v35 }
 0x9c3   : > { %v5135_v36 = vpop.f32.mrf.mxu0 }
 0x9c4   : > { %v5170_v37 = vpop.f32.mrf.mxu1 }
 0x9c5   : > { %v5136_v38 = vpop.f32.mrf.mxu0 }
 0x9c6   : > { %v5171_v39 = vpop.f32.mrf.mxu1  ;;  %v5137_v40 = vadd.f32 %v5136_v38, %v5135_v36 }
 0x9c7   : > { %v5172_v41 = vadd.f32 %v5171_v39, %v5170_v37 }
 0x9c9   : > { %v3856_v43 = vadd.f32 %v5172_v41, %v5137_v40 }
 0x9cb   : > { %v3866_v44 = vadd.f32 %v5062_v42, %v3856_v43 }
 0x9cd   : > { %v3867_v45 = vmax.f32 %v3866_v44, 0.0 }
 0x9cf   : > { %5187 = vmatmul.mubr.msk.f32.vlgmr.msra.gmra.mxu0 %vm3879_vm9, %v3867_v45 }
 0xa8f   : > { %v3949_v47 = vpop.f32.mrf.mxu0 }
 0xa90   : > { %v3950_v48 = vadd.f32 %v5063_v46, %v3949_v47 }
 0xa91   : > { %v5188_v49 = vpop.f32.mrf.mxu0 }
 0xa92   : > { %v3953_v51 = vmax.f32 %v3950_v48, 0.0 }
 0xa94   : > { %v3961_v52 = vmul.f32 %v5065_v50, %v3953_v51 }
 0xa96   : > { %v3962_v53 = vsel %vm3879_vm9, %v3961_v52, 0.0 }
 0xa97   : > { %3963 = vadd.xlane.f32.xlu0 %v3962_v53 }
 0xb20   : > { %v3964_v56 = vpop.xlane.xlu0 %3963 }
 0xb21   : > { %v3972_v57 = vadd.f32 %v5066_v55, %v3964_v56 }
 0xb23   : > { %3975 = vperm.xlu0 %6220, %v3972_v57  }
 0xb9e   : > { %v3976_v58 = vpop.permute.xlu0 %3975 }
 0xb9f   : > { %3978 = vst [vmem:[%s13160_s8] sm:$0xff] %v3976_v58 }
 0xba0 PF: > { %s13161_s2 = sld [smem:[#allocation265_spill]] }
 0xba6   : > { %s12094_s10 = sadd.s32 1, %s13161_s2  }
 0xba7   : > { %s13163_s0 = sld [smem:[#allocation175_spill]]  ;;  %p11380_p7 = scmp.ge.s32.totalorder %s12094_s10, 10  }
 0xba8   : > { %s13164_s28 = sld [smem:[#allocation176_spill]] }
 0xba9   : > { %s13165_s5 = sld [smem:[#allocation349_spill]] }
 0xbaa   : > { %s13166_s2 = sld [smem:[#allocation178_spill]] }
 0xbab   : > { %s13167_s17 = sld [smem:[#allocation179_spill]] }
 0xbac   : > { %s13168_s9 = sld [smem:[#allocation347_spill]] }
 0xbad   : > { %s13169_s7 = sld [smem:[#allocation181_spill]] }
 0xbae   : > { %s13170_s11 = sld [smem:[#allocation182_spill]] }
 0xbaf   : > { %s13171_s15 = sld [smem:[#allocation174_spill]] }
 0xbb0   : > { %s13172_s18 = sld [smem:[#allocation184_spill]] }
 0xbb1   : > { %s13173_s14 = sld [smem:[#allocation185_spill]] }
 0xbb2   : > { %s13174_s20 = sld [smem:[#allocation343_spill]] }
 0xbb3   : > { %s13175_s26 = sld [smem:[#allocation187_spill]] }
 0xbb4   : > { %s13176_s23 = sld [smem:[#allocation188_spill]] }
 0xbb5   : > { %s13177_s4 = sld [smem:[#allocation180_spill]] }
 0xbb6   : > { %s13178_s27 = scalar_select %p11380_p7, 1, 0 }
 0xbb7   : > { %s13181_s24 = sld [smem:[#allocation190_spill]] }
 0xbb8   : > { %13179 = sst [smem:[#allocation360_spill]] %s13178_s27 }
 0xbb9   : > { %s13182_s6 = sld [smem:[#allocation191_spill]] }
 0xbba   : > { %s13183_s27 = sld [smem:[#allocation183_spill]] }
 0xbbb   : > { %s13184_s12 = sld [smem:[#allocation193_spill]] }
 0xbbc   : > { %s13185_s30 = sld [smem:[#allocation194_spill]] }
 0xbbd   : > { %s13186_s8 = sld [smem:[#allocation186_spill]] }
 0xbbe   : > { %s13187_s21 = sld [smem:[#allocation196_spill]] }
 0xbbf   : > { %13188 = sst [smem:[#allocation174_spill]] %s13169_s7 }
 0xbc0   : > { %s13189_s16 = sld [smem:[#allocation197_spill]] }
 0xbc1   : > { %s13190_s22 = sld [smem:[#allocation335_spill]] }
 0xbc2   : > { %13191 = sst [smem:[#allocation175_spill]] %s13171_s15 }
 0xbc3   : > { %s13192_s25 = sld [smem:[#allocation199_spill]] }
 0xbc4   : > { %13193 = sst [smem:[#allocation176_spill]] %s13172_s18 }
 0xbc5   : > { %s13194_s29 = sld [smem:[#allocation200_spill]] }
 0xbc6   : > { %s13195_s3 = sld [smem:[#allocation192_spill]] }
 0xbc7   : > { %13196 = sst [smem:[#allocation177_spill]] %s13174_s20 }
 0xbc8   : > { %s13197_s10 = sld [smem:[#allocation202_spill]] }
 0xbc9   : > { %13198 = sst [smem:[#allocation178_spill]] %s13175_s26 }
 0xbca   : > { %s13199_s13 = sld [smem:[#allocation203_spill]] }
 0xbcb   : > { %13200 = sst [smem:[#allocation179_spill]] %s13176_s23 }
 0xbcc   : > { %s13201_s7 = sld [smem:[#allocation195_spill]] }
 0xbcd   : > { %13202 = sst [smem:[#allocation180_spill]] %s13177_s4 }
 0xbce   : > { %s13203_s19 = sld [smem:[#allocation205_spill]] }
 0xbcf   : > { %13204 = sst [smem:[#allocation181_spill]] %s13181_s24 }
 0xbd0   : > { %s13205_s15 = sld [smem:[#allocation206_spill]] }
 0xbd1   : > { %13206 = sst [smem:[#allocation182_spill]] %s13182_s6 }
 0xbd2   : > { %s13207_s18 = sld [smem:[#allocation198_spill]] }
 0xbd3   : > { %13208 = sst [smem:[#allocation183_spill]] %s13183_s27 }
 0xbd4   : > { %s13209_s1 = sld [smem:[#allocation208_spill]] }
 0xbd5   : > { %13210 = sst [smem:[#allocation184_spill]] %s13184_s12 }
 0xbd6   : > { %s13211_s20 = sld [smem:[#allocation209_spill]] }
 0xbd7   : > { %13212 = sst [smem:[#allocation185_spill]] %s13185_s30 }
 0xbd8   : > { %s13213_s26 = sld [smem:[#allocation201_spill]] }
 0xbd9   : > { %13214 = sst [smem:[#allocation186_spill]] %s13186_s8 }
 0xbda   : > { %s13215_s23 = sld [smem:[#allocation211_spill]] }
 0xbdb   : > { %13216 = sst [smem:[#allocation187_spill]] %s13187_s21 }
 0xbdc   : > { %s13217_s4 = sld [smem:[#allocation212_spill]] }
 0xbdd   : > { %13218 = sst [smem:[#allocation188_spill]] %s13189_s16 }
 0xbde   : > { %s13219_s24 = sld [smem:[#allocation204_spill]] }
 0xbdf   : > { %13220 = sst [smem:[#allocation189_spill]] %s13190_s22 }
 0xbe0   : > { %s13221_s6 = sld [smem:[#allocation214_spill]] }
 0xbe1   : > { %13222 = sst [smem:[#allocation190_spill]] %s13192_s25 }
 0xbe2   : > { %s13223_s27 = sld [smem:[#allocation215_spill]] }
 0xbe3   : > { %13224 = sst [smem:[#allocation191_spill]] %s13194_s29 }
 0xbe4   : > { %s13225_s12 = sld [smem:[#allocation207_spill]] }
 0xbe5   : > { %13226 = sst [smem:[#allocation192_spill]] %s13195_s3 }
 0xbe6   : > { %s13227_s30 = sld [smem:[#allocation217_spill]] }
 0xbe7   : > { %13228 = sst [smem:[#allocation193_spill]] %s13197_s10 }
 0xbe8   : > { %s13229_s8 = sld [smem:[#allocation218_spill]] }
 0xbe9   : > { %13230 = sst [smem:[#allocation194_spill]] %s13199_s13 }
 0xbea   : > { %s13231_s3 = sld [smem:[#allocation210_spill]] }
 0xbeb   : > { %13232 = sst [smem:[#allocation195_spill]] %s13201_s7 }
 0xbec   : > { %s13233_s22 = sld [smem:[#allocation220_spill]] }
 0xbed   : > { %13234 = sst [smem:[#allocation196_spill]] %s13203_s19 }
 0xbee   : > { %s13235_s16 = sld [smem:[#allocation221_spill]] }
 0xbef   : > { %13236 = sst [smem:[#allocation197_spill]] %s13205_s15 }
 0xbf0   : > { %s13237_s21 = sld [smem:[#allocation213_spill]] }
 0xbf1   : > { %13238 = sst [smem:[#allocation198_spill]] %s13207_s18 }
 0xbf2   : > { %s13239_s25 = sld [smem:[#allocation223_spill]] }
 0xbf3   : > { %13240 = sst [smem:[#allocation199_spill]] %s13209_s1 }
 0xbf4   : > { %s13241_s29 = sld [smem:[#allocation224_spill]] }
 0xbf5   : > { %13242 = sst [smem:[#allocation200_spill]] %s13211_s20 }
 0xbf6   : > { %s13243_s10 = sld [smem:[#allocation216_spill]] }
 0xbf7   : > { %13244 = sst [smem:[#allocation201_spill]] %s13213_s26 }
 0xbf8   : > { %s13245_s13 = sld [smem:[#allocation226_spill]] }
 0xbf9   : > { %13246 = sst [smem:[#allocation202_spill]] %s13215_s23 }
 0xbfa   : > { %s13247_s7 = sld [smem:[#allocation227_spill]] }
 0xbfb   : > { %13248 = sst [smem:[#allocation203_spill]] %s13217_s4 }
 0xbfc   : > { %s13249_s19 = sld [smem:[#allocation219_spill]] }
 0xbfd   : > { %13250 = sst [smem:[#allocation204_spill]] %s13219_s24 }
 0xbfe   : > { %s13251_s15 = sld [smem:[#allocation229_spill]] }
 0xbff   : > { %13252 = sst [smem:[#allocation205_spill]] %s13221_s6 }
 0xc00   : > { %s13253_s18 = sld [smem:[#allocation230_spill]] }
 0xc01   : > { %13254 = sst [smem:[#allocation206_spill]] %s13223_s27 }
 0xc02   : > { %s13255_s6 = sld [smem:[#allocation222_spill]] }
 0xc03   : > { %13256 = sst [smem:[#allocation207_spill]] %s13225_s12 }
 0xc04   : > { %s13257_s20 = sld [smem:[#allocation232_spill]] }
 0xc05   : > { %13258 = sst [smem:[#allocation208_spill]] %s13227_s30 }
 0xc06   : > { %s13259_s26 = sld [smem:[#allocation233_spill]] }
 0xc07   : > { %13260 = sst [smem:[#allocation209_spill]] %s13229_s8 }
 0xc08   : > { %s13261_s12 = sld [smem:[#allocation225_spill]] }
 0xc09   : > { %13262 = sst [smem:[#allocation210_spill]] %s13231_s3 }
 0xc0a   : > { %s13263_s4 = sld [smem:[#allocation235_spill]] }
 0xc0b   : > { %13264 = sst [smem:[#allocation211_spill]] %s13233_s22 }
 0xc0c   : > { %s13265_s24 = sld [smem:[#allocation236_spill]] }
 0xc0d   : > { %13266 = sst [smem:[#allocation212_spill]] %s13235_s16 }
 0xc0e   : > { %s13267_s23 = sld [smem:[#allocation228_spill]] }
 0xc0f   : > { %13268 = sst [smem:[#allocation213_spill]] %s13237_s21 }
 0xc10   : > { %s13269_s27 = sld [smem:[#allocation238_spill]] }
 0xc11   : > { %13270 = sst [smem:[#allocation214_spill]] %s13239_s25 }
 0xc12   : > { %s13271_s30 = sld [smem:[#allocation239_spill]] }
 0xc13   : > { %13272 = sst [smem:[#allocation215_spill]] %s13241_s29 }
 0xc14   : > { %s13273_s1 = sld [smem:[#allocation231_spill]] }
 0xc15   : > { %13274 = sst [smem:[#allocation216_spill]] %s13243_s10 }
 0xc16   : > { %s13275_s21 = sld [smem:[#allocation241_spill]] }
 0xc17   : > { %13276 = sst [smem:[#allocation217_spill]] %s13245_s13 }
 0xc18   : > { %s13277_s10 = sld [smem:[#allocation242_spill]] }
 0xc19   : > { %13278 = sst [smem:[#allocation218_spill]] %s13247_s7 }
 0xc1a   : > { %s13279_s8 = sld [smem:[#allocation234_spill]] }
 0xc1b   : > { %13280 = sst [smem:[#allocation219_spill]] %s13249_s19 }
 0xc1c   : > { %s13281_s22 = sld [smem:[#allocation251_spill]] }
 0xc1d   : > { %13282 = sst [smem:[#allocation220_spill]] %s13251_s15 }
 0xc1e   : > { %s13283_s3 = sld [smem:[#allocation252_spill]] }
 0xc1f   : > { %13284 = sst [smem:[#allocation221_spill]] %s13253_s18 }
 0xc20   : > { %s13285_s19 = sld [smem:[#allocation237_spill]] }
 0xc21   : > { %13286 = sst [smem:[#allocation222_spill]] %s13255_s6 }
 0xc22   : > { %s13287_s16 = sld [smem:[#allocation254_spill]] }
 0xc23   : > { %13288 = sst [smem:[#allocation223_spill]] %s13257_s20 }
 0xc24   : > { %s13289_s25 = sld [smem:[#allocation255_spill]] }
 0xc25   : > { %13290 = sst [smem:[#allocation224_spill]] %s13259_s26 }
 0xc26   : > { %s13291_s29 = sld [smem:[#allocation240_spill]] }
 0xc27   : > { %13292 = sst [smem:[#allocation225_spill]] %s13261_s12 }
 0xc28   : > { %s13293_s7 = sld [smem:[#allocation257_spill]] }
 0xc29   : > { %13294 = sst [smem:[#allocation226_spill]] %s13263_s4 }
 0xc2a   : > { %s13295_s13 = sld [smem:[#allocation258_spill]] }
 0xc2b   : > { %13296 = sst [smem:[#allocation227_spill]] %s13265_s24 }
 0xc2c   : > { %s13297_s15 = sld [smem:[#allocation243_spill]] }
 0xc2d   : > { %13298 = sst [smem:[#allocation228_spill]] %s13267_s23 }
 0xc2e   : > { %s13299_s18 = sld [smem:[#allocation260_spill]] }
 0xc2f   : > { %13300 = sst [smem:[#allocation229_spill]] %s13269_s27 }
 0xc30   : > { %s13301_s6 = sld [smem:[#allocation261_spill]] }
 0xc31   : > { %13302 = sst [smem:[#allocation230_spill]] %s13271_s30 }
 0xc32   : > { %s13303_s20 = sld [smem:[#allocation253_spill]] }
 0xc33   : > { %13304 = sst [smem:[#allocation231_spill]] %s13273_s1 }
 0xc34   : > { %s13305_s26 = sld [smem:[#allocation263_spill]] }
 0xc35   : > { %13306 = sst [smem:[#allocation232_spill]] %s13275_s21 }
 0xc36   : > { %s13307_s12 = sld [smem:[#allocation264_spill]] }
 0xc37   : > { %13308 = sst [smem:[#allocation233_spill]] %s13277_s10 }
 0xc38   : > { %s13309_s4 = sld [smem:[#allocation288_spill]] }
 0xc39   : > { %13310 = sst [smem:[#allocation234_spill]] %s13279_s8 }
 0xc3a   : > { %s13311_s24 = sld [smem:[#allocation262_spill]] }
 0xc3b   : > { %13312 = sst [smem:[#allocation235_spill]] %s13281_s22 }
 0xc3c   : > { %s13313_s23 = sld [smem:[#allocation259_spill]] }
 0xc3d   : > { %13314 = sst [smem:[#allocation236_spill]] %s13283_s3 }
 0xc3e   : > { %s13315_s27 = sld [smem:[#allocation285_spill]] }
 0xc3f   : > { %13316 = sst [smem:[#allocation237_spill]] %s13285_s19 }
 0xc40   : > { %s13317_s30 = sld [smem:[#allocation256_spill]] }
 0xc41   : > { %13318 = sst [smem:[#allocation238_spill]] %s13287_s16 }
 0xc42   : > { %s13319_s1 = sld [smem:[#allocation244_spill]] }
 0xc43   : > { %13320 = sst [smem:[#allocation239_spill]] %s13289_s25 }
 0xc44   : > { %s13321_s21 = sld [smem:[#allocation281_spill]] }
 0xc45   : > { %13322 = sst [smem:[#allocation240_spill]] %s13291_s29 }
 0xc46   : > { %s13323_s10 = sld [smem:[#allocation245_spill]] }
 0xc47   : > { %13324 = sst [smem:[#allocation241_spill]] %s13293_s7 }
 0xc48   : > { %s13325_s8 = sld [smem:[#allocation246_spill]] }
 0xc49   : > { %13326 = sst [smem:[#allocation242_spill]] %s13295_s13 }
 0xc4a   : > { %s13327_s16 = sld [smem:[#allocation278_spill]] }
 0xc4b   : > { %13328 = sst [smem:[#allocation243_spill]] %s13297_s15 }
 0xc4c   : > { %s13329_s22 = sld [smem:[#allocation247_spill]] }
 0xc4d   : > { %13330 = sst [smem:[#allocation244_spill]] %s13299_s18 }
 0xc4e   : > { %s13331_s19 = sld [smem:[#allocation248_spill]] }
 0xc4f   : > { %13332 = sst [smem:[#allocation245_spill]] %s13301_s6 }
 0xc50   : > { %s13333_s3 = sld [smem:[#allocation277_spill]] }
 0xc51   : > { %13334 = sst [smem:[#allocation246_spill]] %s13303_s20 }
 0xc52   : > { %s13335_s25 = sld [smem:[#allocation250_spill]] }
 0xc53   : > { %13336 = sst [smem:[#allocation247_spill]] %s13305_s26 }
 0xc54   : > { %s13337_s29 = sld [smem:[#allocation271_spill]] }
 0xc55   : > { %13338 = sst [smem:[#allocation248_spill]] %s13307_s12 }
 0xc56   : > { %s13339_s7 = sld [smem:[#allocation265_spill]] }
 0xc57   : > { %13340 = sst [smem:[#allocation249_spill]] %s13309_s4 }
 0xc58   : > { %13342 = sst [smem:[#allocation250_spill]] %s13311_s24 }
 0xc59   : > { %13343 = sst [smem:[#allocation251_spill]] %s13313_s23 }
 0xc5a   : > { %13344 = sst [smem:[#allocation252_spill]] %s13315_s27 }
 0xc5b   : > { %13345 = sst [smem:[#allocation253_spill]] %s13317_s30 }
 0xc5c   : > { %13346 = sst [smem:[#allocation254_spill]] %s13319_s1  ;;  %s13356_s12 = sadd.s32 1, %s13339_s7  }
 0xc5d   : > { %13347 = sst [smem:[#allocation255_spill]] %s13321_s21 }
 0xc5e   : > { %13348 = sst [smem:[#allocation256_spill]] %s13323_s10 }
 0xc5f   : > { %13349 = sst [smem:[#allocation257_spill]] %s13325_s8 }
 0xc60   : > { %13350 = sst [smem:[#allocation258_spill]] %s13327_s16 }
 0xc61   : > { %13351 = sst [smem:[#allocation259_spill]] %s13329_s22 }
 0xc62   : > { %13352 = sst [smem:[#allocation260_spill]] %s13331_s19  ;;  %160 = sbr.rel (!%p11380_p7) target bundleno = 239 (0xef), region = 664 }
 0xc63   : > { %13353 = sst [smem:[#allocation261_spill]] %s13333_s3 }
 0xc64   : > { %13354 = sst [smem:[#allocation262_spill]] %s13335_s25 }
 0xc65   : > { %13355 = sst [smem:[#allocation263_spill]] %s13337_s29 }
 0xc66   : > { %13357 = sst [smem:[#allocation264_spill]] %s13356_s12 }
 0xc67   :  { %3998 = vsyncpa [#allocation8], 1 }
 0xc68   :  { %4000 = vsyncpa [#allocation8 + $0x1], 1 }
 0xc69   :  { %4001 = vsyncpa [#allocation10], 1 }
 0xc6a   :  { %4003 = vsyncpa [#allocation10 + $0x1], 1 }
 0xc6b   :  { %4004 = vsyncpa [#allocation13], 1 }
 0xc6c   :  { %4006 = vsyncpa [#allocation13 + $0x1], 1 }
 0xc6d   :  { %4007 = vsyncpa [#allocation16], 1 }
 0xc6e   :  { %4009 = vsyncpa [#allocation16 + $0x1], 1 }
 0xc6f   :  { %4010 = vsyncpa [#allocation19], 1 }
 0xc70   :  { %4012 = vsyncpa [#allocation19 + $0x1], 1 }
 0xc71   :  { %4013 = vsyncpa [#allocation22], 1 }
 0xc72   :  { %4015 = vsyncpa [#allocation22 + $0x1], 1 }
 0xc73   :  { %4016 = vsyncpa [#allocation25], 1 }
 0xc74   :  { %4018 = vsyncpa [#allocation25 + $0x1], 1 }
 0xc75   :  { %4019 = vsyncpa [#allocation28], 1 }
 0xc76   :  { %4021 = vsyncpa [#allocation28 + $0x1], 1 }
 0xc77   :  { %4022 = vsyncpa [#allocation31], 1 }
 0xc78   :  { %4024 = vsyncpa [#allocation31 + $0x1], 1 }
 0xc79   :  { %4025 = vsyncpa [#allocation34], 1 }
 0xc7a   :  { %4027 = vsyncpa [#allocation34 + $0x1], 1 }
 0xc7b   :  { %4028 = vsyncpa [#allocation37], 1 }
 0xc7c   :  { %4030 = vsyncpa [#allocation37 + $0x1], 1 }
 0xc7d   :  { %4031 = vsyncpa [#allocation40], 1 }
 0xc7e   :  { %4033 = vsyncpa [#allocation40 + $0x1], 1 }
 0xc7f   :  { %4034 = vsyncpa [#allocation43], 1 }
 0xc80   :  { %4036 = vsyncpa [#allocation43 + $0x1], 1 }
 0xc81   :  { %4037 = vsyncpa [#allocation46], 1 }
 0xc82   :  { %4039 = vsyncpa [#allocation46 + $0x1], 1 }
 0xc83   :  { %4040 = vsyncpa [#allocation49], 1 }
 0xc84   :  { %4042 = vsyncpa [#allocation49 + $0x1], 1 }
 0xc85   :  { %4043 = vsyncpa [#allocation52], 1 }
 0xc86   :  { %4045 = vsyncpa [#allocation52 + $0x1], 1 }
 0xc87   :  { %4046 = vsyncpa [#allocation55], 1 }
 0xc88   :  { %4048 = vsyncpa [#allocation55 + $0x1], 1 }
 0xc89   :  { %4049 = vsyncpa [#allocation58], 1 }
 0xc8a   :  { %4050 = vsyncpa [#allocation61], 1 }
 0xc8b   :  { %4051 = vsyncpa [#allocation64], 1 }

</bundles_post_ra>
